<compile_context>
chip_gen: v6e
topology: v6e:2x2x1
jax: 0.10.0
libtpu: 0.0.40
codegen_flags: <defaults>
</compile_context>

<pallas_src>
import jax
import jax.numpy as jnp
from jax.experimental import pallas as pl
from jax.experimental.pallas import tpu as pltpu


def _round_up(x: int, m: int) -> int:
    return (x + m - 1) // m * m


def _cdiv(a: int, b: int) -> int:
    return (a + b - 1) // b


def _make_kernel(Cin, C1, C2, tm, tap_offsets):
    def kernel(xa_ref, xh_ref, w1_ref, b1_ref, w2_ref, b2_ref, o_ref, p_scr):
        # xa_ref: (Cin, tm)       bf16  flat padded-input lanes for this tile
        # xh_ref: (Cin, halo_pad) bf16  next lanes (halo for the 3x3 taps)
        # w1_ref: (C1, 9*Cin)     bf16  conv1 weight, tap-major columns (resident)
        # b1_ref: (C1, 1)         f32
        # w2_ref: (C1, C2)        f32   conv2 (1x1) weight, transposed (resident)
        # b2_ref: (C2, 1)         f32
        # o_ref : (C2, tm)        f32   lane-dense transposed output tile
        # p_scr : (9*Cin, tm)     bf16  in-VMEM im2col tile (never hits HBM)
        xw = jnp.concatenate([xa_ref[...], xh_ref[...]], axis=-1)
        for t, off in enumerate(tap_offsets):          # 9 static taps
            p_scr[t * Cin:(t + 1) * Cin, :] = xw[:, off:off + tm]

        # conv1 on the MXU (K = 144), f32 accumulation.
        h = jnp.dot(w1_ref[...], p_scr[...], preferred_element_type=jnp.float32)
        h = jnp.maximum(h + b1_ref[...], 0.0)          # (C1, tm) f32, ReLU

        # conv2 (1x1, 8 channels) on the VPU/XLU: broadcast-mul over the 256
        # channel sublanes + sublane reduction, keeping the MXU free.
        w2f = w2_ref[...]                              # (C1, C2) f32
        rows = [jnp.sum(h * w2f[:, c:c + 1], axis=0, keepdims=True)
                for c in range(C2)]                    # 8 x (1, tm)
        y = jnp.concatenate(rows, axis=0) + b2_ref[...]
        o_ref[...] = jnp.maximum(y, 0.0)               # ReLU after conv2
    return kernel


def fused_convs_pallas(xflat, w1t, b1c, w2t, b2c, *, Cin, tm, halo_pad, nblk,
                       tap_offsets):
    # xflat: (N, Cin, Lp) bf16   flat zero-padded image, Lp = nblk*tm + halo_pad
    # w1t  : (C1, 9*Cin)  bf16   b1c: (C1, 1) f32
    # w2t  : (C1, C2)     f32    b2c: (C2, 1) f32
    N = xflat.shape[0]
    C1, K1 = w1t.shape
    C2 = b2c.shape[0]
    Mp = nblk * tm
    r = tm // halo_pad                                  # integral by construction

    kernel = _make_kernel(Cin, C1, C2, tm, tap_offsets)

    flops = 2 * N * Mp * (K1 * C1 + C1 * C2)
    bytes_accessed = (N * Cin * (Mp + nblk * halo_pad) * 2   # input (+ tiny halo re-read)
                      + C1 * K1 * 2 + C1 * 4 + C1 * C2 * 4 + C2 * 4
                      + N * C2 * Mp * 4)                      # f32 output

    return pl.pallas_call(
        kernel,
        out_shape=jax.ShapeDtypeStruct((N, C2, Mp), jnp.float32),
        grid_spec=pltpu.PrefetchScalarGridSpec(
            num_scalar_prefetch=0,
            grid=(N, nblk),
            in_specs=[
                pl.BlockSpec((None, Cin, tm), lambda b, j: (b, 0, j)),          # tile lanes
                pl.BlockSpec((None, Cin, halo_pad),
                             lambda b, j: (b, 0, (j + 1) * r)),                 # halo lanes
                pl.BlockSpec((C1, K1), lambda b, j: (0, 0)),                    # W1^T (resident)
                pl.BlockSpec((C1, 1), lambda b, j: (0, 0)),                     # b1
                pl.BlockSpec((C1, C2), lambda b, j: (0, 0)),                    # W2 (resident)
                pl.BlockSpec((C2, 1), lambda b, j: (0, 0)),                     # b2
            ],
            out_specs=pl.BlockSpec((None, C2, tm), lambda b, j: (b, 0, j)),
            scratch_shapes=[pltpu.VMEM((K1, tm), jnp.bfloat16)],                # im2col tile
        ),
        compiler_params=pltpu.CompilerParams(
            dimension_semantics=("parallel", "parallel"),
            vmem_limit_bytes=32 * 1024 * 1024),
        cost_estimate=pl.CostEstimate(flops=flops, transcendentals=0,
                                      bytes_accessed=bytes_accessed),
    )(xflat, xflat, w1t, b1c, w2t, b2c)


def model_forward(x_nchw, w1_oihw, b1, w2_oihw, b2):
    """Forward pass of the module. x_nchw: (N, Cin, H, W) f32 -> (N, 8, H, W) f32."""
    N, Cin, H, W = x_nchw.shape
    C1 = w1_oihw.shape[0]
    C2 = w2_oihw.shape[0]

    Wp = W + 2                          # padded row stride
    Mv = H * Wp                         # pixel-axis length (2 junk cols per row)
    halo = 2 * Wp + 2                   # largest tap offset along the flat axis
    halo_pad = _round_up(halo, 128)

    # ---- tile selection ------------------------------------------------------
    # >= 4 grid steps when the image allows (2+ per v7x core), ~2k lanes per
    # tile for big images; tm is a multiple of halo_pad (itself a multiple of
    # 128) so stores stay lane-dense and the halo block index stays integral.
    # TODO(synk): for extremely wide images (W >~ 10k) halo_pad forces very
    # large tm; cap/stage differently if that case ever matters.
    target_tm = 2048
    nblk = max(4, _cdiv(Mv, target_tm))
    tm = _round_up(_cdiv(Mv, nblk), halo_pad)
    nblk = _cdiv(Mv, tm)
    Mp = nblk * tm
    Lp = Mp + halo_pad

    # ---- glue (all cheap, 1x traffic): pad + flatten with row stride W+2 ----
    xb = x_nchw.astype(jnp.bfloat16)
    xpad = jnp.pad(xb, ((0, 0), (0, 0), (1, 1), (1, 1)))       # (N, Cin, H+2, W+2)
    xflat = xpad.reshape(N, Cin, (H + 2) * Wp)                 # pure reshape
    xflat = jnp.pad(xflat, ((0, 0), (0, 0), (0, Lp - (H + 2) * Wp)))

    tap_offsets = tuple(di * Wp + dj for di in range(3) for dj in range(3))

    # ---- weights/biases to transposed-matmul layout --------------------------
    w1t = jnp.transpose(w1_oihw, (0, 2, 3, 1)).reshape(C1, 9 * Cin).astype(jnp.bfloat16)
    b1c = b1.reshape(C1, 1).astype(jnp.float32)
    w2t = jnp.transpose(w2_oihw[:, :, 0, 0]).astype(jnp.float32)   # (C1, C2) f32
    b2c = b2.reshape(C2, 1).astype(jnp.float32)

    # ---- Pallas hot path ------------------------------------------------------
    y = fused_convs_pallas(xflat, w1t, b1c, w2t, b2c, Cin=Cin, tm=tm,
                           halo_pad=halo_pad, nblk=nblk, tap_offsets=tap_offsets)

    # already channel-major: drop flat padding and the 2 junk columns per row
    return y[:, :, :Mv].reshape(N, C2, H, Wp)[:, :, :, :W]


def _reference_forward(x_nchw, w1, b1, w2, b2):
    """Pure-JAX f32 reference using lax.conv for verification."""
    dn = jax.lax.conv_dimension_numbers(x_nchw.shape, w1.shape,
                                        ("NCHW", "OIHW", "NCHW"))
    v1 = jax.lax.conv_general_dilated(x_nchw, w1, (1, 1), ((1, 1), (1, 1)),
                                      dimension_numbers=dn)
    v1 = v1 + b1[None, :, None, None]
    v2 = jnp.maximum(v1, 0.0)
    dn2 = jax.lax.conv_dimension_numbers(v2.shape, w2.shape,
                                         ("NCHW", "OIHW", "NCHW"))
    v3 = jax.lax.conv_general_dilated(v2, w2, (1, 1), ((0, 0), (0, 0)),
                                      dimension_numbers=dn2)
    v3 = v3 + b2[None, :, None, None]
    return jnp.maximum(v3, 0.0)


if __name__ == "__main__":
    num_features = 16
    N, H, W = 1, 48, 48              # matches the original module's example input
    C1, C2 = 256, 8

    key = jax.random.PRNGKey(0)
    kx, k1, kb1, k2, kb2 = jax.random.split(key, 5)

    x = jax.random.normal(kx, (N, num_features, H, W), dtype=jnp.float32)
    w1 = 0.05 * jax.random.normal(k1, (C1, num_features, 3, 3), dtype=jnp.float32)
    b1 = 0.01 * jax.random.normal(kb1, (C1,), dtype=jnp.float32)
    w2 = 0.05 * jax.random.normal(k2, (C2, C1, 1, 1), dtype=jnp.float32)
    b2 = 0.01 * jax.random.normal(kb2, (C2,), dtype=jnp.float32)

    out = jax.jit(model_forward)(x, w1, b1, w2, b2)
    out = jax.block_until_ready(out)

    ref = _reference_forward(x, w1, b1, w2, b2)
    assert out.shape == (N, C2, H, W), out.shape
    max_err = float(jnp.max(jnp.abs(out - ref)))
    # bf16 MXU operands (conv1) with f32 accumulation -> loosened tolerance.
    assert jnp.allclose(out, ref, atol=5e-2, rtol=5e-2), max_err

    print("KERNEL_OK")
</pallas_src>

<mosaic_0001>
module attributes {stable_mosaic.version = 11 : i64} {
  func.func @kernel(%arg0: i32, %arg1: i32, %arg2: memref<1x16x640xbf16, #tpu.memory_space<vmem>>, %arg3: memref<1x16x128xbf16, #tpu.memory_space<vmem>>, %arg4: memref<256x144xbf16, #tpu.memory_space<vmem>>, %arg5: memref<256x1xf32, #tpu.memory_space<vmem>>, %arg6: memref<256x8xf32, #tpu.memory_space<vmem>>, %arg7: memref<8x1xf32, #tpu.memory_space<vmem>>, %arg8: memref<1x8x640xf32, #tpu.memory_space<vmem>>, %arg9: memref<144x640xbf16, #tpu.memory_space<vmem>>) attributes {dimension_semantics = [#tpu.dimension_semantics<parallel>, #tpu.dimension_semantics<parallel>], iteration_bounds = array<i64: 1, 4>, scalar_prefetch = 0 : i64, scratch_operands = 1 : i64, tpu.core_type = #tpu.core_type<tc>, window_params = [{transform_indices = @transform_0, window_bounds = array<i64: 1, 16, 640>}, {transform_indices = @transform_1, window_bounds = array<i64: 1, 16, 128>}, {pipeline_mode = #tpu.pipeline_mode<synchronous>, transform_indices = @transform_2, window_bounds = array<i64: 256, 144>}, {pipeline_mode = #tpu.pipeline_mode<synchronous>, transform_indices = @transform_3, window_bounds = array<i64: 256, 1>}, {pipeline_mode = #tpu.pipeline_mode<synchronous>, transform_indices = @transform_4, window_bounds = array<i64: 256, 8>}, {pipeline_mode = #tpu.pipeline_mode<synchronous>, transform_indices = @transform_5, window_bounds = array<i64: 8, 1>}, {transform_indices = @transform_6, window_bounds = array<i64: 1, 8, 640>}]} {
    %c0 = arith.constant 0 : index
    %c0_0 = arith.constant 0 : index
    %c0_1 = arith.constant 0 : index
    %0 = vector.load %arg2[%c0, %c0_0, %c0_1] : memref<1x16x640xbf16, #tpu.memory_space<vmem>>, vector<1x16x640xbf16>
    %1 = vector.shape_cast %0 : vector<1x16x640xbf16> to vector<16x640xbf16>
    %c0_2 = arith.constant 0 : index
    %c0_3 = arith.constant 0 : index
    %c0_4 = arith.constant 0 : index
    %2 = vector.load %arg3[%c0_2, %c0_3, %c0_4] : memref<1x16x128xbf16, #tpu.memory_space<vmem>>, vector<1x16x128xbf16>
    %3 = vector.shape_cast %2 : vector<1x16x128xbf16> to vector<16x128xbf16>
    %4 = tpu.concatenate %1, %3 in 1 : vector<16x640xbf16>, vector<16x128xbf16> -> vector<16x768xbf16>
    %5 = vector.extract_strided_slice %4 {offsets = [0, 0], sizes = [16, 640], strides = [1, 1]} : vector<16x768xbf16> to vector<16x640xbf16>
    %c0_5 = arith.constant 0 : index
    %c0_6 = arith.constant 0 : index
    %6 = vector.load %arg9[%c0_5, %c0_6] : memref<144x640xbf16, #tpu.memory_space<vmem>>, vector<16x640xbf16>
    tpu.vector_store %arg9[%c0_5, %c0_6], %5 {strides = array<i32>} : memref<144x640xbf16, #tpu.memory_space<vmem>>, vector<16x640xbf16>,
    %7 = vector.extract_strided_slice %4 {offsets = [0, 1], sizes = [16, 640], strides = [1, 1]} : vector<16x768xbf16> to vector<16x640xbf16>
    %c16 = arith.constant 16 : index
    %c0_7 = arith.constant 0 : index
    %8 = vector.load %arg9[%c16, %c0_7] : memref<144x640xbf16, #tpu.memory_space<vmem>>, vector<16x640xbf16>
    tpu.vector_store %arg9[%c16, %c0_7], %7 {strides = array<i32>} : memref<144x640xbf16, #tpu.memory_space<vmem>>, vector<16x640xbf16>,
    %9 = vector.extract_strided_slice %4 {offsets = [0, 2], sizes = [16, 640], strides = [1, 1]} : vector<16x768xbf16> to vector<16x640xbf16>
    %c32 = arith.constant 32 : index
    %c0_8 = arith.constant 0 : index
    %10 = vector.load %arg9[%c32, %c0_8] : memref<144x640xbf16, #tpu.memory_space<vmem>>, vector<16x640xbf16>
    tpu.vector_store %arg9[%c32, %c0_8], %9 {strides = array<i32>} : memref<144x640xbf16, #tpu.memory_space<vmem>>, vector<16x640xbf16>,
    %11 = vector.extract_strided_slice %4 {offsets = [0, 50], sizes = [16, 640], strides = [1, 1]} : vector<16x768xbf16> to vector<16x640xbf16>
    %c48 = arith.constant 48 : index
    %c0_9 = arith.constant 0 : index
    %12 = vector.load %arg9[%c48, %c0_9] : memref<144x640xbf16, #tpu.memory_space<vmem>>, vector<16x640xbf16>
    tpu.vector_store %arg9[%c48, %c0_9], %11 {strides = array<i32>} : memref<144x640xbf16, #tpu.memory_space<vmem>>, vector<16x640xbf16>,
    %13 = vector.extract_strided_slice %4 {offsets = [0, 51], sizes = [16, 640], strides = [1, 1]} : vector<16x768xbf16> to vector<16x640xbf16>
    %c64 = arith.constant 64 : index
    %c0_10 = arith.constant 0 : index
    %14 = vector.load %arg9[%c64, %c0_10] : memref<144x640xbf16, #tpu.memory_space<vmem>>, vector<16x640xbf16>
    tpu.vector_store %arg9[%c64, %c0_10], %13 {strides = array<i32>} : memref<144x640xbf16, #tpu.memory_space<vmem>>, vector<16x640xbf16>,
    %15 = vector.extract_strided_slice %4 {offsets = [0, 52], sizes = [16, 640], strides = [1, 1]} : vector<16x768xbf16> to vector<16x640xbf16>
    %c80 = arith.constant 80 : index
    %c0_11 = arith.constant 0 : index
    %16 = vector.load %arg9[%c80, %c0_11] : memref<144x640xbf16, #tpu.memory_space<vmem>>, vector<16x640xbf16>
    tpu.vector_store %arg9[%c80, %c0_11], %15 {strides = array<i32>} : memref<144x640xbf16, #tpu.memory_space<vmem>>, vector<16x640xbf16>,
    %17 = vector.extract_strided_slice %4 {offsets = [0, 100], sizes = [16, 640], strides = [1, 1]} : vector<16x768xbf16> to vector<16x640xbf16>
    %c96 = arith.constant 96 : index
    %c0_12 = arith.constant 0 : index
    %18 = vector.load %arg9[%c96, %c0_12] : memref<144x640xbf16, #tpu.memory_space<vmem>>, vector<16x640xbf16>
    tpu.vector_store %arg9[%c96, %c0_12], %17 {strides = array<i32>} : memref<144x640xbf16, #tpu.memory_space<vmem>>, vector<16x640xbf16>,
    %19 = vector.extract_strided_slice %4 {offsets = [0, 101], sizes = [16, 640], strides = [1, 1]} : vector<16x768xbf16> to vector<16x640xbf16>
    %c112 = arith.constant 112 : index
    %c0_13 = arith.constant 0 : index
    %20 = vector.load %arg9[%c112, %c0_13] : memref<144x640xbf16, #tpu.memory_space<vmem>>, vector<16x640xbf16>
    tpu.vector_store %arg9[%c112, %c0_13], %19 {strides = array<i32>} : memref<144x640xbf16, #tpu.memory_space<vmem>>, vector<16x640xbf16>,
    %21 = vector.extract_strided_slice %4 {offsets = [0, 102], sizes = [16, 640], strides = [1, 1]} : vector<16x768xbf16> to vector<16x640xbf16>
    %c128 = arith.constant 128 : index
    %c0_14 = arith.constant 0 : index
    %22 = vector.load %arg9[%c128, %c0_14] : memref<144x640xbf16, #tpu.memory_space<vmem>>, vector<16x640xbf16>
    tpu.vector_store %arg9[%c128, %c0_14], %21 {strides = array<i32>} : memref<144x640xbf16, #tpu.memory_space<vmem>>, vector<16x640xbf16>,
    %c0_15 = arith.constant 0 : index
    %c0_16 = arith.constant 0 : index
    %23 = vector.load %arg4[%c0_15, %c0_16] : memref<256x144xbf16, #tpu.memory_space<vmem>>, vector<256x144xbf16>
    %c0_17 = arith.constant 0 : index
    %c0_18 = arith.constant 0 : index
    %24 = vector.load %arg9[%c0_17, %c0_18] : memref<144x640xbf16, #tpu.memory_space<vmem>>, vector<144x640xbf16>
    %cst = arith.constant dense<0.000000e+00> : vector<256x640xf32>
    %25 = tpu.matmul %23, %24, %cst {dimension_numbers = #tpu.dot_dimension_numbers<[1], [0], [0], [1], [0, 0, 1, 1], [], []>} : vector<256x144xbf16>, vector<144x640xbf16>, vector<256x640xf32> -> vector<256x640xf32>
    %c0_19 = arith.constant 0 : index
    %c0_20 = arith.constant 0 : index
    %26 = vector.load %arg5[%c0_19, %c0_20] : memref<256x1xf32, #tpu.memory_space<vmem>>, vector<256x1xf32>
    %27 = vector.broadcast %26 : vector<256x1xf32> to vector<256x640xf32>
    %28 = arith.addf %25, %27 : vector<256x640xf32>
    %cst_21 = arith.constant 0.000000e+00 : f32
    %29 = vector.broadcast %cst_21 : f32 to vector<256x640xf32>
    %30 = arith.maximumf %28, %29 : vector<256x640xf32>
    %c0_22 = arith.constant 0 : index
    %c0_23 = arith.constant 0 : index
    %31 = vector.load %arg6[%c0_22, %c0_23] : memref<256x8xf32, #tpu.memory_space<vmem>>, vector<256x8xf32>
    %32 = vector.extract_strided_slice %31 {offsets = [0, 0], sizes = [256, 1], strides = [1, 1]} : vector<256x8xf32> to vector<256x1xf32>
    %33 = vector.broadcast %32 : vector<256x1xf32> to vector<256x640xf32>
    %34 = arith.mulf %30, %33 : vector<256x640xf32>
    %cst_24 = arith.constant dense<0.000000e+00> : vector<640xf32>
    %35 = vector.multi_reduction <add>, %34, %cst_24 [0] : vector<256x640xf32> to vector<640xf32>
    %36 = vector.shape_cast %35 : vector<640xf32> to vector<1x640xf32>
    %37 = vector.extract_strided_slice %31 {offsets = [0, 1], sizes = [256, 1], strides = [1, 1]} : vector<256x8xf32> to vector<256x1xf32>
    %38 = vector.broadcast %37 : vector<256x1xf32> to vector<256x640xf32>
    %39 = arith.mulf %30, %38 : vector<256x640xf32>
    %cst_25 = arith.constant dense<0.000000e+00> : vector<640xf32>
    %40 = vector.multi_reduction <add>, %39, %cst_25 [0] : vector<256x640xf32> to vector<640xf32>
    %41 = vector.shape_cast %40 : vector<640xf32> to vector<1x640xf32>
    %42 = vector.extract_strided_slice %31 {offsets = [0, 2], sizes = [256, 1], strides = [1, 1]} : vector<256x8xf32> to vector<256x1xf32>
    %43 = vector.broadcast %42 : vector<256x1xf32> to vector<256x640xf32>
    %44 = arith.mulf %30, %43 : vector<256x640xf32>
    %cst_26 = arith.constant dense<0.000000e+00> : vector<640xf32>
    %45 = vector.multi_reduction <add>, %44, %cst_26 [0] : vector<256x640xf32> to vector<640xf32>
    %46 = vector.shape_cast %45 : vector<640xf32> to vector<1x640xf32>
    %47 = vector.extract_strided_slice %31 {offsets = [0, 3], sizes = [256, 1], strides = [1, 1]} : vector<256x8xf32> to vector<256x1xf32>
    %48 = vector.broadcast %47 : vector<256x1xf32> to vector<256x640xf32>
    %49 = arith.mulf %30, %48 : vector<256x640xf32>
    %cst_27 = arith.constant dense<0.000000e+00> : vector<640xf32>
    %50 = vector.multi_reduction <add>, %49, %cst_27 [0] : vector<256x640xf32> to vector<640xf32>
    %51 = vector.shape_cast %50 : vector<640xf32> to vector<1x640xf32>
    %52 = vector.extract_strided_slice %31 {offsets = [0, 4], sizes = [256, 1], strides = [1, 1]} : vector<256x8xf32> to vector<256x1xf32>
    %53 = vector.broadcast %52 : vector<256x1xf32> to vector<256x640xf32>
    %54 = arith.mulf %30, %53 : vector<256x640xf32>
    %cst_28 = arith.constant dense<0.000000e+00> : vector<640xf32>
    %55 = vector.multi_reduction <add>, %54, %cst_28 [0] : vector<256x640xf32> to vector<640xf32>
    %56 = vector.shape_cast %55 : vector<640xf32> to vector<1x640xf32>
    %57 = vector.extract_strided_slice %31 {offsets = [0, 5], sizes = [256, 1], strides = [1, 1]} : vector<256x8xf32> to vector<256x1xf32>
    %58 = vector.broadcast %57 : vector<256x1xf32> to vector<256x640xf32>
    %59 = arith.mulf %30, %58 : vector<256x640xf32>
    %cst_29 = arith.constant dense<0.000000e+00> : vector<640xf32>
    %60 = vector.multi_reduction <add>, %59, %cst_29 [0] : vector<256x640xf32> to vector<640xf32>
    %61 = vector.shape_cast %60 : vector<640xf32> to vector<1x640xf32>
    %62 = vector.extract_strided_slice %31 {offsets = [0, 6], sizes = [256, 1], strides = [1, 1]} : vector<256x8xf32> to vector<256x1xf32>
    %63 = vector.broadcast %62 : vector<256x1xf32> to vector<256x640xf32>
    %64 = arith.mulf %30, %63 : vector<256x640xf32>
    %cst_30 = arith.constant dense<0.000000e+00> : vector<640xf32>
    %65 = vector.multi_reduction <add>, %64, %cst_30 [0] : vector<256x640xf32> to vector<640xf32>
    %66 = vector.shape_cast %65 : vector<640xf32> to vector<1x640xf32>
    %67 = vector.extract_strided_slice %31 {offsets = [0, 7], sizes = [256, 1], strides = [1, 1]} : vector<256x8xf32> to vector<256x1xf32>
    %68 = vector.broadcast %67 : vector<256x1xf32> to vector<256x640xf32>
    %69 = arith.mulf %30, %68 : vector<256x640xf32>
    %cst_31 = arith.constant dense<0.000000e+00> : vector<640xf32>
    %70 = vector.multi_reduction <add>, %69, %cst_31 [0] : vector<256x640xf32> to vector<640xf32>
    %71 = vector.shape_cast %70 : vector<640xf32> to vector<1x640xf32>
    %72 = tpu.concatenate %36, %41, %46, %51, %56, %61, %66, %71 in 0 : vector<1x640xf32>, vector<1x640xf32>, vector<1x640xf32>, vector<1x640xf32>, vector<1x640xf32>, vector<1x640xf32>, vector<1x640xf32>, vector<1x640xf32> -> vector<8x640xf32>
    %c0_32 = arith.constant 0 : index
    %c0_33 = arith.constant 0 : index
    %73 = vector.load %arg7[%c0_32, %c0_33] : memref<8x1xf32, #tpu.memory_space<vmem>>, vector<8x1xf32>
    %74 = vector.broadcast %73 : vector<8x1xf32> to vector<8x640xf32>
    %75 = arith.addf %72, %74 : vector<8x640xf32>
    %cst_34 = arith.constant 0.000000e+00 : f32
    %76 = vector.broadcast %cst_34 : f32 to vector<8x640xf32>
    %77 = arith.maximumf %75, %76 : vector<8x640xf32>
    %c0_35 = arith.constant 0 : index
    %c0_36 = arith.constant 0 : index
    %c0_37 = arith.constant 0 : index
    %78 = vector.load %arg8[%c0_35, %c0_36, %c0_37] : memref<1x8x640xf32, #tpu.memory_space<vmem>>, vector<1x8x640xf32>
    %79 = vector.shape_cast %78 : vector<1x8x640xf32> to vector<8x640xf32>
    %80 = vector.shape_cast %77 : vector<8x640xf32> to vector<1x8x640xf32>
    tpu.vector_store %arg8[%c0_35, %c0_36, %c0_37], %80 {strides = array<i32>} : memref<1x8x640xf32, #tpu.memory_space<vmem>>, vector<1x8x640xf32>,
    return
  }
  func.func @transform_0(%arg0: i32, %arg1: i32) -> (i32, i32, i32) {
    %c0_i32 = arith.constant 0 : i32
    %c0_i32_0 = arith.constant 0 : i32
    return %arg0, %c0_i32, %arg1 : i32, i32, i32
  }
  func.func @transform_1(%arg0: i32, %arg1: i32) -> (i32, i32, i32) {
    %c1_i32 = arith.constant 1 : i32
    %0 = arith.addi %arg1, %c1_i32 : i32
    %c5_i32 = arith.constant 5 : i32
    %1 = arith.muli %0, %c5_i32 : i32
    %c0_i32 = arith.constant 0 : i32
    %c0_i32_0 = arith.constant 0 : i32
    return %arg0, %c0_i32, %1 : i32, i32, i32
  }
  func.func @transform_2(%arg0: i32, %arg1: i32) -> (i32, i32) {
    %c0_i32 = arith.constant 0 : i32
    %c0_i32_0 = arith.constant 0 : i32
    %c0_i32_1 = arith.constant 0 : i32
    return %c0_i32, %c0_i32_0 : i32, i32
  }
  func.func @transform_3(%arg0: i32, %arg1: i32) -> (i32, i32) {
    %c0_i32 = arith.constant 0 : i32
    %c0_i32_0 = arith.constant 0 : i32
    %c0_i32_1 = arith.constant 0 : i32
    return %c0_i32, %c0_i32_0 : i32, i32
  }
  func.func @transform_4(%arg0: i32, %arg1: i32) -> (i32, i32) {
    %c0_i32 = arith.constant 0 : i32
    %c0_i32_0 = arith.constant 0 : i32
    %c0_i32_1 = arith.constant 0 : i32
    return %c0_i32, %c0_i32_0 : i32, i32
  }
  func.func @transform_5(%arg0: i32, %arg1: i32) -> (i32, i32) {
    %c0_i32 = arith.constant 0 : i32
    %c0_i32_0 = arith.constant 0 : i32
    %c0_i32_1 = arith.constant 0 : i32
    return %c0_i32, %c0_i32_0 : i32, i32
  }
  func.func @transform_6(%arg0: i32, %arg1: i32) -> (i32, i32, i32) {
    %c0_i32 = arith.constant 0 : i32
    %c0_i32_0 = arith.constant 0 : i32
    return %arg0, %c0_i32, %arg1 : i32, i32, i32
  }
}

</mosaic_0001>

<bundles_post_ra>
// kernel: model_forward.1
= control target key start
LH: loop header
LB: loop body
LE: loop exit
PB: predicated region body
PF: predicated region fallthrough
CT: control target
= control target key end

     0   :  { %s7417_s21 = smov 0   ;;  %s7419_s22 = smov 0   ;;  %s14262_s0 = inlined_call_operand.vmem [shape: bf16[1,16,2688], index: 0, kind: input, shape index: {}, may-alias: {0,1}]   ;;  %s14263_s1 = inlined_call_operand.vmem [shape: bf16[1,16,2688], index: 1, kind: input, shape index: {}, may-alias: {0,1}]   ;;  %s14264_s2 = inlined_call_operand.vmem [shape: bf16[256,144], index: 2, kind: input, shape index: {}]   ;;  %s14265_s3 = inlined_call_operand.vmem [shape: f32[256,1], index: 3, kind: input, shape index: {}]   ;;  %s14266_s4 = inlined_call_operand.vmem [shape: f32[256,8], index: 4, kind: input, shape index: {}]   ;;  %s14267_s5 = inlined_call_operand.vmem [shape: f32[8,1], index: 5, kind: input, shape index: {}]   ;;  %s14268_s6 = inlined_call_operand.vmem [shape: f32[1,8,2560], index: 6, kind: output, shape index: {}]  }
   0x1   :  { %s7421_s23 = smov 0   ;;  %s7423_s24 = smov 0  }
   0x2   :  { %s7425_s25 = smov 0   ;;  %s7427_s26 = smov 0  }
   0x3   :  { %s7429_s27 = smov 0  }
   0x4 LB: > { %s25_s28 = sadd.s32 1, %s7344_s26  ;;  %p44_p1 = scmp.ne.s32.totalorder %s7336_s24, %s7332_s23  ;;  %s7348_s27 = sphi %s7429_s27, %s16_s27   ;;  %s7344_s26 = sphi %s7427_s26, %s16935_s26   ;;  %s7340_s25 = sphi %s7425_s25, %s16934_s25   ;;  %s7336_s24 = sphi %s7423_s24, %s16933_s24   ;;  %s7332_s23 = sphi %s7421_s23, %s16932_s23   ;;  %s7328_s22 = sphi %s7419_s22, %s16931_s22   ;;  %s7324_s21 = sphi %s7417_s21, %s16930_s21  }
   0x5   : > { %p26_p0 = scmp.ge.s32.totalorder %s25_s28, 4  ;;  %s37_s29 = sadd.s32 1, %s7336_s24 }
   0x6   : > { %p45_p2 = scmp.eq.s32.totalorder %s7348_s27, 0  ;;  %s61_s8 = smul.u32 5, %s25_s28 }
   0x7   : > { %s7457_s30 = scalar_select %p26_p0, 0, %s25_s28  }
   0x8   : > { %p7459_p3 = por %p45_p2, %p44_p1  ;;  %s69_s12 = sadd.s32 1, %s7328_s22 }
   0x9   : > { %s33_s9 = ssub.s32 %s7344_s26, %s7457_s30  ;;  %s62_s10 = sadd.s32 1, %s7457_s30 }
   0xa   : > { %p35_p4 = scmp.eq.s32.totalorder %s33_s9, 0  ;;  %s63_s11 = smul.u32 5, %s62_s10 }
   0xb   : > { %p76_p5 = scmp.ne.s32.totalorder %s7328_s22, %s7324_s21  ;;  %p6680_p8 = scmp.ge.s32.totalorder %s7348_s27, 4 }
   0xc   : > { %s7470_s13 = scalar_select %p35_p4, %s7336_s24, %s37_s29  }
   0xd   : > { %s65_s14 = ssub.s32 %s61_s8, %s63_s11  ;;  %p7472_p6 = por %p76_p5, %p45_p2 }
   0xe   : > { %p67_p7 = scmp.eq.s32.totalorder %s65_s14, 0  ;;  %226 = sbr.rel (%p6680_p8) target bundleno = 39 (0x27), region = 32 }
  0x10   : > { %s7477_s16 = scalar_select %p67_p7, %s7328_s22, %s69_s12  }
  0x13   : > { %229 = sbr.rel (!%p7459_p3) target bundleno = 33 (0x21), region = 36  ;;  %s231_s17 = sand.u32 (%p7459_p3), 1, %s7336_s24  }
  0x14   : > { %s6869_s18 = smul.u32 (%p7459_p3), 40, %s231_s17  ;;  %s7358_s11 = smov (%p7459_p3), 0  }
  0x15   : > { %s6846_s19 = smul.u32 (%p7459_p3), 20, %s7344_s26  ;;  %s7362_s12 = smov (%p7459_p3), 0  }
  0x16   : > { %s7487_s8 = scalar_lea.vmem (%p7459_p3), [#allocation3], %s6869_s18  }
  0x17   : > { %s243_s29 = scalar_lea.vmem (%p7459_p3), %s14262_s0, %s6846_s19   ;;  %s7350_s9 = smov (%p7459_p3), %s7487_s8  }
  0x18   : > { %s7354_s10 = smov %s243_s29  }
  0x19 LB: >> { %v629_v0 = vld [vmem:[%s7356_s10] sm:$0xff]  ;;  %v631_v1 = vld [vmem:[%s7356_s10 + $0x54] sm:$0xff]  ;;  %s633_s7 = sadd.s32 1, %s7360_s11  ;;  %s623_s12 = sadd.s32 1, %s7364_s12   ;;  %s7364_s12 = sphi %s7362_s12, %s623_s12   ;;  %s7360_s11 = sphi %s7358_s11, %s7359_s11   ;;  %s7356_s10 = sphi %s7354_s10, %s638_s10   ;;  %s7352_s9 = sphi %s7350_s9, %s639_s9  }
  0x1a   : >> { %630 = vst [vmem:[%s7352_s9] sm:$0xff] %v629_v0  ;;  %632 = vst [vmem:[%s7352_s9 + $0x14] sm:$0xff] %v631_v1  ;;  %p634_p9 = scmp.ge.s32.totalorder %s633_s7, 2  ;;  %p622_p10 = scmp.ge.s32.totalorder %s623_s12, 2 }
  0x1b   : > { %v7318_v2 = vld [vmem:[%s243_s29 + $0x10] sm:$0xf] (%p622_p10)  ;;  %v7319_v3 = vld [vmem:[%s243_s29 + $0x64] sm:$0xf] (%p622_p10) }
  0x1c   : >> { %s16937_s7 = smov (%p634_p9, %s633_s7), 0  ;;  %625 = sbr.rel (!%p622_p10) target bundleno = 25 (0x19), region = 245  ;;  %7320 = vst [vmem:[%s7487_s8 + $0x10] sm:$0xf] (%p622_p10), %v7318_v2  ;;  %7321 = vst [vmem:[%s7487_s8 + $0x24] sm:$0xf] (%p622_p10), %v7319_v3 }
  0x1d   : >> { %s6703_s14 = sshll.u32 %s16937_s7, 3  ;;  %s7359_s11 = smov %s16937_s7  }
  0x1e   : >> { %s638_s10 = scalar_lea.vmem %s243_s29, %s6703_s14   ;;  %s639_s9 = scalar_lea.vmem %s7487_s8, %s6703_s14 [#allocation3]  }
  0x21 PF: > { %657 = sbr.rel (!%p7472_p6) target bundleno = 39 (0x27), region = 102  ;;  %s659_s17 = sand.u32 (%p7472_p6), 1, %s7328_s22  }
  0x22   : > { %s6709_s18 = smul.u32 (%p7472_p6), 20, %s7344_s26  ;;  %s6708_s19 = sshll.u32 (%p7472_p6), %s659_s17, 3 }
  0x23   : > { %s661_s10 = scalar_lea.vmem (%p7472_p6), [#allocation4], %s6708_s19 }
  0x24   : > { %s6548_s9 = scalar_lea.vmem (%p7472_p6), %s14263_s1, %s6709_s18 }
  0x25   : > { %v6710_v4 = vld [vmem:[%s6548_s9 + $0x14] sm:$0xf] (%p7472_p6)  ;;  %v6711_v5 = vld [vmem:[%s6548_s9 + $0x68] sm:$0xf] (%p7472_p6) }
  0x26   : > { %685 = vst [vmem:[%s661_s10] sm:$0xf] %v6710_v4  ;;  %687 = vst [vmem:[%s661_s10 + $0x4] sm:$0xf] %v6711_v5 }
  0x27 PF: > { %p6712_p11 = scmp.ge.s32.totalorder %s7348_s27, 1  ;;  %p714_p12 = scmp.lt.s32.totalorder %s7348_s27, 5 }
  0x29   : > { %p715_p13 = pnand %p6712_p11, %p714_p12 }
  0x2b   : > { %718 = sbr.rel (%p715_p13) target bundleno = 1322 (0x52a), region = 143 }
  0x30   : > { %s721_s15 = sand.u32 1, %s7332_s23   ;;  %s728_s8 = sand.u32 1, %s7324_s21   ;;  %v14269_v6 = vmov 0   ;;  %v1247_v19 = vld [vmem:[%s14265_s3 + $0x8] sm:$0xff]  ;;  %v1246_v20 = vld [vmem:[%s14265_s3] sm:$0xff]  ;;  %v1248_v21 = vld [vmem:[%s14265_s3 + $0x10] sm:$0xff] }
  0x31   : > { %s6870_s29 = smul.u32 40, %s721_s15  ;;  %7074 = vset.pattern.permute.xlu1 %v14269_v6  ;;  %7073 = vset.pattern.permute.xlu0 %v14269_v6  ;;  %s6713_s11 = sshll.u32 %s728_s8, 3  ;;  %v1249_v22 = vld [vmem:[%s14265_s3 + $0x18] sm:$0xff]  ;;  %v1250_v23 = vld [vmem:[%s14265_s3 + $0x20] sm:$0xff]  ;;  %v1251_v24 = vld [vmem:[%s14265_s3 + $0x28] sm:$0xff]  ;;  %vm1816_vm0 = vcmask 130048  }
  0x32   : > { %s7367_s7 = smov 127   ;;  %s730_s21 = scalar_lea.vmem [#allocation4], %s6713_s11  ;;  %v1252_v25 = vld [vmem:[%s14265_s3 + $0x30] sm:$0xff]  ;;  %v1253_v26 = vld [vmem:[%s14265_s3 + $0x38] sm:$0xff]  ;;  %v7095_v27 = vld [vmem:[%s14264_s2 + $0x4] ss:$8 sps:$4 sm:$0xff]  }
  0x33   : > { %s723_s12 = scalar_lea.vmem [#allocation3], %s6870_s29  ;;  %v789_v10 = vld [vmem:[%s730_s21] sm:$0xf]  ;;  %v790_v15 = vld [vmem:[%s730_s21 + $0x4] sm:$0xf]  ;;  %s7368_s23 = smov 126   ;;  %6796 = vmatprep.mubr.msk.bf16.mxu0 %vm1816_vm0, %v7095_v27 }
  0x34   : > { %v7506_v7 = vld [vmem:[%s723_s12 + $0x14] sm:$0xff]  ;;  %v7508_v8 = vld [vmem:[%s723_s12] sm:$0xff]  ;;  %v785_v9 = vld [vmem:[%s723_s12 + $0x10] sm:$0xf]  ;;  %s7369_s14 = smov 78   ;;  %s7370_s17 = smov 77  }
  0x35   : > { %837 = vrot.lane.b32.xlu1 %v7506_v7, %s7367_s7  ;;  %826 = vst [vmem:[#allocation2 + $0x14] sm:$0xff] %v7506_v7  ;;  %831 = vrot.lane.b32.xlu0 %v7508_v8, %s7367_s7  ;;  %823 = vst [vmem:[#allocation2] sm:$0xff] %v7508_v8  ;;  %v6715_v11 = vcombine.low %v785_v9, %v785_v9  ;;  %v784_v12 = vld [vmem:[%s723_s12 + $0x8] sm:$0xff]  ;;  %v6717_v13 = vcombine.low %v785_v9, %v789_v10  ;;  %v788_v14 = vld [vmem:[%s723_s12 + $0x24] sm:$0xf]  ;;  %s7371_s18 = smov 76  }
  0x36   : > { %824 = vst [vmem:[#allocation2 + $0x8] sm:$0xff] %v784_v12  ;;  %v787_v16 = vld [vmem:[%s723_s12 + $0x1c] sm:$0xff]  ;;  %v6716_v17 = vcombine.low %v788_v14, %v788_v14  ;;  %v6718_v18 = vcombine.low %v788_v14, %v790_v15  ;;  %s7372_s19 = smov 28   ;;  %s7373_s20 = smov 27   ;;  %v1257_v32 = vld [vmem:[%s14265_s3 + $0x58] sm:$0xff]  ;;  %vm851_vm1 = vcmask 1039360  }
  0x37   : > { %825 = vst [vmem:[#allocation2 + $0x10] sm:$0xf] %v6715_v11  ;;  %827 = vst [vmem:[#allocation2 + $0x1c] sm:$0xff] %v787_v16  ;;  %s7374_s28 = smov 26   ;;  %v7097_v28 = vld [vmem:[%s14264_s2 + $0x84] ss:$8 sps:$4 sm:$0xff]  }
  0x38   : > { %828 = vst [vmem:[#allocation2 + $0x24] sm:$0xf] %v6716_v17  ;;  %v1254_v29 = vld [vmem:[%s14265_s3 + $0x40] sm:$0xff]  ;;  %v1255_v30 = vld [vmem:[%s14265_s3 + $0x48] sm:$0xff]  ;;  %6804 = vmatprep.mubr.msk.bf16.mxu1 %vm1816_vm0, %v7097_v28  ;;  %v1256_v31 = vld [vmem:[%s14265_s3 + $0x50] sm:$0xff]  ;;  %vm849_vm2 = vcmask 1043456  }
  0x39   : > { %835 = vrot.lane.b32.xlu1 %v6717_v13, %s7367_s7  ;;  %833 = vrot.lane.b32.xlu0 %v784_v12, %s7367_s7  ;;  %v1258_v36 = vld [vmem:[%s14265_s3 + $0x60] sm:$0xff]  ;;  %v1259_v37 = vld [vmem:[%s14265_s3 + $0x68] sm:$0xff]  ;;  %vm892_vm3 = vcmask 1031168   ;;  %vm933_vm4 = vcmask 637952   ;;  %vm974_vm5 = vcmask 629760   ;;  %vm1015_vm6 = vcmask 621568  }
  0x3a   : > { %v1260_v45 = vld [vmem:[%s14265_s3 + $0x70] sm:$0xff]  ;;  %v1261_v46 = vld [vmem:[%s14265_s3 + $0x78] sm:$0xff]  ;;  %v1262_v57 = vld [vmem:[%s14265_s3 + $0x80] sm:$0xff]  ;;  %vm1056_vm7 = vcmask 228352   ;;  %vm1097_vm8 = vcmask 220160   ;;  %vm1138_vm9 = vcmask 211968  }
  0x3b   : > { %v1263_v58 = vld [vmem:[%s14265_s3 + $0x88] sm:$0xff]  ;;  %v1264_v4 = vld [vmem:[%s14265_s3 + $0x90] sm:$0xff]  ;;  %v1265_v5 = vld [vmem:[%s14265_s3 + $0x98] sm:$0xff]  ;;  %vm6420_vm10 = vcmask 1040384   ;;  %vm6426_vm11 = vcmask 1041408   ;;  %vm6432_vm12 = vcmask 1042432  }
  0x3c   : > { %v1267_v14 = vld [vmem:[%s14265_s3 + $0xa8] sm:$0xff]  ;;  %s772_s21 = smul.u32 5, %s7340_s25  ;;  %vm6444_vm13 = vcmask 1044480   ;;  %vm6450_vm14 = vcmask 1045504   ;;  %vm6456_vm15 = vcmask 1046528  }
  0x3d   : > { %841 = vrot.lane.b32.xlu1 %v6718_v18, %s7367_s7  ;;  %839 = vrot.lane.b32.xlu0 %v787_v16, %s7367_s7 }
  0x3e   : > { %p14151_p0 = scmp.lt.s32.totalorder %s772_s21, 19 }
  0x40   : > { %s16939_s21 = smov (!%p14151_p0, %s772_s21), 19 }
  0x41   : > { %875 = vrot.lane.b32.xlu1 %v784_v12, %s7368_s23  ;;  %873 = vrot.lane.b32.xlu0 %v7508_v8, %s7368_s23  ;;  %s6714_s25 = sshll.u32 %s16939_s21, 3 }
  0x45   : > { %879 = vrot.lane.b32.xlu1 %v7506_v7, %s7368_s23  ;;  %877 = vrot.lane.b32.xlu0 %v6717_v13, %s7368_s23 }
  0x49   : > { %883 = vrot.lane.b32.xlu1 %v6718_v18, %s7368_s23  ;;  %881 = vrot.lane.b32.xlu0 %v787_v16, %s7368_s23 }
  0x4d   : > { %916 = vrot.lane.b32.xlu1 %v784_v12, %s7369_s14  ;;  %914 = vrot.lane.b32.xlu0 %v7508_v8, %s7369_s14 }
  0x51   : > { %920 = vrot.lane.b32.xlu1 %v7506_v7, %s7369_s14  ;;  %918 = vrot.lane.b32.xlu0 %v6717_v13, %s7369_s14 }
  0x55   : > { %924 = vrot.lane.b32.xlu1 %v6718_v18, %s7369_s14  ;;  %922 = vrot.lane.b32.xlu0 %v787_v16, %s7369_s14 }
  0x59   : > { %957 = vrot.lane.b32.xlu1 %v784_v12, %s7370_s17  ;;  %955 = vrot.lane.b32.xlu0 %v7508_v8, %s7370_s17 }
  0x5d   : > { %961 = vrot.lane.b32.xlu1 %v7506_v7, %s7370_s17  ;;  %959 = vrot.lane.b32.xlu0 %v6717_v13, %s7370_s17 }
  0x61   : > { %965 = vrot.lane.b32.xlu1 %v6718_v18, %s7370_s17  ;;  %963 = vrot.lane.b32.xlu0 %v787_v16, %s7370_s17 }
  0x65   : > { %998 = vrot.lane.b32.xlu1 %v784_v12, %s7371_s18  ;;  %996 = vrot.lane.b32.xlu0 %v7508_v8, %s7371_s18 }
  0x69   : > { %1002 = vrot.lane.b32.xlu1 %v7506_v7, %s7371_s18  ;;  %1000 = vrot.lane.b32.xlu0 %v6717_v13, %s7371_s18 }
  0x6d   : > { %1006 = vrot.lane.b32.xlu1 %v6718_v18, %s7371_s18  ;;  %1004 = vrot.lane.b32.xlu0 %v787_v16, %s7371_s18  ;;  %s14213_s18 = scalar_lea.vmem %s14268_s6, %s6714_s25 }
  0x71   : > { %1039 = vrot.lane.b32.xlu1 %v784_v12, %s7372_s19  ;;  %1037 = vrot.lane.b32.xlu0 %v7508_v8, %s7372_s19 }
  0x75   : > { %1043 = vrot.lane.b32.xlu1 %v7506_v7, %s7372_s19  ;;  %1041 = vrot.lane.b32.xlu0 %v6717_v13, %s7372_s19 }
  0x79   : > { %1047 = vrot.lane.b32.xlu1 %v6718_v18, %s7372_s19  ;;  %1045 = vrot.lane.b32.xlu0 %v787_v16, %s7372_s19 }
  0x7d   : > { %1080 = vrot.lane.b32.xlu1 %v784_v12, %s7373_s20  ;;  %1078 = vrot.lane.b32.xlu0 %v7508_v8, %s7373_s20 }
  0x81   : > { %1084 = vrot.lane.b32.xlu1 %v7506_v7, %s7373_s20  ;;  %1082 = vrot.lane.b32.xlu0 %v6717_v13, %s7373_s20 }
  0x85   : > { %1088 = vrot.lane.b32.xlu1 %v6718_v18, %s7373_s20  ;;  %1086 = vrot.lane.b32.xlu0 %v787_v16, %s7373_s20 }
  0x89   : > { %1121 = vrot.lane.b32.xlu1 %v784_v12, %s7374_s28  ;;  %1119 = vrot.lane.b32.xlu0 %v7508_v8, %s7374_s28 }
  0x8d   : > { %1125 = vrot.lane.b32.xlu1 %v7506_v7, %s7374_s28  ;;  %1123 = vrot.lane.b32.xlu0 %v6717_v13, %s7374_s28  ;;  %v1266_v13 = vld [vmem:[%s14265_s3 + $0xa0] sm:$0xff] }
  0x91   : > { %1129 = vrot.lane.b32.xlu1 %v6718_v18, %s7374_s28  ;;  %1127 = vrot.lane.b32.xlu0 %v787_v16, %s7374_s28 }
  0x95   : > { %1285 = vperm.xlu1 %7074, %v1247_v19   ;;  %1280 = vperm.xlu0 %7073, %v1246_v20  }
  0x99   : > { %1290 = vperm.xlu1 %7074, %v1248_v21   ;;  %1295 = vperm.xlu0 %7073, %v1249_v22  }
  0x9d   : > { %1300 = vperm.xlu1 %7074, %v1250_v23   ;;  %1305 = vperm.xlu0 %7073, %v1251_v24   ;;  %v1268_v24 = vld [vmem:[%s14265_s3 + $0xb0] sm:$0xff] }
  0xa1   : > { %1310 = vperm.xlu1 %7074, %v1252_v25   ;;  %1315 = vperm.xlu0 %7073, %v1253_v26   ;;  %v1269_v25 = vld [vmem:[%s14265_s3 + $0xb8] sm:$0xff] }
  0xa5   : > { %1320 = vperm.xlu1 %7074, %v1254_v29   ;;  %1325 = vperm.xlu0 %7073, %v1255_v30  }
  0xa7   : > { %v838_v33 = vpop.permute.xlu1 %837  ;;  %v832_v34 = vpop.permute.xlu0 %831 }
  0xa8   : > { %v843_v35 = vrot.slane %v832_v34, 4  ;;  %v846_v51 = vrot.slane %v838_v33, 4 }
  0xa9   : > { %1330 = vperm.xlu1 %7074, %v1256_v31   ;;  %1335 = vperm.xlu0 %7073, %v1257_v32  }
  0xab   : > { %v836_v38 = vpop.permute.xlu1 %835  ;;  %v834_v39 = vpop.permute.xlu0 %833 }
  0xac   : > { %v845_v40 = vrot.slane %v836_v38, 4  ;;  %v844_v41 = vrot.slane %v834_v39, 4 }
  0xad   : > { %1340 = vperm.xlu1 %7074, %v1258_v36   ;;  %1345 = vperm.xlu0 %7073, %v1259_v37   ;;  %v1270_v37 = vld [vmem:[%s14265_s3 + $0xc0] sm:$0xff] }
  0xae   : > { %v855_v42 = vsel %vm851_vm1, %v836_v38, %v845_v40  ;;  %v850_v43 = vsel %vm849_vm2, %v843_v35, %v844_v41  ;;  %v853_v44 = vsel %vm849_vm2, %v844_v41, %v845_v40  ;;  %v1271_v38 = vld [vmem:[%s14265_s3 + $0xc8] sm:$0xff] }
  0xaf   : > { %869 = vst [vmem:[#allocation2 + $0x38] sm:$0xf] %v855_v42  ;;  %v852_v47 = vsel %vm851_vm1, %v832_v34, %v850_v43  ;;  %v854_v48 = vsel %vm851_vm1, %v834_v39, %v853_v44  ;;  %v842_v49 = vpop.permute.xlu1 %841  ;;  %v840_v50 = vpop.permute.xlu0 %839 }
  0xb0   : > { %868 = vst [vmem:[#allocation2 + $0x30] sm:$0xff] %v854_v48  ;;  %v848_v52 = vrot.slane %v842_v49, 4  ;;  %v847_v53 = vrot.slane %v840_v50, 4 }
  0xb1   : > { %1350 = vperm.xlu1 %7074, %v1260_v45   ;;  %1355 = vperm.xlu0 %7073, %v1261_v46   ;;  %v1272_v45 = vld [vmem:[%s14265_s3 + $0xd0] sm:$0xff]  ;;  %v1273_v46 = vld [vmem:[%s14265_s3 + $0xd8] sm:$0xff] }
  0xb2   : > { %v860_v54 = vsel %vm851_vm1, %v842_v49, %v848_v52  ;;  %v856_v55 = vsel %vm849_vm2, %v846_v51, %v847_v53  ;;  %v858_v56 = vsel %vm849_vm2, %v847_v53, %v848_v52 }
  0xb3   : > { %872 = vst [vmem:[#allocation2 + $0x4c] sm:$0xf] %v860_v54  ;;  %v857_v59 = vsel %vm851_vm1, %v838_v33, %v856_v55  ;;  %v859_v60 = vsel %vm851_vm1, %v840_v50, %v858_v56  ;;  %v876_v61 = vpop.permute.xlu1 %875  ;;  %v874_v62 = vpop.permute.xlu0 %873  ;;  %v1274_v56 = vld [vmem:[%s14265_s3 + $0xe0] sm:$0xff] }
  0xb4   : > { %871 = vst [vmem:[#allocation2 + $0x44] sm:$0xff] %v859_v60  ;;  %v886_v63 = vrot.slane %v876_v61, 4  ;;  %v885_v0 = vrot.slane %v874_v62, 4  ;;  %v7600_v1 = vcombine.high %v852_v47, %v857_v59  ;;  %v7602_v2 = vcombine.low %v852_v47, %v857_v59 }
  0xb5   : > { %1360 = vperm.xlu1 %7074, %v1262_v57   ;;  %1365 = vperm.xlu0 %7073, %v1263_v58   ;;  %v1275_v57 = vld [vmem:[%s14265_s3 + $0xe8] sm:$0xff] }
  0xb6   : > { %v891_v3 = vsel %vm849_vm2, %v885_v0, %v886_v63 }
  0xb7   : > { %v893_v7 = vsel %vm892_vm3, %v874_v62, %v891_v3  ;;  %v880_v8 = vpop.permute.xlu1 %879  ;;  %v878_v9 = vpop.permute.xlu0 %877 }
  0xb8   : > { %v887_v10 = vrot.slane %v878_v9, 4  ;;  %v888_v18 = vrot.slane %v880_v8, 4 }
  0xb9   : > { %1370 = vperm.xlu1 %7074, %v1264_v4   ;;  %1375 = vperm.xlu0 %7073, %v1265_v5  }
  0xba   : > { %v894_v11 = vsel %vm849_vm2, %v886_v63, %v887_v10  ;;  %v896_v12 = vsel %vm892_vm3, %v878_v9, %v887_v10 }
  0xbb   : > { %v7621_v15 = vsel %vm892_vm3, %v876_v61, %v894_v11  ;;  %910 = vst [vmem:[#allocation2 + $0x60] sm:$0xf] %v896_v12  ;;  %v884_v16 = vpop.permute.xlu1 %883  ;;  %v882_v17 = vpop.permute.xlu0 %881 }
  0xbc   : > { %v890_v19 = vrot.slane %v884_v16, 4  ;;  %v889_v20 = vrot.slane %v882_v17, 4 }
  0xbd   : > { %1380 = vperm.xlu1 %7074, %v1266_v13   ;;  %1385 = vperm.xlu0 %7073, %v1267_v14  }
  0xbe   : > { %v901_v21 = vsel %vm892_vm3, %v884_v16, %v890_v19  ;;  %v897_v22 = vsel %vm849_vm2, %v888_v18, %v889_v20  ;;  %v899_v23 = vsel %vm849_vm2, %v889_v20, %v890_v19  ;;  %v7703_v16 = vld [vmem:[%s14266_s4] sm:$0xff] }
  0xbf   : > { %913 = vst [vmem:[#allocation2 + $0x74] sm:$0xf] %v901_v21  ;;  %v898_v26 = vsel %vm892_vm3, %v880_v8, %v897_v22  ;;  %v7634_v27 = vsel %vm892_vm3, %v882_v17, %v899_v23  ;;  %v917_v28 = vpop.permute.xlu1 %916  ;;  %v915_v29 = vpop.permute.xlu0 %914  ;;  %v1277_v8 = vld [vmem:[%s14265_s3 + $0xf8] sm:$0xff]  ;;  %v7708_v17 = vld [vmem:[%s14266_s4 + $0x8] sm:$0xff] }
  0xc0   : > { %v927_v30 = vrot.slane %v917_v28, 4  ;;  %v926_v31 = vrot.slane %v915_v29, 4  ;;  %v7636_v32 = vcombine.high %v893_v7, %v898_v26  ;;  %v7638_v33 = vcombine.low %v893_v7, %v898_v26  ;;  %v1276_v7 = vld [vmem:[%s14265_s3 + $0xf0] sm:$0xff] }
  0xc1   : > { %1390 = vperm.xlu1 %7074, %v1268_v24   ;;  %1395 = vperm.xlu0 %7073, %v1269_v25  }
  0xc2   : > { %v932_v36 = vsel %vm849_vm2, %v926_v31, %v927_v30 }
  0xc3   : > { %v7652_v39 = vsel %vm933_vm4, %v915_v29, %v932_v36  ;;  %v921_v40 = vpop.permute.xlu1 %920  ;;  %v919_v41 = vpop.permute.xlu0 %918  ;;  %v7726_v29 = vld [vmem:[%s14266_s4 + $0x18] sm:$0xff] }
  0xc4   : > { %v928_v42 = vrot.slane %v919_v41, 4  ;;  %v929_v50 = vrot.slane %v921_v40, 4 }
  0xc5   : > { %1400 = vperm.xlu1 %7074, %v1270_v37   ;;  %1405 = vperm.xlu0 %7073, %v1271_v38  }
  0xc6   : > { %v935_v43 = vsel %vm849_vm2, %v927_v30, %v928_v42  ;;  %v937_v44 = vsel %vm933_vm4, %v919_v41, %v928_v42 }
  0xc7   : > { %v7663_v47 = vsel %vm933_vm4, %v917_v28, %v935_v43  ;;  %951 = vst [vmem:[#allocation2 + $0x88] sm:$0xf] %v937_v44  ;;  %v925_v48 = vpop.permute.xlu1 %924  ;;  %v923_v49 = vpop.permute.xlu0 %922  ;;  %v7721_v28 = vld [vmem:[%s14266_s4 + $0x10] sm:$0xff]  ;;  %v7744_v44 = vld [vmem:[%s14266_s4 + $0x20] sm:$0xff] }
  0xc8   : > { %v931_v51 = vrot.slane %v925_v48, 4  ;;  %v930_v52 = vrot.slane %v923_v49, 4 }
  0xc9   : > { %1410 = vperm.xlu1 %7074, %v1272_v45   ;;  %1415 = vperm.xlu0 %7073, %v1273_v46   ;;  %v7749_v45 = vld [vmem:[%s14266_s4 + $0x28] sm:$0xff] }
  0xca   : > { %v942_v53 = vsel %vm933_vm4, %v925_v48, %v931_v51  ;;  %v938_v54 = vsel %vm849_vm2, %v929_v50, %v930_v52  ;;  %v940_v55 = vsel %vm849_vm2, %v930_v52, %v931_v51 }
  0xcb   : > { %954 = vst [vmem:[#allocation2 + $0x9c] sm:$0xf] %v942_v53  ;;  %v7675_v58 = vsel %vm933_vm4, %v921_v40, %v938_v54  ;;  %v7678_v59 = vsel %vm933_vm4, %v923_v49, %v940_v55  ;;  %v958_v60 = vpop.permute.xlu1 %957  ;;  %v956_v61 = vpop.permute.xlu0 %955  ;;  %v7761_v53 = vld [vmem:[%s14266_s4 + $0x30] sm:$0xff]  ;;  %v7766_v54 = vld [vmem:[%s14266_s4 + $0x38] sm:$0xff] }
  0xcc   : > { %v968_v62 = vrot.slane %v958_v60, 4  ;;  %v967_v63 = vrot.slane %v956_v61, 4  ;;  %v7682_v0 = vcombine.low %v7652_v39, %v7675_v58 }
  0xcd   : > { %1420 = vperm.xlu1 %7074, %v1274_v56   ;;  %1425 = vperm.xlu0 %7073, %v1275_v57  }
  0xce   : > { %v973_v5 = vsel %vm849_vm2, %v967_v63, %v968_v62 }
  0xcf   : > { %v7696_v9 = vsel %vm974_vm5, %v956_v61, %v973_v5  ;;  %v962_v10 = vpop.permute.xlu1 %961  ;;  %v960_v11 = vpop.permute.xlu0 %959 }
  0xd0   : > { %v969_v12 = vrot.slane %v960_v11, 4  ;;  %v970_v21 = vrot.slane %v962_v10, 4 }
  0xd1   : > { %1430 = vperm.xlu1 %7074, %v1276_v7   ;;  %1435 = vperm.xlu0 %7073, %v1277_v8   ;;  %v7779_v8 = vld [vmem:[%s14266_s4 + $0x40] sm:$0xff] }
  0xd2   : > { %v976_v13 = vsel %vm849_vm2, %v968_v62, %v969_v12  ;;  %v978_v14 = vsel %vm974_vm5, %v960_v11, %v969_v12 }
  0xd3   : > { %v7711_v18 = vsel %vm974_vm5, %v958_v60, %v976_v13  ;;  %992 = vst [vmem:[#allocation2 + $0xb0] sm:$0xf] %v978_v14  ;;  %v966_v19 = vpop.permute.xlu1 %965  ;;  %v964_v20 = vpop.permute.xlu0 %963 }
  0xd4   : > { %v972_v22 = vrot.slane %v966_v19, 4  ;;  %v971_v23 = vrot.slane %v964_v20, 4 }
  0xd5   : > { %2606 = vperm.xlu1 %7074, %v7703_v16   ;;  %2611 = vperm.xlu0 %7073, %v7708_v17  }
  0xd6   : > { %v983_v24 = vsel %vm974_vm5, %v966_v19, %v972_v22  ;;  %v979_v25 = vsel %vm849_vm2, %v970_v21, %v971_v23  ;;  %v981_v26 = vsel %vm849_vm2, %v971_v23, %v972_v22 }
  0xd7   : > { %995 = vst [vmem:[#allocation2 + $0xc4] sm:$0xf] %v983_v24  ;;  %v7729_v30 = vsel %vm974_vm5, %v962_v10, %v979_v25  ;;  %v7732_v31 = vsel %vm974_vm5, %v964_v20, %v981_v26  ;;  %v999_v36 = vpop.permute.xlu1 %998  ;;  %v997_v37 = vpop.permute.xlu0 %996  ;;  %v7784_v10 = vld [vmem:[%s14266_s4 + $0x48] sm:$0xff]  ;;  %v7802_v24 = vld [vmem:[%s14266_s4 + $0x50] sm:$0xff]  ;;  %v7807_v25 = vld [vmem:[%s14266_s4 + $0x58] sm:$0xff] }
  0xd8   : > { %v1009_v38 = vrot.slane %v999_v36, 4  ;;  %v1008_v40 = vrot.slane %v997_v37, 4  ;;  %v6772_v6 = vcombine.high %v7696_v9, %v7729_v30 }
  0xd9   : > { %2616 = vperm.xlu1 %7074, %v7721_v28   ;;  %2621 = vperm.xlu0 %7073, %v7726_v29  }
  0xda   : > { %v1014_v43 = vsel %vm849_vm2, %v1008_v40, %v1009_v38 }
  0xdb   : > { %v7752_v46 = vsel %vm1015_vm6, %v997_v37, %v1014_v43  ;;  %v1003_v48 = vpop.permute.xlu1 %1002  ;;  %v1001_v49 = vpop.permute.xlu0 %1000 }
  0xdc   : > { %v1010_v50 = vrot.slane %v1001_v49, 4  ;;  %v1011_v60 = vrot.slane %v1003_v48, 4 }
  0xdd   : > { %2626 = vperm.xlu1 %7074, %v7744_v44   ;;  %2631 = vperm.xlu0 %7073, %v7749_v45  }
  0xde   : > { %v1017_v51 = vsel %vm849_vm2, %v1009_v38, %v1010_v50  ;;  %v1019_v52 = vsel %vm1015_vm6, %v1001_v49, %v1010_v50  ;;  %v7824_v49 = vld [vmem:[%s14266_s4 + $0x68] sm:$0xff] }
  0xdf   : > { %v7769_v55 = vsel %vm1015_vm6, %v999_v36, %v1017_v51  ;;  %1033 = vst [vmem:[#allocation2 + $0xd8] sm:$0xf] %v1019_v52  ;;  %v1007_v56 = vpop.permute.xlu1 %1006  ;;  %v1005_v57 = vpop.permute.xlu0 %1004 }
  0xe0   : > { %v1013_v61 = vrot.slane %v1007_v56, 4  ;;  %v1012_v62 = vrot.slane %v1005_v57, 4 }
  0xe1   : > { %2636 = vperm.xlu1 %7074, %v7761_v53   ;;  %2641 = vperm.xlu0 %7073, %v7766_v54  }
  0xe2   : > { %v1024_v63 = vsel %vm1015_vm6, %v1007_v56, %v1013_v61  ;;  %v1020_v5 = vsel %vm849_vm2, %v1011_v60, %v1012_v62  ;;  %v1022_v7 = vsel %vm849_vm2, %v1012_v62, %v1013_v61 }
  0xe3   : > { %1036 = vst [vmem:[#allocation2 + $0xec] sm:$0xf] %v1024_v63  ;;  %v7787_v11 = vsel %vm1015_vm6, %v1003_v48, %v1020_v5  ;;  %v7790_v12 = vsel %vm1015_vm6, %v1005_v57, %v1022_v7  ;;  %v1040_v13 = vpop.permute.xlu1 %1039  ;;  %v1038_v14 = vpop.permute.xlu0 %1037  ;;  %v7819_v48 = vld [vmem:[%s14266_s4 + $0x60] sm:$0xff]  ;;  %v7837_v5 = vld [vmem:[%s14266_s4 + $0x70] sm:$0xff]  ;;  %v7842_v7 = vld [vmem:[%s14266_s4 + $0x78] sm:$0xff] }
  0xe4   : > { %v1050_v19 = vrot.slane %v1040_v13, 4  ;;  %v1049_v20 = vrot.slane %v1038_v14, 4  ;;  %v6776_v22 = vcombine.low %v7752_v46, %v7787_v11 }
  0xe5   : > { %2646 = vperm.xlu1 %7074, %v7779_v8   ;;  %2651 = vperm.xlu0 %7073, %v7784_v10  }
  0xe6   : > { %v1055_v23 = vsel %vm849_vm2, %v1049_v20, %v1050_v19 }
  0xe7   : > { %v7810_v26 = vsel %vm1056_vm7, %v1038_v14, %v1055_v23  ;;  %v1044_v36 = vpop.permute.xlu1 %1043  ;;  %v1042_v37 = vpop.permute.xlu0 %1041 }
  0xe8   : > { %v1051_v38 = vrot.slane %v1042_v37, 4  ;;  %v1052_v56 = vrot.slane %v1044_v36, 4 }
  0xe9   : > { %2656 = vperm.xlu1 %7074, %v7802_v24   ;;  %2661 = vperm.xlu0 %7073, %v7807_v25  }
  0xea   : > { %v1058_v40 = vsel %vm849_vm2, %v1050_v19, %v1051_v38  ;;  %v1060_v43 = vsel %vm1056_vm7, %v1042_v37, %v1051_v38 }
  0xeb   : > { %v7827_v50 = vsel %vm1056_vm7, %v1040_v13, %v1058_v40  ;;  %1074 = vst [vmem:[#allocation2 + $0x100] sm:$0xf] %v1060_v43  ;;  %v1048_v51 = vpop.permute.xlu1 %1047  ;;  %v1046_v52 = vpop.permute.xlu0 %1045  ;;  %v7856_v40 = vld [vmem:[%s14266_s4 + $0x80] sm:$0xff] }
  0xec   : > { %v1054_v57 = vrot.slane %v1048_v51, 4  ;;  %v1053_v60 = vrot.slane %v1046_v52, 4 }
  0xed   : > { %2666 = vperm.xlu1 %7074, %v7819_v48   ;;  %2671 = vperm.xlu0 %7073, %v7824_v49  }
  0xee   : > { %v1065_v61 = vsel %vm1056_vm7, %v1048_v51, %v1054_v57  ;;  %v1061_v62 = vsel %vm849_vm2, %v1052_v56, %v1053_v60  ;;  %v1063_v63 = vsel %vm849_vm2, %v1053_v60, %v1054_v57 }
  0xef   : > { %1077 = vst [vmem:[#allocation2 + $0x114] sm:$0xf] %v1065_v61  ;;  %v7845_v13 = vsel %vm1056_vm7, %v1044_v36, %v1061_v62  ;;  %v7848_v14 = vsel %vm1056_vm7, %v1046_v52, %v1063_v63  ;;  %v1081_v19 = vpop.permute.xlu1 %1080  ;;  %v1079_v20 = vpop.permute.xlu0 %1078  ;;  %v7861_v36 = vld [vmem:[%s14266_s4 + $0x88] sm:$0xff]  ;;  %v7871_v61 = vld [vmem:[%s14266_s4 + $0x90] sm:$0xff]  ;;  %v7876_v62 = vld [vmem:[%s14266_s4 + $0x98] sm:$0xff] }
  0xf0   : > { %v1091_v23 = vrot.slane %v1081_v19, 4  ;;  %v1090_v37 = vrot.slane %v1079_v20, 4 }
  0xf1   : > { %2676 = vperm.xlu1 %7074, %v7837_v5   ;;  %2681 = vperm.xlu0 %7073, %v7842_v7  }
  0xf2   : > { %v1096_v38 = vsel %vm849_vm2, %v1090_v37, %v1091_v23 }
  0xf3   : > { %v1098_v43 = vsel %vm1097_vm8, %v1079_v20, %v1096_v38  ;;  %v1085_v51 = vpop.permute.xlu1 %1084  ;;  %v1083_v52 = vpop.permute.xlu0 %1082 }
  0xf4   : > { %v1092_v56 = vrot.slane %v1083_v52, 4  ;;  %v1093_v38 = vrot.slane %v1085_v51, 4 }
  0xf5   : > { %2686 = vperm.xlu1 %7074, %v7856_v40   ;;  %2691 = vperm.xlu0 %7073, %v7861_v36  }
  0xf6   : > { %v1099_v57 = vsel %vm849_vm2, %v1091_v23, %v1092_v56  ;;  %v1101_v60 = vsel %vm1097_vm8, %v1083_v52, %v1092_v56 }
  0xf7   : > { %v7879_v63 = vsel %vm1097_vm8, %v1081_v19, %v1099_v57  ;;  %1115 = vst [vmem:[#allocation2 + $0x128] sm:$0xf] %v1101_v60  ;;  %v1089_v20 = vpop.permute.xlu1 %1088  ;;  %v1087_v37 = vpop.permute.xlu0 %1086  ;;  %v7889_v19 = vld [vmem:[%s14266_s4 + $0xa0] sm:$0xff]  ;;  %v7894_v57 = vld [vmem:[%s14266_s4 + $0xa8] sm:$0xff] }
  0xf8   : > { %v1095_v23 = vrot.slane %v1089_v20, 4  ;;  %v1094_v34 = vrot.slane %v1087_v37, 4 }
  0xf9   : > { %2696 = vperm.xlu1 %7074, %v7871_v61   ;;  %2701 = vperm.xlu0 %7073, %v7876_v62  }
  0xfa   : > { %v1106_v52 = vsel %vm1097_vm8, %v1089_v20, %v1095_v23  ;;  %v1102_v56 = vsel %vm849_vm2, %v1093_v38, %v1094_v34  ;;  %v1104_v35 = vsel %vm849_vm2, %v1094_v34, %v1095_v23 }
  0xfb   : > { %1118 = vst [vmem:[#allocation2 + $0x13c] sm:$0xf] %v1106_v52  ;;  %v1103_v60 = vsel %vm1097_vm8, %v1085_v51, %v1102_v56  ;;  %v7898_v3 = vsel %vm1097_vm8, %v1087_v37, %v1104_v35  ;;  %v1122_v20 = vpop.permute.xlu1 %1121  ;;  %v1120_v38 = vpop.permute.xlu0 %1119  ;;  %v7906_v51 = vld [vmem:[%s14266_s4 + $0xb0] sm:$0xff]  ;;  %v7911_v35 = vld [vmem:[%s14266_s4 + $0xb8] sm:$0xff] }
  0xfc   : > { %v1132_v34 = vrot.slane %v1122_v20, 4  ;;  %v1131_v23 = vrot.slane %v1120_v38, 4  ;;  %v6787_v4 = vcombine.high %v1098_v43, %v1103_v60  ;;  %v6786_v41 = vcombine.low %v1098_v43, %v1103_v60 }
  0xfd   : > { %2706 = vperm.xlu1 %7074, %v7889_v19   ;;  %2711 = vperm.xlu0 %7073, %v7894_v57   ;;  %v6782_v43 = vcombine.high %v7810_v26, %v7845_v13 }
  0xfe   : > { %v1137_v42 = vsel %vm849_vm2, %v1131_v23, %v1132_v34  ;;  %1865 = vmatprep.subr.bf16.mxu0 %v6787_v4  ;;  %6851 = vmatprep.subr.bf16.mxu1 %v6787_v4  ;;  %v6781_v4 = vcombine.low %v7810_v26, %v7845_v13 }
  0xff   : > { %v7916_v37 = vsel %vm1138_vm9, %v1120_v38, %v1137_v42  ;;  %v1126_v52 = vpop.permute.xlu1 %1125  ;;  %v1124_v56 = vpop.permute.xlu0 %1123  ;;  %1866 = vmatpush1.bf16.msra.mxu0 %v6786_v41  ;;  %6860 = vmatpush1.bf16.msra.mxu1 %v6786_v41  ;;  %v7927_v42 = vld [vmem:[%s14266_s4 + $0xc0] sm:$0xff]  ;;  %v7932_v41 = vld [vmem:[%s14266_s4 + $0xc8] sm:$0xff]  ;;  %v6777_v38 = vcombine.high %v7752_v46, %v7787_v11 }
 0x100   : > { %v1133_v60 = vrot.slane %v1124_v56, 4  ;;  %1867 = vmatprep.subr.bf16.mxu0 %v6782_v43  ;;  %6852 = vmatprep.subr.bf16.mxu1 %v6782_v43 }
 0x101   : > { %2716 = vperm.xlu1 %7074, %v7906_v51   ;;  %2721 = vperm.xlu0 %7073, %v7911_v35  }
 0x102   : > { %v1140_v23 = vsel %vm849_vm2, %v1132_v34, %v1133_v60  ;;  %v1142_v21 = vsel %vm1138_vm9, %v1124_v56, %v1133_v60  ;;  %v1134_v34 = vrot.slane %v1126_v52, 4 }
 0x103   : > { %v7937_v43 = vsel %vm1138_vm9, %v1122_v20, %v1140_v23  ;;  %1156 = vst [vmem:[#allocation2 + $0x150] sm:$0xf] %v1142_v21  ;;  %v1130_v26 = vpop.permute.xlu1 %1129  ;;  %v1128_v13 = vpop.permute.xlu0 %1127  ;;  %1868 = vmatpush1.bf16.msra.mxu0 %v6781_v4  ;;  %6861 = vmatpush1.bf16.msra.mxu1 %v6781_v4  ;;  %v7949_v4 = vld [vmem:[%s14266_s4 + $0xd0] sm:$0xff] }
 0x104   : > { %v1136_v56 = vrot.slane %v1130_v26, 4  ;;  %v1135_v60 = vrot.slane %v1128_v13, 4  ;;  %1869 = vmatprep.subr.bf16.mxu0 %v6777_v38  ;;  %6853 = vmatprep.subr.bf16.mxu1 %v6777_v38  ;;  %v7954_v38 = vld [vmem:[%s14266_s4 + $0xd8] sm:$0xff] }
 0x105   : > { %2726 = vperm.xlu1 %7074, %v7927_v42   ;;  %2731 = vperm.xlu0 %7073, %v7932_v41  }
 0x106   : > { %v1147_v20 = vsel %vm1138_vm9, %v1130_v26, %v1136_v56  ;;  %v1143_v21 = vsel %vm849_vm2, %v1134_v34, %v1135_v60  ;;  %v1145_v23 = vsel %vm849_vm2, %v1135_v60, %v1136_v56  ;;  %v6771_v26 = vcombine.low %v7696_v9, %v7729_v30  ;;  %v7969_v34 = vld [vmem:[%s14266_s4 + $0xe0] sm:$0xff]  ;;  %v7983_v9 = vld [vmem:[%s14266_s4 + $0xf0] sm:$0xff]  ;;  %v7988_v30 = vld [vmem:[%s14266_s4 + $0xf8] sm:$0xff] }
 0x107   : > { %1159 = vst [vmem:[#allocation2 + $0x164] sm:$0xf] %v1147_v20  ;;  %v1144_v46 = vsel %vm1138_vm9, %v1126_v52, %v1143_v21  ;;  %v7960_v11 = vsel %vm1138_vm9, %v1128_v13, %v1145_v23  ;;  %1870 = vmatpush1.bf16.msra.mxu0 %v6776_v22  ;;  %6862 = vmatpush1.bf16.msra.mxu1 %v6776_v22  ;;  %v7974_v52 = vld [vmem:[%s14266_s4 + $0xe8] sm:$0xff]  ;;  %v1195_v22 = vld [vmem:[#allocation2 + $0x14] sm:$0xff]  ;;  %v7158_v56 = vld [vmem:[#allocation2] sm:$0xff] }
 0x108   : > { %1871 = vmatprep.subr.bf16.mxu0 %v6772_v6  ;;  %6854 = vmatprep.subr.bf16.mxu1 %v6772_v6  ;;  %v6767_v6 = vcombine.high %v7652_v39, %v7675_v58  ;;  %v6752_v60 = vcombine.high %v7158_v56, %v1195_v22 }
 0x109   : > { %2736 = vperm.xlu1 %7074, %v7949_v4   ;;  %2741 = vperm.xlu0 %7073, %v7954_v38  }
 0x10b   : > { %1872 = vmatpush1.bf16.msra.mxu0 %v6771_v26  ;;  %6863 = vmatpush1.bf16.msra.mxu1 %v6771_v26 }
 0x10c   : > { %1873 = vmatprep.subr.bf16.mxu0 %v6767_v6  ;;  %6855 = vmatprep.subr.bf16.mxu1 %v6767_v6  ;;  %v6789_v6 = vcombine.high %v7879_v63, %v7898_v3 }
 0x10d   : > { %2746 = vperm.xlu1 %7074, %v7969_v34   ;;  %2751 = vperm.xlu0 %7073, %v7974_v52  }
 0x10f   : > { %1874 = vmatpush1.bf16.msra.mxu0 %v7682_v0  ;;  %6864 = vmatpush1.bf16.msra.mxu1 %v7682_v0 }
 0x110   : > { %v7992_v39 = vpop.permute.xlu1 %1285  ;;  %v7994_v58 = vpop.permute.xlu0 %1280  ;;  %1875 = vmatprep.subr.bf16.mxu0 %v7636_v32  ;;  %6856 = vmatprep.subr.bf16.mxu1 %v7636_v32  ;;  %v7375_v32 = vmov 1  }
 0x111   : > { %15019 = vst [vmem:[#allocation5_spill] sm:$0xff] %v7992_v39  ;;  %15020 = vst [vmem:[#allocation6_spill] sm:$0xff] %v7994_v58  ;;  %2756 = vperm.xlu1 %7074, %v7983_v9   ;;  %2761 = vperm.xlu0 %7073, %v7988_v30   ;;  %v8321_v39 = vld [vmem:[%s14264_s2 + $0xf4] ss:$8 sps:$4 sm:$0xff]  }
 0x113   : > { %1876 = vmatpush1.bf16.msra.mxu0 %v7638_v33  ;;  %6865 = vmatpush1.bf16.msra.mxu1 %v7638_v33  ;;  %v6751_v33 = vcombine.low %v7158_v56, %v1195_v22  ;;  %v8031_v22 = vld [vmem:[%s14264_s2] ss:$8 sps:$4 sm:$0xff]  }
 0x114   : > { %v8002_v13 = vpop.permute.xlu1 %1290  ;;  %v8004_v0 = vpop.permute.xlu0 %1295  ;;  %1877 = vmatprep.subr.bf16.mxu0 %v7600_v1  ;;  %6857 = vmatprep.subr.bf16.mxu1 %v7600_v1  ;;  %v6792_v1 = vcombine.high %v7916_v37, %v1144_v46  ;;  %v8036_v56 = vld [vmem:[%s14264_s2 + $0x80] ss:$8 sps:$4 sm:$0xff]  }
 0x115   : > { %15021 = vst [vmem:[#allocation7_spill] sm:$0xff] %v8002_v13  ;;  %15022 = vst [vmem:[#allocation8_spill] sm:$0xff] %v8004_v0  ;;  %7075 = vset.pattern.permute.xlu1 %v7375_v32  ;;  %7076 = vset.pattern.permute.xlu0 %v7375_v32  ;;  %v6788_v32 = vcombine.low %v7879_v63, %v7898_v3  ;;  %v6783_v63 = vcombine.low %v7827_v50, %v7848_v14  ;;  %v7119_v0 = vld [vmem:[#allocation2 + $0x30] ss:$20 sps:$4 sm:$0xff]   ;;  %v8243_v13 = vld [vmem:[%s14264_s2 + $0xd4] ss:$8 sps:$4 sm:$0xff]  }
 0x116   : > { %3110 = vperm.xlu1 %7075, %v7703_v16   ;;  %3114 = vperm.xlu0 %7076, %v7708_v17  }
 0x117   : > { %1878 = vmatpush1.bf16.msra.mxu0 %v7602_v2  ;;  %6866 = vmatpush1.bf16.msra.mxu1 %v7602_v2  ;;  %v6791_v2 = vcombine.low %v7916_v37, %v1144_v46 }
 0x118   : > { %v8012_v20 = vpop.permute.xlu1 %1300  ;;  %v8014_v21 = vpop.permute.xlu0 %1305  ;;  %1879 = vmatprep.subr.bf16.mxu0 %v6752_v60  ;;  %6858 = vmatprep.subr.bf16.mxu1 %v6752_v60  ;;  %v15029_v60 = vmov 0  }
 0x119   : > { %15023 = vst [vmem:[#allocation9_spill] sm:$0xff] %v8012_v20  ;;  %15024 = vst [vmem:[#allocation10_spill] sm:$0xff] %v8014_v21  ;;  %v7118_v21 = vld [vmem:[#allocation2 + $0x60] ss:$20 sps:$4 sm:$0xff]  }
 0x11a   : > { %3118 = vperm.xlu1 %7075, %v7721_v28   ;;  %3126 = vperm.xlu0 %7076, %v7744_v44   ;;  %v7121_v20 = vld [vmem:[#allocation2 + $0x34] ss:$20 sps:$4 sm:$0xff]  }
 0x11b   : > { %1880 = vmatpush1.bf16.msra.mxu0 %v6751_v33  ;;  %6867 = vmatpush1.bf16.msra.mxu1 %v6751_v33  ;;  %v7101_v33 = vld [vmem:[#allocation2 + $0x128] ss:$20 sps:$4 sm:$0xff]  }
 0x11c   : > { %v8019_v23 = vpop.permute.xlu1 %1310  ;;  %v8021_v26 = vpop.permute.xlu0 %1315  ;;  %1895 = vmatprep.subr.bf16.mxu0 %v6792_v1  ;;  %6859 = vmatprep.subr.bf16.mxu1 %v6792_v1  ;;  %v6784_v1 = vcombine.high %v7827_v50, %v7848_v14  ;;  %v15034_v14 = vcombine.high %v7769_v55, %v7790_v12 }
 0x11d   : > { %15025 = vst [vmem:[#allocation11_spill] sm:$0xff] %v8019_v23  ;;  %15026 = vst [vmem:[#allocation12_spill] sm:$0xff] %v8021_v26  ;;  %v7110_v26 = vld [vmem:[#allocation2 + $0xb0] ss:$20 sps:$4 sm:$0xff]   ;;  %v15046_v23 = vcombine.high %v7621_v15, %v7634_v27 }
 0x11e   : > { %3122 = vperm.xlu1 %7075, %v7726_v29   ;;  %3134 = vperm.xlu0 %7076, %v7761_v53  }
 0x11f   : > { %1896 = vmatpush2.bf16.msra.mxu0 %v6791_v2  ;;  %6868 = vmatpush2.bf16.msra.mxu1 %v6791_v2  ;;  %v8054_v2 = vld [vmem:[%s14264_s2 + $0x14] ss:$8 sps:$4 sm:$0xff]  }
 0x120   : > { %v8038_v37 = vpop.permute.xlu1 %1320  ;;  %v8040_v46 = vpop.permute.xlu0 %1325  ;;  %2058 = vmatprep.subr.bf16.mxu1 %v6789_v6  ;;  %2251 = vmatprep.subr.bf16.mxu0 %v15029_v60  ;;  %v8059_v6 = vld [vmem:[%s14264_s2 + $0x94] ss:$8 sps:$4 sm:$0xff]  }
 0x121   : > { %15027 = vst [vmem:[#allocation13_spill] sm:$0xff] %v8038_v37  ;;  %15028 = vst [vmem:[#allocation14_spill] sm:$0xff] %v8040_v46  ;;  %v7102_v37 = vld [vmem:[#allocation2 + $0x100] ss:$20 sps:$4 sm:$0xff]  }
 0x122   : > { %3130 = vperm.xlu1 %7075, %v7749_v45   ;;  %3142 = vperm.xlu0 %7076, %v7779_v8  }
 0x123   : > { %1898 = vmatmul.mubr.bf16.vlgmr.msra.gmra.mxu0 %v8031_v22  ;;  %1978 = vmatmul.mubr.bf16.vlgmr.msra.gmra.mxu1 %v8036_v56 }
 0x124   : > { %v8061_v46 = vpop.permute.xlu1 %1330  ;;  %v8063_v3 = vpop.permute.xlu0 %1335  ;;  %2059 = vmatpush1.bf16.msra.mxu1 %v6788_v32  ;;  %2252 = vmatpush1.bf16.msra.mxu0 %v7101_v33  ;;  %v8077_v32 = vld [vmem:[%s14264_s2 + $0x10] ss:$8 sps:$4 sm:$0xff]  }
 0x125   : > { %15030 = vst [vmem:[#allocation15_spill] sm:$0xff] %v8061_v46  ;;  %15031 = vst [vmem:[#allocation16_spill] sm:$0xff] %v8063_v3  ;;  %2060 = vmatprep.subr.bf16.mxu1 %v6784_v1  ;;  %2253 = vmatprep.subr.bf16.mxu0 %v15029_v60  ;;  %v8082_v33 = vld [vmem:[%s14264_s2 + $0x90] ss:$8 sps:$4 sm:$0xff]   ;;  %v15038_v46 = vcombine.high %v7711_v18, %v7732_v31 }
 0x126   : > { %3138 = vperm.xlu1 %7075, %v7766_v54   ;;  %3150 = vperm.xlu0 %7076, %v7802_v24   ;;  %v7109_v3 = vld [vmem:[#allocation2 + $0xd8] ss:$20 sps:$4 sm:$0xff]  }
 0x127   : > { %6797 = vmatprep.mubr.msk.bf16.mxu0 %vm1816_vm0, %v8054_v2  ;;  %6805 = vmatprep.mubr.msk.bf16.mxu1 %vm1816_vm0, %v8059_v6 }
 0x128   : > { %v8084_v1 = vpop.permute.xlu1 %1340  ;;  %v8086_v50 = vpop.permute.xlu0 %1345  ;;  %2061 = vmatpush1.bf16.msra.mxu1 %v6783_v63  ;;  %2254 = vmatpush1.bf16.msra.mxu0 %v7102_v37  ;;  %v8099_v63 = vld [vmem:[%s14264_s2 + $0x24] ss:$8 sps:$4 sm:$0xff]  }
 0x129   : > { %15032 = vst [vmem:[#allocation17_spill] sm:$0xff] %v8084_v1  ;;  %15033 = vst [vmem:[#allocation18_spill] sm:$0xff] %v8086_v50  ;;  %2062 = vmatprep.subr.bf16.mxu1 %v15034_v14  ;;  %2255 = vmatprep.subr.bf16.mxu0 %v15029_v60  ;;  %v8104_v37 = vld [vmem:[%s14264_s2 + $0xa4] ss:$8 sps:$4 sm:$0xff]   ;;  %v15037_v1 = vcombine.low %v7769_v55, %v7790_v12  ;;  %v8126_v55 = vld [vmem:[%s14264_s2 + $0x20] ss:$8 sps:$4 sm:$0xff]  }
 0x12a   : > { %3146 = vperm.xlu1 %7075, %v7784_v10   ;;  %3158 = vperm.xlu0 %7076, %v7819_v48   ;;  %v8131_v12 = vld [vmem:[%s14264_s2 + $0xa0] ss:$8 sps:$4 sm:$0xff]  }
 0x12b   : > { %1908 = vmatmul.mubr.bf16.gmra.mxu0 %v8077_v32  ;;  %1988 = vmatmul.mubr.bf16.gmra.mxu1 %v8082_v33 }
 0x12c   : > { %v8106_v14 = vpop.permute.xlu1 %1350  ;;  %v8108_v50 = vpop.permute.xlu0 %1355  ;;  %2063 = vmatpush1.bf16.msra.mxu1 %v15037_v1  ;;  %2256 = vmatpush1.bf16.msra.mxu0 %v7109_v3  ;;  %v15041_v1 = vcombine.low %v7711_v18, %v7732_v31  ;;  %v8151_v18 = vld [vmem:[%s14264_s2 + $0x34] ss:$8 sps:$4 sm:$0xff]  }
 0x12d   : > { %15035 = vst [vmem:[#allocation19_spill] sm:$0xff] %v8106_v14  ;;  %15036 = vst [vmem:[#allocation20_spill] sm:$0xff] %v8108_v50  ;;  %2064 = vmatprep.subr.bf16.mxu1 %v15038_v46  ;;  %2257 = vmatprep.subr.bf16.mxu0 %v15029_v60  ;;  %v15042_v50 = vcombine.high %v7663_v47, %v7678_v59  ;;  %v7117_v14 = vld [vmem:[#allocation2 + $0x88] ss:$20 sps:$4 sm:$0xff]  }
 0x12e   : > { %3154 = vperm.xlu1 %7075, %v7807_v25   ;;  %3166 = vperm.xlu0 %7076, %v7837_v5   ;;  %v8156_v31 = vld [vmem:[%s14264_s2 + $0xb4] ss:$8 sps:$4 sm:$0xff]  }
 0x12f   : > { %6798 = vmatprep.mubr.msk.bf16.mxu0 %vm1816_vm0, %v8099_v63  ;;  %6806 = vmatprep.mubr.msk.bf16.mxu1 %vm1816_vm0, %v8104_v37 }
 0x130   : > { %v8133_v46 = vpop.permute.xlu1 %1360  ;;  %v8135_v3 = vpop.permute.xlu0 %1365  ;;  %2065 = vmatpush1.bf16.msra.mxu1 %v15041_v1  ;;  %2258 = vmatpush1.bf16.msra.mxu0 %v7110_v26  ;;  %v15045_v1 = vcombine.low %v7663_v47, %v7678_v59  ;;  %v8178_v47 = vld [vmem:[%s14264_s2 + $0x30] ss:$8 sps:$4 sm:$0xff]  }
 0x131   : > { %15039 = vst [vmem:[#allocation21_spill] sm:$0xff] %v8133_v46  ;;  %15040 = vst [vmem:[#allocation22_spill] sm:$0xff] %v8135_v3  ;;  %2066 = vmatprep.subr.bf16.mxu1 %v15042_v50  ;;  %2259 = vmatprep.subr.bf16.mxu0 %v15029_v60  ;;  %v8183_v59 = vld [vmem:[%s14264_s2 + $0xb0] ss:$8 sps:$4 sm:$0xff]   ;;  %v8316_v3 = vld [vmem:[%s14264_s2 + $0x74] ss:$8 sps:$4 sm:$0xff]  }
 0x132   : > { %3162 = vperm.xlu1 %7075, %v7824_v49   ;;  %3174 = vperm.xlu0 %7076, %v7856_v40  }
 0x133   : > { %1918 = vmatmul.mubr.bf16.gmra.mxu0 %v8126_v55  ;;  %1998 = vmatmul.mubr.bf16.gmra.mxu1 %v8131_v12 }
 0x134   : > { %v8158_v26 = vpop.permute.xlu1 %1370  ;;  %v8160_v50 = vpop.permute.xlu0 %1375  ;;  %2067 = vmatpush1.bf16.msra.mxu1 %v15045_v1  ;;  %2260 = vmatpush1.bf16.msra.mxu0 %v7117_v14  ;;  %v15049_v1 = vcombine.low %v7621_v15, %v7634_v27  ;;  %v8200_v15 = vld [vmem:[%s14264_s2 + $0x44] ss:$8 sps:$4 sm:$0xff]  }
 0x135   : > { %15043 = vst [vmem:[#allocation23_spill] sm:$0xff] %v8158_v26  ;;  %15044 = vst [vmem:[#allocation24_spill] sm:$0xff] %v8160_v50  ;;  %2068 = vmatprep.subr.bf16.mxu1 %v15046_v23  ;;  %2261 = vmatprep.subr.bf16.mxu0 %v15029_v60  ;;  %v7131_v50 = vld [vmem:[#allocation2 + $0xc] ss:$20 sps:$4 sm:$0xff]  }
 0x136   : > { %3170 = vperm.xlu1 %7075, %v7842_v7   ;;  %3182 = vperm.xlu0 %7076, %v7871_v61   ;;  %v7128_v26 = vld [vmem:[#allocation2 + $0x38] ss:$20 sps:$4 sm:$0xff]  }
 0x137   : > { %6799 = vmatprep.mubr.msk.bf16.mxu0 %vm1816_vm0, %v8151_v18  ;;  %6807 = vmatprep.mubr.msk.bf16.mxu1 %vm1816_vm0, %v8156_v31  ;;  %v8205_v27 = vld [vmem:[%s14264_s2 + $0xc4] ss:$8 sps:$4 sm:$0xff]  }
 0x138   : > { %v8185_v23 = vpop.permute.xlu1 %1380  ;;  %v8187_v14 = vpop.permute.xlu0 %1385  ;;  %2069 = vmatpush1.bf16.msra.mxu1 %v15049_v1  ;;  %2262 = vmatpush1.bf16.msra.mxu0 %v7118_v21  ;;  %v7129_v1 = vld [vmem:[#allocation2 + $0x8] ss:$20 sps:$4 sm:$0xff]  }
 0x139   : > { %15047 = vst [vmem:[#allocation25_spill] sm:$0xff] %v8185_v23  ;;  %15048 = vst [vmem:[#allocation26_spill] sm:$0xff] %v8187_v14  ;;  %2070 = vmatprep.subr.bf16.mxu1 %v7121_v20  ;;  %2263 = vmatprep.subr.bf16.mxu0 %v15029_v60  ;;  %v7132_v14 = vld [vmem:[#allocation2 + $0x10] ss:$20 sps:$4 sm:$0xff]   ;;  %v6794_v23 = vcombine.high %v7937_v43, %v7960_v11 }
 0x13a   : > { %3178 = vperm.xlu1 %7075, %v7861_v36   ;;  %3190 = vperm.xlu0 %7076, %v7889_v19  }
 0x13b   : > { %1928 = vmatmul.mubr.bf16.gmra.mxu0 %v8178_v47  ;;  %2008 = vmatmul.mubr.bf16.gmra.mxu1 %v8183_v59 }
 0x13c   : > { %v8207_v20 = vpop.permute.xlu1 %1390  ;;  %v8209_v21 = vpop.permute.xlu0 %1395  ;;  %2071 = vmatpush1.bf16.msra.mxu1 %v7119_v0  ;;  %2264 = vmatpush1.bf16.msra.mxu0 %v7128_v26  ;;  %v8223_v0 = vld [vmem:[%s14264_s2 + $0x40] ss:$8 sps:$4 sm:$0xff]  }
 0x13d   : > { %15050 = vst [vmem:[#allocation27_spill] sm:$0xff] %v8207_v20  ;;  %15051 = vst [vmem:[#allocation28_spill] sm:$0xff] %v8209_v21  ;;  %2072 = vmatprep.subr.bf16.mxu1 %v7131_v50  ;;  %2265 = vmatprep.subr.bf16.mxu0 %v15029_v60  ;;  %v8228_v26 = vld [vmem:[%s14264_s2 + $0xc0] ss:$8 sps:$4 sm:$0xff]   ;;  %v8238_v20 = vld [vmem:[%s14264_s2 + $0x54] ss:$8 sps:$4 sm:$0xff]  }
 0x13e   : > { %3186 = vperm.xlu1 %7075, %v7876_v62   ;;  %3198 = vperm.xlu0 %7076, %v7906_v51  }
 0x13f   : > { %6800 = vmatprep.mubr.msk.bf16.mxu0 %vm1816_vm0, %v8200_v15  ;;  %6808 = vmatprep.mubr.msk.bf16.mxu1 %vm1816_vm0, %v8205_v27 }
 0x140   : > { %v8230_v50 = vpop.permute.xlu1 %1400  ;;  %v8232_v21 = vpop.permute.xlu0 %1405  ;;  %2073 = vmatpush1.bf16.msra.mxu1 %v7129_v1  ;;  %2266 = vmatpush1.bf16.msra.mxu0 %v7132_v14  ;;  %v6793_v14 = vcombine.low %v7937_v43, %v7960_v11  ;;  %v8264_v43 = vld [vmem:[%s14264_s2 + $0x50] ss:$8 sps:$4 sm:$0xff]  }
 0x141   : > { %15052 = vst [vmem:[#allocation29_spill] sm:$0xff] %v8230_v50  ;;  %15053 = vst [vmem:[#allocation30_spill] sm:$0xff] %v8232_v21  ;;  %2088 = vmatprep.subr.bf16.mxu1 %v6794_v23  ;;  %2281 = vmatprep.subr.bf16.mxu0 %v15029_v60  ;;  %v7139_v23 = vld [vmem:[#allocation2 + $0x150] ss:$20 sps:$4 sm:$0xff]   ;;  %v8302_v21 = vld [vmem:[%s14264_s2 + $0x60] ss:$8 sps:$4 sm:$0xff]  }
 0x142   : > { %3194 = vperm.xlu1 %7075, %v7894_v57   ;;  %3206 = vperm.xlu0 %7076, %v7927_v42   ;;  %v8269_v11 = vld [vmem:[%s14264_s2 + $0xd0] ss:$8 sps:$4 sm:$0xff]  }
 0x143   : > { %1938 = vmatmul.mubr.bf16.gmra.mxu0 %v8223_v0  ;;  %2018 = vmatmul.mubr.bf16.gmra.mxu1 %v8228_v26 }
 0x144   : > { %v8251_v1 = vpop.permute.xlu1 %1410  ;;  %v8253_v60 = vpop.permute.xlu0 %1415  ;;  %2089 = vmatpush2.bf16.msra.mxu1 %v6793_v14  ;;  %2282 = vmatpush2.bf16.msra.mxu0 %v7139_v23 }
 0x145   : > { %15054 = vst [vmem:[#allocation31_spill] sm:$0xff] %v8251_v1  ;;  %15055 = vst [vmem:[#allocation32_spill] sm:$0xff] %v8253_v60  ;;  %6801 = vmatprep.mubr.msk.bf16.mxu0 %vm1816_vm0, %v8238_v20  ;;  %6809 = vmatprep.mubr.msk.bf16.mxu1 %vm1816_vm0, %v8243_v13  ;;  %v8278_v60 = vld [vmem:[%s14264_s2 + $0x64] ss:$8 sps:$4 sm:$0xff]  }
 0x146   : > { %3202 = vperm.xlu1 %7075, %v7911_v35   ;;  %3214 = vperm.xlu0 %7076, %v7949_v4   ;;  %v8283_v1 = vld [vmem:[%s14264_s2 + $0xe4] ss:$8 sps:$4 sm:$0xff]  }
 0x148   : > { %v8271_v14 = vpop.permute.xlu1 %1420  ;;  %v8273_v23 = vpop.permute.xlu0 %1425 }
 0x149   : > { %15056 = vst [vmem:[#allocation33_spill] sm:$0xff] %v8271_v14  ;;  %15057 = vst [vmem:[#allocation34_spill] sm:$0xff] %v8273_v23 }
 0x14a   : > { %3210 = vperm.xlu1 %7075, %v7932_v41   ;;  %3222 = vperm.xlu0 %7076, %v7969_v34  }
 0x14b   : > { %1948 = vmatmul.mubr.bf16.gmra.mxu0 %v8264_v43  ;;  %2028 = vmatmul.mubr.bf16.gmra.mxu1 %v8269_v11 }
 0x14c   : > { %v8289_v14 = vpop.permute.xlu1 %1430  ;;  %v8291_v23 = vpop.permute.xlu0 %1435  ;;  %6802 = vmatprep.mubr.msk.bf16.mxu0 %vm1816_vm0, %v8278_v60  ;;  %6810 = vmatprep.mubr.msk.bf16.mxu1 %vm1816_vm0, %v8283_v1 }
 0x14d   : > { %15058 = vst [vmem:[#allocation35_spill] sm:$0xff] %v8289_v14  ;;  %15059 = vst [vmem:[#allocation36_spill] sm:$0xff] %v8291_v23  ;;  %v8311_v23 = vld [vmem:[%s14264_s2 + $0xe0] ss:$8 sps:$4 sm:$0xff]  }
 0x14e   : > { %3218 = vperm.xlu1 %7075, %v7954_v38   ;;  %3230 = vperm.xlu0 %7076, %v7983_v9  }
 0x150   : > { %v8304_v50 = vpop.permute.xlu1 %2606  ;;  %v8306_v14 = vpop.permute.xlu0 %2611 }
 0x151   : > { %15060 = vst [vmem:[#allocation37_spill] sm:$0xff] %v8304_v50  ;;  %15061 = vst [vmem:[#allocation38_spill] sm:$0xff] %v8306_v14  ;;  %v7376_v50 = vmov 2  }
 0x152   : > { %3226 = vperm.xlu1 %7075, %v7974_v52   ;;  %7077 = vset.pattern.permute.xlu0 %v7376_v50 }
 0x153   : > { %3583 = vperm.xlu0 %7077, %v7703_v16   ;;  %1958 = vmatmul.mubr.bf16.gmra.mxu0 %v8302_v21 }
 0x154   : > { %v8326_v14 = vpop.permute.xlu1 %2616  ;;  %v8328_v46 = vpop.permute.xlu0 %2621  ;;  %2038 = vmatmul.mubr.bf16.gmra.mxu1 %v8311_v23  ;;  %6803 = vmatprep.mubr.msk.bf16.mxu0 %vm1816_vm0, %v8316_v3 }
 0x155   : > { %15062 = vst [vmem:[#allocation39_spill] sm:$0xff] %v8326_v14  ;;  %15063 = vst [vmem:[#allocation40_spill] sm:$0xff] %v8328_v46  ;;  %6811 = vmatprep.mubr.msk.bf16.mxu1 %vm1816_vm0, %v8321_v39  ;;  %v8344_v46 = vld [vmem:[%s14264_s2 + $0x70] ss:$8 sps:$4 sm:$0xff]  }
 0x156   : > { %3234 = vperm.xlu1 %7075, %v7988_v30   ;;  %v8349_v14 = vld [vmem:[%s14264_s2 + $0xf0] ss:$8 sps:$4 sm:$0xff]  }
 0x157   : > { %3595 = vperm.xlu0 %7077, %v7726_v29  }
 0x158   : > { %v8337_v58 = vpop.permute.xlu1 %2626  ;;  %v8339_v16 = vpop.permute.xlu0 %2631 }
 0x159   : > { %15064 = vst [vmem:[#allocation41_spill] sm:$0xff] %v8337_v58  ;;  %15065 = vst [vmem:[#allocation42_spill] sm:$0xff] %v8339_v16  ;;  %v7159_v16 = vld [vmem:[%s14264_s2 + $0x4] ss:$8 sps:$4 sm:$0xff]  }
 0x15a   : > { %7078 = vset.pattern.permute.xlu1 %v7376_v50 }
 0x15b   : > { %3587 = vperm.xlu1 %7078, %v7708_v17   ;;  %3603 = vperm.xlu0 %7077, %v7749_v45  }
 0x15c   : > { %v8353_v29 = vpop.permute.xlu1 %2636  ;;  %v8355_v58 = vpop.permute.xlu0 %2641  ;;  %1968 = vmatmul.mubr.bf16.gmra.mxu0 %v8344_v46  ;;  %2048 = vmatmul.mubr.bf16.gmra.mxu1 %v8349_v14 }
 0x15d   : > { %15066 = vst [vmem:[#allocation43_spill] sm:$0xff] %v8353_v29  ;;  %15067 = vst [vmem:[#allocation44_spill] sm:$0xff] %v8355_v58  ;;  %6812 = vmatprep.mubr.msk.bf16.mxu1 %vm1816_vm0, %v7159_v16  ;;  %6828 = vmatprep.mubr.msk.bf16.mxu0 %vm1816_vm0, %v7159_v16 }
 0x15f   : > { %3591 = vperm.xlu1 %7078, %v7721_v28   ;;  %3611 = vperm.xlu0 %7077, %v7766_v54  }
 0x160   : > { %v8366_v17 = vpop.permute.xlu1 %2646  ;;  %v8368_v45 = vpop.permute.xlu0 %2651 }
 0x161   : > { %15068 = vst [vmem:[#allocation45_spill] sm:$0xff] %v8366_v17  ;;  %15069 = vst [vmem:[#allocation46_spill] sm:$0xff] %v8368_v45 }
 0x163   : > { %3599 = vperm.xlu1 %7078, %v7744_v44   ;;  %3619 = vperm.xlu0 %7077, %v7784_v10  }
 0x164   : > { %v8372_v50 = vpop.permute.xlu1 %2656  ;;  %v8374_v58 = vpop.permute.xlu0 %2661  ;;  %2091 = vmatmul.mubr.bf16.vlgmr.msra.gmra.mxu1 %v8031_v22  ;;  %2284 = vmatmul.mubr.bf16.vlgmr.msra.gmra.mxu0 %v8031_v22 }
 0x165   : > { %15070 = vst [vmem:[#allocation47_spill] sm:$0xff] %v8372_v50  ;;  %15071 = vst [vmem:[#allocation48_spill] sm:$0xff] %v8374_v58  ;;  %6813 = vmatprep.mubr.msk.bf16.mxu1 %vm1816_vm0, %v8054_v2  ;;  %6829 = vmatprep.mubr.msk.bf16.mxu0 %vm1816_vm0, %v8054_v2 }
 0x167   : > { %3607 = vperm.xlu1 %7078, %v7761_v53   ;;  %3627 = vperm.xlu0 %7077, %v7807_v25  }
 0x168   : > { %v8384_v28 = vpop.permute.xlu1 %2666  ;;  %v8386_v44 = vpop.permute.xlu0 %2671 }
 0x169   : > { %15072 = vst [vmem:[#allocation49_spill] sm:$0xff] %v8384_v28  ;;  %15073 = vst [vmem:[#allocation50_spill] sm:$0xff] %v8386_v44 }
 0x16b   : > { %3615 = vperm.xlu1 %7078, %v7779_v8   ;;  %3635 = vperm.xlu0 %7077, %v7824_v49  }
 0x16c   : > { %v8390_v54 = vpop.permute.xlu1 %2676  ;;  %v8392_v10 = vpop.permute.xlu0 %2681  ;;  %2101 = vmatmul.mubr.bf16.gmra.mxu1 %v8077_v32  ;;  %2292 = vmatmul.mubr.bf16.gmra.mxu0 %v8077_v32 }
 0x16d   : > { %15074 = vst [vmem:[#allocation51_spill] sm:$0xff] %v8390_v54  ;;  %15075 = vst [vmem:[#allocation52_spill] sm:$0xff] %v8392_v10  ;;  %6814 = vmatprep.mubr.msk.bf16.mxu1 %vm1816_vm0, %v8099_v63  ;;  %6830 = vmatprep.mubr.msk.bf16.mxu0 %vm1816_vm0, %v8099_v63 }
 0x16f   : > { %3623 = vperm.xlu1 %7078, %v7802_v24   ;;  %3643 = vperm.xlu0 %7077, %v7842_v7  }
 0x170   : > { %v8402_v22 = vpop.permute.xlu1 %2686  ;;  %v8404_v2 = vpop.permute.xlu0 %2691 }
 0x171   : > { %15076 = vst [vmem:[#allocation53_spill] sm:$0xff] %v8402_v22  ;;  %15077 = vst [vmem:[#allocation54_spill] sm:$0xff] %v8404_v2 }
 0x173   : > { %3631 = vperm.xlu1 %7078, %v7819_v48   ;;  %3651 = vperm.xlu0 %7077, %v7861_v36  }
 0x174   : > { %v8408_v16 = vpop.permute.xlu1 %2696  ;;  %v8410_v32 = vpop.permute.xlu0 %2701  ;;  %2111 = vmatmul.mubr.bf16.gmra.mxu1 %v8126_v55  ;;  %2300 = vmatmul.mubr.bf16.gmra.mxu0 %v8126_v55 }
 0x175   : > { %15078 = vst [vmem:[#allocation55_spill] sm:$0xff] %v8408_v16  ;;  %15079 = vst [vmem:[#allocation56_spill] sm:$0xff] %v8410_v32  ;;  %6815 = vmatprep.mubr.msk.bf16.mxu1 %vm1816_vm0, %v8151_v18  ;;  %6831 = vmatprep.mubr.msk.bf16.mxu0 %vm1816_vm0, %v8151_v18 }
 0x177   : > { %3639 = vperm.xlu1 %7078, %v7837_v5   ;;  %3659 = vperm.xlu0 %7077, %v7876_v62  }
 0x178   : > { %v8420_v63 = vpop.permute.xlu1 %2706  ;;  %v8422_v10 = vpop.permute.xlu0 %2711 }
 0x179   : > { %15080 = vst [vmem:[#allocation57_spill] sm:$0xff] %v8420_v63  ;;  %15081 = vst [vmem:[#allocation58_spill] sm:$0xff] %v8422_v10 }
 0x17b   : > { %3647 = vperm.xlu1 %7078, %v7856_v40   ;;  %3667 = vperm.xlu0 %7077, %v7894_v57  }
 0x17c   : > { %v8426_v54 = vpop.permute.xlu1 %2716  ;;  %v8428_v55 = vpop.permute.xlu0 %2721  ;;  %2121 = vmatmul.mubr.bf16.gmra.mxu1 %v8178_v47  ;;  %2308 = vmatmul.mubr.bf16.gmra.mxu0 %v8178_v47 }
 0x17d   : > { %15082 = vst [vmem:[#allocation59_spill] sm:$0xff] %v8426_v54  ;;  %15083 = vst [vmem:[#allocation60_spill] sm:$0xff] %v8428_v55  ;;  %6816 = vmatprep.mubr.msk.bf16.mxu1 %vm1816_vm0, %v8200_v15  ;;  %6832 = vmatprep.mubr.msk.bf16.mxu0 %vm1816_vm0, %v8200_v15 }
 0x17f   : > { %3655 = vperm.xlu1 %7078, %v7871_v61   ;;  %3675 = vperm.xlu0 %7077, %v7911_v35  }
 0x180   : > { %v8438_v18 = vpop.permute.xlu1 %2726  ;;  %v8440_v44 = vpop.permute.xlu0 %2731 }
 0x181   : > { %15084 = vst [vmem:[#allocation61_spill] sm:$0xff] %v8438_v18  ;;  %15085 = vst [vmem:[#allocation62_spill] sm:$0xff] %v8440_v44  ;;  %v8538_v18 = vld [vmem:[%s14266_s4 + $0x18] sm:$0xff] }
 0x182   : > { %15104 = vst [vmem:[#allocation81_spill] sm:$0xff] %v8538_v18 }
 0x183   : > { %3663 = vperm.xlu1 %7078, %v7889_v19   ;;  %3683 = vperm.xlu0 %7077, %v7932_v41  }
 0x184   : > { %v8444_v28 = vpop.permute.xlu1 %2736  ;;  %v8446_v47 = vpop.permute.xlu0 %2741  ;;  %2131 = vmatmul.mubr.bf16.gmra.mxu1 %v8223_v0  ;;  %2316 = vmatmul.mubr.bf16.gmra.mxu0 %v8223_v0 }
 0x185   : > { %15086 = vst [vmem:[#allocation63_spill] sm:$0xff] %v8444_v28  ;;  %15087 = vst [vmem:[#allocation64_spill] sm:$0xff] %v8446_v47  ;;  %6817 = vmatprep.mubr.msk.bf16.mxu1 %vm1816_vm0, %v8238_v20  ;;  %6833 = vmatprep.mubr.msk.bf16.mxu0 %vm1816_vm0, %v8238_v20 }
 0x187   : > { %3671 = vperm.xlu1 %7078, %v7906_v51   ;;  %3691 = vperm.xlu0 %7077, %v7954_v38  }
 0x188   : > { %v8456_v15 = vpop.permute.xlu1 %2746  ;;  %v8458_v58 = vpop.permute.xlu0 %2751 }
 0x189   : > { %15088 = vst [vmem:[#allocation65_spill] sm:$0xff] %v8456_v15  ;;  %15089 = vst [vmem:[#allocation66_spill] sm:$0xff] %v8458_v58  ;;  %v8499_v15 = vld [vmem:[%s14266_s4 + $0x20] sm:$0xff] }
 0x18b   : > { %3679 = vperm.xlu1 %7078, %v7927_v42   ;;  %3699 = vperm.xlu0 %7077, %v7974_v52  }
 0x18c   : > { %v8462_v47 = vpop.permute.xlu1 %2756  ;;  %v8464_v0 = vpop.permute.xlu0 %2761  ;;  %2141 = vmatmul.mubr.bf16.gmra.mxu1 %v8264_v43  ;;  %2324 = vmatmul.mubr.bf16.gmra.mxu0 %v8264_v43  ;;  %v8482_v43 = vld [vmem:[%s14266_s4 + $0x8] sm:$0xff] }
 0x18d   : > { %15090 = vst [vmem:[#allocation67_spill] sm:$0xff] %v8462_v47  ;;  %15091 = vst [vmem:[#allocation68_spill] sm:$0xff] %v8464_v0  ;;  %6818 = vmatprep.mubr.msk.bf16.mxu1 %vm1816_vm0, %v8278_v60  ;;  %6834 = vmatprep.mubr.msk.bf16.mxu0 %vm1816_vm0, %v8278_v60  ;;  %v7377_v0 = vmov 3  }
 0x18f   : > { %3687 = vperm.xlu1 %7078, %v7949_v4   ;;  %3707 = vperm.xlu0 %7077, %v7988_v30  }
 0x191   : > { %v8474_v20 = vpop.permute.xlu1 %3110  ;;  %v8476_v58 = vpop.permute.xlu0 %3114 }
 0x192   : > { %15092 = vst [vmem:[#allocation69_spill] sm:$0xff] %v8474_v20  ;;  %15093 = vst [vmem:[#allocation70_spill] sm:$0xff] %v8476_v58 }
 0x193   : > { %3695 = vperm.xlu1 %7078, %v7969_v34   ;;  %7080 = vset.pattern.permute.xlu0 %v7377_v0 }
 0x194   : > { %4060 = vperm.xlu0 %7080, %v8482_v43   ;;  %2151 = vmatmul.mubr.bf16.gmra.mxu1 %v8302_v21 }
 0x195   : > { %v8486_v60 = vpop.permute.xlu1 %3118  ;;  %v8488_v47 = vpop.permute.xlu0 %3126  ;;  %2332 = vmatmul.mubr.bf16.gmra.mxu0 %v8302_v21  ;;  %6819 = vmatprep.mubr.msk.bf16.mxu1 %vm1816_vm0, %v8316_v3  ;;  %v8509_v21 = vld [vmem:[%s14266_s4] sm:$0xff] }
 0x196   : > { %15094 = vst [vmem:[#allocation71_spill] sm:$0xff] %v8486_v60  ;;  %15095 = vst [vmem:[#allocation72_spill] sm:$0xff] %v8488_v47  ;;  %6835 = vmatprep.mubr.msk.bf16.mxu0 %vm1816_vm0, %v8316_v3 }
 0x197   : > { %3703 = vperm.xlu1 %7078, %v7983_v9   ;;  %15098 = vst [vmem:[#allocation75_spill] sm:$0xff] %v8509_v21 }
 0x198   : > { %4072 = vperm.xlu0 %7080, %v8499_v15  }
 0x199   : > { %v8502_v28 = vpop.permute.xlu1 %3122  ;;  %v8504_v44 = vpop.permute.xlu0 %3134 }
 0x19a   : > { %15096 = vst [vmem:[#allocation73_spill] sm:$0xff] %v8502_v28  ;;  %15097 = vst [vmem:[#allocation74_spill] sm:$0xff] %v8504_v44 }
 0x19b   : > { %7079 = vset.pattern.permute.xlu1 %v7377_v0  ;;  %v7163_v0 = vld [vmem:[%s14264_s2 + $0x84] ss:$8 sps:$4 sm:$0xff]  }
 0x19c   : > { %4056 = vperm.xlu1 %7079, %v8509_v21   ;;  %4080 = vperm.xlu0 %7080, %v7761_v53   ;;  %v8527_v53 = vld [vmem:[%s14266_s4 + $0x10] sm:$0xff] }
 0x19d   : > { %v8513_v3 = vpop.permute.xlu1 %3130  ;;  %v8515_v50 = vpop.permute.xlu0 %3142  ;;  %2161 = vmatmul.mubr.bf16.gmra.mxu1 %v8344_v46  ;;  %2340 = vmatmul.mubr.bf16.gmra.mxu0 %v8344_v46  ;;  %15101 = vst [vmem:[#allocation78_spill] sm:$0xff] %v8527_v53 }
 0x19e   : > { %15099 = vst [vmem:[#allocation76_spill] sm:$0xff] %v8513_v3  ;;  %15100 = vst [vmem:[#allocation77_spill] sm:$0xff] %v8515_v50  ;;  %6820 = vmatprep.mubr.msk.bf16.mxu1 %vm1816_vm0, %v7163_v0  ;;  %6836 = vmatprep.mubr.msk.bf16.mxu0 %vm1816_vm0, %v7163_v0 }
 0x1a0   : > { %4064 = vperm.xlu1 %7079, %v8527_v53   ;;  %4088 = vperm.xlu0 %7080, %v7779_v8   ;;  %v8555_v8 = vld [vmem:[%s14266_s4 + $0x28] sm:$0xff] }
 0x1a1   : > { %v8531_v45 = vpop.permute.xlu1 %3138  ;;  %v8533_v46 = vpop.permute.xlu0 %3150  ;;  %15107 = vst [vmem:[#allocation84_spill] sm:$0xff] %v8555_v8 }
 0x1a2   : > { %15102 = vst [vmem:[#allocation79_spill] sm:$0xff] %v8531_v45  ;;  %15103 = vst [vmem:[#allocation80_spill] sm:$0xff] %v8533_v46 }
 0x1a4   : > { %4068 = vperm.xlu1 %7079, %v8538_v18   ;;  %4096 = vperm.xlu0 %7080, %v7802_v24  }
 0x1a5   : > { %v8542_v0 = vpop.permute.xlu1 %3146  ;;  %v8544_v55 = vpop.permute.xlu0 %3158  ;;  %2171 = vmatmul.mubr.bf16.gmra.mxu1 %v8036_v56  ;;  %2348 = vmatmul.mubr.bf16.gmra.mxu0 %v8036_v56  ;;  %v8566_v56 = vld [vmem:[%s14266_s4 + $0x38] sm:$0xff] }
 0x1a6   : > { %15105 = vst [vmem:[#allocation82_spill] sm:$0xff] %v8542_v0  ;;  %15106 = vst [vmem:[#allocation83_spill] sm:$0xff] %v8544_v55  ;;  %6821 = vmatprep.mubr.msk.bf16.mxu1 %vm1816_vm0, %v8059_v6  ;;  %6837 = vmatprep.mubr.msk.bf16.mxu0 %vm1816_vm0, %v8059_v6  ;;  %v15160_v0 = vld [vmem:[#allocation7_spill] sm:$0xff] }
 0x1a7   : > { %15110 = vst [vmem:[#allocation87_spill] sm:$0xff] %v8566_v56 }
 0x1a8   : > { %4076 = vperm.xlu1 %7079, %v8555_v8   ;;  %4104 = vperm.xlu0 %7080, %v7819_v48   ;;  %v8583_v48 = vld [vmem:[%s14266_s4 + $0x48] sm:$0xff] }
 0x1a9   : > { %v8559_v24 = vpop.permute.xlu1 %3154  ;;  %v8561_v55 = vpop.permute.xlu0 %3166 }
 0x1aa   : > { %15108 = vst [vmem:[#allocation85_spill] sm:$0xff] %v8559_v24  ;;  %15109 = vst [vmem:[#allocation86_spill] sm:$0xff] %v8561_v55 }
 0x1ac   : > { %4084 = vperm.xlu1 %7079, %v8566_v56   ;;  %4112 = vperm.xlu0 %7080, %v7837_v5  }
 0x1ad   : > { %v8570_v6 = vpop.permute.xlu1 %3162  ;;  %v8572_v46 = vpop.permute.xlu0 %3174  ;;  %2181 = vmatmul.mubr.bf16.gmra.mxu1 %v8082_v33  ;;  %2356 = vmatmul.mubr.bf16.gmra.mxu0 %v8082_v33 }
 0x1ae   : > { %15111 = vst [vmem:[#allocation88_spill] sm:$0xff] %v8570_v6  ;;  %15112 = vst [vmem:[#allocation89_spill] sm:$0xff] %v8572_v46  ;;  %6822 = vmatprep.mubr.msk.bf16.mxu1 %vm1816_vm0, %v8104_v37  ;;  %6838 = vmatprep.mubr.msk.bf16.mxu0 %vm1816_vm0, %v8104_v37  ;;  %v8715_v6 = vld [vmem:[%s14266_s4 + $0x68] sm:$0xff] }
 0x1af   : > { %15145 = vst [vmem:[#allocation120_spill] sm:$0xff] %v8715_v6 }
 0x1b0   : > { %4092 = vperm.xlu1 %7079, %v8583_v48   ;;  %4120 = vperm.xlu0 %7080, %v7856_v40  }
 0x1b1   : > { %v8587_v5 = vpop.permute.xlu1 %3170  ;;  %v8589_v55 = vpop.permute.xlu0 %3182 }
 0x1b2   : > { %15113 = vst [vmem:[#allocation90_spill] sm:$0xff] %v8587_v5  ;;  %15114 = vst [vmem:[#allocation91_spill] sm:$0xff] %v8589_v55 }
 0x1b4   : > { %4100 = vperm.xlu1 %7079, %v7807_v25   ;;  %4128 = vperm.xlu0 %7080, %v7871_v61  }
 0x1b5   : > { %v8593_v33 = vpop.permute.xlu1 %3178  ;;  %v8595_v37 = vpop.permute.xlu0 %3190  ;;  %2191 = vmatmul.mubr.bf16.gmra.mxu1 %v8131_v12  ;;  %2364 = vmatmul.mubr.bf16.gmra.mxu0 %v8131_v12 }
 0x1b6   : > { %15115 = vst [vmem:[#allocation92_spill] sm:$0xff] %v8593_v33  ;;  %15116 = vst [vmem:[#allocation93_spill] sm:$0xff] %v8595_v37  ;;  %6823 = vmatprep.mubr.msk.bf16.mxu1 %vm1816_vm0, %v8156_v31  ;;  %6839 = vmatprep.mubr.msk.bf16.mxu0 %vm1816_vm0, %v8156_v31 }
 0x1b8   : > { %4108 = vperm.xlu1 %7079, %v7824_v49   ;;  %4136 = vperm.xlu0 %7080, %v7889_v19  }
 0x1b9   : > { %v8605_v25 = vpop.permute.xlu1 %3186  ;;  %v8607_v40 = vpop.permute.xlu0 %3198 }
 0x1ba   : > { %15117 = vst [vmem:[#allocation94_spill] sm:$0xff] %v8605_v25  ;;  %15118 = vst [vmem:[#allocation95_spill] sm:$0xff] %v8607_v40 }
 0x1bc   : > { %4116 = vperm.xlu1 %7079, %v7842_v7   ;;  %4144 = vperm.xlu0 %7080, %v7906_v51  }
 0x1bd   : > { %v8611_v61 = vpop.permute.xlu1 %3194  ;;  %v8613_v12 = vpop.permute.xlu0 %3206  ;;  %2201 = vmatmul.mubr.bf16.gmra.mxu1 %v8183_v59  ;;  %2372 = vmatmul.mubr.bf16.gmra.mxu0 %v8183_v59 }
 0x1be   : > { %15119 = vst [vmem:[#allocation96_spill] sm:$0xff] %v8611_v61  ;;  %15120 = vst [vmem:[#allocation97_spill] sm:$0xff] %v8613_v12  ;;  %6824 = vmatprep.mubr.msk.bf16.mxu1 %vm1816_vm0, %v8205_v27  ;;  %6840 = vmatprep.mubr.msk.bf16.mxu0 %vm1816_vm0, %v8205_v27 }
 0x1c0   : > { %4124 = vperm.xlu1 %7079, %v7861_v36   ;;  %4152 = vperm.xlu0 %7080, %v7927_v42  }
 0x1c1   : > { %v8623_v49 = vpop.permute.xlu1 %3202  ;;  %v8625_v7 = vpop.permute.xlu0 %3214 }
 0x1c2   : > { %15121 = vst [vmem:[#allocation98_spill] sm:$0xff] %v8623_v49  ;;  %15122 = vst [vmem:[#allocation99_spill] sm:$0xff] %v8625_v7 }
 0x1c4   : > { %4132 = vperm.xlu1 %7079, %v7876_v62   ;;  %4160 = vperm.xlu0 %7080, %v7949_v4  }
 0x1c5   : > { %v8629_v19 = vpop.permute.xlu1 %3210  ;;  %v8631_v51 = vpop.permute.xlu0 %3222  ;;  %2211 = vmatmul.mubr.bf16.gmra.mxu1 %v8228_v26  ;;  %2380 = vmatmul.mubr.bf16.gmra.mxu0 %v8228_v26  ;;  %v15139_v26 = vld [vmem:[#allocation6_spill] sm:$0xff] }
 0x1c6   : > { %15123 = vst [vmem:[#allocation100_spill] sm:$0xff] %v8629_v19  ;;  %15124 = vst [vmem:[#allocation101_spill] sm:$0xff] %v8631_v51  ;;  %6825 = vmatprep.mubr.msk.bf16.mxu1 %vm1816_vm0, %v8243_v13  ;;  %6841 = vmatprep.mubr.msk.bf16.mxu0 %vm1816_vm0, %v8243_v13 }
 0x1c8   : > { %4140 = vperm.xlu1 %7079, %v7894_v57   ;;  %4168 = vperm.xlu0 %7080, %v7969_v34   ;;  %v7378_v57 = vmov 4  }
 0x1c9   : > { %v8641_v36 = vpop.permute.xlu1 %3218  ;;  %v8643_v62 = vpop.permute.xlu0 %3230 }
 0x1ca   : > { %15125 = vst [vmem:[#allocation102_spill] sm:$0xff] %v8641_v36  ;;  %15126 = vst [vmem:[#allocation103_spill] sm:$0xff] %v8643_v62  ;;  %v15143_v62 = vld [vmem:[#allocation21_spill] sm:$0xff] }
 0x1cc   : > { %4148 = vperm.xlu1 %7079, %v7911_v35   ;;  %4176 = vperm.xlu0 %7080, %v7983_v9  }
 0x1cd   : > { %v8647_v42 = vpop.permute.xlu1 %3226  ;;  %2221 = vmatmul.mubr.bf16.gmra.mxu1 %v8269_v11  ;;  %2388 = vmatmul.mubr.bf16.gmra.mxu0 %v8269_v11  ;;  %v8700_v11 = vld [vmem:[%s14266_s4 + $0x58] sm:$0xff] }
 0x1ce   : > { %15127 = vst [vmem:[#allocation104_spill] sm:$0xff] %v8647_v42  ;;  %v8651_v4 = vpop.permute.xlu0 %3583  ;;  %6826 = vmatprep.mubr.msk.bf16.mxu1 %vm1816_vm0, %v8283_v1  ;;  %6842 = vmatprep.mubr.msk.bf16.mxu0 %vm1816_vm0, %v8283_v1  ;;  %15140 = vst [vmem:[#allocation116_spill] sm:$0xff] %v8700_v11 }
 0x1cf   : > { %15128 = vst [vmem:[#allocation105_spill] sm:$0xff] %v8651_v4 }
 0x1d0   : > { %4156 = vperm.xlu1 %7079, %v7932_v41   ;;  %7081 = vset.pattern.permute.xlu0 %v7378_v57 }
 0x1d1   : > { %v8658_v35 = vpop.permute.xlu1 %3234  ;;  %4529 = vperm.xlu0 %7081, %v8509_v21  }
 0x1d2   : > { %15129 = vst [vmem:[#allocation106_spill] sm:$0xff] %v8658_v35  ;;  %v8661_v34 = vpop.permute.xlu0 %3595 }
 0x1d3   : > { %15130 = vst [vmem:[#allocation107_spill] sm:$0xff] %v8661_v34 }
 0x1d4   : > { %4164 = vperm.xlu1 %7079, %v7954_v38  }
 0x1d5   : > { %4541 = vperm.xlu0 %7081, %v8538_v18   ;;  %2231 = vmatmul.mubr.bf16.gmra.mxu1 %v8311_v23  ;;  %v15159_v18 = vld [vmem:[#allocation38_spill] sm:$0xff] }
 0x1d6   : > { %v8666_v9 = vpop.permute.xlu1 %3587  ;;  %v8668_v13 = vpop.permute.xlu0 %3603  ;;  %2396 = vmatmul.mubr.bf16.gmra.mxu0 %v8311_v23  ;;  %6827 = vmatprep.mubr.msk.bf16.mxu1 %vm1816_vm0, %v8321_v39 }
 0x1d7   : > { %15131 = vst [vmem:[#allocation108_spill] sm:$0xff] %v8666_v9  ;;  %15132 = vst [vmem:[#allocation109_spill] sm:$0xff] %v8668_v13  ;;  %6843 = vmatprep.mubr.msk.bf16.mxu0 %vm1816_vm0, %v8321_v39 }
 0x1d8   : > { %4172 = vperm.xlu1 %7079, %v7974_v52  }
 0x1d9   : > { %4549 = vperm.xlu0 %7081, %v8555_v8  }
 0x1da   : > { %v8677_v41 = vpop.permute.xlu1 %3591  ;;  %v8679_v38 = vpop.permute.xlu0 %3611 }
 0x1db   : > { %15133 = vst [vmem:[#allocation110_spill] sm:$0xff] %v8677_v41  ;;  %15134 = vst [vmem:[#allocation111_spill] sm:$0xff] %v8679_v38 }
 0x1dc   : > { %4180 = vperm.xlu1 %7079, %v7988_v30  }
 0x1dd   : > { %4557 = vperm.xlu0 %7081, %v8566_v56   ;;  %2241 = vmatmul.mubr.bf16.gmra.mxu1 %v8349_v14 }
 0x1de   : > { %v8684_v31 = vpop.permute.xlu1 %3599  ;;  %v8686_v59 = vpop.permute.xlu0 %3619  ;;  %2404 = vmatmul.mubr.bf16.gmra.mxu0 %v8349_v14 }
 0x1df   : > { %15135 = vst [vmem:[#allocation112_spill] sm:$0xff] %v8684_v31  ;;  %15136 = vst [vmem:[#allocation113_spill] sm:$0xff] %v8686_v59 }
 0x1e0   : > { %7082 = vset.pattern.permute.xlu1 %v7378_v57 }
 0x1e1   : > { %4533 = vperm.xlu1 %7082, %v8482_v43   ;;  %4565 = vperm.xlu0 %7081, %v8583_v48  }
 0x1e2   : > { %v8691_v52 = vpop.permute.xlu1 %3607  ;;  %v8693_v39 = vpop.permute.xlu0 %3627 }
 0x1e3   : > { %15137 = vst [vmem:[#allocation114_spill] sm:$0xff] %v8691_v52  ;;  %15138 = vst [vmem:[#allocation115_spill] sm:$0xff] %v8693_v39  ;;  %v1899_v30 = vpop.f32.mrf.mxu0  ;;  %v1979_v27 = vpop.f32.mrf.mxu1 }
 0x1e4   : > { %v1900_v1 = vadd.f32 %v1899_v30, %v15139_v26  ;;  %v1980_v5 = vadd.f32 %v1979_v27, %v15143_v62 }
 0x1e5   : > { %4537 = vperm.xlu1 %7082, %v8527_v53   ;;  %4573 = vperm.xlu0 %7081, %v8700_v11   ;;  %v1901_v14 = vpop.f32.mrf.mxu0  ;;  %v1981_v23 = vpop.f32.mrf.mxu1 }
 0x1e6   : > { %v8703_v48 = vpop.permute.xlu1 %3615  ;;  %v8705_v57 = vpop.permute.xlu0 %3635  ;;  %v1902_v35 = vadd.f32 %v1901_v14, %v15139_v26  ;;  %v8709_v51 = vmax.f32 %v1900_v1, 0.0  ;;  %v15147_v14 = vld [vmem:[#allocation5_spill] sm:$0xff]  ;;  %v8727_v39 = vmax.f32 %v1980_v5, 0.0 }
 0x1e7   : > { %15141 = vst [vmem:[#allocation117_spill] sm:$0xff] %v8703_v48  ;;  %15142 = vst [vmem:[#allocation118_spill] sm:$0xff] %v8705_v57  ;;  %v1903_v30 = vpop.f32.mrf.mxu0  ;;  %v1983_v42 = vpop.f32.mrf.mxu1  ;;  %v1982_v57 = vadd.f32 %v1981_v23, %v15143_v62 }
 0x1e8   : > { %15144 = vst [vmem:[#allocation119_spill] sm:$0xff] %v8709_v51  ;;  %v8718_v11 = vmax.f32 %v1902_v35, 0.0  ;;  %v1904_v26 = vadd.f32 %v1903_v30, %v15147_v14  ;;  %15150 = vst [vmem:[#allocation124_spill] sm:$0xff] %v8727_v39  ;;  %v3237_v23 = vmul.f32 %v8474_v20, %v8709_v51  ;;  %v3710_v19 = vmul.f32 %v8651_v4, %v8709_v51 }
 0x1e9   : > { %4545 = vperm.xlu1 %7082, %v8499_v15   ;;  %4581 = vperm.xlu0 %7081, %v8715_v6   ;;  %v1905_v27 = vpop.f32.mrf.mxu0  ;;  %v1985_v36 = vpop.f32.mrf.mxu1  ;;  %v15151_v6 = vld [vmem:[#allocation37_spill] sm:$0xff]  ;;  %v8741_v5 = vmax.f32 %v1982_v57, 0.0 }
 0x1ea   : > { %15146 = vst [vmem:[#allocation121_spill] sm:$0xff] %v8718_v11  ;;  %v8722_v7 = vpop.permute.xlu1 %3623  ;;  %v8724_v1 = vpop.permute.xlu0 %3643  ;;  %v1906_v56 = vadd.f32 %v1905_v27, %v15147_v14  ;;  %v2764_v35 = vmul.f32 %v15151_v6, %v8709_v51  ;;  %v8733_v62 = vmax.f32 %v1904_v26, 0.0  ;;  %v2765_v27 = vmul.f32 %v15151_v6, %v8718_v11  ;;  %v8746_v14 = vld [vmem:[%s14266_s4 + $0x30] sm:$0xff] }
 0x1eb   : > { %15148 = vst [vmem:[#allocation122_spill] sm:$0xff] %v8722_v7  ;;  %15149 = vst [vmem:[#allocation123_spill] sm:$0xff] %v8724_v1  ;;  %v1909_v24 = vpop.f32.mrf.mxu0  ;;  %v1989_v8 = vpop.f32.mrf.mxu1  ;;  %v15157_v26 = vld [vmem:[#allocation22_spill] sm:$0xff] }
 0x1ec   : > { %15152 = vst [vmem:[#allocation125_spill] sm:$0xff] %v8733_v62  ;;  %v8735_v30 = vmax.f32 %v1906_v56, 0.0  ;;  %15154 = vst [vmem:[#allocation127_spill] sm:$0xff] %v8741_v5  ;;  %v8752_v56 = vld [vmem:[%s14266_s4 + $0x78] sm:$0xff]  ;;  %v1984_v1 = vadd.f32 %v1983_v42, %v15157_v26  ;;  %v2769_v7 = vmul.f32 %v15159_v18, %v8733_v62  ;;  %v3242_v53 = vmul.f32 %v8476_v58, %v8733_v62 }
 0x1ed   : > { %15155 = vst [vmem:[#allocation128_spill] sm:$0xff] %v8746_v14  ;;  %4553 = vperm.xlu1 %7082, %v8746_v14   ;;  %15156 = vst [vmem:[#allocation129_spill] sm:$0xff] %v8752_v56  ;;  %4589 = vperm.xlu0 %7081, %v8752_v56   ;;  %v1911_v51 = vpop.f32.mrf.mxu0  ;;  %v1991_v6 = vpop.f32.mrf.mxu1  ;;  %v3715_v59 = vmul.f32 %v8666_v9, %v8733_v62  ;;  %v1910_v21 = vadd.f32 %v1909_v24, %v15160_v0 }
 0x1ee   : > { %15153 = vst [vmem:[#allocation126_spill] sm:$0xff] %v8735_v30  ;;  %v8756_v57 = vpop.permute.xlu1 %3631  ;;  %v3238_v56 = vmul.f32 %v8474_v20, %v8718_v11  ;;  %v3711_v42 = vmul.f32 %v8651_v4, %v8718_v11  ;;  %v3243_v12 = vmul.f32 %v8476_v58, %v8735_v30  ;;  %v8773_v14 = vpop.permute.xlu0 %3651  ;;  %v2924_v50 = vadd.f32 %v2769_v7, %v2764_v35  ;;  %v8785_v58 = vld [vmem:[%s14266_s4 + $0x40] sm:$0xff] }
 0x1ef   : > { %15158 = vst [vmem:[#allocation130_spill] sm:$0xff] %v8756_v57  ;;  %v2770_v57 = vmul.f32 %v15159_v18, %v8735_v30  ;;  %v1913_v49 = vpop.f32.mrf.mxu0  ;;  %v1993_v48 = vpop.f32.mrf.mxu1  ;;  %15161 = vst [vmem:[#allocation131_spill] sm:$0xff] %v8773_v14  ;;  %v3397_v62 = vadd.f32 %v3242_v53, %v3237_v23  ;;  %v3870_v17 = vadd.f32 %v3715_v59, %v3710_v19  ;;  %v8794_v59 = vmax.f32 %v1984_v1, 0.0  ;;  %v15170_v1 = vld [vmem:[#allocation8_spill] sm:$0xff] }
 0x1f0   : > { %v3716_v24 = vmul.f32 %v8666_v9, %v8735_v30  ;;  %v8779_v20 = vmul.f32 %v8402_v22, %v8727_v39  ;;  %v3434_v11 = vadd.f32 %v3243_v12, %v3238_v56  ;;  %v1986_v18 = vadd.f32 %v1985_v36, %v15157_v26  ;;  %15163 = vst [vmem:[#allocation133_spill] sm:$0xff] %v8785_v58  ;;  %v8799_v12 = vld [vmem:[%s14266_s4 + $0x88] sm:$0xff] }
 0x1f1   : > { %v2961_v4 = vadd.f32 %v2770_v57, %v2765_v27  ;;  %4561 = vperm.xlu1 %7082, %v8785_v58   ;;  %v1915_v53 = vpop.f32.mrf.mxu0  ;;  %v8788_v7 = vpop.f32.mrf.mxu1  ;;  %v8792_v19 = vmul.f32 %v8572_v46, %v8727_v39  ;;  %15165 = vst [vmem:[#allocation135_spill] sm:$0xff] %v8794_v59  ;;  %15166 = vst [vmem:[#allocation136_spill] sm:$0xff] %v8799_v12  ;;  %4597 = vperm.xlu0 %7081, %v8799_v12   ;;  %v8802_v36 = vmax.f32 %v1910_v21, 0.0  ;;  %v15169_v27 = vld [vmem:[#allocation23_spill] sm:$0xff] }
 0x1f2   : > { %15162 = vst [vmem:[#allocation132_spill] sm:$0xff] %v8779_v20  ;;  %v3907_v35 = vadd.f32 %v3716_v24, %v3711_v42  ;;  %v8806_v23 = vmul.f32 %v8402_v22, %v8741_v5  ;;  %v1990_v56 = vadd.f32 %v1989_v8, %v15169_v27  ;;  %v1912_v57 = vadd.f32 %v1911_v51, %v15160_v0  ;;  %v8813_v9 = vpop.permute.xlu1 %3639 }
 0x1f3   : > { %15164 = vst [vmem:[#allocation134_spill] sm:$0xff] %v8792_v19  ;;  %15167 = vst [vmem:[#allocation137_spill] sm:$0xff] %v8802_v36  ;;  %v1914_v26 = vadd.f32 %v1913_v49, %v15170_v1  ;;  %v1919_v42 = vpop.f32.mrf.mxu0  ;;  %v8811_v24 = vpop.f32.mrf.mxu1  ;;  %v15172_v19 = vld [vmem:[#allocation39_spill] sm:$0xff]  ;;  %v3247_v21 = vmul.f32 %v8486_v60, %v8802_v36  ;;  %v3720_v22 = vmul.f32 %v8677_v41, %v8802_v36  ;;  %v8826_v49 = vmax.f32 %v1986_v18, 0.0 }
 0x1f4   : > { %15168 = vst [vmem:[#allocation138_spill] sm:$0xff] %v8806_v23  ;;  %15171 = vst [vmem:[#allocation139_spill] sm:$0xff] %v8813_v9  ;;  %v2774_v20 = vmul.f32 %v15172_v19, %v8802_v36  ;;  %v1992_v8 = vadd.f32 %v1991_v6, %v15169_v27  ;;  %v8824_v51 = vmul.f32 %v8572_v46, %v8741_v5  ;;  %v8828_v0 = vmax.f32 %v1912_v57, 0.0  ;;  %v8833_v23 = vld [vmem:[%s14266_s4 + $0x50] sm:$0xff]  ;;  %v8842_v27 = vpop.permute.xlu0 %3659 }
 0x1f5   : > { %15174 = vst [vmem:[#allocation141_spill] sm:$0xff] %v8826_v49  ;;  %15176 = vst [vmem:[#allocation143_spill] sm:$0xff] %v8833_v23  ;;  %4569 = vperm.xlu1 %7082, %v8833_v23   ;;  %v8836_v9 = vmax.f32 %v1914_v26, 0.0  ;;  %v1921_v12 = vpop.f32.mrf.mxu0  ;;  %v8840_v6 = vmul.f32 %v8404_v2, %v8794_v59  ;;  %v3398_v46 = vadd.f32 %v3397_v62, %v3247_v21  ;;  %v15184_v21 = vld [vmem:[#allocation40_spill] sm:$0xff] }
 0x1f6   : > { %15173 = vst [vmem:[#allocation140_spill] sm:$0xff] %v8824_v51  ;;  %15175 = vst [vmem:[#allocation142_spill] sm:$0xff] %v8828_v0  ;;  %v2925_v18 = vadd.f32 %v2924_v50, %v2774_v20  ;;  %v3871_v57 = vadd.f32 %v3870_v17, %v3720_v22  ;;  %v8847_v51 = vld [vmem:[%s14266_s4 + $0x98] sm:$0xff]  ;;  %v8852_v26 = vmul.f32 %v8593_v33, %v8794_v59  ;;  %v8860_v50 = vpop.f32.mrf.mxu1  ;;  %v8862_v20 = vmax.f32 %v1990_v56, 0.0 }
 0x1f7   : > { %15177 = vst [vmem:[#allocation144_spill] sm:$0xff] %v8836_v9  ;;  %15178 = vst [vmem:[#allocation145_spill] sm:$0xff] %v8840_v6  ;;  %4605 = vperm.xlu0 %7081, %v8847_v51   ;;  %v2775_v36 = vmul.f32 %v15172_v19, %v8828_v0  ;;  %v3248_v6 = vmul.f32 %v8486_v60, %v8828_v0  ;;  %v3721_v17 = vmul.f32 %v8677_v41, %v8828_v0  ;;  %v1923_v22 = vpop.f32.mrf.mxu0  ;;  %v8874_v41 = vld [vmem:[%s14266_s4 + $0x60] sm:$0xff] }
 0x1f8   : > { %15179 = vst [vmem:[#allocation146_spill] sm:$0xff] %v8842_v27  ;;  %15180 = vst [vmem:[#allocation147_spill] sm:$0xff] %v8847_v51  ;;  %v8864_v62 = vmax.f32 %v1992_v8, 0.0  ;;  %v2779_v51 = vmul.f32 %v15184_v21, %v8836_v9  ;;  %v3252_v60 = vmul.f32 %v8502_v28, %v8836_v9  ;;  %v8881_v8 = vmul.f32 %v8773_v14, %v8794_v59 }
 0x1f9   : > { %15181 = vst [vmem:[#allocation148_spill] sm:$0xff] %v8852_v26  ;;  %15182 = vst [vmem:[#allocation149_spill] sm:$0xff] %v8862_v20  ;;  %v15185_v26 = vld [vmem:[#allocation24_spill] sm:$0xff]  ;;  %v2962_v23 = vadd.f32 %v2961_v4, %v2775_v36  ;;  %v3435_v19 = vadd.f32 %v3434_v11, %v3248_v6  ;;  %v3908_v58 = vadd.f32 %v3907_v35, %v3721_v17  ;;  %4577 = vperm.xlu1 %7082, %v8874_v41   ;;  %v8877_v56 = vpop.f32.mrf.mxu0  ;;  %v8887_v11 = vpop.permute.xlu1 %3647  ;;  %v8894_v36 = vld [vmem:[%s14266_s4 + $0xa8] sm:$0xff] }
 0x1fa   : > { %15183 = vst [vmem:[#allocation150_spill] sm:$0xff] %v8864_v62  ;;  %v1994_v30 = vadd.f32 %v1993_v48, %v15185_v26  ;;  %15186 = vst [vmem:[#allocation151_spill] sm:$0xff] %v8881_v8  ;;  %v8885_v4 = vmul.f32 %v8404_v2, %v8826_v49  ;;  %v2926_v48 = vadd.f32 %v2925_v18, %v2779_v51  ;;  %v2003_v18 = vpop.f32.mrf.mxu1  ;;  %v8912_v8 = vpop.permute.xlu0 %3667 }
 0x1fb   : > { %15188 = vst [vmem:[#allocation153_spill] sm:$0xff] %v8887_v11  ;;  %v3725_v35 = vmul.f32 %v8661_v34, %v8836_v9  ;;  %15189 = vst [vmem:[#allocation154_spill] sm:$0xff] %v8894_v36  ;;  %4613 = vperm.xlu0 %7081, %v8894_v36   ;;  %v8899_v6 = vmul.f32 %v8593_v33, %v8826_v49  ;;  %v8903_v17 = vmul.f32 %v8773_v14, %v8826_v49  ;;  %v8906_v59 = vpop.f32.mrf.mxu0  ;;  %v15195_v33 = vld [vmem:[#allocation9_spill] sm:$0xff] }
 0x1fc   : > { %15187 = vst [vmem:[#allocation152_spill] sm:$0xff] %v8885_v4  ;;  %v3399_v2 = vadd.f32 %v3398_v46, %v3252_v60  ;;  %v1916_v51 = vadd.f32 %v1915_v53, %v15170_v1  ;;  %v8910_v4 = vmul.f32 %v8408_v16, %v8862_v20  ;;  %15193 = vst [vmem:[#allocation158_spill] sm:$0xff] %v8912_v8  ;;  %v8914_v9 = vmax.f32 %v1994_v30, 0.0  ;;  %v8934_v30 = vld [vmem:[%s14266_s4 + $0x70] sm:$0xff] }
 0x1fd   : > { %15190 = vst [vmem:[#allocation155_spill] sm:$0xff] %v8899_v6  ;;  %15191 = vst [vmem:[#allocation156_spill] sm:$0xff] %v8903_v17  ;;  %v3872_v36 = vadd.f32 %v3871_v57, %v3725_v35  ;;  %v1920_v6 = vadd.f32 %v1919_v42, %v15195_v33  ;;  %v8919_v14 = vmul.f32 %v8589_v55, %v8862_v20  ;;  %4585 = vperm.xlu1 %7082, %v8934_v30   ;;  %v8937_v42 = vpop.f32.mrf.mxu0 }
 0x1fe   : > { %15192 = vst [vmem:[#allocation157_spill] sm:$0xff] %v8910_v4  ;;  %15194 = vst [vmem:[#allocation159_spill] sm:$0xff] %v8914_v9  ;;  %v8923_v60 = vmul.f32 %v8408_v16, %v8864_v62  ;;  %v8927_v46 = vmul.f32 %v8589_v55, %v8864_v62  ;;  %v8929_v53 = vmax.f32 %v1916_v51, 0.0  ;;  %v8941_v57 = vmul.f32 %v8887_v11, %v8727_v39  ;;  %v8953_v16 = vld [vmem:[%s14266_s4 + $0xb8] sm:$0xff]  ;;  %v8963_v39 = vpop.f32.mrf.mxu1 }
 0x1ff   : > { %15196 = vst [vmem:[#allocation160_spill] sm:$0xff] %v8919_v14  ;;  %v8945_v35 = vmul.f32 %v8887_v11, %v8741_v5  ;;  %v8947_v55 = vmax.f32 %v1920_v6, 0.0  ;;  %v1922_v51 = vadd.f32 %v1921_v12, %v15195_v33  ;;  %15203 = vst [vmem:[#allocation167_spill] sm:$0xff] %v8953_v16  ;;  %4621 = vperm.xlu0 %7081, %v8953_v16   ;;  %v15204_v6 = vld [vmem:[#allocation10_spill] sm:$0xff]  ;;  %v8965_v12 = vpop.f32.mrf.mxu0  ;;  %v15209_v16 = vld [vmem:[#allocation25_spill] sm:$0xff] }
 0x200   : > { %15197 = vst [vmem:[#allocation161_spill] sm:$0xff] %v8923_v60  ;;  %15198 = vst [vmem:[#allocation162_spill] sm:$0xff] %v8927_v46  ;;  %v2780_v49 = vmul.f32 %v15184_v21, %v8929_v53  ;;  %v3253_v1 = vmul.f32 %v8502_v28, %v8929_v53  ;;  %v3726_v11 = vmul.f32 %v8661_v34, %v8929_v53  ;;  %v8973_v21 = vpop.permute.xlu1 %3655  ;;  %v15207_v28 = vld [vmem:[#allocation41_spill] sm:$0xff] }
 0x201   : > { %15199 = vst [vmem:[#allocation163_spill] sm:$0xff] %v8929_v53  ;;  %15200 = vst [vmem:[#allocation164_spill] sm:$0xff] %v8941_v57  ;;  %v1924_v5 = vadd.f32 %v1923_v22, %v15204_v6  ;;  %v8969_v33 = vmul.f32 %v8410_v32, %v8914_v9  ;;  %v1996_v46 = vadd.f32 %v8788_v7, %v15185_v26  ;;  %v8987_v7 = vpop.f32.mrf.mxu0  ;;  %v8989_v26 = vpop.permute.xlu0 %3675  ;;  %v15228_v53 = vld [vmem:[#allocation11_spill] sm:$0xff] }
 0x202   : > { %15201 = vst [vmem:[#allocation165_spill] sm:$0xff] %v8945_v35  ;;  %15202 = vst [vmem:[#allocation166_spill] sm:$0xff] %v8947_v55  ;;  %v2784_v60 = vmul.f32 %v15207_v28, %v8947_v55  ;;  %v3257_v34 = vmul.f32 %v8488_v47, %v8947_v55  ;;  %v2963_v22 = vadd.f32 %v2962_v23, %v2780_v49  ;;  %v8998_v23 = vld [vmem:[%s14266_s4 + $0xc8] sm:$0xff] }
 0x203   : > { %15205 = vst [vmem:[#allocation168_spill] sm:$0xff] %v8969_v33  ;;  %15206 = vst [vmem:[#allocation169_spill] sm:$0xff] %v8973_v21  ;;  %v3436_v17 = vadd.f32 %v3435_v19, %v3253_v1  ;;  %v3909_v35 = vadd.f32 %v3908_v58, %v3726_v11  ;;  %v3730_v14 = vmul.f32 %v8684_v31, %v8947_v55  ;;  %v8984_v33 = vld [vmem:[%s14266_s4 + $0x80] sm:$0xff]  ;;  %v8993_v58 = vmax.f32 %v1922_v51, 0.0  ;;  %v9009_v11 = vpop.f32.mrf.mxu0 }
 0x204   : > { %4593 = vperm.xlu1 %7082, %v8984_v33   ;;  %15208 = vst [vmem:[#allocation170_spill] sm:$0xff] %v8989_v26  ;;  %v2927_v4 = vadd.f32 %v2926_v48, %v2784_v60  ;;  %v3400_v57 = vadd.f32 %v3399_v2, %v3257_v34  ;;  %v2000_v19 = vadd.f32 %v8811_v24, %v15209_v16  ;;  %15211 = vst [vmem:[#allocation172_spill] sm:$0xff] %v8998_v23  ;;  %v2009_v24 = vpop.f32.mrf.mxu1 }
 0x205   : > { %15210 = vst [vmem:[#allocation171_spill] sm:$0xff] %v8993_v58  ;;  %4629 = vperm.xlu0 %7081, %v8998_v23   ;;  %v9003_v1 = vmul.f32 %v8605_v25, %v8914_v9  ;;  %v3873_v49 = vadd.f32 %v3872_v36, %v3730_v14  ;;  %v2002_v2 = vadd.f32 %v8860_v50, %v15209_v16  ;;  %v9007_v34 = vmax.f32 %v1924_v5, 0.0  ;;  %v15218_v16 = vld [vmem:[#allocation26_spill] sm:$0xff] }
 0x206   : > { %v9013_v48 = vmul.f32 %v8842_v27, %v8914_v9  ;;  %v9015_v60 = vmax.f32 %v1996_v46, 0.0  ;;  %v2785_v51 = vmul.f32 %v15207_v28, %v8993_v58  ;;  %v3258_v14 = vmul.f32 %v8488_v47, %v8993_v58  ;;  %v9035_v9 = vld [vmem:[%s14266_s4 + $0x90] sm:$0xff]  ;;  %v9038_v47 = vpop.f32.mrf.mxu0 }
 0x207   : > { %15212 = vst [vmem:[#allocation173_spill] sm:$0xff] %v9003_v1  ;;  %15213 = vst [vmem:[#allocation174_spill] sm:$0xff] %v9007_v34  ;;  %v9023_v50 = vmul.f32 %v8973_v21, %v8862_v20  ;;  %v9027_v5 = vmul.f32 %v8973_v21, %v8864_v62  ;;  %v3731_v36 = vmul.f32 %v8684_v31, %v8993_v58  ;;  %v9040_v28 = vmax.f32 %v2000_v19, 0.0  ;;  %v9042_v21 = vpop.permute.xlu1 %3663  ;;  %v15221_v62 = vld [vmem:[#allocation42_spill] sm:$0xff] }
 0x208   : > { %15214 = vst [vmem:[#allocation175_spill] sm:$0xff] %v9013_v48  ;;  %15215 = vst [vmem:[#allocation176_spill] sm:$0xff] %v9015_v60  ;;  %v2004_v46 = vadd.f32 %v2003_v18, %v15218_v16  ;;  %4601 = vperm.xlu1 %7082, %v9035_v9   ;;  %v2964_v20 = vadd.f32 %v2963_v22, %v2785_v51  ;;  %v3437_v48 = vadd.f32 %v3436_v17, %v3258_v14  ;;  %v9049_v18 = vld [vmem:[%s14266_s4 + $0xd8] sm:$0xff]  ;;  %v9058_v22 = vpop.f32.mrf.mxu1  ;;  %v9060_v51 = vpop.f32.mrf.mxu0 }
 0x209   : > { %15216 = vst [vmem:[#allocation177_spill] sm:$0xff] %v9023_v50  ;;  %15217 = vst [vmem:[#allocation178_spill] sm:$0xff] %v9027_v5  ;;  %v2789_v31 = vmul.f32 %v15221_v62, %v9007_v34  ;;  %4637 = vperm.xlu0 %7081, %v9049_v18   ;;  %v3910_v5 = vadd.f32 %v3909_v35, %v3731_v36  ;;  %v9052_v1 = vmax.f32 %v2002_v2, 0.0  ;;  %v9070_v35 = vpop.permute.xlu0 %3683 }
 0x20a   : > { %15219 = vst [vmem:[#allocation179_spill] sm:$0xff] %v9040_v28  ;;  %15220 = vst [vmem:[#allocation180_spill] sm:$0xff] %v9042_v21  ;;  %v3262_v19 = vmul.f32 %v8513_v3, %v9007_v34  ;;  %v3735_v17 = vmul.f32 %v8668_v13, %v9007_v34  ;;  %v9064_v14 = vmul.f32 %v8410_v32, %v9015_v60 }
 0x20b   : > { %15222 = vst [vmem:[#allocation181_spill] sm:$0xff] %v9049_v18  ;;  %15223 = vst [vmem:[#allocation182_spill] sm:$0xff] %v9052_v1  ;;  %v9068_v18 = vmul.f32 %v8605_v25, %v9015_v60  ;;  %v2928_v2 = vadd.f32 %v2927_v4, %v2789_v31  ;;  %v1926_v36 = vadd.f32 %v8877_v56, %v15204_v6  ;;  %v9083_v25 = vld [vmem:[%s14266_s4 + $0xa0] sm:$0xff]  ;;  %v9086_v31 = vpop.f32.mrf.mxu0 }
 0x20c   : > { %15224 = vst [vmem:[#allocation183_spill] sm:$0xff] %v9064_v14  ;;  %15226 = vst [vmem:[#allocation185_spill] sm:$0xff] %v9070_v35  ;;  %v9076_v50 = vmul.f32 %v8842_v27, %v9015_v60  ;;  %v3401_v23 = vadd.f32 %v3400_v57, %v3262_v19  ;;  %v3874_v34 = vadd.f32 %v3873_v49, %v3735_v17  ;;  %4609 = vperm.xlu1 %7082, %v9083_v25   ;;  %v9103_v49 = vld [vmem:[%s14266_s4 + $0xe8] sm:$0xff]  ;;  %v2013_v27 = vpop.f32.mrf.mxu1 }
 0x20d   : > { %15225 = vst [vmem:[#allocation184_spill] sm:$0xff] %v9068_v18  ;;  %v1930_v32 = vadd.f32 %v8906_v59, %v15228_v53  ;;  %v9090_v56 = vmul.f32 %v8420_v63, %v9040_v28  ;;  %v9094_v4 = vmul.f32 %v8595_v37, %v9040_v28  ;;  %v9096_v57 = vmax.f32 %v2004_v46, 0.0  ;;  %15233 = vst [vmem:[#allocation191_spill] sm:$0xff] %v9103_v49  ;;  %v9120_v60 = vpop.f32.mrf.mxu0 }
 0x20e   : > { %15227 = vst [vmem:[#allocation186_spill] sm:$0xff] %v9076_v50  ;;  %v9098_v59 = vmax.f32 %v1926_v36, 0.0  ;;  %4645 = vperm.xlu0 %7081, %v9103_v49   ;;  %v9108_v19 = vmul.f32 %v8420_v63, %v9052_v1  ;;  %v9112_v17 = vmul.f32 %v8595_v37, %v9052_v1  ;;  %v9116_v46 = vmul.f32 %v9042_v21, %v9040_v28  ;;  %v9128_v37 = vpop.permute.xlu1 %3671  ;;  %v15239_v50 = vld [vmem:[#allocation27_spill] sm:$0xff] }
 0x20f   : > { %15229 = vst [vmem:[#allocation187_spill] sm:$0xff] %v9090_v56  ;;  %15230 = vst [vmem:[#allocation188_spill] sm:$0xff] %v9094_v4  ;;  %v9118_v36 = vmax.f32 %v1930_v32, 0.0  ;;  %v1932_v28 = vadd.f32 %v8937_v42, %v15228_v53  ;;  %v2006_v32 = vadd.f32 %v8963_v39, %v15218_v16  ;;  %v2010_v18 = vadd.f32 %v2009_v24, %v15239_v50  ;;  %v9147_v16 = vpop.permute.xlu0 %3691 }
 0x210   : > { %15231 = vst [vmem:[#allocation189_spill] sm:$0xff] %v9096_v57  ;;  %15232 = vst [vmem:[#allocation190_spill] sm:$0xff] %v9098_v59  ;;  %v2790_v6 = vmul.f32 %v15221_v62, %v9098_v59  ;;  %v3263_v63 = vmul.f32 %v8513_v3, %v9098_v59  ;;  %v15240_v62 = vld [vmem:[#allocation12_spill] sm:$0xff]  ;;  %v9145_v3 = vpop.f32.mrf.mxu0  ;;  %v9159_v49 = vmul.f32 %v9042_v21, %v9052_v1 }
 0x211   : > { %15234 = vst [vmem:[#allocation192_spill] sm:$0xff] %v9108_v19  ;;  %15235 = vst [vmem:[#allocation193_spill] sm:$0xff] %v9112_v17  ;;  %v3736_v19 = vmul.f32 %v8668_v13, %v9098_v59  ;;  %v2794_v17 = vmul.f32 %v8353_v29, %v9118_v36  ;;  %v1934_v14 = vadd.f32 %v8965_v12, %v15240_v62  ;;  %v9142_v13 = vld [vmem:[%s14266_s4 + $0xb0] sm:$0xff]  ;;  %v9154_v12 = vld [vmem:[%s14266_s4 + $0xf8] sm:$0xff]  ;;  %v9177_v1 = vmax.f32 %v1932_v28, 0.0 }
 0x212   : > { %15236 = vst [vmem:[#allocation194_spill] sm:$0xff] %v9116_v46  ;;  %15237 = vst [vmem:[#allocation195_spill] sm:$0xff] %v9118_v36  ;;  %4617 = vperm.xlu1 %7082, %v9142_v13   ;;  %v2965_v42 = vadd.f32 %v2964_v20, %v2790_v6  ;;  %v3438_v53 = vadd.f32 %v3437_v48, %v3263_v63  ;;  %v3267_v24 = vmul.f32 %v8504_v44, %v9118_v36  ;;  %v2015_v48 = vpop.f32.mrf.mxu1  ;;  %v9188_v46 = vld [vmem:[%s14266_s4 + $0xc0] sm:$0xff] }
 0x213   : > { %15238 = vst [vmem:[#allocation196_spill] sm:$0xff] %v9128_v37  ;;  %v3911_v39 = vadd.f32 %v3910_v5, %v3736_v19  ;;  %15241 = vst [vmem:[#allocation197_spill] sm:$0xff] %v9147_v16  ;;  %4653 = vperm.xlu0 %7081, %v9154_v12   ;;  %v9163_v63 = vmul.f32 %v8422_v10, %v9096_v57  ;;  %v2929_v20 = vadd.f32 %v2928_v2, %v2794_v17  ;;  %v9167_v5 = vpop.f32.mrf.mxu0 }
 0x214   : > { %15242 = vst [vmem:[#allocation198_spill] sm:$0xff] %v9154_v12  ;;  %15243 = vst [vmem:[#allocation199_spill] sm:$0xff] %v9159_v49  ;;  %v3740_v6 = vmul.f32 %v8691_v52, %v9118_v36  ;;  %v9171_v19 = vmul.f32 %v8611_v61, %v9096_v57  ;;  %v9175_v12 = vmul.f32 %v8912_v8, %v9096_v57  ;;  %v9179_v49 = vmax.f32 %v2006_v32, 0.0  ;;  %v15253_v57 = vld [vmem:[#allocation28_spill] sm:$0xff] }
 0x215   : > { %15244 = vst [vmem:[#allocation200_spill] sm:$0xff] %v9163_v63  ;;  %v3402_v21 = vadd.f32 %v3401_v23, %v3267_v24  ;;  %15247 = vst [vmem:[#allocation203_spill] sm:$0xff] %v9177_v1  ;;  %v9181_v17 = vmax.f32 %v2010_v18, 0.0  ;;  %v9183_v63 = vmax.f32 %v1934_v14, 0.0  ;;  %v2795_v28 = vmul.f32 %v8353_v29, %v9177_v1  ;;  %v9199_v18 = vpop.permute.xlu1 %3679 }
 0x216   : > { %15245 = vst [vmem:[#allocation201_spill] sm:$0xff] %v9171_v19  ;;  %15246 = vst [vmem:[#allocation202_spill] sm:$0xff] %v9175_v12  ;;  %v3875_v2 = vadd.f32 %v3874_v34, %v3740_v6  ;;  %4625 = vperm.xlu1 %7082, %v9188_v46   ;;  %v9191_v19 = vpop.f32.mrf.mxu0  ;;  %v3268_v23 = vmul.f32 %v8504_v44, %v9177_v1  ;;  %v3741_v34 = vmul.f32 %v8691_v52, %v9177_v1  ;;  %v14490_v32 = vmov 5   ;;  %v15252_v6 = vld [vmem:[#allocation44_spill] sm:$0xff]  ;;  %v2019_v52 = vpop.f32.mrf.mxu1 }
 0x217   : > { %15248 = vst [vmem:[#allocation204_spill] sm:$0xff] %v9179_v49  ;;  %15249 = vst [vmem:[#allocation205_spill] sm:$0xff] %v9181_v17  ;;  %v1936_v14 = vadd.f32 %v8987_v7, %v15240_v62  ;;  %7084 = vset.pattern.permute.xlu0 %v14490_v32  ;;  %v2012_v24 = vadd.f32 %v9058_v22, %v15239_v50  ;;  %v2799_v29 = vmul.f32 %v15252_v6, %v9183_v63  ;;  %v9214_v32 = vpop.permute.xlu0 %3699 }
 0x218   : > { %15250 = vst [vmem:[#allocation206_spill] sm:$0xff] %v9183_v63  ;;  %15251 = vst [vmem:[#allocation207_spill] sm:$0xff] %v9199_v18  ;;  %v3272_v44 = vmul.f32 %v8531_v45, %v9183_v63  ;;  %v2014_v12 = vadd.f32 %v2013_v27, %v15253_v57  ;;  %5006 = vperm.xlu0 %7084, %v8482_v43   ;;  %v9212_v4 = vpop.f32.mrf.mxu0  ;;  %v2966_v7 = vadd.f32 %v2965_v42, %v2795_v28 }
 0x219   : > { %v3439_v62 = vadd.f32 %v3438_v53, %v3268_v23  ;;  %v3912_v56 = vadd.f32 %v3911_v39, %v3741_v34  ;;  %15254 = vst [vmem:[#allocation208_spill] sm:$0xff] %v9214_v32  ;;  %v3745_v22 = vmul.f32 %v8679_v38, %v9183_v63  ;;  %v9220_v50 = vmul.f32 %v8422_v10, %v9179_v49  ;;  %v9229_v53 = vld [vmem:[%s14266_s4 + $0xd0] sm:$0xff] }
 0x21a   : > { %v9224_v27 = vmul.f32 %v8611_v61, %v9179_v49  ;;  %v2930_v59 = vadd.f32 %v2929_v20, %v2799_v29  ;;  %v3403_v43 = vadd.f32 %v3402_v21, %v3272_v44  ;;  %4633 = vperm.xlu1 %7082, %v9229_v53   ;;  %v9232_v42 = vpop.f32.mrf.mxu0  ;;  %v9236_v39 = vmul.f32 %v8912_v8, %v9179_v49  ;;  %v15262_v20 = vld [vmem:[#allocation13_spill] sm:$0xff]  ;;  %v2021_v61 = vpop.f32.mrf.mxu1 }
 0x21b   : > { %15255 = vst [vmem:[#allocation209_spill] sm:$0xff] %v9220_v50  ;;  %v9240_v28 = vmul.f32 %v8426_v54, %v9181_v17  ;;  %v3876_v23 = vadd.f32 %v3875_v2, %v3745_v22  ;;  %v9242_v29 = vmax.f32 %v1936_v14, 0.0  ;;  %v9246_v44 = vmul.f32 %v8607_v40, %v9181_v17  ;;  %v15272_v49 = vld [vmem:[#allocation45_spill] sm:$0xff] }
 0x21c   : > { %15256 = vst [vmem:[#allocation210_spill] sm:$0xff] %v9224_v27  ;;  %15257 = vst [vmem:[#allocation211_spill] sm:$0xff] %v9236_v39  ;;  %v9248_v21 = vmax.f32 %v2012_v24, 0.0  ;;  %v1940_v34 = vadd.f32 %v9009_v11, %v15262_v20  ;;  %v1942_v8 = vadd.f32 %v9038_v47, %v15262_v20  ;;  %5018 = vperm.xlu0 %7084, %v8499_v15   ;;  %v9264_v11 = vpop.f32.mrf.mxu0  ;;  %v9270_v15 = vmax.f32 %v2014_v12, 0.0  ;;  %v9279_v20 = vld [vmem:[%s14266_s4 + $0xe0] sm:$0xff]  ;;  %v15285_v27 = vld [vmem:[#allocation14_spill] sm:$0xff] }
 0x21d   : > { %15258 = vst [vmem:[#allocation212_spill] sm:$0xff] %v9240_v28  ;;  %15259 = vst [vmem:[#allocation213_spill] sm:$0xff] %v9242_v29  ;;  %v2800_v2 = vmul.f32 %v15252_v6, %v9242_v29  ;;  %v3273_v14 = vmul.f32 %v8531_v45, %v9242_v29  ;;  %v3746_v22 = vmul.f32 %v8679_v38, %v9242_v29  ;;  %v9282_v45 = vpop.permute.xlu0 %3707  ;;  %v15269_v6 = vld [vmem:[#allocation29_spill] sm:$0xff] }
 0x21e   : > { %15260 = vst [vmem:[#allocation214_spill] sm:$0xff] %v9246_v44  ;;  %15261 = vst [vmem:[#allocation215_spill] sm:$0xff] %v9248_v21  ;;  %v2016_v24 = vadd.f32 %v2015_v48, %v15253_v57  ;;  %v9262_v44 = vpop.permute.xlu1 %3687  ;;  %v9268_v47 = vmul.f32 %v9128_v37, %v9181_v17  ;;  %v9272_v28 = vmax.f32 %v1940_v34, 0.0  ;;  %v9274_v10 = vmax.f32 %v1942_v8, 0.0  ;;  %4641 = vperm.xlu1 %7082, %v9279_v20   ;;  %v9285_v12 = vpop.f32.mrf.mxu0 }
 0x21f   : > { %15263 = vst [vmem:[#allocation216_spill] sm:$0xff] %v9262_v44  ;;  %15265 = vst [vmem:[#allocation218_spill] sm:$0xff] %v9270_v15  ;;  %v2967_v48 = vadd.f32 %v2966_v7, %v2800_v2  ;;  %v3440_v57 = vadd.f32 %v3439_v62, %v3273_v14  ;;  %v3913_v38 = vadd.f32 %v3912_v56, %v3746_v22  ;;  %v15273_v62 = vld [vmem:[#allocation77_spill] sm:$0xff]  ;;  %v2023_v7 = vpop.f32.mrf.mxu1  ;;  %v15274_v2 = vld [vmem:[#allocation128_spill] sm:$0xff] }
 0x220   : > { %15264 = vst [vmem:[#allocation217_spill] sm:$0xff] %v9268_v47  ;;  %15266 = vst [vmem:[#allocation219_spill] sm:$0xff] %v9272_v28  ;;  %v2020_v47 = vadd.f32 %v2019_v52, %v15269_v6  ;;  %v9289_v8 = vmul.f32 %v8426_v54, %v9248_v21  ;;  %v9293_v34 = vmul.f32 %v8607_v40, %v9248_v21  ;;  %5026 = vperm.xlu0 %7084, %v15274_v2   ;;  %v15277_v22 = vld [vmem:[#allocation117_spill] sm:$0xff] }
 0x221   : > { %15267 = vst [vmem:[#allocation220_spill] sm:$0xff] %v9274_v10  ;;  %15268 = vst [vmem:[#allocation221_spill] sm:$0xff] %v9282_v45  ;;  %v2804_v17 = vmul.f32 %v15272_v49, %v9272_v28  ;;  %v3277_v56 = vmul.f32 %v15273_v62, %v9272_v28  ;;  %v9302_v52 = vmul.f32 %v9128_v37, %v9248_v21  ;;  %v9304_v14 = vmax.f32 %v2016_v24, 0.0  ;;  %v9318_v24 = vld [vmem:[%s14266_s4 + $0xf0] sm:$0xff] }
 0x222   : > { %15270 = vst [vmem:[#allocation222_spill] sm:$0xff] %v9289_v8  ;;  %15271 = vst [vmem:[#allocation223_spill] sm:$0xff] %v9293_v34  ;;  %v3750_v45 = vmul.f32 %v15277_v22, %v9272_v28  ;;  %v2022_v34 = vadd.f32 %v2021_v61, %v15269_v6  ;;  %v9309_v8 = vpop.f32.mrf.mxu0  ;;  %v2805_v39 = vmul.f32 %v15272_v49, %v9274_v10  ;;  %4649 = vperm.xlu1 %7082, %v9318_v24   ;;  %v15283_v37 = vld [vmem:[#allocation98_spill] sm:$0xff] }
 0x223   : > { %15275 = vst [vmem:[#allocation128_spill] sm:$0xff] %v9302_v52  ;;  %15276 = vst [vmem:[#allocation224_spill] sm:$0xff] %v9304_v14  ;;  %v2931_v40 = vadd.f32 %v2930_v59, %v2804_v17  ;;  %v3404_v54 = vadd.f32 %v3403_v43, %v3277_v56  ;;  %v3278_v2 = vmul.f32 %v15273_v62, %v9274_v10  ;;  %v15279_v52 = vld [vmem:[#allocation60_spill] sm:$0xff]  ;;  %v9325_v59 = vmax.f32 %v2020_v47, 0.0  ;;  %v9329_v43 = vpop.permute.xlu1 %3695 }
 0x224   : > { %15278 = vst [vmem:[#allocation225_spill] sm:$0xff] %v9318_v24  ;;  %v9323_v61 = vmul.f32 %v15279_v52, %v9270_v15  ;;  %v3877_v6 = vadd.f32 %v3876_v23, %v3750_v45  ;;  %v3751_v17 = vmul.f32 %v15277_v22, %v9274_v10  ;;  %15282 = vst [vmem:[#allocation228_spill] sm:$0xff] %v9329_v43  ;;  %v9331_v56 = vpop.f32.mrf.mxu0  ;;  %v15286_v45 = vld [vmem:[#allocation133_spill] sm:$0xff]  ;;  %v9348_v29 = vmax.f32 %v2022_v34, 0.0 }
 0x225   : > { %15281 = vst [vmem:[#allocation227_spill] sm:$0xff] %v9325_v59  ;;  %v9335_v62 = vmul.f32 %v15283_v37, %v9270_v15  ;;  %v2968_v49 = vadd.f32 %v2967_v48, %v2805_v39  ;;  %v3441_v21 = vadd.f32 %v3440_v57, %v3278_v2  ;;  %v1944_v50 = vadd.f32 %v9060_v51, %v15285_v27  ;;  %v15295_v34 = vld [vmem:[#allocation61_spill] sm:$0xff] }
 0x226   : > { %15280 = vst [vmem:[#allocation226_spill] sm:$0xff] %v9323_v61  ;;  %v2025_v61 = vpop.f32.mrf.mxu1  ;;  %5034 = vperm.xlu0 %7084, %v15286_v45   ;;  %v9342_v23 = vmul.f32 %v8989_v26, %v9270_v15  ;;  %v9346_v47 = vmul.f32 %v15279_v52, %v9304_v14  ;;  %v3914_v22 = vadd.f32 %v3913_v38, %v3751_v17  ;;  %15289 = vst [vmem:[#allocation231_spill] sm:$0xff] %v9348_v29  ;;  %v9352_v57 = vpop.f32.mrf.mxu0  ;;  %v15294_v38 = vmov 5   ;;  %v15297_v45 = vld [vmem:[#allocation97_spill] sm:$0xff]  ;;  %v15304_v52 = vld [vmem:[#allocation82_spill] sm:$0xff] }
 0x227   : > { %15284 = vst [vmem:[#allocation229_spill] sm:$0xff] %v9335_v62  ;;  %v9350_v62 = vpop.permute.xlu0 %4060  ;;  %v9356_v51 = vmul.f32 %v15283_v37, %v9304_v14  ;;  %v9360_v39 = vmul.f32 %v8989_v26, %v9304_v14  ;;  %v9362_v48 = vmax.f32 %v1944_v50, 0.0  ;;  %v1946_v2 = vadd.f32 %v9086_v31, %v15285_v27  ;;  %7083 = vset.pattern.permute.xlu1 %v15294_v38  ;;  %v15300_v37 = vld [vmem:[#allocation15_spill] sm:$0xff]  ;;  %v15303_v31 = vld [vmem:[#allocation46_spill] sm:$0xff] }
 0x228   : > { %15287 = vst [vmem:[#allocation133_spill] sm:$0xff] %v9342_v23  ;;  %15288 = vst [vmem:[#allocation230_spill] sm:$0xff] %v9346_v47  ;;  %v9369_v17 = vmul.f32 %v15295_v34, %v9325_v59  ;;  %v9373_v23 = vmul.f32 %v15297_v45, %v9325_v59  ;;  %v15301_v50 = vld [vmem:[#allocation75_spill] sm:$0xff]  ;;  %v9379_v26 = vpop.f32.mrf.mxu0 }
 0x229   : > { %15290 = vst [vmem:[#allocation232_spill] sm:$0xff] %v9350_v62  ;;  %15291 = vst [vmem:[#allocation233_spill] sm:$0xff] %v9356_v51  ;;  %v15299_v51 = vld [vmem:[#allocation30_spill] sm:$0xff]  ;;  %5002 = vperm.xlu1 %7083, %v15301_v50   ;;  %v2809_v38 = vmul.f32 %v15303_v31, %v9362_v48  ;;  %v3282_v27 = vmul.f32 %v15304_v52, %v9362_v48  ;;  %v9387_v15 = vmax.f32 %v1946_v2, 0.0  ;;  %v9406_v2 = vpop.permute.xlu1 %3703 }
 0x22a   : > { %15292 = vst [vmem:[#allocation234_spill] sm:$0xff] %v9360_v39  ;;  %15293 = vst [vmem:[#allocation235_spill] sm:$0xff] %v9362_v48  ;;  %v2024_v47 = vadd.f32 %v2023_v7, %v15299_v51  ;;  %v1950_v39 = vadd.f32 %v9120_v60, %v15300_v37  ;;  %v15307_v7 = vld [vmem:[#allocation143_spill] sm:$0xff]  ;;  %v9392_v60 = vmul.f32 %v9199_v18, %v9325_v59  ;;  %v9408_v63 = vpop.f32.mrf.mxu0 }
 0x22b   : > { %15296 = vst [vmem:[#allocation236_spill] sm:$0xff] %v9369_v17  ;;  %15298 = vst [vmem:[#allocation237_spill] sm:$0xff] %v9373_v23  ;;  %v15305_v17 = vld [vmem:[#allocation113_spill] sm:$0xff]  ;;  %v2029_v23 = vpop.f32.mrf.mxu1  ;;  %5042 = vperm.xlu0 %7084, %v15307_v7   ;;  %v9396_v50 = vmul.f32 %v15295_v34, %v9348_v29  ;;  %v2932_v7 = vadd.f32 %v2931_v40, %v2809_v38  ;;  %v3405_v24 = vadd.f32 %v3404_v54, %v3282_v27  ;;  %v15318_v27 = vld [vmem:[#allocation126_spill] sm:$0xff] }
 0x22c   : > { %15302 = vst [vmem:[#allocation75_spill] sm:$0xff] %v9379_v26  ;;  %v3755_v14 = vmul.f32 %v15305_v17, %v9362_v48  ;;  %15306 = vst [vmem:[#allocation238_spill] sm:$0xff] %v9387_v15  ;;  %v9400_v26 = vmul.f32 %v15297_v45, %v9348_v29  ;;  %v9404_v48 = vmul.f32 %v9199_v18, %v9348_v29  ;;  %v9412_v34 = vmax.f32 %v2024_v47, 0.0  ;;  %v9419_v18 = vpop.permute.xlu0 %4072  ;;  %v2287_v40 = vpop.f32.mrf.mxu0  ;;  %v15317_v54 = vld [vmem:[#allocation125_spill] sm:$0xff] }
 0x22d   : > { %15308 = vst [vmem:[#allocation143_spill] sm:$0xff] %v9392_v60  ;;  %15309 = vst [vmem:[#allocation239_spill] sm:$0xff] %v9396_v50  ;;  %v2810_v60 = vmul.f32 %v15303_v31, %v9387_v15  ;;  %v3283_v50 = vmul.f32 %v15304_v52, %v9387_v15  ;;  %v9426_v38 = vmax.f32 %v1950_v39, 0.0  ;;  %v2031_v45 = vpop.f32.mrf.mxu1  ;;  %v15324_v39 = vld [vmem:[#allocation122_spill] sm:$0xff] }
 0x22e   : > { %15310 = vst [vmem:[#allocation240_spill] sm:$0xff] %v9400_v26  ;;  %15311 = vst [vmem:[#allocation241_spill] sm:$0xff] %v9404_v48  ;;  %v3878_v59 = vadd.f32 %v3877_v6, %v3755_v14  ;;  %v3756_v26 = vmul.f32 %v15305_v17, %v9387_v15  ;;  %v2026_v48 = vadd.f32 %v2025_v61, %v15299_v51  ;;  %v15320_v61 = vld [vmem:[#allocation31_spill] sm:$0xff]  ;;  %v9432_v40 = vpop.f32.mrf.mxu0  ;;  %v15330_v15 = vld [vmem:[#allocation16_spill] sm:$0xff] }
 0x22f   : > { %15312 = vst [vmem:[#allocation242_spill] sm:$0xff] %v9406_v2  ;;  %15313 = vst [vmem:[#allocation243_spill] sm:$0xff] %v9408_v63  ;;  %v15316_v2 = vld [vmem:[#allocation78_spill] sm:$0xff]  ;;  %v4188_v6 = vmul.f32 %v9350_v62, %v15317_v54  ;;  %v4189_v14 = vmul.f32 %v9350_v62, %v15318_v27  ;;  %v2969_v47 = vadd.f32 %v2968_v49, %v2810_v60  ;;  %5050 = vperm.xlu0 %7084, %v8874_v41   ;;  %v15322_v54 = vld [vmem:[#allocation47_spill] sm:$0xff] }
 0x230   : > { %15314 = vst [vmem:[#allocation244_spill] sm:$0xff] %v9412_v34  ;;  %15315 = vst [vmem:[#allocation245_spill] sm:$0xff] %v9419_v18  ;;  %5010 = vperm.xlu1 %7083, %v15316_v2   ;;  %v3442_v17 = vadd.f32 %v3441_v21, %v3283_v50  ;;  %v3915_v52 = vadd.f32 %v3914_v22, %v3756_v26  ;;  %v2030_v51 = vadd.f32 %v2029_v23, %v15320_v61  ;;  %v15323_v27 = vld [vmem:[#allocation80_spill] sm:$0xff]  ;;  %v15325_v26 = vld [vmem:[#allocation62_spill] sm:$0xff]  ;;  %v9456_v50 = vpop.permute.xlu1 %4056  ;;  %v2290_v29 = vpop.f32.mrf.mxu0 }
 0x231   : > { %15319 = vst [vmem:[#allocation78_spill] sm:$0xff] %v9426_v38  ;;  %v1952_v2 = vadd.f32 %v9145_v3, %v15300_v37  ;;  %15321 = vst [vmem:[#allocation246_spill] sm:$0xff] %v9432_v40  ;;  %v2814_v31 = vmul.f32 %v15322_v54, %v9426_v38  ;;  %v3287_v49 = vmul.f32 %v15323_v27, %v9426_v38  ;;  %v9448_v3 = vmax.f32 %v2026_v48, 0.0  ;;  %v15329_v37 = vld [vmem:[#allocation81_spill] sm:$0xff] }
 0x232   : > { %v3760_v60 = vmul.f32 %v15324_v39, %v9426_v38  ;;  %v9442_v41 = vmul.f32 %v9419_v18, %v8947_v55  ;;  %v9446_v21 = vmul.f32 %v15325_v26, %v9412_v34  ;;  %v9452_v22 = vmul.f32 %v9419_v18, %v8993_v58  ;;  %v9469_v29 = vpop.f32.mrf.mxu0 }
 0x233   : > { %15327 = vst [vmem:[#allocation248_spill] sm:$0xff] %v9448_v3  ;;  %v9454_v23 = vmax.f32 %v1952_v2, 0.0  ;;  %v2933_v62 = vadd.f32 %v2932_v7, %v2814_v31  ;;  %v3406_v55 = vadd.f32 %v3405_v24, %v3287_v49  ;;  %v1954_v63 = vadd.f32 %v9167_v5, %v15330_v15  ;;  %5058 = vperm.xlu0 %7084, %v8934_v30   ;;  %v15332_v24 = vld [vmem:[#allocation100_spill] sm:$0xff] }
 0x234   : > { %15326 = vst [vmem:[#allocation247_spill] sm:$0xff] %v9446_v21  ;;  %5014 = vperm.xlu1 %7083, %v15329_v37   ;;  %v3879_v40 = vadd.f32 %v3878_v59, %v3760_v60  ;;  %v2033_v21 = vpop.f32.mrf.mxu1  ;;  %v2032_v37 = vadd.f32 %v2031_v45, %v15320_v61  ;;  %15331 = vst [vmem:[#allocation81_spill] sm:$0xff] %v9469_v29  ;;  %v9473_v59 = vmul.f32 %v15332_v24, %v9412_v34  ;;  %v15338_v61 = vld [vmem:[#allocation84_spill] sm:$0xff] }
 0x235   : > { %15328 = vst [vmem:[#allocation249_spill] sm:$0xff] %v9454_v23  ;;  %v2815_v48 = vmul.f32 %v15322_v54, %v9454_v23  ;;  %v3288_v2 = vmul.f32 %v15323_v27, %v9454_v23  ;;  %v3761_v58 = vmul.f32 %v15324_v39, %v9454_v23  ;;  %v9477_v30 = vmul.f32 %v9070_v35, %v9412_v34  ;;  %v15337_v39 = vld [vmem:[#allocation119_spill] sm:$0xff]  ;;  %v2295_v27 = vpop.f32.mrf.mxu0  ;;  %v15340_v54 = vld [vmem:[#allocation48_spill] sm:$0xff] }
 0x236   : > { %15333 = vst [vmem:[#allocation250_spill] sm:$0xff] %v9473_v59  ;;  %v9479_v5 = vmax.f32 %v2030_v51, 0.0  ;;  %v9481_v31 = vmax.f32 %v1954_v63, 0.0  ;;  %v4183_v45 = vmul.f32 %v9456_v50, %v15337_v39  ;;  %v9488_v59 = vmul.f32 %v15325_v26, %v9448_v3  ;;  %v15341_v51 = vld [vmem:[#allocation85_spill] sm:$0xff]  ;;  %v15346_v29 = vld [vmem:[#allocation32_spill] sm:$0xff] }
 0x237   : > { %15334 = vst [vmem:[#allocation251_spill] sm:$0xff] %v9477_v30  ;;  %v2970_v7 = vadd.f32 %v2969_v47, %v2815_v48  ;;  %v3443_v49 = vadd.f32 %v3442_v17, %v3288_v2  ;;  %v3916_v60 = vadd.f32 %v3915_v52, %v3761_v58  ;;  %v15342_v47 = vld [vmem:[#allocation115_spill] sm:$0xff]  ;;  %v2035_v58 = vpop.f32.mrf.mxu1  ;;  %5066 = vperm.xlu0 %7084, %v8984_v33   ;;  %v9501_v27 = vmax.f32 %v2032_v37, 0.0  ;;  %v9507_v26 = vpop.f32.mrf.mxu0 }
 0x238   : > { %15335 = vst [vmem:[#allocation252_spill] sm:$0xff] %v9479_v5  ;;  %15336 = vst [vmem:[#allocation253_spill] sm:$0xff] %v9481_v31  ;;  %5022 = vperm.xlu1 %7083, %v15338_v61   ;;  %v2819_v30 = vmul.f32 %v15340_v54, %v9481_v31  ;;  %v3292_v63 = vmul.f32 %v15341_v51, %v9481_v31  ;;  %v3765_v17 = vmul.f32 %v15342_v47, %v9481_v31  ;;  %v15345_v61 = vld [vmem:[#allocation121_spill] sm:$0xff]  ;;  %v15348_v37 = vld [vmem:[#allocation63_spill] sm:$0xff] }
 0x239   : > { %15339 = vst [vmem:[#allocation84_spill] sm:$0xff] %v9488_v59  ;;  %v9499_v52 = vmul.f32 %v15332_v24, %v9448_v3  ;;  %15344 = vst [vmem:[#allocation255_spill] sm:$0xff] %v9501_v27  ;;  %v4184_v48 = vmul.f32 %v9456_v50, %v15345_v61  ;;  %v4343_v2 = vadd.f32 %v4188_v6, %v4183_v45  ;;  %v9505_v59 = vpop.permute.xlu1 %4064  ;;  %v15350_v45 = vld [vmem:[#allocation87_spill] sm:$0xff]  ;;  %v2298_v61 = vpop.f32.mrf.mxu0 }
 0x23a   : > { %v2934_v39 = vadd.f32 %v2933_v62, %v2819_v30  ;;  %v3407_v34 = vadd.f32 %v3406_v55, %v3292_v63  ;;  %v3880_v18 = vadd.f32 %v3879_v40, %v3765_v17  ;;  %v2034_v31 = vadd.f32 %v2033_v21, %v15346_v29  ;;  %v15351_v55 = vld [vmem:[#allocation99_spill] sm:$0xff]  ;;  %v9529_v21 = vpop.permute.xlu0 %4080  ;;  %v15355_v30 = vld [vmem:[#allocation17_spill] sm:$0xff] }
 0x23b   : > { %15343 = vst [vmem:[#allocation254_spill] sm:$0xff] %v9499_v52  ;;  %v9512_v33 = vmul.f32 %v9070_v35, %v9448_v3  ;;  %v9516_v52 = vmul.f32 %v15348_v37, %v9479_v5  ;;  %v4380_v24 = vadd.f32 %v4189_v14, %v4184_v48  ;;  %v1956_v6 = vadd.f32 %v9191_v19, %v15330_v15  ;;  %v15356_v14 = vld [vmem:[#allocation137_spill] sm:$0xff]  ;;  %v15375_v15 = vld [vmem:[#allocation18_spill] sm:$0xff] }
 0x23c   : > { %5030 = vperm.xlu1 %7083, %v15350_v45   ;;  %v9523_v62 = vmul.f32 %v15351_v55, %v9479_v5  ;;  %v9527_v40 = vmul.f32 %v9262_v44, %v9479_v5  ;;  %15354 = vst [vmem:[#allocation259_spill] sm:$0xff] %v9529_v21  ;;  %v1960_v63 = vadd.f32 %v9212_v4, %v15355_v30  ;;  %v2039_v45 = vpop.f32.mrf.mxu1  ;;  %v9548_v4 = vpop.f32.mrf.mxu0 }
 0x23d   : > { %15347 = vst [vmem:[#allocation256_spill] sm:$0xff] %v9512_v33  ;;  %15349 = vst [vmem:[#allocation257_spill] sm:$0xff] %v9516_v52  ;;  %v4193_v17 = vmul.f32 %v9505_v59, %v15356_v14  ;;  %5074 = vperm.xlu0 %7084, %v9035_v9   ;;  %v9538_v19 = vmul.f32 %v15348_v37, %v9501_v27  ;;  %v9542_v61 = vmul.f32 %v15351_v55, %v9501_v27  ;;  %v15364_v37 = vld [vmem:[#allocation33_spill] sm:$0xff]  ;;  %v9580_v14 = vpop.permute.xlu1 %4068 }
 0x23e   : > { %15352 = vst [vmem:[#allocation87_spill] sm:$0xff] %v9523_v62  ;;  %15353 = vst [vmem:[#allocation258_spill] sm:$0xff] %v9527_v40  ;;  %v9544_v48 = vmax.f32 %v1956_v6, 0.0  ;;  %v4194_v40 = vmul.f32 %v9505_v59, %v8828_v0  ;;  %v9550_v33 = vmax.f32 %v2034_v31, 0.0  ;;  %v2036_v9 = vadd.f32 %v2035_v58, %v15346_v29  ;;  %v7193_v31 = vld [vmem:[%s14266_s4 + $0x48] sm:$0xff]  ;;  %v2303_v58 = vpop.f32.mrf.mxu0 }
 0x23f   : > { %15357 = vst [vmem:[#allocation260_spill] sm:$0xff] %v9538_v19  ;;  %15358 = vst [vmem:[#allocation261_spill] sm:$0xff] %v9542_v61  ;;  %v9553_v62 = vmax.f32 %v1960_v63, 0.0  ;;  %v4344_v52 = vadd.f32 %v4343_v2, %v4193_v17  ;;  %v9568_v2 = vmul.f32 %v9262_v44, %v9501_v27  ;;  %v9572_v63 = vmul.f32 %v9529_v21, %v9118_v36  ;;  %v15363_v17 = vld [vmem:[#allocation49_spill] sm:$0xff] }
 0x240   : > { %15359 = vst [vmem:[#allocation262_spill] sm:$0xff] %v9544_v48  ;;  %15360 = vst [vmem:[#allocation263_spill] sm:$0xff] %v9550_v33  ;;  %v2820_v19 = vmul.f32 %v15340_v54, %v9544_v48  ;;  %v3293_v6 = vmul.f32 %v15341_v51, %v9544_v48  ;;  %v3766_v61 = vmul.f32 %v15342_v47, %v9544_v48  ;;  %5038 = vperm.xlu1 %7083, %v7193_v31   ;;  %v15365_v31 = vld [vmem:[#allocation83_spill] sm:$0xff] }
 0x241   : > { %15361 = vst [vmem:[#allocation264_spill] sm:$0xff] %v9553_v62  ;;  %v9561_v55 = vadd.f32 %v4380_v24, %v4194_v40  ;;  %15362 = vst [vmem:[#allocation265_spill] sm:$0xff] %v9568_v2  ;;  %v2824_v29 = vmul.f32 %v15363_v17, %v9553_v62  ;;  %v2040_v24 = vadd.f32 %v2039_v45, %v15364_v37  ;;  %5082 = vperm.xlu0 %7084, %v9083_v25   ;;  %v9582_v2 = vpop.f32.mrf.mxu0  ;;  %v15367_v45 = vld [vmem:[#allocation130_spill] sm:$0xff] }
 0x242   : > { %v2971_v40 = vadd.f32 %v2970_v7, %v2820_v19  ;;  %v3444_v35 = vadd.f32 %v3443_v49, %v3293_v6  ;;  %v3917_v0 = vadd.f32 %v3916_v60, %v3766_v61  ;;  %v3297_v58 = vmul.f32 %v15365_v31, %v9553_v62  ;;  %v9592_v7 = vpop.permute.xlu0 %4088  ;;  %v2041_v49 = vpop.f32.mrf.mxu1  ;;  %v15369_v60 = vld [vmem:[#allocation64_spill] sm:$0xff]  ;;  %v15371_v61 = vld [vmem:[#allocation102_spill] sm:$0xff] }
 0x243   : > { %v9586_v44 = vmul.f32 %v9529_v21, %v9177_v1  ;;  %v9588_v36 = vmax.f32 %v2036_v9, 0.0  ;;  %v2935_v47 = vadd.f32 %v2934_v39, %v2824_v29  ;;  %v3770_v25 = vmul.f32 %v15367_v45, %v9553_v62  ;;  %15368 = vst [vmem:[#allocation267_spill] sm:$0xff] %v9592_v7  ;;  %v15373_v1 = vld [vmem:[#allocation116_spill] sm:$0xff]  ;;  %v2306_v39 = vpop.f32.mrf.mxu0 }
 0x244   : > { %v9596_v19 = vmul.f32 %v15369_v60, %v9550_v33  ;;  %v9600_v6 = vmul.f32 %v15371_v61, %v9550_v33  ;;  %v3408_v51 = vadd.f32 %v3407_v34, %v3297_v58  ;;  %v1962_v9 = vadd.f32 %v9232_v42, %v15355_v30  ;;  %5046 = vperm.xlu1 %7083, %v15373_v1  }
 0x245   : > { %15366 = vst [vmem:[#allocation266_spill] sm:$0xff] %v9588_v36  ;;  %v9607_v29 = vmul.f32 %v9147_v16, %v9550_v33  ;;  %v3881_v54 = vadd.f32 %v3880_v18, %v3770_v25  ;;  %v1964_v3 = vadd.f32 %v9264_v11, %v15375_v15  ;;  %5090 = vperm.xlu0 %7084, %v9142_v13   ;;  %v9614_v34 = vmax.f32 %v2040_v24, 0.0  ;;  %v9626_v18 = vpop.f32.mrf.mxu0  ;;  %v2043_v25 = vpop.f32.mrf.mxu1 }
 0x246   : > { %15370 = vst [vmem:[#allocation268_spill] sm:$0xff] %v9596_v19  ;;  %15372 = vst [vmem:[#allocation269_spill] sm:$0xff] %v9600_v6  ;;  %v15376_v19 = vld [vmem:[#allocation144_spill] sm:$0xff]  ;;  %v9618_v42 = vmul.f32 %v9592_v7, %v9272_v28  ;;  %v9622_v1 = vmul.f32 %v9592_v7, %v9274_v10  ;;  %v9624_v58 = vmax.f32 %v1962_v9, 0.0  ;;  %v9630_v11 = vmul.f32 %v15369_v60, %v9588_v36  ;;  %v15382_v10 = vld [vmem:[#allocation163_spill] sm:$0xff]  ;;  %v9668_v7 = vpop.permute.xlu0 %4096 }
 0x247   : > { %15374 = vst [vmem:[#allocation116_spill] sm:$0xff] %v9607_v29  ;;  %v4198_v21 = vmul.f32 %v9580_v14, %v15376_v19  ;;  %15377 = vst [vmem:[#allocation270_spill] sm:$0xff] %v9614_v34  ;;  %v9634_v13 = vmul.f32 %v15371_v61, %v9588_v36  ;;  %v9636_v24 = vmax.f32 %v1964_v3, 0.0  ;;  %v15383_v60 = vld [vmem:[#allocation120_spill] sm:$0xff]  ;;  %v2311_v61 = vpop.f32.mrf.mxu0  ;;  %v9649_v3 = vmul.f32 %v9147_v16, %v9588_v36  ;;  %v15391_v36 = vld [vmem:[#allocation34_spill] sm:$0xff] }
 0x248   : > { %15378 = vst [vmem:[#allocation271_spill] sm:$0xff] %v9624_v58  ;;  %15379 = vst [vmem:[#allocation272_spill] sm:$0xff] %v9630_v11  ;;  %v2825_v29 = vmul.f32 %v15363_v17, %v9624_v58  ;;  %v3298_v9 = vmul.f32 %v15365_v31, %v9624_v58  ;;  %v3771_v6 = vmul.f32 %v15367_v45, %v9624_v58  ;;  %5054 = vperm.xlu1 %7083, %v15383_v60   ;;  %v15386_v28 = vld [vmem:[#allocation88_spill] sm:$0xff]  ;;  %v15387_v60 = vld [vmem:[#allocation118_spill] sm:$0xff] }
 0x249   : > { %15380 = vst [vmem:[#allocation273_spill] sm:$0xff] %v9634_v13  ;;  %15381 = vst [vmem:[#allocation274_spill] sm:$0xff] %v9636_v24  ;;  %v4345_v39 = vadd.f32 %v4344_v52, %v4198_v21  ;;  %v4199_v11 = vmul.f32 %v9580_v14, %v15382_v10  ;;  %v2042_v52 = vadd.f32 %v2041_v49, %v15364_v37  ;;  %v15385_v21 = vld [vmem:[#allocation50_spill] sm:$0xff]  ;;  %5098 = vperm.xlu0 %7084, %v9188_v46   ;;  %v9659_v10 = vpop.permute.xlu1 %4076  ;;  %v9661_v16 = vpop.f32.mrf.mxu0  ;;  %v15389_v49 = vld [vmem:[#allocation65_spill] sm:$0xff] }
 0x24a   : > { %15384 = vst [vmem:[#allocation120_spill] sm:$0xff] %v9649_v3  ;;  %v2829_v13 = vmul.f32 %v15385_v21, %v9636_v24  ;;  %v3302_v31 = vmul.f32 %v15386_v28, %v9636_v24  ;;  %v2972_v45 = vadd.f32 %v2971_v40, %v2825_v29  ;;  %v3445_v17 = vadd.f32 %v3444_v35, %v3298_v9  ;;  %v2045_v46 = vpop.f32.mrf.mxu1  ;;  %v15395_v9 = vld [vmem:[#allocation129_spill] sm:$0xff] }
 0x24b   : > { %v3918_v30 = vadd.f32 %v3917_v0, %v3771_v6  ;;  %v3775_v61 = vmul.f32 %v15387_v60, %v9636_v24  ;;  %15388 = vst [vmem:[#allocation275_spill] sm:$0xff] %v9661_v16  ;;  %v9665_v3 = vmul.f32 %v15389_v49, %v9614_v34  ;;  %v2044_v33 = vadd.f32 %v2043_v25, %v15391_v36  ;;  %v15393_v0 = vld [vmem:[#allocation101_spill] sm:$0xff]  ;;  %v15399_v25 = vld [vmem:[#allocation174_spill] sm:$0xff] }
 0x24c   : > { %v2936_v37 = vadd.f32 %v2935_v47, %v2829_v13  ;;  %v3409_v19 = vadd.f32 %v3408_v51, %v3302_v31  ;;  %15392 = vst [vmem:[#allocation277_spill] sm:$0xff] %v9668_v7  ;;  %v9672_v35 = vmul.f32 %v15393_v0, %v9614_v34  ;;  %v4382_v6 = vadd.f32 %v9561_v55, %v4199_v11  ;;  %v15398_v31 = vld [vmem:[#allocation19_spill] sm:$0xff] }
 0x24d   : > { %15390 = vst [vmem:[#allocation276_spill] sm:$0xff] %v9665_v3  ;;  %v3882_v40 = vadd.f32 %v3881_v54, %v3775_v61  ;;  %v1966_v29 = vadd.f32 %v9285_v12, %v15375_v15  ;;  %5062 = vperm.xlu1 %7083, %v15395_v9   ;;  %v2314_v3 = vpop.f32.mrf.mxu0  ;;  %v9680_v51 = vmul.f32 %v9329_v43, %v9614_v34  ;;  %v9682_v47 = vmax.f32 %v2042_v52, 0.0 }
 0x24e   : > { %15394 = vst [vmem:[#allocation278_spill] sm:$0xff] %v9672_v35  ;;  %v1970_v13 = vadd.f32 %v9309_v8, %v15398_v31  ;;  %v4208_v54 = vmul.f32 %v9659_v10, %v15399_v25  ;;  %5106 = vperm.xlu0 %7084, %v9229_v53   ;;  %v9691_v12 = vmul.f32 %v9668_v7, %v9426_v38  ;;  %v9699_v61 = vmax.f32 %v2044_v33, 0.0  ;;  %v2049_v53 = vpop.f32.mrf.mxu1  ;;  %v15421_v25 = vld [vmem:[#allocation20_spill] sm:$0xff] }
 0x24f   : > { %15396 = vst [vmem:[#allocation129_spill] sm:$0xff] %v9680_v51  ;;  %15397 = vst [vmem:[#allocation279_spill] sm:$0xff] %v9682_v47  ;;  %v9693_v55 = vmax.f32 %v1966_v29, 0.0  ;;  %v4346_v11 = vadd.f32 %v4345_v39, %v9442_v41  ;;  %v4383_v3 = vadd.f32 %v4382_v6, %v9452_v22  ;;  %v9697_v52 = vpop.f32.mrf.mxu0  ;;  %v9703_v8 = vmul.f32 %v9668_v7, %v9454_v23  ;;  %v15404_v51 = vld [vmem:[#allocation190_spill] sm:$0xff]  ;;  %v15405_v39 = vld [vmem:[#allocation136_spill] sm:$0xff] }
 0x250   : > { %15401 = vst [vmem:[#allocation281_spill] sm:$0xff] %v9697_v52  ;;  %15402 = vst [vmem:[#allocation282_spill] sm:$0xff] %v9699_v61  ;;  %v9705_v9 = vmax.f32 %v1970_v13, 0.0  ;;  %v4209_v35 = vmul.f32 %v9659_v10, %v15404_v51  ;;  %v9718_v13 = vmul.f32 %v15389_v49, %v9682_v47  ;;  %v9722_v23 = vmul.f32 %v15393_v0, %v9682_v47  ;;  %v15413_v0 = vld [vmem:[#allocation35_spill] sm:$0xff]  ;;  %v2051_v51 = vpop.f32.mrf.mxu1 }
 0x251   : > { %15400 = vst [vmem:[#allocation280_spill] sm:$0xff] %v9693_v55  ;;  %v2830_v29 = vmul.f32 %v15385_v21, %v9693_v55  ;;  %v3303_v41 = vmul.f32 %v15386_v28, %v9693_v55  ;;  %v3776_v22 = vmul.f32 %v15387_v60, %v9693_v55  ;;  %v4347_v33 = vadd.f32 %v4346_v11, %v4208_v54  ;;  %v2319_v6 = vpop.f32.mrf.mxu0  ;;  %v15408_v21 = vld [vmem:[#allocation51_spill] sm:$0xff] }
 0x252   : > { %15403 = vst [vmem:[#allocation283_spill] sm:$0xff] %v9705_v9  ;;  %5070 = vperm.xlu1 %7083, %v15405_v39   ;;  %15406 = vst [vmem:[#allocation136_spill] sm:$0xff] %v9718_v13  ;;  %v2046_v38 = vadd.f32 %v2045_v46, %v15391_v36  ;;  %v2834_v28 = vmul.f32 %v15408_v21, %v9705_v9  ;;  %5114 = vperm.xlu0 %7084, %v9279_v20   ;;  %v15409_v39 = vld [vmem:[#allocation86_spill] sm:$0xff]  ;;  %v15412_v46 = vld [vmem:[#allocation139_spill] sm:$0xff]  ;;  %v9739_v20 = vpop.permute.xlu1 %4084 }
 0x253   : > { %15407 = vst [vmem:[#allocation284_spill] sm:$0xff] %v9722_v23  ;;  %v2973_v60 = vadd.f32 %v2972_v45, %v2830_v29  ;;  %v3446_v54 = vadd.f32 %v3445_v17, %v3303_v41  ;;  %v3919_v11 = vadd.f32 %v3918_v30, %v3776_v22  ;;  %v3307_v6 = vmul.f32 %v15409_v39, %v9705_v9  ;;  %v9730_v15 = vpop.f32.mrf.mxu0  ;;  %v15415_v30 = vld [vmem:[#allocation66_spill] sm:$0xff]  ;;  %v15417_v22 = vld [vmem:[#allocation147_spill] sm:$0xff] }
 0x254   : > { %15410 = vst [vmem:[#allocation285_spill] sm:$0xff] %v9730_v15  ;;  %v9734_v13 = vmul.f32 %v9329_v43, %v9682_v47  ;;  %v2937_v23 = vadd.f32 %v2936_v37, %v2834_v28  ;;  %v3780_v36 = vmul.f32 %v15412_v46, %v9705_v9  ;;  %v2050_v49 = vadd.f32 %v2049_v53, %v15413_v0  ;;  %v15418_v37 = vld [vmem:[#allocation104_spill] sm:$0xff] }
 0x255   : > { %15414 = vst [vmem:[#allocation287_spill] sm:$0xff] %v9739_v20  ;;  %v9743_v17 = vmul.f32 %v15415_v30, %v9699_v61  ;;  %v3410_v45 = vadd.f32 %v3409_v19, %v3307_v6  ;;  %v4384_v29 = vadd.f32 %v4383_v3, %v4209_v35  ;;  %v1972_v41 = vadd.f32 %v9331_v56, %v15398_v31  ;;  %v2322_v28 = vpop.f32.mrf.mxu0  ;;  %v15422_v19 = vld [vmem:[#allocation225_spill] sm:$0xff]  ;;  %v9761_v56 = vpop.permute.xlu0 %4104  ;;  %v15426_v6 = vld [vmem:[#allocation206_spill] sm:$0xff]  ;;  %v15435_v15 = vld [vmem:[#allocation36_spill] sm:$0xff] }
 0x256   : > { %15411 = vst [vmem:[#allocation286_spill] sm:$0xff] %v9734_v13  ;;  %5078 = vperm.xlu1 %7083, %v15417_v22   ;;  %v9750_v13 = vmul.f32 %v15418_v37, %v9699_v61  ;;  %v9754_v53 = vmul.f32 %v9214_v32, %v9699_v61  ;;  %v3883_v43 = vadd.f32 %v3882_v40, %v3780_v36  ;;  %v9759_v35 = vmax.f32 %v2046_v38, 0.0  ;;  %v2053_v36 = vpop.f32.mrf.mxu1  ;;  %v15429_v40 = vld [vmem:[#allocation213_spill] sm:$0xff] }
 0x257   : > { %15416 = vst [vmem:[#allocation288_spill] sm:$0xff] %v9743_v17  ;;  %v1974_v17 = vadd.f32 %v9352_v57, %v15421_v25  ;;  %5122 = vperm.xlu0 %7084, %v15422_v19   ;;  %15424 = vst [vmem:[#allocation290_spill] sm:$0xff] %v9761_v56  ;;  %v9763_v3 = vmax.f32 %v1972_v41, 0.0  ;;  %v4218_v22 = vmul.f32 %v9739_v20, %v15426_v6  ;;  %v9775_v19 = vpop.f32.mrf.mxu0 }
 0x258   : > { %15419 = vst [vmem:[#allocation147_spill] sm:$0xff] %v9750_v13  ;;  %15420 = vst [vmem:[#allocation289_spill] sm:$0xff] %v9754_v53  ;;  %v4348_v28 = vadd.f32 %v4347_v33, %v9572_v63  ;;  %v9768_v13 = vmax.f32 %v2050_v49, 0.0  ;;  %v4219_v57 = vmul.f32 %v9739_v20, %v15429_v40  ;;  %v4385_v38 = vadd.f32 %v4384_v29, %v9586_v44  ;;  %v15431_v33 = vld [vmem:[#allocation154_spill] sm:$0xff]  ;;  %v15432_v29 = vld [vmem:[#allocation52_spill] sm:$0xff] }
 0x259   : > { %15423 = vst [vmem:[#allocation225_spill] sm:$0xff] %v9759_v35  ;;  %15425 = vst [vmem:[#allocation291_spill] sm:$0xff] %v9763_v3  ;;  %v9770_v53 = vmax.f32 %v1974_v17, 0.0  ;;  %v2835_v41 = vmul.f32 %v15408_v21, %v9763_v3  ;;  %v3308_v31 = vmul.f32 %v15409_v39, %v9763_v3  ;;  %v3781_v63 = vmul.f32 %v15412_v46, %v9763_v3  ;;  %v15433_v21 = vld [vmem:[#allocation90_spill] sm:$0xff]  ;;  %v2327_v39 = vpop.f32.mrf.mxu0 }
 0x25a   : > { %15427 = vst [vmem:[#allocation292_spill] sm:$0xff] %v9768_v13  ;;  %15430 = vst [vmem:[#allocation294_spill] sm:$0xff] %v9775_v19  ;;  %v9783_v49 = vadd.f32 %v4348_v28, %v4218_v22  ;;  %5086 = vperm.xlu1 %7083, %v15431_v33   ;;  %v9788_v17 = vmul.f32 %v9761_v56, %v9553_v62  ;;  %v2052_v44 = vadd.f32 %v2051_v51, %v15413_v0  ;;  %v15434_v22 = vld [vmem:[#allocation123_spill] sm:$0xff]  ;;  %v2055_v51 = vpop.f32.mrf.mxu1 }
 0x25b   : > { %15428 = vst [vmem:[#allocation293_spill] sm:$0xff] %v9770_v53  ;;  %v2839_v40 = vmul.f32 %v15432_v29, %v9770_v53  ;;  %v3312_v6 = vmul.f32 %v15433_v21, %v9770_v53  ;;  %v2974_v7 = vadd.f32 %v2973_v60, %v2835_v41  ;;  %v3447_v19 = vadd.f32 %v3446_v54, %v3308_v31  ;;  %v9800_v0 = vpop.f32.mrf.mxu0  ;;  %v15439_v54 = vld [vmem:[#allocation75_spill] sm:$0xff] }
 0x25c   : > { %v3920_v46 = vadd.f32 %v3919_v11, %v3781_v63  ;;  %v3785_v28 = vmul.f32 %v15434_v22, %v9770_v53  ;;  %v2054_v62 = vadd.f32 %v2053_v36, %v15435_v15  ;;  %v9798_v52 = vadd.f32 %v4385_v38, %v4219_v57  ;;  %15436 = vst [vmem:[#allocation154_spill] sm:$0xff] %v9800_v0  ;;  %v15440_v11 = vld [vmem:[#allocation167_spill] sm:$0xff] }
 0x25d   : > { %v2938_v33 = vadd.f32 %v2937_v23, %v2839_v40  ;;  %v3411_v61 = vadd.f32 %v3410_v45, %v3312_v6  ;;  %v9804_v20 = vmul.f32 %v15415_v30, %v9759_v35  ;;  %v9808_v60 = vmul.f32 %v15418_v37, %v9759_v35  ;;  %v15443_v6 = vld [vmem:[#allocation132_spill] sm:$0xff]  ;;  %v15444_v40 = vld [vmem:[#allocation134_spill] sm:$0xff]  ;;  %v2330_v38 = vpop.f32.mrf.mxu0  ;;  %v15445_v41 = vld [vmem:[#allocation67_spill] sm:$0xff] }
 0x25e   : > { %v3884_v31 = vadd.f32 %v3883_v43, %v3785_v28  ;;  %v1976_v23 = vadd.f32 %v15439_v54, %v15421_v25  ;;  %5094 = vperm.xlu1 %7083, %v15440_v11   ;;  %v9815_v39 = vmul.f32 %v9214_v32, %v9759_v35  ;;  %v9817_v45 = vmax.f32 %v2052_v44, 0.0  ;;  %v15447_v43 = vld [vmem:[#allocation103_spill] sm:$0xff]  ;;  %v15449_v54 = vld [vmem:[#allocation164_spill] sm:$0xff]  ;;  %v15462_v30 = vld [vmem:[#allocation177_spill] sm:$0xff] }
 0x25f   : > { %15437 = vst [vmem:[#allocation295_spill] sm:$0xff] %v9804_v20  ;;  %15438 = vst [vmem:[#allocation296_spill] sm:$0xff] %v9808_v60  ;;  %v2939_v36 = vadd.f32 %v2938_v33, %v15443_v6  ;;  %v3412_v57 = vadd.f32 %v3411_v61, %v15444_v40  ;;  %v9823_v63 = vmul.f32 %v15445_v41, %v9768_v13  ;;  %v15451_v33 = vld [vmem:[#allocation145_spill] sm:$0xff]  ;;  %v15452_v61 = vld [vmem:[#allocation148_spill] sm:$0xff]  ;;  %v9838_v38 = vmax.f32 %v2054_v62, 0.0 }
 0x260   : > { %15441 = vst [vmem:[#allocation75_spill] sm:$0xff] %v9815_v39  ;;  %15442 = vst [vmem:[#allocation167_spill] sm:$0xff] %v9817_v45  ;;  %v9827_v28 = vmul.f32 %v15447_v43, %v9768_v13  ;;  %v3885_v11 = vadd.f32 %v3884_v31, %v15449_v54  ;;  %v9830_v60 = vmax.f32 %v1976_v23, 0.0  ;;  %v9834_v44 = vmul.f32 %v9761_v56, %v9624_v58  ;;  %v2092_v39 = vpop.f32.mrf.mxu1  ;;  %v15455_v20 = vld [vmem:[#allocation151_spill] sm:$0xff]  ;;  %v15457_v54 = vld [vmem:[#allocation172_spill] sm:$0xff] }
 0x261   : > { %15446 = vst [vmem:[#allocation132_spill] sm:$0xff] %v9823_v63  ;;  %v2940_v6 = vadd.f32 %v2939_v36, %v15451_v33  ;;  %v3413_v40 = vadd.f32 %v3412_v57, %v15452_v61  ;;  %15453 = vst [vmem:[#allocation145_spill] sm:$0xff] %v9838_v38  ;;  %v9840_v63 = vpop.f32.mrf.mxu0  ;;  %v9854_v62 = vmul.f32 %v15445_v41, %v9817_v45  ;;  %v15460_v57 = vld [vmem:[#allocation157_spill] sm:$0xff]  ;;  %v15461_v33 = vld [vmem:[#allocation160_spill] sm:$0xff] }
 0x262   : > { %15448 = vst [vmem:[#allocation134_spill] sm:$0xff] %v9827_v28  ;;  %15450 = vst [vmem:[#allocation164_spill] sm:$0xff] %v9830_v60  ;;  %v3886_v32 = vadd.f32 %v3885_v11, %v15455_v20  ;;  %v9843_v28 = vpop.permute.xlu0 %4112  ;;  %v2840_v31 = vmul.f32 %v15432_v29, %v9830_v60  ;;  %v3313_v23 = vmul.f32 %v15433_v21, %v9830_v60  ;;  %5102 = vperm.xlu1 %7083, %v15457_v54   ;;  %v15463_v25 = vld [vmem:[#allocation168_spill] sm:$0xff]  ;;  %v15464_v56 = vld [vmem:[#allocation173_spill] sm:$0xff] }
 0x263   : > { %15454 = vst [vmem:[#allocation148_spill] sm:$0xff] %v9840_v63  ;;  %15456 = vst [vmem:[#allocation151_spill] sm:$0xff] %v9843_v28  ;;  %v3786_v36 = vmul.f32 %v15434_v22, %v9830_v60  ;;  %v9858_v20 = vmul.f32 %v15447_v43, %v9817_v45  ;;  %v2941_v11 = vadd.f32 %v2940_v6, %v15460_v57  ;;  %v2335_v37 = vpop.f32.mrf.mxu0  ;;  %v2094_v6 = vpop.f32.mrf.mxu1  ;;  %v15466_v57 = vld [vmem:[#allocation138_spill] sm:$0xff]  ;;  %v15524_v35 = vld [vmem:[#allocation253_spill] sm:$0xff] }
 0x264   : > { %15458 = vst [vmem:[#allocation172_spill] sm:$0xff] %v9854_v62  ;;  %v3414_v61 = vadd.f32 %v3413_v40, %v15461_v33  ;;  %v3887_v58 = vadd.f32 %v3886_v32, %v15462_v30  ;;  %v2975_v21 = vadd.f32 %v2974_v7, %v2840_v31  ;;  %v3448_v29 = vadd.f32 %v3447_v19, %v3313_v23  ;;  %v15465_v40 = vld [vmem:[#allocation175_spill] sm:$0xff]  ;;  %v15467_v7 = vld [vmem:[#allocation140_spill] sm:$0xff]  ;;  %v15474_v41 = vld [vmem:[#allocation194_spill] sm:$0xff] }
 0x265   : > { %15459 = vst [vmem:[#allocation297_spill] sm:$0xff] %v9858_v20  ;;  %v3921_v22 = vadd.f32 %v3920_v46, %v3786_v36  ;;  %v2942_v54 = vadd.f32 %v2941_v11, %v15463_v25  ;;  %v9867_v62 = vmul.f32 %v9843_v28, %v9705_v9  ;;  %v9871_v20 = vmul.f32 %v9843_v28, %v9763_v3  ;;  %v15468_v46 = vld [vmem:[#allocation165_spill] sm:$0xff]  ;;  %v9877_v25 = vpop.permute.xlu1 %4092  ;;  %v15471_v31 = vld [vmem:[#allocation187_spill] sm:$0xff]  ;;  %v15472_v36 = vld [vmem:[#allocation188_spill] sm:$0xff] }
 0x266   : > { %v3415_v63 = vadd.f32 %v3414_v61, %v15464_v56  ;;  %v3888_v37 = vadd.f32 %v3887_v58, %v15465_v40  ;;  %v2976_v32 = vadd.f32 %v2975_v21, %v15466_v57  ;;  %v3449_v30 = vadd.f32 %v3448_v29, %v15467_v7  ;;  %15469 = vst [vmem:[#allocation157_spill] sm:$0xff] %v9877_v25  ;;  %v15470_v56 = vld [vmem:[#allocation181_spill] sm:$0xff]  ;;  %v15473_v61 = vld [vmem:[#allocation6_spill] sm:$0xff]  ;;  %v15475_v40 = vld [vmem:[#allocation152_spill] sm:$0xff] }
 0x267   : > { %v3922_v19 = vadd.f32 %v3921_v22, %v15468_v46  ;;  %5110 = vperm.xlu1 %7083, %v15470_v56   ;;  %v2943_v23 = vadd.f32 %v2942_v54, %v15471_v31  ;;  %v2056_v33 = vadd.f32 %v2055_v51, %v15435_v15  ;;  %v2093_v43 = vadd.f32 %v2092_v39, %v15473_v61  ;;  %v15476_v57 = vld [vmem:[#allocation155_spill] sm:$0xff]  ;;  %v15477_v7 = vld [vmem:[#allocation156_spill] sm:$0xff]  ;;  %v15480_v56 = vld [vmem:[#allocation201_spill] sm:$0xff]  ;;  %v2096_v31 = vpop.f32.mrf.mxu1 }
 0x268   : > { %v3416_v11 = vadd.f32 %v3415_v63, %v15472_v36  ;;  %v3889_v58 = vadd.f32 %v3888_v37, %v15474_v41  ;;  %v2977_v21 = vadd.f32 %v2976_v32, %v15475_v40  ;;  %v3450_v29 = vadd.f32 %v3449_v30, %v15476_v57  ;;  %v15478_v46 = vld [vmem:[#allocation200_spill] sm:$0xff]  ;;  %v15482_v63 = vld [vmem:[#allocation243_spill] sm:$0xff]  ;;  %v9898_v41 = vpop.f32.mrf.mxu0  ;;  %v15485_v37 = vld [vmem:[#allocation202_spill] sm:$0xff] }
 0x269   : > { %v3923_v22 = vadd.f32 %v3922_v19, %v15477_v7  ;;  %v9889_v3 = vadd.f32 %v2943_v23, %v15478_v46  ;;  %v2286_v54 = vadd.f32 %v15482_v63, %v15473_v61  ;;  %v15483_v51 = vld [vmem:[#allocation235_spill] sm:$0xff]  ;;  %15484 = vst [vmem:[#allocation168_spill] sm:$0xff] %v9898_v41  ;;  %v15487_v30 = vld [vmem:[#allocation161_spill] sm:$0xff]  ;;  %v15488_v36 = vld [vmem:[#allocation162_spill] sm:$0xff]  ;;  %v9907_v7 = vmax.f32 %v2093_v43, 0.0  ;;  %v2098_v28 = vpop.f32.mrf.mxu1 }
 0x26a   : > { %v9892_v9 = vadd.f32 %v3416_v11, %v15480_v56  ;;  %v4228_v39 = vmul.f32 %v9877_v25, %v15483_v51  ;;  %v9901_v32 = vadd.f32 %v3889_v58, %v15485_v37  ;;  %v2978_v19 = vadd.f32 %v2977_v21, %v15487_v30  ;;  %v15489_v40 = vld [vmem:[#allocation178_spill] sm:$0xff]  ;;  %v15490_v11 = vld [vmem:[#allocation191_spill] sm:$0xff]  ;;  %v2338_v37 = vpop.f32.mrf.mxu0  ;;  %v15494_v30 = vld [vmem:[#allocation184_spill] sm:$0xff] }
 0x26b   : > { %15479 = vst [vmem:[#allocation160_spill] sm:$0xff] %v9889_v3  ;;  %v3451_v23 = vadd.f32 %v3450_v29, %v15488_v36  ;;  %v3924_v57 = vadd.f32 %v3923_v22, %v15489_v40  ;;  %5118 = vperm.xlu1 %7083, %v15490_v11   ;;  %15491 = vst [vmem:[#allocation175_spill] sm:$0xff] %v9907_v7  ;;  %v15492_v46 = vld [vmem:[#allocation238_spill] sm:$0xff]  ;;  %v4350_v63 = vadd.f32 %v9783_v49, %v9618_v42  ;;  %v15498_v3 = vld [vmem:[#allocation5_spill] sm:$0xff] }
 0x26c   : > { %15481 = vst [vmem:[#allocation177_spill] sm:$0xff] %v9892_v9  ;;  %15486 = vst [vmem:[#allocation173_spill] sm:$0xff] %v9901_v32  ;;  %v4229_v56 = vmul.f32 %v9877_v25, %v15492_v46  ;;  %v4387_v58 = vadd.f32 %v9798_v52, %v9622_v1  ;;  %v15493_v32 = vld [vmem:[#allocation183_spill] sm:$0xff]  ;;  %v15495_v36 = vld [vmem:[#allocation186_spill] sm:$0xff]  ;;  %v9918_v40 = vmax.f32 %v2056_v33, 0.0  ;;  %v9920_v43 = vmax.f32 %v2286_v54, 0.0  ;;  %v9987_v25 = vpop.f32.mrf.mxu0 }
 0x26d   : > { %v2979_v21 = vadd.f32 %v2978_v19, %v15493_v32  ;;  %v3452_v29 = vadd.f32 %v3451_v23, %v15494_v30  ;;  %v3925_v22 = vadd.f32 %v3924_v57, %v15495_v36  ;;  %v4351_v11 = vadd.f32 %v4350_v63, %v4228_v39  ;;  %v15499_v42 = vld [vmem:[#allocation192_spill] sm:$0xff]  ;;  %v15500_v46 = vld [vmem:[#allocation193_spill] sm:$0xff]  ;;  %v15501_v52 = vld [vmem:[#allocation199_spill] sm:$0xff]  ;;  %15525 = vst [vmem:[#allocation156_spill] sm:$0xff] %v9987_v25 }
 0x26e   : > { %15496 = vst [vmem:[#allocation138_spill] sm:$0xff] %v9918_v40  ;;  %15497 = vst [vmem:[#allocation140_spill] sm:$0xff] %v9920_v43  ;;  %v4388_v9 = vadd.f32 %v4387_v58, %v4229_v56  ;;  %v2097_v15 = vadd.f32 %v2096_v31, %v15498_v3  ;;  %v15502_v32 = vld [vmem:[#allocation246_spill] sm:$0xff]  ;;  %v15504_v33 = vld [vmem:[#allocation37_spill] sm:$0xff]  ;;  %v9933_v56 = vpop.permute.xlu0 %4120  ;;  %v2095_v31 = vadd.f32 %v2094_v6, %v15473_v61  ;;  %v9957_v61 = vpop.permute.xlu1 %4100 }
 0x26f   : > { %v2980_v49 = vadd.f32 %v2979_v21, %v15499_v42  ;;  %v3453_v1 = vadd.f32 %v3452_v29, %v15500_v46  ;;  %v3926_v37 = vadd.f32 %v3925_v22, %v15501_v52  ;;  %v2289_v19 = vadd.f32 %v15502_v32, %v15498_v3  ;;  %v15503_v23 = vld [vmem:[#allocation198_spill] sm:$0xff]  ;;  %v15505_v39 = vld [vmem:[#allocation69_spill] sm:$0xff]  ;;  %15506 = vst [vmem:[#allocation165_spill] sm:$0xff] %v9933_v56  ;;  %v15512_v29 = vld [vmem:[#allocation211_spill] sm:$0xff]  ;;  %v2343_v34 = vpop.f32.mrf.mxu0 }
 0x270   : > { %5126 = vperm.xlu1 %7083, %v15503_v23   ;;  %v2766_v54 = vmul.f32 %v15504_v33, %v9907_v7  ;;  %v3239_v57 = vmul.f32 %v15505_v39, %v9907_v7  ;;  %v9936_v63 = vmax.f32 %v2097_v15, 0.0  ;;  %v15508_v46 = vld [vmem:[#allocation209_spill] sm:$0xff]  ;;  %v15510_v21 = vld [vmem:[#allocation210_spill] sm:$0xff]  ;;  %v4185_v32 = vmul.f32 %v9456_v50, %v9907_v7  ;;  %15516 = vst [vmem:[#allocation152_spill] sm:$0xff] %v9957_v61  ;;  %v15521_v51 = vld [vmem:[#allocation108_spill] sm:$0xff] }
 0x271   : > { %v9939_v58 = vadd.f32 %v2980_v49, %v15508_v46  ;;  %v9942_v30 = vadd.f32 %v3453_v1, %v15510_v21  ;;  %v9945_v36 = vadd.f32 %v3926_v37, %v15512_v29  ;;  %v9947_v22 = vmax.f32 %v2289_v19, 0.0  ;;  %v15515_v42 = vld [vmem:[#allocation105_spill] sm:$0xff]  ;;  %v2102_v49 = vpop.f32.mrf.mxu1  ;;  %v15517_v19 = vld [vmem:[#allocation124_spill] sm:$0xff]  ;;  %v15518_v46 = vld [vmem:[#allocation127_spill] sm:$0xff] }
 0x272   : > { %15507 = vst [vmem:[#allocation181_spill] sm:$0xff] %v9936_v63  ;;  %v3712_v52 = vmul.f32 %v15515_v42, %v9907_v7  ;;  %v2768_v15 = vmul.f32 %v15504_v33, %v9920_v43  ;;  %v3241_v6 = vmul.f32 %v15505_v39, %v9920_v43  ;;  %v3714_v1 = vmul.f32 %v15515_v42, %v9920_v43  ;;  %v15519_v29 = vld [vmem:[#allocation38_spill] sm:$0xff]  ;;  %v15522_v40 = vld [vmem:[#allocation232_spill] sm:$0xff] }
 0x273   : > { %15509 = vst [vmem:[#allocation187_spill] sm:$0xff] %v9939_v58  ;;  %15511 = vst [vmem:[#allocation188_spill] sm:$0xff] %v9942_v30  ;;  %v4187_v37 = vmul.f32 %v9456_v50, %v9920_v43  ;;  %v9965_v23 = vmul.f32 %v9933_v56, %v15517_v19  ;;  %v9969_v21 = vmul.f32 %v9933_v56, %v15518_v46  ;;  %v15520_v30 = vld [vmem:[#allocation70_spill] sm:$0xff]  ;;  %v9979_v0 = vmax.f32 %v2095_v31, 0.0  ;;  %v2104_v16 = vpop.f32.mrf.mxu1 }
 0x274   : > { %15513 = vst [vmem:[#allocation6_spill] sm:$0xff] %v9945_v36  ;;  %15514 = vst [vmem:[#allocation194_spill] sm:$0xff] %v9947_v22  ;;  %v2773_v36 = vmul.f32 %v15519_v29, %v9947_v22  ;;  %v3246_v58 = vmul.f32 %v15520_v30, %v9947_v22  ;;  %v3719_v41 = vmul.f32 %v15521_v51, %v9947_v22 }
 0x275   : > { %v4192_v38 = vmul.f32 %v15522_v40, %v9947_v22  ;;  %15523 = vst [vmem:[#allocation155_spill] sm:$0xff] %v9979_v0  ;;  %v2771_v19 = vmul.f32 %v15519_v29, %v9936_v63  ;;  %v4238_v46 = vmul.f32 %v9957_v61, %v15524_v35  ;;  %v4239_v56 = vmul.f32 %v9957_v61, %v9544_v48 }
 0x276   : > { %v3072_v43 = vadd.f32 %v2773_v36, %v2768_v15  ;;  %v3545_v7 = vadd.f32 %v3246_v58, %v3241_v6  ;;  %v4018_v45 = vadd.f32 %v3719_v41, %v3714_v1  ;;  %v3244_v31 = vmul.f32 %v15520_v30, %v9936_v63  ;;  %v15526_v58 = vld [vmem:[#allocation7_spill] sm:$0xff] }
 0x277   : > { %v4491_v13 = vadd.f32 %v4192_v38, %v4187_v37  ;;  %v3717_v22 = vmul.f32 %v15521_v51, %v9936_v63  ;;  %v4352_v47 = vadd.f32 %v4351_v11, %v9691_v12  ;;  %v4389_v35 = vadd.f32 %v4388_v9, %v9703_v8  ;;  %v15527_v38 = vld [vmem:[#allocation81_spill] sm:$0xff]  ;;  %v10005_v8 = vpop.permute.xlu0 %4128  ;;  %v2106_v37 = vpop.f32.mrf.mxu1 }
 0x278   : > { %v4190_v48 = vmul.f32 %v15522_v40, %v9936_v63  ;;  %v2099_v36 = vadd.f32 %v2098_v28, %v15498_v3  ;;  %v2103_v41 = vadd.f32 %v2102_v49, %v15526_v58  ;;  %v2294_v15 = vadd.f32 %v15527_v38, %v15526_v58  ;;  %15528 = vst [vmem:[#allocation200_spill] sm:$0xff] %v10005_v8  ;;  %v10013_v49 = vpop.permute.xlu1 %4108  ;;  %v10071_v63 = vpop.f32.mrf.mxu0 }
 0x279   : > { %v2767_v6 = vmul.f32 %v15504_v33, %v9979_v0  ;;  %v3240_v1 = vmul.f32 %v15505_v39, %v9979_v0  ;;  %v4353_v12 = vadd.f32 %v4352_v47, %v4238_v46  ;;  %v4390_v11 = vadd.f32 %v4389_v35, %v4239_v56  ;;  %15530 = vst [vmem:[#allocation243_spill] sm:$0xff] %v10013_v49  ;;  %v15532_v46 = vld [vmem:[#allocation149_spill] sm:$0xff] }
 0x27a   : > { %v3713_v34 = vmul.f32 %v15515_v42, %v9979_v0  ;;  %v4186_v9 = vmul.f32 %v9456_v50, %v9979_v0  ;;  %v2998_v3 = vadd.f32 %v2771_v19, %v2766_v54  ;;  %v10011_v28 = vmax.f32 %v2099_v36, 0.0  ;;  %v15535_v36 = vld [vmem:[#allocation150_spill] sm:$0xff]  ;;  %15542 = vst [vmem:[#allocation183_spill] sm:$0xff] %v10071_v63 }
 0x27b   : > { %v3471_v33 = vadd.f32 %v3244_v31, %v3239_v57  ;;  %v10015_v38 = vmax.f32 %v2103_v41, 0.0  ;;  %v4354_v47 = vadd.f32 %v4353_v12, %v9788_v17  ;;  %v4391_v35 = vadd.f32 %v4390_v11, %v9834_v44  ;;  %v15534_v31 = vld [vmem:[#allocation8_spill] sm:$0xff]  ;;  %v15537_v41 = vld [vmem:[#allocation71_spill] sm:$0xff]  ;;  %v15538_v12 = vld [vmem:[#allocation110_spill] sm:$0xff] }
 0x27c   : > { %15529 = vst [vmem:[#allocation201_spill] sm:$0xff] %v10011_v28  ;;  %v3944_v39 = vadd.f32 %v3717_v22, %v3712_v52  ;;  %v4417_v56 = vadd.f32 %v4190_v48, %v4185_v32  ;;  %v10021_v42 = vmul.f32 %v10005_v8, %v15532_v46  ;;  %v10023_v50 = vmax.f32 %v2294_v15, 0.0 }
 0x27d   : > { %15531 = vst [vmem:[#allocation202_spill] sm:$0xff] %v10015_v38  ;;  %v4248_v54 = vmul.f32 %v10013_v49, %v9636_v24  ;;  %v4249_v57 = vmul.f32 %v10013_v49, %v9693_v55  ;;  %v2105_v19 = vadd.f32 %v2104_v16, %v15526_v58  ;;  %v2107_v17 = vadd.f32 %v2106_v37, %v15534_v31  ;;  %v15536_v16 = vld [vmem:[#allocation39_spill] sm:$0xff]  ;;  %v10057_v37 = vpop.permute.xlu0 %4136 }
 0x27e   : > { %15533 = vst [vmem:[#allocation161_spill] sm:$0xff] %v10023_v50  ;;  %v10033_v44 = vmul.f32 %v10005_v8, %v15535_v36  ;;  %v2772_v48 = vmul.f32 %v15519_v29, %v10011_v28  ;;  %v3245_v22 = vmul.f32 %v15520_v30, %v10011_v28  ;;  %v3718_v52 = vmul.f32 %v15521_v51, %v10011_v28 }
 0x27f   : > { %v4191_v32 = vmul.f32 %v15522_v40, %v10011_v28  ;;  %v2776_v58 = vmul.f32 %v15536_v16, %v10015_v38  ;;  %v3249_v15 = vmul.f32 %v15537_v41, %v10015_v38  ;;  %v3722_v11 = vmul.f32 %v15538_v12, %v10015_v38  ;;  %15539 = vst [vmem:[#allocation162_spill] sm:$0xff] %v10057_v37 }
 0x280   : > { %v2778_v29 = vmul.f32 %v15536_v16, %v10023_v50  ;;  %v3251_v30 = vmul.f32 %v15537_v41, %v10023_v50  ;;  %v3724_v51 = vmul.f32 %v15538_v12, %v10023_v50  ;;  %v4197_v40 = vmul.f32 %v9505_v59, %v10023_v50 }
 0x281   : > { %v4355_v36 = vadd.f32 %v4354_v47, %v4248_v54  ;;  %v4392_v46 = vadd.f32 %v4391_v35, %v4249_v57  ;;  %v10059_v8 = vmax.f32 %v2105_v19, 0.0  ;;  %v10061_v55 = vmax.f32 %v2107_v17, 0.0  ;;  %v15543_v47 = vld [vmem:[#allocation179_spill] sm:$0xff]  ;;  %v15544_v54 = vld [vmem:[#allocation182_spill] sm:$0xff]  ;;  %v10083_v17 = vpop.permute.xlu1 %4116 }
 0x282   : > { %v10063_v24 = vadd.f32 %v3072_v43, %v2778_v29  ;;  %v10065_v25 = vadd.f32 %v3545_v7, %v3251_v30  ;;  %v10067_v49 = vadd.f32 %v4018_v45, %v3724_v51  ;;  %v10069_v28 = vadd.f32 %v4491_v13, %v4197_v40  ;;  %v2108_v7 = vpop.f32.mrf.mxu1  ;;  %15545 = vst [vmem:[#allocation184_spill] sm:$0xff] %v10083_v17  ;;  %v2346_v29 = vpop.f32.mrf.mxu0 }
 0x283   : > { %15540 = vst [vmem:[#allocation178_spill] sm:$0xff] %v10059_v8  ;;  %15541 = vst [vmem:[#allocation191_spill] sm:$0xff] %v10061_v55  ;;  %v3035_v61 = vadd.f32 %v2772_v48, %v2767_v6  ;;  %v4195_v50 = vmul.f32 %v9505_v59, %v10015_v38  ;;  %v10077_v35 = vmul.f32 %v10057_v37, %v15543_v47 }
 0x284   : > { %v10081_v43 = vmul.f32 %v10057_v37, %v15544_v54  ;;  %v3508_v57 = vadd.f32 %v3245_v22, %v3240_v1  ;;  %v3981_v45 = vadd.f32 %v3718_v52, %v3713_v34  ;;  %v4454_v19 = vadd.f32 %v4191_v32, %v4186_v9  ;;  %v15546_v34 = vld [vmem:[#allocation40_spill] sm:$0xff] }
 0x285   : > { %v2999_v13 = vadd.f32 %v2998_v3, %v2776_v58  ;;  %v3472_v6 = vadd.f32 %v3471_v33, %v3249_v15  ;;  %v3945_v48 = vadd.f32 %v3944_v39, %v3722_v11  ;;  %v2777_v30 = vmul.f32 %v15536_v16, %v10059_v8  ;;  %v15547_v3 = vld [vmem:[#allocation73_spill] sm:$0xff]  ;;  %v2112_v16 = vpop.f32.mrf.mxu1 }
 0x286   : > { %v3250_v51 = vmul.f32 %v15537_v41, %v10059_v8  ;;  %v3723_v40 = vmul.f32 %v15538_v12, %v10059_v8  ;;  %v4196_v1 = vmul.f32 %v9505_v59, %v10059_v8  ;;  %v2781_v9 = vmul.f32 %v15546_v34, %v10061_v55  ;;  %v15548_v59 = vld [vmem:[#allocation107_spill] sm:$0xff]  ;;  %v15552_v8 = vld [vmem:[#allocation9_spill] sm:$0xff] }
 0x287   : > { %v3254_v22 = vmul.f32 %v15547_v3, %v10061_v55  ;;  %v2297_v33 = vadd.f32 %v9507_v26, %v15534_v31  ;;  %v4258_v39 = vmul.f32 %v10083_v17, %v9770_v53  ;;  %v4259_v52 = vmul.f32 %v10083_v17, %v9830_v60 }
 0x288   : > { %v4356_v32 = vadd.f32 %v4355_v36, %v9867_v62  ;;  %v3727_v58 = vmul.f32 %v15548_v59, %v10061_v55  ;;  %v4200_v41 = vmul.f32 %v9580_v14, %v10061_v55  ;;  %v4393_v15 = vadd.f32 %v4392_v46, %v9871_v20  ;;  %v10112_v62 = vpop.permute.xlu0 %4144  ;;  %v10117_v20 = vpop.permute.xlu1 %4124 }
 0x289   : > { %v2109_v12 = vadd.f32 %v2108_v7, %v15534_v31  ;;  %v4418_v26 = vadd.f32 %v4417_v56, %v4195_v50  ;;  %v3036_v11 = vadd.f32 %v3035_v61, %v2777_v30  ;;  %v10110_v29 = vmax.f32 %v2297_v33, 0.0  ;;  %15550 = vst [vmem:[#allocation5_spill] sm:$0xff] %v10112_v62  ;;  %15553 = vst [vmem:[#allocation193_spill] sm:$0xff] %v10117_v20  ;;  %v2114_v46 = vpop.f32.mrf.mxu1 }
 0x28a   : > { %v4357_v54 = vadd.f32 %v4356_v32, %v4258_v39  ;;  %v3509_v47 = vadd.f32 %v3508_v57, %v3250_v51  ;;  %v3982_v37 = vadd.f32 %v3981_v45, %v3723_v40  ;;  %v4394_v60 = vadd.f32 %v4393_v15, %v4259_v52  ;;  %v15556_v51 = vld [vmem:[#allocation135_spill] sm:$0xff] }
 0x28b   : > { %15549 = vst [vmem:[#allocation186_spill] sm:$0xff] %v10110_v29  ;;  %v10114_v36 = vmax.f32 %v2109_v12, 0.0  ;;  %v4455_v53 = vadd.f32 %v4454_v19, %v4196_v1  ;;  %v3000_v17 = vadd.f32 %v2999_v13, %v2781_v9  ;;  %v3473_v63 = vadd.f32 %v3472_v6, %v3254_v22  ;;  %v15554_v19 = vld [vmem:[#allocation205_spill] sm:$0xff]  ;;  %v15555_v6 = vld [vmem:[#allocation215_spill] sm:$0xff]  ;;  %v10143_v1 = vpop.f32.mrf.mxu0  ;;  %v2116_v52 = vpop.f32.mrf.mxu1  ;;  %v15563_v12 = vld [vmem:[#allocation10_spill] sm:$0xff] }
 0x28c   : > { %v2113_v38 = vadd.f32 %v2112_v16, %v15552_v8  ;;  %v3946_v56 = vadd.f32 %v3945_v48, %v3727_v58  ;;  %v4419_v61 = vadd.f32 %v4418_v26, %v4200_v41  ;;  %v2783_v50 = vmul.f32 %v15546_v34, %v10110_v29  ;;  %15557 = vst [vmem:[#allocation199_spill] sm:$0xff] %v10143_v1  ;;  %v15560_v16 = vld [vmem:[#allocation141_spill] sm:$0xff] }
 0x28d   : > { %15551 = vst [vmem:[#allocation192_spill] sm:$0xff] %v10114_v36  ;;  %v2302_v31 = vadd.f32 %v9548_v4, %v15552_v8  ;;  %v3256_v7 = vmul.f32 %v15547_v3, %v10110_v29  ;;  %v3729_v57 = vmul.f32 %v15548_v59, %v10110_v29  ;;  %v4202_v45 = vmul.f32 %v9580_v14, %v10110_v29  ;;  %v2351_v41 = vpop.f32.mrf.mxu0 }
 0x28e   : > { %v10131_v13 = vmul.f32 %v10112_v62, %v15554_v19  ;;  %v10135_v48 = vmul.f32 %v10112_v62, %v15555_v6  ;;  %v2782_v4 = vmul.f32 %v15546_v34, %v10114_v36  ;;  %v3255_v30 = vmul.f32 %v15547_v3, %v10114_v36  ;;  %v15569_v19 = vld [vmem:[#allocation231_spill] sm:$0xff] }
 0x28f   : > { %v4268_v40 = vmul.f32 %v10117_v20, %v15556_v51  ;;  %v3728_v9 = vmul.f32 %v15548_v59, %v10114_v36  ;;  %v10147_v22 = vmax.f32 %v2113_v38, 0.0  ;;  %v4358_v33 = vadd.f32 %v4357_v54, %v9965_v23  ;;  %v10161_v54 = vpop.permute.xlu0 %4152 }
 0x290   : > { %v4395_v39 = vadd.f32 %v4394_v60, %v9969_v21  ;;  %v3074_v34 = vadd.f32 %v10063_v24, %v2783_v50  ;;  %v4201_v3 = vmul.f32 %v9580_v14, %v10114_v36  ;;  %v10154_v32 = vmax.f32 %v2302_v31, 0.0  ;;  %15561 = vst [vmem:[#allocation37_spill] sm:$0xff] %v10161_v54  ;;  %v15562_v14 = vld [vmem:[#allocation41_spill] sm:$0xff]  ;;  %v15564_v31 = vld [vmem:[#allocation72_spill] sm:$0xff] }
 0x291   : > { %15558 = vst [vmem:[#allocation246_spill] sm:$0xff] %v10147_v22  ;;  %v4269_v58 = vmul.f32 %v10117_v20, %v15560_v16  ;;  %v3547_v59 = vadd.f32 %v10065_v25, %v3256_v7  ;;  %v4020_v38 = vadd.f32 %v10067_v49, %v3729_v57  ;;  %v4493_v23 = vadd.f32 %v10069_v28, %v4202_v45  ;;  %v15565_v25 = vld [vmem:[#allocation112_spill] sm:$0xff]  ;;  %v15566_v28 = vld [vmem:[#allocation245_spill] sm:$0xff]  ;;  %v10193_v16 = vpop.permute.xlu1 %4132 }
 0x292   : > { %15559 = vst [vmem:[#allocation198_spill] sm:$0xff] %v10154_v32  ;;  %v2115_v60 = vadd.f32 %v2114_v46, %v15552_v8  ;;  %v3037_v24 = vadd.f32 %v3036_v11, %v2782_v4  ;;  %v3510_v21 = vadd.f32 %v3509_v47, %v3255_v30  ;;  %v2786_v15 = vmul.f32 %v15562_v14, %v10147_v22  ;;  %v2118_v30 = vpop.f32.mrf.mxu1 }
 0x293   : > { %v2117_v26 = vadd.f32 %v2116_v52, %v15563_v12  ;;  %v3983_v50 = vadd.f32 %v3982_v37, %v3728_v9  ;;  %v3259_v41 = vmul.f32 %v15564_v31, %v10147_v22  ;;  %v3732_v49 = vmul.f32 %v15565_v25, %v10147_v22  ;;  %v15568_v52 = vld [vmem:[#allocation227_spill] sm:$0xff]  ;;  %15571 = vst [vmem:[#allocation210_spill] sm:$0xff] %v10193_v16 }
 0x294   : > { %v4205_v7 = vmul.f32 %v15566_v28, %v10147_v22  ;;  %v2788_v8 = vmul.f32 %v15562_v14, %v10154_v32  ;;  %v3261_v47 = vmul.f32 %v15564_v31, %v10154_v32  ;;  %v3734_v11 = vmul.f32 %v15565_v25, %v10154_v32 }
 0x295   : > { %v4207_v37 = vmul.f32 %v15566_v28, %v10154_v32  ;;  %v4456_v46 = vadd.f32 %v4455_v53, %v4201_v3  ;;  %v4359_v57 = vadd.f32 %v4358_v33, %v4268_v40  ;;  %v4396_v45 = vadd.f32 %v4395_v39, %v4269_v58  ;;  %v10197_v39 = vpop.permute.xlu0 %4160 }
 0x296   : > { %v10181_v4 = vmax.f32 %v2115_v60, 0.0  ;;  %v3001_v9 = vadd.f32 %v3000_v17, %v2786_v15  ;;  %v10185_v6 = vmul.f32 %v10161_v54, %v15568_v52  ;;  %v10189_v62 = vmul.f32 %v10161_v54, %v15569_v19  ;;  %15572 = vst [vmem:[#allocation211_spill] sm:$0xff] %v10197_v39  ;;  %v15573_v54 = vld [vmem:[#allocation159_spill] sm:$0xff] }
 0x297   : > { %v10191_v20 = vmax.f32 %v2117_v26, 0.0  ;;  %v3474_v51 = vadd.f32 %v3473_v63, %v3259_v41  ;;  %v3947_v53 = vadd.f32 %v3946_v56, %v3732_v49  ;;  %v4420_v40 = vadd.f32 %v4419_v61, %v4205_v7  ;;  %v15574_v56 = vld [vmem:[#allocation176_spill] sm:$0xff]  ;;  %v2122_v41 = vpop.f32.mrf.mxu1 }
 0x298   : > { %15567 = vst [vmem:[#allocation69_spill] sm:$0xff] %v10181_v4  ;;  %v2305_v33 = vadd.f32 %v9582_v2, %v15563_v12  ;;  %v3075_v17 = vadd.f32 %v3074_v34, %v2788_v8  ;;  %v3548_v3 = vadd.f32 %v3547_v59, %v3261_v47  ;;  %v4021_v58 = vadd.f32 %v4020_v38, %v3734_v11  ;;  %v10207_v2 = vpop.f32.mrf.mxu0  ;;  %v15576_v38 = vld [vmem:[#allocation42_spill] sm:$0xff]  ;;  %v15579_v11 = vld [vmem:[#allocation109_spill] sm:$0xff] }
 0x299   : > { %15570 = vst [vmem:[#allocation209_spill] sm:$0xff] %v10191_v20  ;;  %v4494_v60 = vadd.f32 %v4493_v23, %v4207_v37  ;;  %v2787_v15 = vmul.f32 %v15562_v14, %v10181_v4  ;;  %v3260_v26 = vmul.f32 %v15564_v31, %v10181_v4  ;;  %v4278_v63 = vmul.f32 %v10193_v16, %v15573_v54  ;;  %v15577_v31 = vld [vmem:[#allocation76_spill] sm:$0xff]  ;;  %v10239_v54 = vpop.permute.xlu1 %4140 }
 0x29a   : > { %v4279_v61 = vmul.f32 %v10193_v16, %v15574_v56  ;;  %15575 = vst [vmem:[#allocation105_spill] sm:$0xff] %v10207_v2  ;;  %v3733_v34 = vmul.f32 %v15565_v25, %v10181_v4  ;;  %v4206_v59 = vmul.f32 %v15566_v28, %v10181_v4  ;;  %v2791_v23 = vmul.f32 %v15576_v38, %v10191_v20  ;;  %v2354_v25 = vpop.f32.mrf.mxu0  ;;  %v15609_v4 = vld [vmem:[#allocation13_spill] sm:$0xff] }
 0x29b   : > { %v10217_v14 = vmul.f32 %v10197_v39, %v9479_v5  ;;  %v3264_v49 = vmul.f32 %v15577_v31, %v10191_v20  ;;  %v10221_v7 = vmax.f32 %v2305_v33, 0.0  ;;  %v4360_v8 = vadd.f32 %v4359_v57, %v10021_v42  ;;  %v15580_v5 = vld [vmem:[#allocation11_spill] sm:$0xff]  ;;  %15582 = vst [vmem:[#allocation108_spill] sm:$0xff] %v10239_v54 }
 0x29c   : > { %v4397_v47 = vadd.f32 %v4396_v45, %v10033_v44  ;;  %v3737_v28 = vmul.f32 %v15579_v11, %v10191_v20  ;;  %v4210_v37 = vmul.f32 %v9659_v10, %v10191_v20  ;;  %v2119_v19 = vadd.f32 %v2118_v30, %v15563_v12  ;;  %v2124_v12 = vpop.f32.mrf.mxu1 }
 0x29d   : > { %15578 = vst [vmem:[#allocation38_spill] sm:$0xff] %v10221_v7  ;;  %v2123_v52 = vadd.f32 %v2122_v41, %v15580_v5  ;;  %v3038_v16 = vadd.f32 %v3037_v24, %v2787_v15  ;;  %v3511_v56 = vadd.f32 %v3510_v21, %v3260_v26  ;;  %v2793_v33 = vmul.f32 %v15576_v38, %v10221_v7 }
 0x29e   : > { %v3266_v42 = vmul.f32 %v15577_v31, %v10221_v7  ;;  %v3739_v44 = vmul.f32 %v15579_v11, %v10221_v7  ;;  %v4361_v57 = vadd.f32 %v4360_v8, %v4278_v63  ;;  %v4398_v45 = vadd.f32 %v4397_v47, %v4279_v61  ;;  %v15584_v61 = vld [vmem:[#allocation189_spill] sm:$0xff]  ;;  %v15589_v8 = vld [vmem:[#allocation114_spill] sm:$0xff] }
 0x29f   : > { %v10237_v25 = vmax.f32 %v2119_v19, 0.0  ;;  %v3984_v30 = vadd.f32 %v3983_v50, %v3733_v34  ;;  %v4457_v41 = vadd.f32 %v4456_v46, %v4206_v59  ;;  %v3002_v24 = vadd.f32 %v3001_v9, %v2791_v23  ;;  %v15586_v59 = vld [vmem:[#allocation74_spill] sm:$0xff]  ;;  %v15588_v23 = vld [vmem:[#allocation204_spill] sm:$0xff] }
 0x2a0   : > { %v10241_v21 = vmax.f32 %v2123_v52, 0.0  ;;  %v3475_v15 = vadd.f32 %v3474_v51, %v3264_v49  ;;  %v3948_v26 = vadd.f32 %v3947_v53, %v3737_v28  ;;  %v4421_v2 = vadd.f32 %v4420_v40, %v4210_v37  ;;  %v15591_v37 = vld [vmem:[#allocation12_spill] sm:$0xff] }
 0x2a1   : > { %15581 = vst [vmem:[#allocation70_spill] sm:$0xff] %v10237_v25  ;;  %v2310_v1 = vadd.f32 %v9626_v18, %v15580_v5  ;;  %v3076_v32 = vadd.f32 %v3075_v17, %v2793_v33  ;;  %v4212_v63 = vmul.f32 %v9659_v10, %v10221_v7  ;;  %v10249_v19 = vmul.f32 %v10197_v39, %v9501_v27  ;;  %v2126_v18 = vpop.f32.mrf.mxu1  ;;  %v15585_v17 = vld [vmem:[#allocation43_spill] sm:$0xff]  ;;  %v10285_v27 = vpop.permute.xlu0 %4168 }
 0x2a2   : > { %15583 = vst [vmem:[#allocation232_spill] sm:$0xff] %v10241_v21  ;;  %v4288_v50 = vmul.f32 %v10239_v54, %v15584_v61  ;;  %v3549_v46 = vadd.f32 %v3548_v3, %v3266_v42  ;;  %v4022_v9 = vadd.f32 %v4021_v58, %v3739_v44  ;;  %v2792_v51 = vmul.f32 %v15576_v38, %v10237_v25 }
 0x2a3   : > { %v3265_v52 = vmul.f32 %v15577_v31, %v10237_v25  ;;  %v3738_v53 = vmul.f32 %v15579_v11, %v10237_v25  ;;  %v4211_v40 = vmul.f32 %v9659_v10, %v10237_v25  ;;  %v2796_v34 = vmul.f32 %v15585_v17, %v10241_v21  ;;  %v15590_v10 = vld [vmem:[#allocation259_spill] sm:$0xff]  ;;  %15593 = vst [vmem:[#allocation8_spill] sm:$0xff] %v10285_v27 }
 0x2a4   : > { %v3269_v3 = vmul.f32 %v15586_v59, %v10241_v21  ;;  %v10265_v58 = vmax.f32 %v2310_v1, 0.0  ;;  %v4289_v38 = vmul.f32 %v10239_v54, %v15588_v23  ;;  %v4362_v31 = vadd.f32 %v4361_v57, %v10077_v35  ;;  %v10281_v57 = vpop.f32.mrf.mxu0 }
 0x2a5   : > { %v4399_v49 = vadd.f32 %v4398_v45, %v10081_v43  ;;  %v3742_v47 = vmul.f32 %v15589_v8, %v10241_v21  ;;  %v4215_v11 = vmul.f32 %v15590_v10, %v10241_v21  ;;  %v2125_v28 = vadd.f32 %v2124_v12, %v15580_v5  ;;  %15592 = vst [vmem:[#allocation81_spill] sm:$0xff] %v10281_v57 }
 0x2a6   : > { %15587 = vst [vmem:[#allocation7_spill] sm:$0xff] %v10265_v58  ;;  %v2127_v33 = vadd.f32 %v2126_v18, %v15591_v37  ;;  %v4495_v42 = vadd.f32 %v4494_v60, %v4212_v63  ;;  %v3039_v1 = vadd.f32 %v3038_v16, %v2792_v51  ;;  %v2798_v44 = vmul.f32 %v15585_v17, %v10265_v58  ;;  %v2359_v51 = vpop.f32.mrf.mxu0 }
 0x2a7   : > { %v3271_v35 = vmul.f32 %v15586_v59, %v10265_v58  ;;  %v3744_v43 = vmul.f32 %v15589_v8, %v10265_v58  ;;  %v4363_v45 = vadd.f32 %v4362_v31, %v4288_v50  ;;  %v4400_v39 = vadd.f32 %v4399_v49, %v4289_v38  ;;  %v15596_v50 = vld [vmem:[#allocation270_spill] sm:$0xff]  ;;  %v15597_v31 = vld [vmem:[#allocation279_spill] sm:$0xff] }
 0x2a8   : > { %v10287_v5 = vmax.f32 %v2125_v28, 0.0  ;;  %v3512_v12 = vadd.f32 %v3511_v56, %v3265_v52  ;;  %v3985_v60 = vadd.f32 %v3984_v30, %v3738_v53  ;;  %v4458_v16 = vadd.f32 %v4457_v41, %v4211_v40  ;;  %v10301_v30 = vpop.permute.xlu1 %4148  ;;  %v2128_v41 = vpop.f32.mrf.mxu1  ;;  %v15599_v53 = vld [vmem:[#allocation44_spill] sm:$0xff]  ;;  %v15602_v49 = vld [vmem:[#allocation218_spill] sm:$0xff]  ;;  %v15605_v28 = vld [vmem:[#allocation287_spill] sm:$0xff] }
 0x2a9   : > { %v10289_v63 = vmax.f32 %v2127_v33, 0.0  ;;  %v3003_v18 = vadd.f32 %v3002_v24, %v2796_v34  ;;  %v3476_v54 = vadd.f32 %v3475_v15, %v3269_v3  ;;  %v3949_v23 = vadd.f32 %v3948_v26, %v3742_v47  ;;  %15598 = vst [vmem:[#allocation110_spill] sm:$0xff] %v10301_v30  ;;  %v15600_v34 = vld [vmem:[#allocation79_spill] sm:$0xff]  ;;  %v15603_v47 = vld [vmem:[#allocation224_spill] sm:$0xff] }
 0x2aa   : > { %15594 = vst [vmem:[#allocation39_spill] sm:$0xff] %v10287_v5  ;;  %v4422_v61 = vadd.f32 %v4421_v2, %v4215_v11  ;;  %v3077_v57 = vadd.f32 %v3076_v32, %v2798_v44  ;;  %v4217_v21 = vmul.f32 %v15590_v10, %v10265_v58  ;;  %v10295_v38 = vmul.f32 %v10285_v27, %v15596_v50  ;;  %v15604_v11 = vld [vmem:[#allocation111_spill] sm:$0xff]  ;;  %v10330_v50 = vpop.permute.xlu0 %4176 }
 0x2ab   : > { %15595 = vst [vmem:[#allocation71_spill] sm:$0xff] %v10289_v63  ;;  %v10299_v56 = vmul.f32 %v10285_v27, %v15597_v31  ;;  %v3550_v52 = vadd.f32 %v3549_v46, %v3271_v35  ;;  %v4023_v24 = vadd.f32 %v4022_v9, %v3744_v43  ;;  %v2797_v2 = vmul.f32 %v15585_v17, %v10287_v5  ;;  %v15601_v46 = vld [vmem:[#allocation275_spill] sm:$0xff]  ;;  %v2132_v43 = vpop.f32.mrf.mxu1 }
 0x2ac   : > { %v3270_v32 = vmul.f32 %v15586_v59, %v10287_v5  ;;  %v3743_v15 = vmul.f32 %v15589_v8, %v10287_v5  ;;  %v4216_v26 = vmul.f32 %v15590_v10, %v10287_v5  ;;  %v2801_v40 = vmul.f32 %v15599_v53, %v10289_v63  ;;  %15607 = vst [vmem:[#allocation73_spill] sm:$0xff] %v10330_v50 }
 0x2ad   : > { %v3274_v3 = vmul.f32 %v15600_v34, %v10289_v63  ;;  %v2313_v9 = vadd.f32 %v15601_v46, %v15591_v37  ;;  %v4298_v17 = vmul.f32 %v10301_v30, %v15602_v49  ;;  %v4299_v59 = vmul.f32 %v10301_v30, %v15603_v47 }
 0x2ae   : > { %v4364_v8 = vadd.f32 %v4363_v45, %v10131_v13  ;;  %v3747_v10 = vmul.f32 %v15604_v11, %v10289_v63  ;;  %v4220_v33 = vmul.f32 %v15605_v28, %v10289_v63  ;;  %v4401_v44 = vadd.f32 %v4400_v39, %v10135_v48 }
 0x2af   : > { %v2129_v35 = vadd.f32 %v2128_v41, %v15591_v37  ;;  %v4496_v51 = vadd.f32 %v4495_v42, %v4217_v21  ;;  %v3040_v46 = vadd.f32 %v3039_v1, %v2797_v2  ;;  %v10328_v27 = vmax.f32 %v2313_v9, 0.0  ;;  %v15610_v42 = vld [vmem:[#allocation281_spill] sm:$0xff]  ;;  %v10339_v41 = vpop.f32.mrf.mxu0 }
 0x2b0   : > { %v4365_v31 = vadd.f32 %v4364_v8, %v4298_v17  ;;  %v3513_v30 = vadd.f32 %v3512_v12, %v3270_v32  ;;  %v3986_v13 = vadd.f32 %v3985_v60, %v3743_v15  ;;  %v4402_v45 = vadd.f32 %v4401_v44, %v4299_v59  ;;  %15611 = vst [vmem:[#allocation9_spill] sm:$0xff] %v10339_v41  ;;  %v4530_v59 = vpop.permute.xlu0 %4529  ;;  %v2134_v8 = vpop.f32.mrf.mxu1 }
 0x2b1   : > { %15606 = vst [vmem:[#allocation40_spill] sm:$0xff] %v10328_v27  ;;  %v10332_v47 = vmax.f32 %v2129_v35, 0.0  ;;  %v4459_v49 = vadd.f32 %v4458_v16, %v4216_v26  ;;  %v3004_v58 = vadd.f32 %v3003_v18, %v2801_v40  ;;  %v3477_v5 = vadd.f32 %v3476_v54, %v3274_v3  ;;  %v15613_v16 = vld [vmem:[#allocation292_spill] sm:$0xff]  ;;  %v2362_v26 = vpop.f32.mrf.mxu0  ;;  %v15614_v40 = vld [vmem:[#allocation167_spill] sm:$0xff] }
 0x2b2   : > { %v2133_v48 = vadd.f32 %v2132_v43, %v15609_v4  ;;  %v3950_v39 = vadd.f32 %v3949_v23, %v3747_v10  ;;  %v4423_v37 = vadd.f32 %v4422_v61, %v4220_v33  ;;  %v2803_v21 = vmul.f32 %v15599_v53, %v10328_v27  ;;  %v10349_v23 = vpop.permute.xlu1 %4156 }
 0x2b3   : > { %15608 = vst [vmem:[#allocation107_spill] sm:$0xff] %v10332_v47  ;;  %v2318_v1 = vadd.f32 %v15610_v42, %v15609_v4  ;;  %v3276_v12 = vmul.f32 %v15600_v34, %v10328_v27  ;;  %v3749_v60 = vmul.f32 %v15604_v11, %v10328_v27  ;;  %v4222_v54 = vmul.f32 %v15605_v28, %v10328_v27 }
 0x2b4   : > { %v2802_v61 = vmul.f32 %v15599_v53, %v10332_v47  ;;  %15612 = vst [vmem:[#allocation41_spill] sm:$0xff] %v10349_v23  ;;  %v10353_v18 = vmul.f32 %v10330_v50, %v15613_v16  ;;  %v3275_v2 = vmul.f32 %v15600_v34, %v10332_v47  ;;  %v3748_v32 = vmul.f32 %v15604_v11, %v10332_v47  ;;  %v15617_v11 = vld [vmem:[#allocation244_spill] sm:$0xff] }
 0x2b5   : > { %v4221_v15 = vmul.f32 %v15605_v28, %v10332_v47  ;;  %v10363_v3 = vmul.f32 %v10330_v50, %v15614_v40  ;;  %v10365_v53 = vmax.f32 %v2133_v48, 0.0  ;;  %v4366_v9 = vadd.f32 %v4365_v31, %v10185_v6  ;;  %v15618_v28 = vld [vmem:[#allocation248_spill] sm:$0xff]  ;;  %v15622_v40 = vld [vmem:[#allocation175_spill] sm:$0xff] }
 0x2b6   : > { %v4403_v17 = vadd.f32 %v4402_v45, %v10189_v62  ;;  %v3078_v34 = vadd.f32 %v3077_v57, %v2803_v21  ;;  %v10369_v10 = vmax.f32 %v2318_v1, 0.0  ;;  %v4308_v33 = vmul.f32 %v10349_v23, %v15617_v11  ;;  %v15619_v62 = vld [vmem:[#allocation119_spill] sm:$0xff]  ;;  %v15620_v57 = vld [vmem:[#allocation45_spill] sm:$0xff] }
 0x2b7   : > { %15615 = vst [vmem:[#allocation10_spill] sm:$0xff] %v10365_v53  ;;  %v4309_v44 = vmul.f32 %v10349_v23, %v15618_v28  ;;  %v3551_v35 = vadd.f32 %v3550_v52, %v3276_v12  ;;  %v4024_v43 = vadd.f32 %v4023_v24, %v3749_v60  ;;  %v4497_v42 = vadd.f32 %v4496_v51, %v4222_v54  ;;  %v15621_v21 = vld [vmem:[#allocation121_spill] sm:$0xff]  ;;  %v2136_v24 = vpop.f32.mrf.mxu1 }
 0x2b8   : > { %15616 = vst [vmem:[#allocation72_spill] sm:$0xff] %v10369_v10  ;;  %v3041_v48 = vadd.f32 %v3040_v46, %v2802_v61  ;;  %v3514_v26 = vadd.f32 %v3513_v30, %v3275_v2  ;;  %v3987_v50 = vadd.f32 %v3986_v13, %v3748_v32  ;;  %v10375_v6 = vadd.f32 %v4459_v49, %v4221_v15  ;;  %v15623_v30 = vld [vmem:[#allocation77_spill] sm:$0xff]  ;;  %v15625_v13 = vld [vmem:[#allocation267_spill] sm:$0xff] }
 0x2b9   : > { %v10378_v31 = vmul.f32 %v4530_v59, %v15619_v62  ;;  %v2806_v45 = vmul.f32 %v15620_v57, %v10365_v53  ;;  %v10383_v1 = vmul.f32 %v4530_v59, %v15621_v21  ;;  %v10386_v16 = vmul.f32 %v4530_v59, %v15622_v40  ;;  %v15624_v51 = vld [vmem:[#allocation117_spill] sm:$0xff]  ;;  %v15626_v40 = vld [vmem:[#allocation14_spill] sm:$0xff] }
 0x2ba   : > { %v10389_v52 = vmul.f32 %v4530_v59, %v9979_v0  ;;  %v3279_v49 = vmul.f32 %v15623_v30, %v10365_v53  ;;  %v3752_v46 = vmul.f32 %v15624_v51, %v10365_v53  ;;  %v4225_v12 = vmul.f32 %v15625_v13, %v10365_v53  ;;  %v15628_v28 = vld [vmem:[#allocation285_spill] sm:$0xff] }
 0x2bb   : > { %v2808_v60 = vmul.f32 %v15620_v57, %v10369_v10  ;;  %v3281_v54 = vmul.f32 %v15623_v30, %v10369_v10  ;;  %v4367_v61 = vadd.f32 %v4366_v9, %v4308_v33  ;;  %v4404_v2 = vadd.f32 %v4403_v17, %v4309_v44  ;;  %v10412_v9 = vpop.permute.xlu1 %4164 }
 0x2bc   : > { %v2135_v32 = vadd.f32 %v2134_v8, %v15609_v4  ;;  %v3754_v15 = vmul.f32 %v15624_v51, %v10369_v10  ;;  %v4227_v0 = vmul.f32 %v15625_v13, %v10369_v10  ;;  %v2137_v21 = vadd.f32 %v2136_v24, %v15626_v40  ;;  %15629 = vst [vmem:[#allocation245_spill] sm:$0xff] %v10412_v9  ;;  %v10421_v24 = vld [vmem:[%s14266_s4] sm:$0xff] }
 0x2bd   : > { %v14749_v23 = vmov 7   ;;  %v2321_v11 = vadd.f32 %v15628_v28, %v15626_v40  ;;  %v4368_v4 = vadd.f32 %v4367_v61, %v10217_v14  ;;  %v4405_v17 = vadd.f32 %v4404_v2, %v10249_v19  ;;  %15631 = vst [vmem:[#allocation76_spill] sm:$0xff] %v10421_v24  ;;  %v10428_v19 = vpop.permute.xlu0 %4541  ;;  %v15638_v61 = vld [vmem:[#allocation140_spill] sm:$0xff] }
 0x2be   : > { %v10407_v62 = vmax.f32 %v2135_v32, 0.0  ;;  %7086 = vset.pattern.permute.xlu0 %v14749_v23  ;;  %v3005_v8 = vadd.f32 %v3004_v58, %v2806_v45  ;;  %v3478_v33 = vadd.f32 %v3477_v5, %v3279_v49  ;;  %v3951_v44 = vadd.f32 %v3950_v39, %v3752_v46  ;;  %v10424_v32 = vpop.f32.mrf.mxu0  ;;  %v2138_v58 = vpop.f32.mrf.mxu1  ;;  %v15633_v45 = vld [vmem:[#allocation263_spill] sm:$0xff]  ;;  %v15634_v49 = vld [vmem:[#allocation266_spill] sm:$0xff] }
 0x2bf   : > { %v10416_v41 = vmax.f32 %v2137_v21, 0.0  ;;  %5948 = vperm.xlu0 %7086, %v10421_v24   ;;  %15632 = vst [vmem:[#allocation109_spill] sm:$0xff] %v10424_v32  ;;  %v4424_v28 = vadd.f32 %v4423_v37, %v4225_v12  ;;  %v3079_v23 = vadd.f32 %v3078_v34, %v2808_v60  ;;  %v3552_v10 = vadd.f32 %v3551_v35, %v3281_v54  ;;  %v15636_v12 = vld [vmem:[#allocation82_spill] sm:$0xff]  ;;  %v10467_v53 = vpop.permute.xlu1 %4172 }
 0x2c0   : > { %15627 = vst [vmem:[#allocation112_spill] sm:$0xff] %v10407_v62  ;;  %v2807_v14 = vmul.f32 %v15620_v57, %v10407_v62  ;;  %v3280_v5 = vmul.f32 %v15623_v30, %v10407_v62  ;;  %v3753_v39 = vmul.f32 %v15624_v51, %v10407_v62  ;;  %v4318_v21 = vmul.f32 %v10412_v9, %v15633_v45  ;;  %v2367_v34 = vpop.f32.mrf.mxu0  ;;  %v15635_v57 = vld [vmem:[#allocation46_spill] sm:$0xff]  ;;  %v15639_v45 = vld [vmem:[#allocation144_spill] sm:$0xff] }
 0x2c1   : > { %15630 = vst [vmem:[#allocation42_spill] sm:$0xff] %v10416_v41  ;;  %v4319_v37 = vmul.f32 %v10412_v9, %v15634_v49  ;;  %v4226_v35 = vmul.f32 %v15625_v13, %v10407_v62  ;;  %v2811_v46 = vmul.f32 %v15635_v57, %v10416_v41  ;;  %v3284_v60 = vmul.f32 %v15636_v12, %v10416_v41  ;;  %v10456_v13 = vld [vmem:[%s14266_s4 + $0x18] sm:$0xff] }
 0x2c2   : > { %v10444_v30 = vmax.f32 %v2321_v11, 0.0  ;;  %v4025_v54 = vadd.f32 %v4024_v43, %v3754_v15  ;;  %v4498_v51 = vadd.f32 %v4497_v42, %v4227_v0  ;;  %v10447_v2 = vmul.f32 %v4530_v59, %v15638_v61  ;;  %15640 = vst [vmem:[#allocation43_spill] sm:$0xff] %v10456_v13  ;;  %v15641_v11 = vld [vmem:[#allocation113_spill] sm:$0xff]  ;;  %v15643_v59 = vld [vmem:[#allocation163_spill] sm:$0xff]  ;;  %v2142_v15 = vpop.f32.mrf.mxu1  ;;  %15645 = vst [vmem:[#allocation114_spill] sm:$0xff] %v10467_v53 }
 0x2c3   : > { %v10451_v9 = vmul.f32 %v10428_v19, %v15639_v45  ;;  %5960 = vperm.xlu0 %7086, %v10456_v13   ;;  %v3042_v34 = vadd.f32 %v3041_v48, %v2807_v14  ;;  %v3757_v49 = vmul.f32 %v15641_v11, %v10416_v41  ;;  %v15642_v0 = vld [vmem:[#allocation157_spill] sm:$0xff]  ;;  %v10465_v42 = vmul.f32 %v10428_v19, %v15643_v59 }
 0x2c4   : > { %15637 = vst [vmem:[#allocation11_spill] sm:$0xff] %v10444_v30  ;;  %v4230_v43 = vmul.f32 %v15642_v0, %v10416_v41  ;;  %v3515_v45 = vadd.f32 %v3514_v26, %v3280_v5  ;;  %v3988_v61 = vadd.f32 %v3987_v50, %v3753_v39  ;;  %v4369_v32 = vadd.f32 %v4368_v4, %v4318_v21  ;;  %v15646_v50 = vld [vmem:[#allocation15_spill] sm:$0xff] }
 0x2c5   : > { %15644 = vst [vmem:[#allocation74_spill] sm:$0xff] %v10465_v42  ;;  %v4406_v62 = vadd.f32 %v4405_v17, %v4319_v37  ;;  %v4461_v13 = vadd.f32 %v10375_v6, %v4226_v35  ;;  %v3006_v48 = vadd.f32 %v3005_v8, %v2811_v46  ;;  %v3479_v14 = vadd.f32 %v3478_v33, %v3284_v60  ;;  %v10481_v17 = vld [vmem:[%s14266_s4 + $0x28] sm:$0xff]  ;;  %v15648_v6 = vld [vmem:[#allocation282_spill] sm:$0xff]  ;;  %v2144_v60 = vpop.f32.mrf.mxu1 }
 0x2c6   : > { %v2813_v24 = vmul.f32 %v15635_v57, %v10444_v30  ;;  %v3286_v22 = vmul.f32 %v15636_v12, %v10444_v30  ;;  %v3759_v59 = vmul.f32 %v15641_v11, %v10444_v30  ;;  %v2139_v26 = vadd.f32 %v2138_v58, %v15626_v40  ;;  %15647 = vst [vmem:[#allocation259_spill] sm:$0xff] %v10481_v17  ;;  %v15649_v33 = vld [vmem:[#allocation225_spill] sm:$0xff]  ;;  %v15652_v35 = vld [vmem:[#allocation294_spill] sm:$0xff] }
 0x2c7   : > { %v2143_v4 = vadd.f32 %v2142_v15, %v15646_v50  ;;  %5968 = vperm.xlu0 %7086, %v10481_v17   ;;  %v4328_v8 = vmul.f32 %v10467_v53, %v15648_v6  ;;  %v4329_v5 = vmul.f32 %v10467_v53, %v15649_v33  ;;  %v4370_v39 = vadd.f32 %v4369_v32, %v10295_v38  ;;  %v10514_v32 = vpop.f32.mrf.mxu0  ;;  %v15664_v33 = vld [vmem:[#allocation190_spill] sm:$0xff] }
 0x2c8   : > { %v4407_v21 = vadd.f32 %v4406_v62, %v10299_v56  ;;  %v3952_v40 = vadd.f32 %v3951_v44, %v3757_v49  ;;  %v10490_v58 = vmax.f32 %v2139_v26, 0.0  ;;  %v2326_v46 = vadd.f32 %v15652_v35, %v15646_v50  ;;  %v10511_v44 = vld [vmem:[%s14266_s4 + $0x38] sm:$0xff]  ;;  %15655 = vst [vmem:[#allocation111_spill] sm:$0xff] %v10514_v32 }
 0x2c9   : > { %v10492_v37 = vmax.f32 %v2143_v4, 0.0  ;;  %v4425_v15 = vadd.f32 %v4424_v28, %v4230_v43  ;;  %v4232_v6 = vmul.f32 %v15642_v0, %v10444_v30  ;;  %v4371_v17 = vadd.f32 %v4370_v39, %v4328_v8  ;;  %15654 = vst [vmem:[#allocation275_spill] sm:$0xff] %v10511_v44  ;;  %v4550_v43 = vpop.permute.xlu0 %4549  ;;  %v15656_v26 = vld [vmem:[#allocation47_spill] sm:$0xff]  ;;  %v15657_v8 = vld [vmem:[#allocation80_spill] sm:$0xff] }
 0x2ca   : > { %15650 = vst [vmem:[#allocation12_spill] sm:$0xff] %v10490_v58  ;;  %v4408_v42 = vadd.f32 %v4407_v21, %v4329_v5  ;;  %v3080_v53 = vadd.f32 %v3079_v23, %v2813_v24  ;;  %v10500_v38 = vmul.f32 %v10428_v19, %v10061_v55  ;;  %v10504_v56 = vmul.f32 %v10428_v19, %v10114_v36  ;;  %v15662_v36 = vld [vmem:[#allocation174_spill] sm:$0xff] }
 0x2cb   : > { %15651 = vst [vmem:[#allocation44_spill] sm:$0xff] %v10492_v37  ;;  %v2812_v62 = vmul.f32 %v15635_v57, %v10490_v58  ;;  %5976 = vperm.xlu0 %7086, %v10511_v44   ;;  %v3553_v23 = vadd.f32 %v3552_v10, %v3286_v22  ;;  %v4026_v24 = vadd.f32 %v4025_v54, %v3759_v59  ;;  %v10526_v39 = vmax.f32 %v2326_v46, 0.0  ;;  %v2146_v22 = vpop.f32.mrf.mxu1  ;;  %v2370_v10 = vpop.f32.mrf.mxu0 }
 0x2cc   : > { %15653 = vst [vmem:[#allocation79_spill] sm:$0xff] %v10504_v56  ;;  %v3285_v28 = vmul.f32 %v15636_v12, %v10490_v58  ;;  %v3758_v49 = vmul.f32 %v15641_v11, %v10490_v58  ;;  %v4231_v57 = vmul.f32 %v15642_v0, %v10490_v58  ;;  %v2816_v4 = vmul.f32 %v15656_v26, %v10492_v37  ;;  %v15660_v11 = vld [vmem:[#allocation122_spill] sm:$0xff]  ;;  %v15661_v0 = vld [vmem:[#allocation277_spill] sm:$0xff] }
 0x2cd   : > { %v3289_v5 = vmul.f32 %v15657_v8, %v10492_v37  ;;  %15658 = vst [vmem:[#allocation287_spill] sm:$0xff] %v10526_v39  ;;  %v4499_v54 = vadd.f32 %v4498_v51, %v4232_v6  ;;  %v10530_v12 = vmul.f32 %v10428_v19, %v10110_v29  ;;  %v3762_v59 = vmul.f32 %v15660_v11, %v10492_v37  ;;  %v10548_v19 = vld [vmem:[%s14266_s4 + $0x48] sm:$0xff] }
 0x2ce   : > { %v4235_v21 = vmul.f32 %v15661_v0, %v10492_v37  ;;  %v3043_v35 = vadd.f32 %v3042_v34, %v2812_v62  ;;  %v10537_v55 = vmul.f32 %v4550_v43, %v15662_v36  ;;  %v10540_v46 = vmul.f32 %v4550_v43, %v15664_v33  ;;  %15667 = vst [vmem:[#allocation117_spill] sm:$0xff] %v10548_v19  ;;  %v15668_v62 = vld [vmem:[#allocation16_spill] sm:$0xff]  ;;  %v10555_v37 = vpop.permute.xlu1 %4180 }
 0x2cf   : > { %15659 = vst [vmem:[#allocation13_spill] sm:$0xff] %v10530_v12  ;;  %v10543_v10 = vmul.f32 %v4550_v43, %v10191_v20  ;;  %5984 = vperm.xlu0 %7086, %v10548_v19   ;;  %v3516_v51 = vadd.f32 %v3515_v45, %v3285_v28  ;;  %v3989_v6 = vadd.f32 %v3988_v61, %v3758_v49  ;;  %15669 = vst [vmem:[#allocation267_spill] sm:$0xff] %v10555_v37  ;;  %v15675_v28 = vld [vmem:[#allocation138_spill] sm:$0xff] }
 0x2d0   : > { %15663 = vst [vmem:[#allocation281_spill] sm:$0xff] %v10537_v55  ;;  %15665 = vst [vmem:[#allocation45_spill] sm:$0xff] %v10540_v46  ;;  %v2145_v34 = vadd.f32 %v2144_v60, %v15646_v50  ;;  %v2147_v36 = vadd.f32 %v2146_v22, %v15668_v62  ;;  %v4462_v29 = vadd.f32 %v4461_v13, %v4231_v57  ;;  %v15673_v50 = vld [vmem:[#allocation154_spill] sm:$0xff]  ;;  %v15674_v60 = vld [vmem:[#allocation145_spill] sm:$0xff] }
 0x2d1   : > { %15666 = vst [vmem:[#allocation77_spill] sm:$0xff] %v10543_v10  ;;  %v3007_v32 = vadd.f32 %v3006_v48, %v2816_v4  ;;  %v3480_v33 = vadd.f32 %v3479_v14, %v3289_v5  ;;  %v2818_v20 = vmul.f32 %v15656_v26, %v10526_v39  ;;  %v3953_v44 = vadd.f32 %v3952_v40, %v3762_v59  ;;  %v10570_v14 = vld [vmem:[%s14266_s4 + $0x58] sm:$0xff]  ;;  %v4558_v59 = vpop.permute.xlu0 %4557 }
 0x2d2   : > { %v4426_v10 = vadd.f32 %v4425_v15, %v4235_v21  ;;  %v10557_v46 = vmax.f32 %v2145_v34, 0.0  ;;  %v10559_v55 = vmax.f32 %v2147_v36, 0.0  ;;  %v3291_v45 = vmul.f32 %v15657_v8, %v10526_v39  ;;  %15672 = vst [vmem:[#allocation46_spill] sm:$0xff] %v10570_v14 }
 0x2d3   : > { %v3764_v61 = vmul.f32 %v15660_v11, %v10526_v39  ;;  %v4372_v13 = vadd.f32 %v4371_v17, %v10353_v18  ;;  %v4409_v48 = vadd.f32 %v4408_v42, %v10363_v3  ;;  %5992 = vperm.xlu0 %7086, %v10570_v14   ;;  %v4237_v36 = vmul.f32 %v15661_v0, %v10526_v39  ;;  %v2148_v3 = vpop.f32.mrf.mxu1 }
 0x2d4   : > { %15670 = vst [vmem:[#allocation14_spill] sm:$0xff] %v10557_v46  ;;  %15671 = vst [vmem:[#allocation285_spill] sm:$0xff] %v10559_v55  ;;  %v2329_v40 = vadd.f32 %v15673_v50, %v15668_v62  ;;  %v4338_v15 = vmul.f32 %v10555_v37, %v15674_v60  ;;  %v4339_v18 = vmul.f32 %v10555_v37, %v15675_v28  ;;  %v15685_v60 = vld [vmem:[#allocation206_spill] sm:$0xff] }
 0x2d5   : > { %v3081_v42 = vadd.f32 %v3080_v53, %v2818_v20  ;;  %v10582_v17 = vmul.f32 %v4550_v43, %v10237_v25  ;;  %v10585_v49 = vmul.f32 %v4550_v43, %v10221_v7  ;;  %v2817_v57 = vmul.f32 %v15656_v26, %v10557_v46  ;;  %v15678_v20 = vld [vmem:[#allocation48_spill] sm:$0xff]  ;;  %v15679_v43 = vld [vmem:[#allocation85_spill] sm:$0xff]  ;;  %v15680_v26 = vld [vmem:[#allocation115_spill] sm:$0xff] }
 0x2d6   : > { %v3290_v4 = vmul.f32 %v15657_v8, %v10557_v46  ;;  %v3763_v5 = vmul.f32 %v15660_v11, %v10557_v46  ;;  %v4236_v22 = vmul.f32 %v15661_v0, %v10557_v46  ;;  %v2821_v53 = vmul.f32 %v15678_v20, %v10559_v55  ;;  %v10604_v8 = vld [vmem:[%s14266_s4 + $0x68] sm:$0xff]  ;;  %v10607_v11 = vpop.f32.mrf.mxu0  ;;  %v15683_v0 = vld [vmem:[#allocation152_spill] sm:$0xff] }
 0x2d7   : > { %15676 = vst [vmem:[#allocation82_spill] sm:$0xff] %v10582_v17  ;;  %15677 = vst [vmem:[#allocation113_spill] sm:$0xff] %v10585_v49  ;;  %v3554_v21 = vadd.f32 %v3553_v23, %v3291_v45  ;;  %v4027_v34 = vadd.f32 %v4026_v24, %v3764_v61  ;;  %v3294_v50 = vmul.f32 %v15679_v43, %v10559_v55  ;;  %6000 = vperm.xlu0 %7086, %v10604_v8   ;;  %v2152_v61 = vpop.f32.mrf.mxu1 }
 0x2d8   : > { %v3767_v37 = vmul.f32 %v15680_v26, %v10559_v55  ;;  %15681 = vst [vmem:[#allocation157_spill] sm:$0xff] %v10604_v8  ;;  %15682 = vst [vmem:[#allocation15_spill] sm:$0xff] %v10607_v11  ;;  %v4240_v7 = vmul.f32 %v15683_v0, %v10559_v55  ;;  %v10611_v23 = vmax.f32 %v2329_v40, 0.0  ;;  %v4373_v24 = vadd.f32 %v4372_v13, %v4338_v15  ;;  %v2375_v14 = vpop.f32.mrf.mxu0  ;;  %v15687_v40 = vld [vmem:[#allocation17_spill] sm:$0xff] }
 0x2d9   : > { %v4410_v45 = vadd.f32 %v4409_v48, %v4339_v18  ;;  %v4500_v25 = vadd.f32 %v4499_v54, %v4237_v36  ;;  %v3044_v28 = vadd.f32 %v3043_v35, %v2817_v57  ;;  %v10614_v39 = vmul.f32 %v4558_v59, %v15685_v60  ;;  %v10623_v54 = vld [vmem:[%s14266_s4 + $0x78] sm:$0xff] }
 0x2da   : > { %15684 = vst [vmem:[#allocation294_spill] sm:$0xff] %v10611_v23  ;;  %v2149_v46 = vadd.f32 %v2148_v3, %v15668_v62  ;;  %v3517_v19 = vadd.f32 %v3516_v51, %v3290_v4  ;;  %v3990_v8 = vadd.f32 %v3989_v6, %v3763_v5  ;;  %v4463_v49 = vadd.f32 %v4462_v29, %v4236_v22  ;;  %v15688_v6 = vld [vmem:[#allocation213_spill] sm:$0xff]  ;;  %v4534_v22 = vpop.permute.xlu1 %4533 }
 0x2db   : > { %v3008_v11 = vadd.f32 %v3007_v32, %v2821_v53  ;;  %v4374_v17 = vrot.slane %v4373_v24, 4  ;;  %v4411_v12 = vrot.slane %v4410_v45, 4  ;;  %v2153_v13 = vadd.f32 %v2152_v61, %v15687_v40  ;;  %6008 = vperm.xlu0 %7086, %v10623_v54   ;;  %v10649_v3 = vld [vmem:[%s14266_s4 + $0x88] sm:$0xff] }
 0x2dc   : > { %v10617_v56 = vmax.f32 %v2149_v46, 0.0  ;;  %v3481_v35 = vadd.f32 %v3480_v33, %v3294_v50  ;;  %v3954_v62 = vadd.f32 %v3953_v44, %v3767_v37  ;;  %v4427_v48 = vadd.f32 %v4426_v10, %v4240_v7  ;;  %v15690_v7 = vld [vmem:[#allocation148_spill] sm:$0xff] }
 0x2dd   : > { %v2823_v29 = vmul.f32 %v15678_v20, %v10611_v23  ;;  %v3296_v32 = vmul.f32 %v15679_v43, %v10611_v23  ;;  %v4375_v46 = vadd.f32 %v4374_v17, %v4373_v24  ;;  %v4412_v51 = vadd.f32 %v4411_v12, %v4410_v45 }
 0x2de   : > { %15686 = vst [vmem:[#allocation47_spill] sm:$0xff] %v10617_v56  ;;  %v10631_v14 = vmul.f32 %v4558_v59, %v15688_v6  ;;  %v3769_v36 = vmul.f32 %v15680_v26, %v10611_v23  ;;  %v10636_v15 = vmul.f32 %v4558_v59, %v10289_v63  ;;  %v10638_v33 = vmax.f32 %v2153_v13, 0.0  ;;  %v15692_v13 = vld [vmem:[#allocation83_spill] sm:$0xff] }
 0x2df   : > { %v2334_v37 = vadd.f32 %v15690_v7, %v15687_v40  ;;  %v4242_v44 = vmul.f32 %v15683_v0, %v10611_v23  ;;  %v4376_v10 = vrot.slane %v4375_v46, 2  ;;  %v4413_v18 = vrot.slane %v4412_v51, 2  ;;  %6016 = vperm.xlu0 %7086, %v10649_v3   ;;  %v10670_v7 = vpop.f32.mrf.mxu0 }
 0x2e0   : > { %15689 = vst [vmem:[#allocation80_spill] sm:$0xff] %v10638_v33  ;;  %v2822_v12 = vmul.f32 %v15678_v20, %v10617_v56  ;;  %v3082_v17 = vadd.f32 %v3081_v42, %v2823_v29  ;;  %v10653_v57 = vmul.f32 %v4558_v59, %v10332_v47  ;;  %v10656_v4 = vmul.f32 %v4558_v59, %v10328_v27  ;;  %v15691_v42 = vld [vmem:[#allocation49_spill] sm:$0xff]  ;;  %v15699_v47 = vld [vmem:[#allocation126_spill] sm:$0xff] }
 0x2e1   : > { %v3295_v5 = vmul.f32 %v15679_v43, %v10617_v56  ;;  %v3555_v53 = vadd.f32 %v3554_v21, %v3296_v32  ;;  %v4377_v20 = vadd.f32 %v4376_v10, %v4375_v46  ;;  %v4414_v50 = vadd.f32 %v4413_v18, %v4412_v51  ;;  %15694 = vst [vmem:[#allocation277_spill] sm:$0xff] %v10670_v7  ;;  %v15695_v46 = vld [vmem:[#allocation125_spill] sm:$0xff] }
 0x2e2   : > { %v3768_v24 = vmul.f32 %v15680_v26, %v10617_v56  ;;  %v4241_v45 = vmul.f32 %v15683_v0, %v10617_v56  ;;  %v2826_v61 = vmul.f32 %v15691_v42, %v10638_v33  ;;  %v3299_v59 = vmul.f32 %v15692_v13, %v10638_v33  ;;  %v2154_v26 = vpop.f32.mrf.mxu1  ;;  %v10678_v0 = vld [vmem:[%s14266_s4 + $0x98] sm:$0xff] }
 0x2e3   : > { %v10668_v29 = vmax.f32 %v2334_v37, 0.0  ;;  %v4028_v43 = vadd.f32 %v4027_v34, %v3769_v36  ;;  %v4501_v21 = vadd.f32 %v4500_v25, %v4242_v44  ;;  %v10672_v32 = vadd.f32 %v3044_v28, %v2822_v12  ;;  %15696 = vst [vmem:[#allocation16_spill] sm:$0xff] %v10678_v0  ;;  %6024 = vperm.xlu0 %7086, %v10678_v0   ;;  %v15697_v37 = vld [vmem:[#allocation130_spill] sm:$0xff]  ;;  %v2378_v34 = vpop.f32.mrf.mxu0 }
 0x2e4   : > { %v4661_v51 = vmul.f32 %v4534_v22, %v15695_v46  ;;  %v4378_v10 = vrot.slane %v4377_v20, 1  ;;  %v10681_v18 = vadd.f32 %v3517_v19, %v3295_v5  ;;  %v3772_v27 = vmul.f32 %v15697_v37, %v10638_v33  ;;  %v15698_v25 = vld [vmem:[#allocation290_spill] sm:$0xff] }
 0x2e5   : > { %15693 = vst [vmem:[#allocation122_spill] sm:$0xff] %v10668_v29  ;;  %v4245_v28 = vmul.f32 %v15698_v25, %v10638_v33  ;;  %v4415_v36 = vrot.slane %v4414_v50, 1  ;;  %v10687_v44 = vadd.f32 %v3990_v8, %v3768_v24  ;;  %v2828_v12 = vmul.f32 %v15691_v42, %v10668_v29  ;;  %v15700_v46 = vld [vmem:[#allocation194_spill] sm:$0xff]  ;;  %v2156_v33 = vpop.f32.mrf.mxu1 }
 0x2e6   : > { %v4662_v63 = vmul.f32 %v4534_v22, %v15699_v47  ;;  %v10692_v6 = vadd.f32 %v4463_v49, %v4241_v45  ;;  %v10694_v60 = vadd.f32 %v3008_v11, %v2826_v61  ;;  %v10696_v19 = vadd.f32 %v3481_v35, %v3299_v59  ;;  %v4538_v47 = vpop.permute.xlu1 %4537  ;;  %v10708_v49 = vld [vmem:[%s14266_s4 + $0xa8] sm:$0xff] }
 0x2e7   : > { %v3301_v5 = vmul.f32 %v15692_v13, %v10668_v29  ;;  %v3774_v34 = vmul.f32 %v15697_v37, %v10668_v29  ;;  %v4665_v8 = vmul.f32 %v4534_v22, %v15700_v46  ;;  %v4816_v24 = vadd.f32 %v4661_v51, %v10378_v31  ;;  %15701 = vst [vmem:[#allocation154_spill] sm:$0xff] %v10708_v49 }
 0x2e8   : > { %v4853_v7 = vadd.f32 %v4662_v63, %v10383_v1  ;;  %6032 = vperm.xlu0 %7086, %v10708_v49   ;;  %v10711_v11 = vadd.f32 %v4378_v10, %v4377_v20  ;;  %v3955_v35 = vadd.f32 %v3954_v62, %v3772_v27  ;;  %v10713_v45 = vadd.f32 %v4427_v48, %v4245_v28  ;;  %v15704_v1 = vld [vmem:[#allocation181_spill] sm:$0xff]  ;;  %v15705_v20 = vld [vmem:[#allocation18_spill] sm:$0xff]  ;;  %v4566_v28 = vpop.permute.xlu0 %4565 }
 0x2e9   : > { %v4247_v61 = vmul.f32 %v15698_v25, %v10668_v29  ;;  %v10717_v31 = vadd.f32 %v4415_v36, %v4414_v50  ;;  %v10719_v63 = vadd.f32 %v3082_v17, %v2828_v12  ;;  %v4663_v59 = vmul.f32 %v4534_v22, %v15704_v1  ;;  %v15706_v27 = vld [vmem:[#allocation137_spill] sm:$0xff]  ;;  %v15707_v50 = vld [vmem:[#allocation168_spill] sm:$0xff]  ;;  %v15708_v17 = vld [vmem:[#allocation142_spill] sm:$0xff] }
 0x2ea   : > { %15702 = vst [vmem:[#allocation48_spill] sm:$0xff] %v10711_v11  ;;  %v4964_v51 = vadd.f32 %v4665_v8, %v10447_v2  ;;  %v10723_v46 = vadd.f32 %v3555_v53, %v3301_v5  ;;  %v2155_v49 = vadd.f32 %v2154_v26, %v15687_v40  ;;  %v2157_v10 = vadd.f32 %v2156_v33, %v15705_v20  ;;  %v10737_v2 = vld [vmem:[%s14266_s4 + $0xb8] sm:$0xff]  ;;  %v15711_v40 = vld [vmem:[#allocation201_spill] sm:$0xff]  ;;  %v15715_v1 = vld [vmem:[#allocation202_spill] sm:$0xff] }
 0x2eb   : > { %15703 = vst [vmem:[#allocation85_spill] sm:$0xff] %v10717_v31  ;;  %v4666_v62 = vmul.f32 %v4538_v47, %v15706_v27  ;;  %v10728_v48 = vadd.f32 %v4028_v43, %v3774_v34  ;;  %v2337_v36 = vadd.f32 %v15707_v50, %v15705_v20  ;;  %v4667_v12 = vmul.f32 %v4538_v47, %v15708_v17  ;;  %v15709_v31 = vld [vmem:[#allocation161_spill] sm:$0xff] }
 0x2ec   : > { %v4670_v11 = vmul.f32 %v4538_v47, %v15709_v31  ;;  %15710 = vst [vmem:[#allocation115_spill] sm:$0xff] %v10737_v2  ;;  %6040 = vperm.xlu0 %7086, %v10737_v2   ;;  %v4664_v33 = vmul.f32 %v4534_v22, %v15711_v40  ;;  %v10741_v53 = vmax.f32 %v2155_v49, 0.0  ;;  %v10743_v43 = vmax.f32 %v2157_v10, 0.0  ;;  %v15714_v31 = vld [vmem:[#allocation235_spill] sm:$0xff]  ;;  %v15716_v22 = vld [vmem:[#allocation178_spill] sm:$0xff]  ;;  %v2158_v40 = vpop.f32.mrf.mxu1 }
 0x2ed   : > { %v4817_v26 = vadd.f32 %v4816_v24, %v4666_v62  ;;  %v4502_v5 = vadd.f32 %v4501_v21, %v4247_v61  ;;  %v4890_v34 = vadd.f32 %v4663_v59, %v10386_v16  ;;  %v4854_v8 = vadd.f32 %v4853_v7, %v4667_v12  ;;  %v15720_v61 = vld [vmem:[#allocation88_spill] sm:$0xff]  ;;  %v15721_v59 = vld [vmem:[#allocation118_spill] sm:$0xff] }
 0x2ee   : > { %15712 = vst [vmem:[#allocation152_spill] sm:$0xff] %v10741_v53  ;;  %15713 = vst [vmem:[#allocation17_spill] sm:$0xff] %v10743_v43  ;;  %v10746_v50 = vadd.f32 %v4964_v51, %v4670_v11  ;;  %v10749_v17 = vmul.f32 %v4566_v28, %v15714_v31  ;;  %v2827_v27 = vmul.f32 %v15691_v42, %v10741_v53  ;;  %v10761_v21 = vmax.f32 %v2337_v36, 0.0  ;;  %v10766_v42 = vld [vmem:[%s14266_s4 + $0xc8] sm:$0xff]  ;;  %v15719_v11 = vld [vmem:[#allocation50_spill] sm:$0xff]  ;;  %v10776_v51 = vpop.f32.mrf.mxu0 }
 0x2ef   : > { %v4668_v2 = vmul.f32 %v4538_v47, %v15715_v1  ;;  %v4669_v49 = vmul.f32 %v4538_v47, %v15716_v22  ;;  %v3300_v24 = vmul.f32 %v15692_v13, %v10741_v53  ;;  %v3773_v16 = vmul.f32 %v15697_v37, %v10741_v53  ;;  %15718 = vst [vmem:[#allocation49_spill] sm:$0xff] %v10766_v42  ;;  %v15723_v10 = vld [vmem:[#allocation238_spill] sm:$0xff]  ;;  %v15725_v31 = vld [vmem:[#allocation243_spill] sm:$0xff] }
 0x2f0   : > { %v4246_v7 = vmul.f32 %v15698_v25, %v10741_v53  ;;  %15717 = vst [vmem:[#allocation148_spill] sm:$0xff] %v10761_v21  ;;  %6048 = vperm.xlu0 %7086, %v10766_v42   ;;  %v4927_v47 = vadd.f32 %v4664_v33, %v10389_v52  ;;  %v2831_v13 = vmul.f32 %v15719_v11, %v10743_v43  ;;  %15722 = vst [vmem:[#allocation83_spill] sm:$0xff] %v10776_v51  ;;  %v2162_v51 = vpop.f32.mrf.mxu1  ;;  %v2383_v29 = vpop.f32.mrf.mxu0 }
 0x2f1   : > { %v3304_v37 = vmul.f32 %v15720_v61, %v10743_v43  ;;  %v3777_v25 = vmul.f32 %v15721_v59, %v10743_v43  ;;  %v10779_v62 = vmul.f32 %v4566_v28, %v15723_v10  ;;  %v10782_v36 = vmul.f32 %v4566_v28, %v10416_v41 }
 0x2f2   : > { %v10785_v12 = vmul.f32 %v4566_v28, %v10490_v58  ;;  %v10788_v52 = vmul.f32 %v4566_v28, %v10444_v30  ;;  %v3046_v33 = vadd.f32 %v10672_v32, %v2827_v27  ;;  %v4250_v22 = vmul.f32 %v15725_v31, %v10743_v43  ;;  %v4574_v28 = vpop.permute.xlu0 %4573  ;;  %v10801_v32 = vld [vmem:[%s14266_s4 + $0xd8] sm:$0xff] }
 0x2f3   : > { %v4891_v1 = vadd.f32 %v4890_v34, %v4668_v2  ;;  %v4928_v42 = vadd.f32 %v4927_v47, %v4669_v49  ;;  %v3519_v10 = vadd.f32 %v10681_v18, %v3300_v24  ;;  %v3992_v41 = vadd.f32 %v10687_v44, %v3773_v16  ;;  %15726 = vst [vmem:[#allocation290_spill] sm:$0xff] %v10801_v32  ;;  %v15727_v49 = vld [vmem:[#allocation19_spill] sm:$0xff]  ;;  %v15732_v47 = vld [vmem:[#allocation156_spill] sm:$0xff] }
 0x2f4   : > { %15724 = vst [vmem:[#allocation130_spill] sm:$0xff] %v10788_v52  ;;  %v4465_v53 = vadd.f32 %v10692_v6, %v4246_v7  ;;  %v2833_v58 = vmul.f32 %v15719_v11, %v10761_v21  ;;  %6056 = vperm.xlu0 %7086, %v10801_v32   ;;  %v3010_v27 = vadd.f32 %v10694_v60, %v2831_v13  ;;  %v15728_v7 = vld [vmem:[#allocation253_spill] sm:$0xff] }
 0x2f5   : > { %v3483_v29 = vadd.f32 %v10696_v19, %v3304_v37  ;;  %v3956_v18 = vadd.f32 %v3955_v35, %v3777_v25  ;;  %v3306_v44 = vmul.f32 %v15720_v61, %v10761_v21  ;;  %v3779_v6 = vmul.f32 %v15721_v59, %v10761_v21  ;;  %v15730_v19 = vld [vmem:[#allocation262_spill] sm:$0xff] }
 0x2f6   : > { %v4252_v2 = vmul.f32 %v15725_v31, %v10761_v21  ;;  %v2159_v34 = vadd.f32 %v2158_v40, %v15705_v20  ;;  %v2163_v24 = vadd.f32 %v2162_v51, %v15727_v49  ;;  %v4429_v16 = vadd.f32 %v10713_v45, %v4250_v22  ;;  %v4546_v45 = vpop.permute.xlu1 %4545 }
 0x2f7   : > { %v10816_v60 = vmul.f32 %v4574_v28, %v15728_v7  ;;  %v10819_v35 = vmul.f32 %v4574_v28, %v15730_v19  ;;  %v2342_v13 = vadd.f32 %v15732_v47, %v15727_v49  ;;  %v3084_v37 = vadd.f32 %v10719_v63, %v2833_v58  ;;  %v15737_v7 = vld [vmem:[#allocation74_spill] sm:$0xff] }
 0x2f8   : > { %v10825_v25 = vmul.f32 %v4574_v28, %v10559_v55  ;;  %v10828_v20 = vmul.f32 %v4574_v28, %v10617_v56  ;;  %v10830_v40 = vmax.f32 %v2159_v34, 0.0  ;;  %v3557_v22 = vadd.f32 %v10723_v46, %v3306_v44  ;;  %v15740_v46 = vld [vmem:[#allocation166_spill] sm:$0xff] }
 0x2f9   : > { %15729 = vst [vmem:[#allocation18_spill] sm:$0xff] %v10816_v60  ;;  %15731 = vst [vmem:[#allocation168_spill] sm:$0xff] %v10819_v35  ;;  %v10833_v51 = vmax.f32 %v2163_v24, 0.0  ;;  %v4818_v19 = vadd.f32 %v4817_v26, %v10451_v9  ;;  %v4855_v30 = vadd.f32 %v4854_v8, %v15737_v7  ;;  %v4030_v47 = vadd.f32 %v10728_v48, %v3779_v6  ;;  %v15741_v24 = vld [vmem:[#allocation171_spill] sm:$0xff]  ;;  %v15745_v7 = vld [vmem:[#allocation86_spill] sm:$0xff] }
 0x2fa   : > { %15733 = vst [vmem:[#allocation50_spill] sm:$0xff] %v10825_v25  ;;  %15734 = vst [vmem:[#allocation88_spill] sm:$0xff] %v10828_v20  ;;  %v4503_v58 = vadd.f32 %v4502_v5, %v4252_v2  ;;  %v10839_v63 = vmul.f32 %v4574_v28, %v10611_v23  ;;  %v2832_v56 = vmul.f32 %v15719_v11, %v10830_v40  ;;  %v10845_v55 = vmax.f32 %v2342_v13, 0.0  ;;  %v15742_v5 = vld [vmem:[#allocation246_spill] sm:$0xff]  ;;  %v15743_v28 = vld [vmem:[#allocation69_spill] sm:$0xff]  ;;  %v2164_v11 = vpop.f32.mrf.mxu1  ;;  %v10868_v25 = vpop.f32.mrf.mxu0 }
 0x2fb   : > { %15735 = vst [vmem:[#allocation118_spill] sm:$0xff] %v10830_v40  ;;  %15736 = vst [vmem:[#allocation243_spill] sm:$0xff] %v10833_v51  ;;  %v3305_v34 = vmul.f32 %v15720_v61, %v10830_v40  ;;  %v4676_v44 = vmul.f32 %v4546_v45, %v15740_v46  ;;  %v4677_v9 = vmul.f32 %v4546_v45, %v15741_v24  ;;  %v15744_v2 = vld [vmem:[#allocation51_spill] sm:$0xff]  ;;  %v15747_v46 = vld [vmem:[#allocation198_spill] sm:$0xff] }
 0x2fc   : > { %15738 = vst [vmem:[#allocation19_spill] sm:$0xff] %v10839_v63  ;;  %15739 = vst [vmem:[#allocation156_spill] sm:$0xff] %v10845_v55  ;;  %v3778_v26 = vmul.f32 %v15721_v59, %v10830_v40  ;;  %v4251_v48 = vmul.f32 %v15725_v31, %v10830_v40  ;;  %v4678_v8 = vmul.f32 %v4546_v45, %v15742_v5  ;;  %v15746_v23 = vld [vmem:[#allocation139_spill] sm:$0xff] }
 0x2fd   : > { %v4679_v6 = vmul.f32 %v4546_v45, %v15743_v28  ;;  %v2836_v61 = vmul.f32 %v15744_v2, %v10833_v51  ;;  %v3309_v13 = vmul.f32 %v15745_v7, %v10833_v51  ;;  %v3782_v24 = vmul.f32 %v15746_v23, %v10833_v51  ;;  %v15748_v31 = vld [vmem:[#allocation151_spill] sm:$0xff]  ;;  %15750 = vst [vmem:[#allocation74_spill] sm:$0xff] %v10868_v25 }
 0x2fe   : > { %v4680_v32 = vmul.f32 %v4546_v45, %v15747_v46  ;;  %v10862_v59 = vadd.f32 %v3046_v33, %v2832_v56  ;;  %v4255_v63 = vmul.f32 %v15748_v31, %v10833_v51  ;;  %v4892_v5 = vadd.f32 %v4891_v1, %v10500_v38  ;;  %v15749_v28 = vld [vmem:[#allocation79_spill] sm:$0xff]  ;;  %v2166_v1 = vpop.f32.mrf.mxu1 }
 0x2ff   : > { %v4929_v20 = vadd.f32 %v4928_v42, %v15749_v28  ;;  %v10870_v0 = vadd.f32 %v3519_v10, %v3305_v34  ;;  %v2838_v35 = vmul.f32 %v15744_v2, %v10845_v55  ;;  %v4819_v60 = vadd.f32 %v4818_v19, %v4676_v44  ;;  %v2386_v42 = vpop.f32.mrf.mxu0  ;;  %v4582_v19 = vpop.permute.xlu0 %4581  ;;  %v15775_v46 = vld [vmem:[#allocation123_spill] sm:$0xff] }
 0x300   : > { %v10874_v52 = vadd.f32 %v4855_v30, %v4677_v9  ;;  %v10876_v45 = vadd.f32 %v3992_v41, %v3778_v26  ;;  %v10878_v56 = vadd.f32 %v4465_v53, %v4251_v48  ;;  %v3311_v33 = vmul.f32 %v15745_v7, %v10845_v55 }
 0x301   : > { %v3784_v38 = vmul.f32 %v15746_v23, %v10845_v55  ;;  %v10884_v10 = vadd.f32 %v3010_v27, %v2836_v61  ;;  %v10886_v34 = vadd.f32 %v3483_v29, %v3309_v13  ;;  %v10888_v28 = vadd.f32 %v3956_v18, %v3782_v24  ;;  %v15751_v27 = vld [vmem:[#allocation20_spill] sm:$0xff]  ;;  %v15752_v18 = vld [vmem:[#allocation183_spill] sm:$0xff] }
 0x302   : > { %v4257_v41 = vmul.f32 %v15748_v31, %v10845_v55  ;;  %v10892_v30 = vadd.f32 %v4429_v16, %v4255_v63  ;;  %v4893_v53 = vadd.f32 %v4892_v5, %v4678_v8  ;;  %v2165_v44 = vadd.f32 %v2164_v11, %v15727_v49  ;;  %v15753_v16 = vld [vmem:[#allocation13_spill] sm:$0xff]  ;;  %v15760_v11 = vld [vmem:[#allocation280_spill] sm:$0xff]  ;;  %v15781_v55 = vld [vmem:[#allocation259_spill] sm:$0xff] }
 0x303   : > { %v10895_v9 = vadd.f32 %v3084_v37, %v2838_v35  ;;  %v4930_v26 = vadd.f32 %v4929_v20, %v4679_v6  ;;  %v14819_v48 = vmov 6   ;;  %v2167_v29 = vadd.f32 %v2166_v1, %v15751_v27  ;;  %v10912_v49 = vld [vmem:[%s14266_s4 + $0x8] sm:$0xff]  ;;  %v4554_v35 = vpop.permute.xlu1 %4553  ;;  %v15756_v20 = vld [vmem:[#allocation274_spill] sm:$0xff]  ;;  %v15759_v6 = vld [vmem:[#allocation76_spill] sm:$0xff] }
 0x304   : > { %7085 = vset.pattern.permute.xlu1 %v14819_v48  ;;  %v2345_v24 = vadd.f32 %v15752_v18, %v15751_v27  ;;  %v10901_v61 = vadd.f32 %v3557_v22, %v3311_v33  ;;  %v10903_v13 = vadd.f32 %v4030_v47, %v3784_v38  ;;  %v4966_v63 = vadd.f32 %v10746_v50, %v15753_v16  ;;  %v15758_v8 = vld [vmem:[#allocation281_spill] sm:$0xff]  ;;  %v15766_v16 = vld [vmem:[#allocation203_spill] sm:$0xff] }
 0x305   : > { %v10907_v5 = vmax.f32 %v2165_v44, 0.0  ;;  %15755 = vst [vmem:[#allocation86_spill] sm:$0xff] %v10912_v49  ;;  %5479 = vperm.xlu1 %7085, %v10912_v49   ;;  %7088 = vset.pattern.permute.xlu0 %v14819_v48  ;;  %v4504_v37 = vadd.f32 %v4503_v58, %v4257_v41  ;;  %v10917_v22 = vmul.f32 %v4582_v19, %v15756_v20  ;;  %v10919_v47 = vmax.f32 %v2167_v29, 0.0  ;;  %v15765_v44 = vld [vmem:[#allocation195_spill] sm:$0xff] }
 0x306   : > { %v4820_v50 = vadd.f32 %v4819_v60, %v15758_v8  ;;  %5475 = vperm.xlu0 %7088, %v15759_v6   ;;  %v10924_v33 = vmul.f32 %v4582_v19, %v15760_v11  ;;  %v10927_v38 = vmul.f32 %v4582_v19, %v10743_v43  ;;  %v10930_v1 = vmul.f32 %v4582_v19, %v10830_v40  ;;  %v15767_v6 = vld [vmem:[#allocation232_spill] sm:$0xff]  ;;  %v15768_v40 = vld [vmem:[#allocation39_spill] sm:$0xff]  ;;  %v2168_v11 = vpop.f32.mrf.mxu1 }
 0x307   : > { %15754 = vst [vmem:[#allocation51_spill] sm:$0xff] %v10907_v5  ;;  %15757 = vst [vmem:[#allocation139_spill] sm:$0xff] %v10919_v47  ;;  %v2837_v58 = vmul.f32 %v15744_v2, %v10907_v5  ;;  %v10935_v42 = vmul.f32 %v4582_v19, %v10761_v21  ;;  %v3310_v60 = vmul.f32 %v15745_v7, %v10907_v5  ;;  %v10939_v41 = vmax.f32 %v2345_v24, 0.0  ;;  %v10948_v2 = vld [vmem:[%s14266_s4 + $0x10] sm:$0xff]  ;;  %v10951_v7 = vpop.f32.mrf.mxu0  ;;  %v15771_v24 = vld [vmem:[#allocation52_spill] sm:$0xff] }
 0x308   : > { %15761 = vst [vmem:[#allocation151_spill] sm:$0xff] %v10927_v38  ;;  %15762 = vst [vmem:[#allocation79_spill] sm:$0xff] %v10930_v1  ;;  %v4686_v29 = vmul.f32 %v4554_v35, %v15765_v44  ;;  %v4967_v18 = vadd.f32 %v4966_v63, %v4680_v32  ;;  %v4687_v8 = vmul.f32 %v4554_v35, %v15766_v16  ;;  %v15772_v21 = vld [vmem:[#allocation7_spill] sm:$0xff]  ;;  %v15774_v16 = vld [vmem:[#allocation90_spill] sm:$0xff] }
 0x309   : > { %15763 = vst [vmem:[#allocation20_spill] sm:$0xff] %v10935_v42  ;;  %15764 = vst [vmem:[#allocation183_spill] sm:$0xff] %v10939_v41  ;;  %v4688_v48 = vmul.f32 %v4554_v35, %v15767_v6  ;;  %v4689_v43 = vmul.f32 %v4554_v35, %v15768_v40  ;;  %5483 = vperm.xlu1 %7085, %v10948_v2   ;;  %v3783_v19 = vmul.f32 %v15746_v23, %v10907_v5  ;;  %v15773_v40 = vld [vmem:[#allocation43_spill] sm:$0xff]  ;;  %v15776_v23 = vld [vmem:[#allocation184_spill] sm:$0xff] }
 0x30a   : > { %15769 = vst [vmem:[#allocation13_spill] sm:$0xff] %v10948_v2  ;;  %15770 = vst [vmem:[#allocation281_spill] sm:$0xff] %v10951_v7  ;;  %v4256_v32 = vmul.f32 %v15748_v31, %v10907_v5  ;;  %v2841_v63 = vmul.f32 %v15771_v24, %v10919_v47  ;;  %v4690_v20 = vmul.f32 %v4554_v35, %v15772_v21  ;;  %5487 = vperm.xlu0 %7088, %v15773_v40   ;;  %v2391_v31 = vpop.f32.mrf.mxu0  ;;  %v15777_v21 = vld [vmem:[#allocation45_spill] sm:$0xff] }
 0x30b   : > { %v10962_v6 = vadd.f32 %v10862_v59, %v2837_v58  ;;  %v3314_v44 = vmul.f32 %v15774_v16, %v10919_v47  ;;  %v3787_v7 = vmul.f32 %v15775_v46, %v10919_v47  ;;  %v4260_v25 = vmul.f32 %v15776_v23, %v10919_v47  ;;  %v15778_v31 = vld [vmem:[#allocation77_spill] sm:$0xff] }
 0x30c   : > { %v10971_v2 = vadd.f32 %v10870_v0, %v3310_v60  ;;  %v2843_v35 = vmul.f32 %v15771_v24, %v10939_v41  ;;  %v4821_v40 = vadd.f32 %v4820_v50, %v4686_v29  ;;  %v4857_v59 = vadd.f32 %v10874_v52, %v15777_v21  ;;  %v2172_v0 = vpop.f32.mrf.mxu1  ;;  %v10987_v60 = vld [vmem:[%s14266_s4 + $0x20] sm:$0xff]  ;;  %v15780_v29 = vld [vmem:[#allocation82_spill] sm:$0xff] }
 0x30d   : > { %v3316_v58 = vmul.f32 %v15774_v16, %v10939_v41  ;;  %v3789_v49 = vmul.f32 %v15775_v46, %v10939_v41  ;;  %v4262_v42 = vmul.f32 %v15776_v23, %v10939_v41  ;;  %v4894_v1 = vadd.f32 %v4893_v53, %v15778_v31  ;;  %15779 = vst [vmem:[#allocation76_spill] sm:$0xff] %v10987_v60 }
 0x30e   : > { %5491 = vperm.xlu1 %7085, %v10987_v60   ;;  %v3994_v21 = vadd.f32 %v10876_v45, %v3783_v19  ;;  %v4467_v52 = vadd.f32 %v10878_v56, %v4256_v32  ;;  %v4858_v50 = vadd.f32 %v4857_v59, %v4687_v8  ;;  %v4931_v38 = vadd.f32 %v4930_v26, %v15780_v29  ;;  %v15782_v45 = vld [vmem:[#allocation113_spill] sm:$0xff]  ;;  %v11006_v8 = vpop.permute.xlu0 %4589 }
 0x30f   : > { %5495 = vperm.xlu0 %7088, %v15781_v55   ;;  %v3012_v5 = vadd.f32 %v10884_v10, %v2841_v63  ;;  %v3485_v53 = vadd.f32 %v10886_v34, %v3314_v44  ;;  %v10997_v31 = vadd.f32 %v10888_v28, %v3787_v7  ;;  %v11000_v51 = vadd.f32 %v10892_v30, %v4260_v25  ;;  %v15783_v55 = vld [vmem:[#allocation21_spill] sm:$0xff]  ;;  %v11021_v30 = vld [vmem:[%s14266_s4 + $0x30] sm:$0xff] }
 0x310   : > { %v11003_v60 = vadd.f32 %v10895_v9, %v2843_v35  ;;  %v4968_v56 = vadd.f32 %v4967_v18, %v15782_v45  ;;  %v2169_v26 = vadd.f32 %v2168_v11, %v15751_v27  ;;  %v2173_v19 = vadd.f32 %v2172_v0, %v15783_v55  ;;  %15784 = vst [vmem:[#allocation52_spill] sm:$0xff] %v11021_v30  ;;  %v11060_v0 = vld [vmem:[%s14266_s4 + $0x40] sm:$0xff]  ;;  %v15798_v45 = vld [vmem:[#allocation10_spill] sm:$0xff] }
 0x311   : > { %v11011_v10 = vadd.f32 %v10901_v61, %v3316_v58  ;;  %v11014_v34 = vadd.f32 %v10903_v13, %v3789_v49  ;;  %v11016_v28 = vadd.f32 %v4504_v37, %v4262_v42  ;;  %v4895_v25 = vadd.f32 %v4894_v1, %v4688_v48  ;;  %v15787_v61 = vld [vmem:[#allocation199_spill] sm:$0xff]  ;;  %v4562_v13 = vpop.permute.xlu1 %4561  ;;  %v15789_v37 = vld [vmem:[#allocation293_spill] sm:$0xff]  ;;  %v15790_v1 = vld [vmem:[#allocation164_spill] sm:$0xff]  ;;  %v2174_v58 = vpop.f32.mrf.mxu1  ;;  %15794 = vst [vmem:[#allocation184_spill] sm:$0xff] %v11060_v0 }
 0x312   : > { %5499 = vperm.xlu1 %7085, %v11021_v30   ;;  %v4932_v9 = vadd.f32 %v4931_v38, %v4689_v43  ;;  %v11024_v27 = vmax.f32 %v2169_v26, 0.0  ;;  %v11026_v11 = vmax.f32 %v2173_v19, 0.0  ;;  %v2350_v44 = vadd.f32 %v15787_v61, %v15783_v55  ;;  %v15788_v49 = vld [vmem:[#allocation275_spill] sm:$0xff]  ;;  %v15799_v26 = vld [vmem:[#allocation117_spill] sm:$0xff] }
 0x313   : > { %5503 = vperm.xlu0 %7088, %v15788_v49   ;;  %v11033_v48 = vmul.f32 %v11006_v8, %v15789_v37  ;;  %v11037_v42 = vmul.f32 %v11006_v8, %v15790_v1  ;;  %v4822_v43 = vadd.f32 %v4821_v40, %v10614_v39  ;;  %v4859_v38 = vadd.f32 %v4858_v50, %v10631_v14  ;;  %v15792_v40 = vld [vmem:[#allocation219_spill] sm:$0xff]  ;;  %v11063_v50 = vpop.f32.mrf.mxu0  ;;  %v15800_v19 = vld [vmem:[#allocation89_spill] sm:$0xff]  ;;  %v15801_v49 = vld [vmem:[#allocation112_spill] sm:$0xff] }
 0x314   : > { %15785 = vst [vmem:[#allocation43_spill] sm:$0xff] %v11024_v27  ;;  %15786 = vst [vmem:[#allocation90_spill] sm:$0xff] %v11026_v11  ;;  %v4969_v18 = vadd.f32 %v4968_v56, %v4690_v20  ;;  %v11043_v7 = vmul.f32 %v11006_v8, %v10919_v47  ;;  %v11047_v32 = vmul.f32 %v11006_v8, %v10939_v41  ;;  %v15793_v20 = vld [vmem:[#allocation220_spill] sm:$0xff]  ;;  %v11069_v29 = vmax.f32 %v2350_v44, 0.0 }
 0x315   : > { %v2842_v63 = vmul.f32 %v15771_v24, %v11024_v27  ;;  %v3315_v35 = vmul.f32 %v15774_v16, %v11024_v27  ;;  %v3788_v39 = vmul.f32 %v15775_v46, %v11024_v27  ;;  %v4696_v14 = vmul.f32 %v4562_v13, %v15792_v40  ;;  %15795 = vst [vmem:[#allocation45_spill] sm:$0xff] %v11063_v50  ;;  %v15796_v24 = vld [vmem:[#allocation53_spill] sm:$0xff]  ;;  %v15802_v47 = vld [vmem:[#allocation72_spill] sm:$0xff] }
 0x316   : > { %15791 = vst [vmem:[#allocation123_spill] sm:$0xff] %v11047_v32  ;;  %v4697_v59 = vmul.f32 %v4562_v13, %v15793_v20  ;;  %5507 = vperm.xlu1 %7085, %v11060_v0   ;;  %v4261_v16 = vmul.f32 %v15776_v23, %v11024_v27  ;;  %v2846_v46 = vmul.f32 %v15796_v24, %v11026_v11  ;;  %15797 = vst [vmem:[#allocation77_spill] sm:$0xff] %v11069_v29  ;;  %v2394_v20 = vpop.f32.mrf.mxu0  ;;  %v15803_v40 = vld [vmem:[#allocation153_spill] sm:$0xff] }
 0x317   : > { %v4698_v56 = vmul.f32 %v4562_v13, %v15798_v45  ;;  %5511 = vperm.xlu0 %7088, %v15799_v26   ;;  %v3319_v61 = vmul.f32 %v15800_v19, %v11026_v11  ;;  %v4699_v41 = vmul.f32 %v4562_v13, %v15801_v49  ;;  %v4700_v1 = vmul.f32 %v4562_v13, %v15802_v47  ;;  %v15804_v50 = vld [vmem:[#allocation165_spill] sm:$0xff]  ;;  %v2176_v13 = vpop.f32.mrf.mxu1 }
 0x318   : > { %v4896_v37 = vadd.f32 %v4895_v25, %v10636_v15  ;;  %v3049_v23 = vadd.f32 %v10962_v6, %v2842_v63  ;;  %v3792_v44 = vmul.f32 %v15803_v40, %v11026_v11  ;;  %v4265_v45 = vmul.f32 %v15804_v50, %v11026_v11  ;;  %v11090_v15 = vld [vmem:[%s14266_s4 + $0x50] sm:$0xff] }
 0x319   : > { %v4933_v26 = vadd.f32 %v4932_v9, %v10653_v57  ;;  %v3522_v0 = vadd.f32 %v10971_v2, %v3315_v35  ;;  %v11085_v30 = vadd.f32 %v3994_v21, %v3788_v39  ;;  %v4823_v49 = vadd.f32 %v4822_v43, %v4696_v14  ;;  %15805 = vst [vmem:[#allocation82_spill] sm:$0xff] %v11090_v15  ;;  %v15806_v2 = vld [vmem:[#allocation46_spill] sm:$0xff]  ;;  %v11109_v35 = vpop.permute.xlu0 %4597 }
 0x31a   : > { %v4860_v32 = vadd.f32 %v4859_v38, %v4697_v59  ;;  %5515 = vperm.xlu1 %7085, %v11090_v15   ;;  %v4468_v6 = vadd.f32 %v4467_v52, %v4261_v16  ;;  %v3013_v25 = vadd.f32 %v3012_v5, %v2846_v46  ;;  %v2848_v63 = vmul.f32 %v15796_v24, %v11069_v29  ;;  %v15807_v39 = vld [vmem:[#allocation22_spill] sm:$0xff] }
 0x31b   : > { %v3321_v57 = vmul.f32 %v15800_v19, %v11069_v29  ;;  %5519 = vperm.xlu0 %7088, %v15806_v2   ;;  %v3486_v21 = vadd.f32 %v3485_v53, %v3319_v61  ;;  %v3794_v9 = vmul.f32 %v15803_v40, %v11069_v29  ;;  %v4267_v43 = vmul.f32 %v15804_v50, %v11069_v29  ;;  %v15808_v53 = vld [vmem:[#allocation105_spill] sm:$0xff] }
 0x31c   : > { %v2175_v38 = vadd.f32 %v2174_v58, %v15783_v55  ;;  %v11104_v52 = vadd.f32 %v10997_v31, %v3792_v44  ;;  %v11107_v5 = vadd.f32 %v11000_v51, %v4265_v45  ;;  %v2177_v14 = vadd.f32 %v2176_v13, %v15807_v39  ;;  %v4570_v55 = vpop.permute.xlu1 %4569  ;;  %v11120_v31 = vld [vmem:[%s14266_s4 + $0x60] sm:$0xff]  ;;  %v15817_v13 = vld [vmem:[#allocation78_spill] sm:$0xff] }
 0x31d   : > { %v2353_v20 = vadd.f32 %v15808_v53, %v15807_v39  ;;  %v4897_v59 = vadd.f32 %v4896_v37, %v4698_v56  ;;  %v4934_v16 = vadd.f32 %v4933_v26, %v4699_v41  ;;  %v4970_v46 = vadd.f32 %v4969_v18, %v10656_v4  ;;  %15810 = vst [vmem:[#allocation113_spill] sm:$0xff] %v11120_v31  ;;  %v15812_v37 = vld [vmem:[#allocation157_spill] sm:$0xff]  ;;  %v15813_v56 = vld [vmem:[#allocation135_spill] sm:$0xff] }
 0x31e   : > { %v11115_v61 = vmax.f32 %v2175_v38, 0.0  ;;  %5523 = vperm.xlu1 %7085, %v11120_v31   ;;  %v3087_v51 = vadd.f32 %v11003_v60, %v2848_v63  ;;  %v3560_v58 = vadd.f32 %v11011_v10, %v3321_v57  ;;  %v11125_v45 = vmax.f32 %v2177_v14, 0.0  ;;  %v15814_v60 = vld [vmem:[#allocation141_spill] sm:$0xff]  ;;  %v2178_v63 = vpop.f32.mrf.mxu1  ;;  %v15821_v38 = vld [vmem:[#allocation54_spill] sm:$0xff] }
 0x31f   : > { %v4824_v41 = vadd.f32 %v4823_v49, %v10749_v17  ;;  %5527 = vperm.xlu0 %7088, %v15812_v37   ;;  %v4033_v4 = vadd.f32 %v11014_v34, %v3794_v9  ;;  %v4506_v18 = vadd.f32 %v11016_v28, %v4267_v43  ;;  %v11133_v44 = vmul.f32 %v11109_v35, %v15813_v56  ;;  %v11146_v28 = vpop.f32.mrf.mxu0  ;;  %v15819_v9 = vld [vmem:[#allocation249_spill] sm:$0xff]  ;;  %v15825_v56 = vld [vmem:[#allocation131_spill] sm:$0xff] }
 0x320   : > { %15809 = vst [vmem:[#allocation259_spill] sm:$0xff] %v11115_v61  ;;  %15811 = vst [vmem:[#allocation21_spill] sm:$0xff] %v11125_v45  ;;  %v2847_v26 = vmul.f32 %v15796_v24, %v11115_v61  ;;  %v11139_v10 = vmul.f32 %v11109_v35, %v15814_v60  ;;  %v3320_v17 = vmul.f32 %v15800_v19, %v11115_v61  ;;  %v11143_v49 = vmax.f32 %v2353_v20, 0.0  ;;  %v11156_v19 = vld [vmem:[%s14266_s4 + $0x70] sm:$0xff]  ;;  %v15823_v20 = vld [vmem:[#allocation44_spill] sm:$0xff] }
 0x321   : > { %v4706_v34 = vmul.f32 %v4570_v55, %v15817_v13  ;;  %15818 = vst [vmem:[#allocation53_spill] sm:$0xff] %v11146_v28  ;;  %v4971_v57 = vadd.f32 %v4970_v46, %v4700_v1  ;;  %v3793_v2 = vmul.f32 %v15803_v40, %v11115_v61  ;;  %v4266_v24 = vmul.f32 %v15804_v50, %v11115_v61  ;;  %v15822_v1 = vld [vmem:[#allocation92_spill] sm:$0xff]  ;;  %v15824_v46 = vld [vmem:[#allocation14_spill] sm:$0xff]  ;;  %v2399_v50 = vpop.f32.mrf.mxu0  ;;  %v15826_v13 = vld [vmem:[#allocation193_spill] sm:$0xff] }
 0x322   : > { %15815 = vst [vmem:[#allocation199_spill] sm:$0xff] %v11139_v10  ;;  %15816 = vst [vmem:[#allocation275_spill] sm:$0xff] %v11143_v49  ;;  %v4707_v43 = vmul.f32 %v4570_v55, %v15819_v9  ;;  %5531 = vperm.xlu1 %7085, %v11156_v19   ;;  %v2851_v14 = vmul.f32 %v15821_v38, %v11125_v45  ;;  %v3324_v53 = vmul.f32 %v15822_v1, %v11125_v45  ;;  %v15827_v28 = vld [vmem:[#allocation287_spill] sm:$0xff] }
 0x323   : > { %15820 = vst [vmem:[#allocation117_spill] sm:$0xff] %v11156_v19  ;;  %v4708_v40 = vmul.f32 %v4570_v55, %v15823_v20  ;;  %v4709_v37 = vmul.f32 %v4570_v55, %v15824_v46  ;;  %5535 = vperm.xlu0 %7088, %v10623_v54   ;;  %v11166_v60 = vadd.f32 %v3049_v23, %v2847_v26  ;;  %v2182_v46 = vpop.f32.mrf.mxu1 }
 0x324   : > { %v3797_v9 = vmul.f32 %v15825_v56, %v11125_v45  ;;  %v4270_v47 = vmul.f32 %v15826_v13, %v11125_v45  ;;  %v4710_v19 = vmul.f32 %v4570_v55, %v15827_v28  ;;  %v11173_v31 = vadd.f32 %v3522_v0, %v3320_v17  ;;  %v11190_v0 = vld [vmem:[%s14266_s4 + $0x80] sm:$0xff] }
 0x325   : > { %v2853_v20 = vmul.f32 %v15821_v38, %v11143_v49  ;;  %v4825_v15 = vadd.f32 %v4824_v41, %v4706_v34  ;;  %v4861_v50 = vadd.f32 %v4860_v32, %v10779_v62  ;;  %v11179_v54 = vadd.f32 %v11085_v30, %v3793_v2  ;;  %15828 = vst [vmem:[#allocation89_spill] sm:$0xff] %v11190_v0  ;;  %v15829_v2 = vld [vmem:[#allocation23_spill] sm:$0xff] }
 0x326   : > { %v11181_v23 = vadd.f32 %v4468_v6, %v4266_v24  ;;  %v3326_v26 = vmul.f32 %v15822_v1, %v11143_v49  ;;  %v3799_v55 = vmul.f32 %v15825_v56, %v11143_v49  ;;  %5539 = vperm.xlu1 %7085, %v11190_v0   ;;  %v11193_v62 = vadd.f32 %v3013_v25, %v2851_v14  ;;  %v11206_v14 = vpop.permute.xlu0 %4605 }
 0x327   : > { %v11195_v32 = vadd.f32 %v3486_v21, %v3324_v53  ;;  %v4272_v30 = vmul.f32 %v15826_v13, %v11143_v49  ;;  %v4862_v6 = vadd.f32 %v4861_v50, %v4707_v43  ;;  %5543 = vperm.xlu0 %7088, %v10649_v3   ;;  %v4898_v41 = vadd.f32 %v4897_v59, %v10782_v36  ;;  %v15831_v53 = vld [vmem:[#allocation81_spill] sm:$0xff]  ;;  %v15832_v36 = vld [vmem:[#allocation130_spill] sm:$0xff] }
 0x328   : > { %v4935_v17 = vadd.f32 %v4934_v16, %v10785_v12  ;;  %v2179_v34 = vadd.f32 %v2178_v63, %v15807_v39  ;;  %v2183_v24 = vadd.f32 %v2182_v46, %v15829_v2  ;;  %v3960_v28 = vadd.f32 %v11104_v52, %v3797_v9  ;;  %15830 = vst [vmem:[#allocation153_spill] sm:$0xff] %v11206_v14  ;;  %v4578_v39 = vpop.permute.xlu1 %4577  ;;  %v11220_v52 = vld [vmem:[%s14266_s4 + $0x90] sm:$0xff]  ;;  %v15838_v63 = vld [vmem:[#allocation16_spill] sm:$0xff] }
 0x329   : > { %v4433_v25 = vadd.f32 %v11107_v5, %v4270_v47  ;;  %v3088_v21 = vadd.f32 %v3087_v51, %v2853_v20  ;;  %v2358_v43 = vadd.f32 %v15831_v53, %v15829_v2  ;;  %v11210_v50 = vadd.f32 %v3560_v58, %v3326_v26  ;;  %15834 = vst [vmem:[#allocation46_spill] sm:$0xff] %v11220_v52  ;;  %v15836_v16 = vld [vmem:[#allocation18_spill] sm:$0xff]  ;;  %v15837_v58 = vld [vmem:[#allocation168_spill] sm:$0xff]  ;;  %v15839_v20 = vld [vmem:[#allocation159_spill] sm:$0xff]  ;;  %v11240_v53 = vpop.f32.mrf.mxu0 }
 0x32a   : > { %v11212_v3 = vadd.f32 %v4033_v4, %v3799_v55  ;;  %v4972_v12 = vadd.f32 %v4971_v57, %v15832_v36  ;;  %v11215_v59 = vmax.f32 %v2179_v34, 0.0  ;;  %5547 = vperm.xlu1 %7085, %v11220_v52   ;;  %v4507_v47 = vadd.f32 %v4506_v18, %v4272_v30  ;;  %v15842_v30 = vld [vmem:[#allocation264_spill] sm:$0xff]  ;;  %v15843_v34 = vld [vmem:[#allocation271_spill] sm:$0xff]  ;;  %15844 = vst [vmem:[#allocation54_spill] sm:$0xff] %v11240_v53 }
 0x32b   : > { %v11223_v5 = vmax.f32 %v2183_v24, 0.0  ;;  %v4826_v51 = vadd.f32 %v4825_v15, %v15836_v16  ;;  %v4863_v4 = vadd.f32 %v4862_v6, %v15837_v58  ;;  %5551 = vperm.xlu0 %7088, %v15838_v63   ;;  %v4899_v57 = vadd.f32 %v4898_v41, %v4708_v40  ;;  %v2184_v24 = vpop.f32.mrf.mxu1  ;;  %v15850_v16 = vld [vmem:[#allocation91_spill] sm:$0xff]  ;;  %v15851_v63 = vld [vmem:[#allocation152_spill] sm:$0xff] }
 0x32c   : > { %15833 = vst [vmem:[#allocation165_spill] sm:$0xff] %v11215_v59  ;;  %v4936_v9 = vadd.f32 %v4935_v17, %v4709_v37  ;;  %v11230_v46 = vmul.f32 %v11206_v14, %v15839_v20  ;;  %v2852_v26 = vmul.f32 %v15821_v38, %v11215_v59  ;;  %v3325_v18 = vmul.f32 %v15822_v1, %v11215_v59  ;;  %v15845_v37 = vld [vmem:[#allocation176_spill] sm:$0xff]  ;;  %v15852_v20 = vld [vmem:[#allocation154_spill] sm:$0xff] }
 0x32d   : > { %15835 = vst [vmem:[#allocation22_spill] sm:$0xff] %v11223_v5  ;;  %v11236_v55 = vmax.f32 %v2358_v43, 0.0  ;;  %v4716_v15 = vmul.f32 %v4578_v39, %v15842_v30  ;;  %v4717_v6 = vmul.f32 %v4578_v39, %v15843_v34  ;;  %v4973_v40 = vadd.f32 %v4972_v12, %v4710_v19  ;;  %v15847_v17 = vld [vmem:[#allocation80_spill] sm:$0xff]  ;;  %v15849_v19 = vld [vmem:[#allocation55_spill] sm:$0xff]  ;;  %v15853_v34 = vld [vmem:[#allocation169_spill] sm:$0xff] }
 0x32e   : > { %15840 = vst [vmem:[#allocation105_spill] sm:$0xff] %v11230_v46  ;;  %v11244_v41 = vmul.f32 %v11206_v14, %v15845_v37  ;;  %v3798_v38 = vmul.f32 %v15825_v56, %v11215_v59  ;;  %v4718_v36 = vmul.f32 %v4578_v39, %v15847_v17  ;;  %v11252_v1 = vld [vmem:[%s14266_s4 + $0xa0] sm:$0xff]  ;;  %v4271_v43 = vmul.f32 %v15826_v13, %v11215_v59  ;;  %v2402_v37 = vpop.f32.mrf.mxu0 }
 0x32f   : > { %15841 = vst [vmem:[#allocation157_spill] sm:$0xff] %v11236_v55  ;;  %15848 = vst [vmem:[#allocation131_spill] sm:$0xff] %v11252_v1  ;;  %5555 = vperm.xlu1 %7085, %v11252_v1   ;;  %v2856_v12 = vmul.f32 %v15849_v19, %v11223_v5  ;;  %v3329_v58 = vmul.f32 %v15850_v16, %v11223_v5  ;;  %v4719_v56 = vmul.f32 %v4578_v39, %v15851_v63  ;;  %v15854_v53 = vld [vmem:[#allocation200_spill] sm:$0xff]  ;;  %v15855_v1 = vld [vmem:[#allocation122_spill] sm:$0xff] }
 0x330   : > { %15846 = vst [vmem:[#allocation92_spill] sm:$0xff] %v11244_v41  ;;  %5559 = vperm.xlu0 %7088, %v15852_v20   ;;  %v11264_v17 = vadd.f32 %v11166_v60, %v2852_v26  ;;  %v3802_v30 = vmul.f32 %v15853_v34, %v11223_v5  ;;  %v4275_v13 = vmul.f32 %v15854_v53, %v11223_v5  ;;  %v2186_v20 = vpop.f32.mrf.mxu1 }
 0x331   : > { %v4720_v52 = vmul.f32 %v4578_v39, %v15855_v1  ;;  %v11272_v0 = vadd.f32 %v11173_v31, %v3325_v18  ;;  %v2858_v63 = vmul.f32 %v15849_v19, %v11236_v55  ;;  %v4827_v37 = vadd.f32 %v4826_v51, %v4716_v15  ;;  %v11288_v31 = vld [vmem:[%s14266_s4 + $0xb0] sm:$0xff]  ;;  %v15859_v1 = vld [vmem:[#allocation88_spill] sm:$0xff] }
 0x332   : > { %v4864_v41 = vadd.f32 %v4863_v4, %v4717_v6  ;;  %v11277_v60 = vadd.f32 %v11179_v54, %v3798_v38  ;;  %v3331_v26 = vmul.f32 %v15850_v16, %v11236_v55  ;;  %v3804_v46 = vmul.f32 %v15853_v34, %v11236_v55  ;;  %15856 = vst [vmem:[#allocation193_spill] sm:$0xff] %v11288_v31  ;;  %v15857_v18 = vld [vmem:[#allocation50_spill] sm:$0xff]  ;;  %v15858_v6 = vld [vmem:[#allocation115_spill] sm:$0xff] }
 0x333   : > { %v4277_v39 = vmul.f32 %v15854_v53, %v11236_v55  ;;  %5563 = vperm.xlu1 %7085, %v11288_v31   ;;  %v11292_v51 = vadd.f32 %v11181_v23, %v4271_v43  ;;  %v11295_v54 = vadd.f32 %v11193_v62, %v2856_v12  ;;  %v11298_v4 = vadd.f32 %v11195_v32, %v3329_v58  ;;  %v15860_v31 = vld [vmem:[#allocation24_spill] sm:$0xff]  ;;  %v15861_v62 = vld [vmem:[#allocation19_spill] sm:$0xff]  ;;  %v11312_v32 = vpop.permute.xlu0 %4613 }
 0x334   : > { %v4900_v15 = vadd.f32 %v4899_v57, %v15857_v18  ;;  %5567 = vperm.xlu0 %7088, %v15858_v6   ;;  %v11302_v38 = vadd.f32 %v3960_v28, %v3802_v30  ;;  %v4937_v14 = vadd.f32 %v4936_v9, %v15859_v1  ;;  %v2185_v10 = vadd.f32 %v2184_v24, %v15829_v2  ;;  %v15863_v57 = vld [vmem:[#allocation9_spill] sm:$0xff]  ;;  %v11316_v18 = vpop.f32.mrf.mxu0  ;;  %v11329_v30 = vld [vmem:[%s14266_s4 + $0xc0] sm:$0xff] }
 0x335   : > { %v2187_v55 = vadd.f32 %v2186_v20, %v15860_v31  ;;  %v11307_v23 = vadd.f32 %v4433_v25, %v4275_v13  ;;  %v11309_v43 = vadd.f32 %v3088_v21, %v2858_v63  ;;  %v4974_v12 = vadd.f32 %v4973_v40, %v15861_v62  ;;  %15862 = vst [vmem:[#allocation23_spill] sm:$0xff] %v11312_v32  ;;  %v4586_v21 = vpop.permute.xlu1 %4585  ;;  %v15869_v1 = vld [vmem:[#allocation189_spill] sm:$0xff]  ;;  %v15871_v13 = vld [vmem:[#allocation204_spill] sm:$0xff]  ;;  %v15877_v62 = vld [vmem:[#allocation51_spill] sm:$0xff] }
 0x336   : > { %v2361_v58 = vadd.f32 %v15863_v57, %v15860_v31  ;;  %15864 = vst [vmem:[#allocation81_spill] sm:$0xff] %v11316_v18  ;;  %v3562_v28 = vadd.f32 %v11210_v50, %v3331_v26  ;;  %v11320_v9 = vadd.f32 %v11212_v3, %v3804_v46  ;;  %v11322_v2 = vadd.f32 %v4507_v47, %v4277_v39  ;;  %v2407_v46 = vpop.f32.mrf.mxu0  ;;  %v15868_v47 = vld [vmem:[#allocation49_spill] sm:$0xff]  ;;  %v2188_v39 = vpop.f32.mrf.mxu1 }
 0x337   : > { %v11324_v25 = vmax.f32 %v2185_v10, 0.0  ;;  %15866 = vst [vmem:[#allocation18_spill] sm:$0xff] %v11329_v30  ;;  %5571 = vperm.xlu1 %7085, %v11329_v30   ;;  %v4901_v24 = vadd.f32 %v4900_v15, %v4718_v36  ;;  %v11332_v40 = vmax.f32 %v2187_v55, 0.0  ;;  %v4828_v50 = vadd.f32 %v4827_v37, %v10917_v22  ;;  %v15874_v22 = vld [vmem:[#allocation283_spill] sm:$0xff]  ;;  %v15881_v46 = vld [vmem:[#allocation156_spill] sm:$0xff] }
 0x338   : > { %v4865_v3 = vadd.f32 %v4864_v41, %v10924_v33  ;;  %5575 = vperm.xlu0 %7088, %v15868_v47   ;;  %v4938_v10 = vadd.f32 %v4937_v14, %v4719_v56  ;;  %v11339_v63 = vmul.f32 %v11312_v32, %v15869_v1  ;;  %v11343_v20 = vmul.f32 %v11312_v32, %v15871_v13  ;;  %v15875_v41 = vld [vmem:[#allocation291_spill] sm:$0xff]  ;;  %v15882_v13 = vld [vmem:[#allocation290_spill] sm:$0xff] }
 0x339   : > { %15865 = vst [vmem:[#allocation130_spill] sm:$0xff] %v11324_v25  ;;  %15867 = vst [vmem:[#allocation168_spill] sm:$0xff] %v11332_v40  ;;  %v2857_v55 = vmul.f32 %v15849_v19, %v11324_v25  ;;  %v4975_v36 = vadd.f32 %v4974_v12, %v4720_v52  ;;  %v11347_v26 = vmax.f32 %v2361_v58, 0.0  ;;  %v4726_v33 = vmul.f32 %v4586_v21, %v15874_v22  ;;  %v15876_v15 = vld [vmem:[#allocation243_spill] sm:$0xff]  ;;  %v11360_v52 = vld [vmem:[%s14266_s4 + $0xd0] sm:$0xff] }
 0x33a   : > { %15870 = vst [vmem:[#allocation16_spill] sm:$0xff] %v11339_v63  ;;  %15872 = vst [vmem:[#allocation55_spill] sm:$0xff] %v11343_v20  ;;  %v4727_v37 = vmul.f32 %v4586_v21, %v15875_v41  ;;  %v3330_v14 = vmul.f32 %v15850_v16, %v11324_v25  ;;  %v3803_v56 = vmul.f32 %v15853_v34, %v11324_v25  ;;  %v15879_v12 = vld [vmem:[#allocation56_spill] sm:$0xff]  ;;  %v15880_v58 = vld [vmem:[#allocation94_spill] sm:$0xff] }
 0x33b   : > { %15873 = vst [vmem:[#allocation91_spill] sm:$0xff] %v11347_v26  ;;  %v4728_v6 = vmul.f32 %v4586_v21, %v15876_v15  ;;  %v4729_v57 = vmul.f32 %v4586_v21, %v15877_v62  ;;  %15878 = vst [vmem:[#allocation154_spill] sm:$0xff] %v11360_v52  ;;  %5579 = vperm.xlu1 %7085, %v11360_v52   ;;  %v4276_v19 = vmul.f32 %v15854_v53, %v11324_v25  ;;  %v15883_v62 = vld [vmem:[#allocation146_spill] sm:$0xff]  ;;  %v15885_v53 = vld [vmem:[#allocation151_spill] sm:$0xff]  ;;  %v11379_v52 = vpop.f32.mrf.mxu0 }
 0x33c   : > { %v2861_v16 = vmul.f32 %v15879_v12, %v11332_v40  ;;  %v3334_v34 = vmul.f32 %v15880_v58, %v11332_v40  ;;  %v4730_v47 = vmul.f32 %v4586_v21, %v15881_v46  ;;  %5583 = vperm.xlu0 %7088, %v15882_v13   ;;  %v11372_v1 = vadd.f32 %v11264_v17, %v2857_v55  ;;  %v15884_v41 = vld [vmem:[#allocation210_spill] sm:$0xff]  ;;  %v2192_v17 = vpop.f32.mrf.mxu1  ;;  %v4594_v55 = vpop.permute.xlu1 %4593 }
 0x33d   : > { %v3807_v15 = vmul.f32 %v15883_v62, %v11332_v40  ;;  %v4280_v22 = vmul.f32 %v15884_v41, %v11332_v40  ;;  %v4902_v18 = vadd.f32 %v4901_v24, %v15885_v53  ;;  %15886 = vst [vmem:[#allocation169_spill] sm:$0xff] %v11379_v52  ;;  %v2863_v30 = vmul.f32 %v15879_v12, %v11347_v26  ;;  %v11396_v52 = vld [vmem:[%s14266_s4 + $0xe0] sm:$0xff] }
 0x33e   : > { %v3336_v21 = vmul.f32 %v15880_v58, %v11347_v26  ;;  %v4829_v13 = vadd.f32 %v4828_v50, %v4726_v33  ;;  %v4866_v46 = vadd.f32 %v4865_v3, %v4727_v37  ;;  %v3525_v20 = vadd.f32 %v11272_v0, %v3330_v14  ;;  %15887 = vst [vmem:[#allocation200_spill] sm:$0xff] %v11396_v52  ;;  %v2410_v50 = vpop.f32.mrf.mxu0  ;;  %v15888_v33 = vld [vmem:[#allocation79_spill] sm:$0xff]  ;;  %v11406_v14 = vld [vmem:[%s14266_s4 + $0xe8] sm:$0xff] }
 0x33f   : > { %v11387_v63 = vadd.f32 %v11277_v60, %v3803_v56  ;;  %v3809_v24 = vmul.f32 %v15883_v62, %v11347_v26  ;;  %v4282_v53 = vmul.f32 %v15884_v41, %v11347_v26  ;;  %5587 = vperm.xlu1 %7085, %v11396_v52   ;;  %v4471_v3 = vadd.f32 %v11292_v51, %v4276_v19  ;;  %v15890_v19 = vld [vmem:[#allocation25_spill] sm:$0xff] }
 0x340   : > { %v3016_v0 = vadd.f32 %v11295_v54, %v2861_v16  ;;  %v3489_v60 = vadd.f32 %v11298_v4, %v3334_v34  ;;  %v4939_v37 = vadd.f32 %v4938_v10, %v15888_v33  ;;  %15889 = vst [vmem:[#allocation50_spill] sm:$0xff] %v11406_v14  ;;  %5591 = vperm.xlu0 %7088, %v11406_v14   ;;  %v11420_v34 = vpop.permute.xlu0 %4621  ;;  %v15892_v50 = vld [vmem:[#allocation109_spill] sm:$0xff] }
 0x341   : > { %v3962_v56 = vadd.f32 %v11302_v38, %v3807_v15  ;;  %v11411_v52 = vadd.f32 %v11307_v23, %v4280_v22  ;;  %v2189_v51 = vadd.f32 %v2188_v39, %v15860_v31  ;;  %v2193_v54 = vadd.f32 %v2192_v17, %v15890_v19  ;;  %15891 = vst [vmem:[#allocation115_spill] sm:$0xff] %v11420_v34  ;;  %v15893_v22 = vld [vmem:[#allocation20_spill] sm:$0xff] }
 0x342   : > { %v11416_v4 = vadd.f32 %v11309_v43, %v2863_v30  ;;  %v11418_v10 = vadd.f32 %v3562_v28, %v3336_v21  ;;  %v4903_v16 = vadd.f32 %v4902_v18, %v4728_v6  ;;  %v2366_v33 = vadd.f32 %v15892_v50, %v15890_v19  ;;  %v11434_v6 = vpop.permute.xlu1 %4601  ;;  %v15897_v21 = vld [vmem:[#allocation86_spill] sm:$0xff] }
 0x343   : > { %v4036_v38 = vadd.f32 %v11320_v9, %v3809_v24  ;;  %v4509_v23 = vadd.f32 %v11322_v2, %v4282_v53  ;;  %v4976_v15 = vadd.f32 %v4975_v36, %v15893_v22  ;;  %v11427_v31 = vmax.f32 %v2189_v51, 0.0  ;;  %v15898_v9 = vld [vmem:[#allocation218_spill] sm:$0xff]  ;;  %v15900_v36 = vld [vmem:[#allocation224_spill] sm:$0xff]  ;;  %v15904_v53 = vld [vmem:[#allocation127_spill] sm:$0xff]  ;;  %v2194_v51 = vpop.f32.mrf.mxu1 }
 0x344   : > { %v15895_v39 = vmov 7   ;;  %v4940_v43 = vadd.f32 %v4939_v37, %v4729_v57  ;;  %v11430_v30 = vmax.f32 %v2193_v54, 0.0  ;;  %v4830_v18 = vadd.f32 %v4829_v13, %v11033_v48  ;;  %v15903_v13 = vld [vmem:[#allocation124_spill] sm:$0xff]  ;;  %v11459_v54 = vld [vmem:[%s14266_s4 + $0xf0] sm:$0xff]  ;;  %v15906_v22 = vld [vmem:[#allocation57_spill] sm:$0xff] }
 0x345   : > { %15894 = vst [vmem:[#allocation88_spill] sm:$0xff] %v11427_v31  ;;  %7087 = vset.pattern.permute.xlu1 %v15895_v39  ;;  %v4867_v28 = vadd.f32 %v4866_v46, %v11037_v42  ;;  %v11439_v2 = vmul.f32 %v11420_v34, %v15898_v9  ;;  %v11443_v17 = vmul.f32 %v11420_v34, %v15900_v36  ;;  %v11452_v46 = vmax.f32 %v2366_v33, 0.0  ;;  %v15907_v36 = vld [vmem:[#allocation93_spill] sm:$0xff] }
 0x346   : > { %15896 = vst [vmem:[#allocation24_spill] sm:$0xff] %v11430_v30  ;;  %5952 = vperm.xlu1 %7087, %v15897_v21   ;;  %v2862_v57 = vmul.f32 %v15879_v12, %v11427_v31  ;;  %v4734_v48 = vmul.f32 %v11006_v8, %v11024_v27  ;;  %7090 = vset.pattern.permute.xlu0 %v15895_v39  ;;  %15905 = vst [vmem:[#allocation56_spill] sm:$0xff] %v11459_v54 }
 0x347   : > { %15899 = vst [vmem:[#allocation19_spill] sm:$0xff] %v11439_v2  ;;  %15901 = vst [vmem:[#allocation9_spill] sm:$0xff] %v11443_v17  ;;  %v3335_v42 = vmul.f32 %v15880_v58, %v11427_v31  ;;  %v4736_v24 = vmul.f32 %v4594_v55, %v15903_v13  ;;  %v4737_v37 = vmul.f32 %v4594_v55, %v15904_v53  ;;  %6068 = vperm.xlu0 %7090, %v11459_v54   ;;  %v15908_v53 = vld [vmem:[#allocation13_spill] sm:$0xff]  ;;  %v2196_v17 = vpop.f32.mrf.mxu1  ;;  %v15915_v2 = vld [vmem:[#allocation26_spill] sm:$0xff] }
 0x348   : > { %15902 = vst [vmem:[#allocation49_spill] sm:$0xff] %v11452_v46  ;;  %v4977_v8 = vadd.f32 %v4976_v15, %v4730_v47  ;;  %v3808_v12 = vmul.f32 %v15883_v62, %v11427_v31  ;;  %v4738_v58 = vmul.f32 %v4594_v55, %v11026_v11  ;;  %v4739_v50 = vmul.f32 %v4594_v55, %v11115_v61  ;;  %v15909_v62 = vld [vmem:[#allocation180_spill] sm:$0xff]  ;;  %v15910_v61 = vld [vmem:[#allocation162_spill] sm:$0xff] }
 0x349   : > { %v4281_v33 = vmul.f32 %v15884_v41, %v11427_v31  ;;  %v2866_v21 = vmul.f32 %v15906_v22, %v11430_v30  ;;  %v3339_v9 = vmul.f32 %v15907_v36, %v11430_v30  ;;  %v4740_v27 = vmul.f32 %v4594_v55, %v11069_v29  ;;  %v11482_v55 = vpop.permute.xlu1 %4609 }
 0x34a   : > { %5956 = vperm.xlu1 %7087, %v15908_v53   ;;  %v3053_v47 = vadd.f32 %v11372_v1, %v2862_v57  ;;  %v3812_v15 = vmul.f32 %v15909_v62, %v11430_v30  ;;  %v4285_v11 = vmul.f32 %v15910_v61, %v11430_v30  ;;  %v4904_v41 = vadd.f32 %v4903_v16, %v11043_v7 }
 0x34b   : > { %v3526_v13 = vadd.f32 %v3525_v20, %v3335_v42  ;;  %v2868_v39 = vmul.f32 %v15906_v22, %v11452_v46  ;;  %v4831_v54 = vadd.f32 %v4830_v18, %v4736_v24  ;;  %v4868_v14 = vadd.f32 %v4867_v28, %v4737_v37  ;;  %v15912_v42 = vld [vmem:[#allocation76_spill] sm:$0xff]  ;;  %v15913_v37 = vld [vmem:[#allocation123_spill] sm:$0xff] }
 0x34c   : > { %v15911_v53 = vmov 0   ;;  %v3999_v1 = vadd.f32 %v11387_v63, %v3808_v12  ;;  %v3341_v57 = vmul.f32 %v15907_v36, %v11452_v46  ;;  %v3814_v29 = vmul.f32 %v15909_v62, %v11452_v46  ;;  %v11496_v63 = vpop.permute.xlu0 %4629 }
 0x34d   : > { %7092 = vset.pattern.permute.xlu0 %v15911_v53  ;;  %v4287_v7 = vmul.f32 %v15910_v61, %v11452_v46  ;;  %v4472_v20 = vadd.f32 %v4471_v3, %v4281_v33  ;;  %v3017_v16 = vadd.f32 %v3016_v0, %v2866_v21  ;;  %v11492_v18 = vadd.f32 %v3489_v60, %v3339_v9  ;;  %v15916_v0 = vld [vmem:[#allocation111_spill] sm:$0xff]  ;;  %v15918_v33 = vld [vmem:[#allocation244_spill] sm:$0xff] }
 0x34e   : > { %v4941_v28 = vadd.f32 %v4940_v43, %v4734_v48  ;;  %5964 = vperm.xlu1 %7087, %v15912_v42   ;;  %v3963_v24 = vadd.f32 %v3962_v56, %v3812_v15  ;;  %v4978_v53 = vadd.f32 %v4977_v8, %v15913_v37  ;;  %15914 = vst [vmem:[#allocation94_spill] sm:$0xff] %v11496_v63  ;;  %v15927_v15 = vld [vmem:[#allocation150_spill] sm:$0xff]  ;;  %v15929_v42 = vld [vmem:[#allocation157_spill] sm:$0xff]  ;;  %v15930_v37 = vld [vmem:[#allocation184_spill] sm:$0xff] }
 0x34f   : > { %v2195_v12 = vadd.f32 %v2194_v51, %v15890_v19  ;;  %v2197_v34 = vadd.f32 %v2196_v17, %v15915_v2  ;;  %v4436_v32 = vadd.f32 %v11411_v52, %v4285_v11  ;;  %v3091_v46 = vadd.f32 %v11416_v4, %v2868_v39  ;;  %v11514_v52 = vpop.permute.xlu1 %4617  ;;  %v15922_v4 = vld [vmem:[#allocation52_spill] sm:$0xff] }
 0x350   : > { %v4905_v3 = vadd.f32 %v4904_v41, %v4738_v58  ;;  %v2369_v60 = vadd.f32 %v15916_v0, %v15915_v2  ;;  %v3564_v43 = vadd.f32 %v11418_v10, %v3341_v57  ;;  %v4037_v9 = vadd.f32 %v4036_v38, %v3814_v29  ;;  %15921 = vst [vmem:[#allocation151_spill] sm:$0xff] %v11514_v52  ;;  %v15923_v51 = vld [vmem:[#allocation248_spill] sm:$0xff]  ;;  %v2198_v58 = vpop.f32.mrf.mxu1  ;;  %v15928_v41 = vld [vmem:[#allocation58_spill] sm:$0xff] }
 0x351   : > { %v4510_v56 = vadd.f32 %v4509_v23, %v4287_v7  ;;  %v11505_v48 = vmax.f32 %v2195_v12, 0.0  ;;  %v4942_v8 = vadd.f32 %v4941_v28, %v4739_v50  ;;  %v11509_v19 = vmul.f32 %v11496_v63, %v15918_v33  ;;  %v15932_v12 = vld [vmem:[#allocation158_spill] sm:$0xff] }
 0x352   : > { %v11511_v17 = vmax.f32 %v2197_v34, 0.0  ;;  %v4832_v11 = vadd.f32 %v4831_v54, %v11133_v44  ;;  %5972 = vperm.xlu1 %7087, %v15922_v4   ;;  %v4979_v39 = vadd.f32 %v4978_v53, %v4740_v27  ;;  %v11519_v29 = vmul.f32 %v11496_v63, %v15923_v51  ;;  %v15926_v54 = vld [vmem:[#allocation149_spill] sm:$0xff]  ;;  %v11556_v51 = vpop.permute.xlu0 %4637 }
 0x353   : > { %15917 = vst [vmem:[#allocation290_spill] sm:$0xff] %v11505_v48  ;;  %15919 = vst [vmem:[#allocation146_spill] sm:$0xff] %v11509_v19  ;;  %v2867_v10 = vmul.f32 %v15906_v22, %v11505_v48  ;;  %v4743_v38 = vmul.f32 %v11109_v35, %v11125_v45  ;;  %v3340_v34 = vmul.f32 %v15907_v36, %v11505_v48  ;;  %v11527_v23 = vmax.f32 %v2369_v60, 0.0  ;;  %v15933_v60 = vld [vmem:[#allocation108_spill] sm:$0xff] }
 0x354   : > { %15920 = vst [vmem:[#allocation210_spill] sm:$0xff] %v11511_v17  ;;  %15924 = vst [vmem:[#allocation79_spill] sm:$0xff] %v11519_v29  ;;  %v4744_v44 = vmul.f32 %v11109_v35, %v11215_v59  ;;  %v4746_v27 = vmul.f32 %v11434_v6, %v15926_v54  ;;  %v3813_v50 = vmul.f32 %v15909_v62, %v11505_v48 }
 0x355   : > { %15925 = vst [vmem:[#allocation25_spill] sm:$0xff] %v11527_v23  ;;  %v4286_v22 = vmul.f32 %v15910_v61, %v11505_v48  ;;  %v4745_v21 = vmul.f32 %v11109_v35, %v11143_v49  ;;  %v4747_v36 = vmul.f32 %v11434_v6, %v15927_v15  ;;  %v2871_v57 = vmul.f32 %v15928_v41, %v11511_v17  ;;  %v15931_v35 = vld [vmem:[#allocation96_spill] sm:$0xff] }
 0x356   : > { %v4748_v7 = vmul.f32 %v11434_v6, %v11223_v5  ;;  %v4749_v28 = vmul.f32 %v11434_v6, %v11324_v25  ;;  %v4750_v62 = vmul.f32 %v11434_v6, %v15929_v42  ;;  %5980 = vperm.xlu1 %7087, %v15930_v37   ;;  %v3054_v61 = vadd.f32 %v3053_v47, %v2867_v10  ;;  %v15935_v6 = vld [vmem:[#allocation199_spill] sm:$0xff]  ;;  %v2202_v37 = vpop.f32.mrf.mxu1  ;;  %v11561_v47 = vpop.permute.xlu1 %4625 }
 0x357   : > { %v3344_v53 = vmul.f32 %v15931_v35, %v11511_v17  ;;  %v3817_v0 = vmul.f32 %v15932_v12, %v11511_v17  ;;  %v4290_v4 = vmul.f32 %v15933_v60, %v11511_v17  ;;  %15934 = vst [vmem:[#allocation109_spill] sm:$0xff] %v11556_v51  ;;  %v3527_v33 = vadd.f32 %v3526_v13, %v3340_v34 }
 0x358   : > { %v2873_v49 = vmul.f32 %v15928_v41, %v11527_v23  ;;  %v4833_v59 = vadd.f32 %v4832_v11, %v4746_v27  ;;  %v4869_v45 = vadd.f32 %v4868_v14, %v15935_v6  ;;  %15936 = vst [vmem:[#allocation20_spill] sm:$0xff] %v11561_v47  ;;  %v4000_v10 = vadd.f32 %v3999_v1, %v3813_v50  ;;  %v15937_v11 = vld [vmem:[#allocation82_spill] sm:$0xff]  ;;  %v15938_v1 = vld [vmem:[#allocation27_spill] sm:$0xff] }
 0x359   : > { %v4473_v42 = vadd.f32 %v4472_v20, %v4286_v22  ;;  %v3346_v25 = vmul.f32 %v15931_v35, %v11527_v23  ;;  %v3819_v5 = vmul.f32 %v15932_v12, %v11527_v23  ;;  %v4292_v13 = vmul.f32 %v15933_v60, %v11527_v23 }
 0x35a   : > { %v4870_v34 = vadd.f32 %v4869_v45, %v4747_v36  ;;  %v4906_v15 = vadd.f32 %v4905_v3, %v4743_v38  ;;  %v4943_v54 = vadd.f32 %v4942_v8, %v4744_v44  ;;  %5988 = vperm.xlu1 %7087, %v15937_v11   ;;  %v3018_v14 = vadd.f32 %v3017_v16, %v2871_v57  ;;  %v15941_v45 = vld [vmem:[#allocation15_spill] sm:$0xff]  ;;  %v11581_v44 = vpop.permute.xlu1 %4633  ;;  %v15953_v11 = vld [vmem:[#allocation196_spill] sm:$0xff] }
 0x35b   : > { %v4980_v27 = vadd.f32 %v4979_v39, %v4745_v21  ;;  %v2199_v6 = vadd.f32 %v2198_v58, %v15915_v2  ;;  %v2203_v20 = vadd.f32 %v2202_v37, %v15938_v1  ;;  %v3491_v50 = vadd.f32 %v11492_v18, %v3344_v53  ;;  %v11579_v2 = vpop.permute.xlu0 %4645  ;;  %v15943_v18 = vld [vmem:[#allocation113_spill] sm:$0xff]  ;;  %v15952_v37 = vld [vmem:[#allocation95_spill] sm:$0xff] }
 0x35c   : > { %v3964_v22 = vadd.f32 %v3963_v24, %v3817_v0  ;;  %v4437_v63 = vadd.f32 %v4436_v32, %v4290_v4  ;;  %v3092_v29 = vadd.f32 %v3091_v46, %v2873_v49  ;;  %v3565_v19 = vadd.f32 %v3564_v43, %v3346_v25  ;;  %15942 = vst [vmem:[#allocation93_spill] sm:$0xff] %v11579_v2  ;;  %v15944_v49 = vld [vmem:[#allocation263_spill] sm:$0xff]  ;;  %v15945_v46 = vld [vmem:[#allocation266_spill] sm:$0xff] }
 0x35d   : > { %v11573_v47 = vmax.f32 %v2199_v6, 0.0  ;;  %v11575_v52 = vmax.f32 %v2203_v20, 0.0  ;;  %v2374_v3 = vadd.f32 %v15941_v45, %v15938_v1  ;;  %v4038_v8 = vadd.f32 %v4037_v9, %v3819_v5  ;;  %v15954_v6 = vld [vmem:[#allocation5_spill] sm:$0xff] }
 0x35e   : > { %v4511_v16 = vadd.f32 %v4510_v56, %v4292_v13  ;;  %v4907_v39 = vadd.f32 %v4906_v15, %v4748_v7  ;;  %v4944_v38 = vadd.f32 %v4943_v54, %v4749_v28  ;;  %5996 = vperm.xlu1 %7087, %v15943_v18   ;;  %v4981_v32 = vadd.f32 %v4980_v27, %v4750_v62  ;;  %v15946_v56 = vld [vmem:[#allocation153_spill] sm:$0xff]  ;;  %v15947_v15 = vld [vmem:[#allocation59_spill] sm:$0xff]  ;;  %v2204_v7 = vpop.f32.mrf.mxu1 }
 0x35f   : > { %15939 = vst [vmem:[#allocation86_spill] sm:$0xff] %v11573_v47  ;;  %15940 = vst [vmem:[#allocation57_spill] sm:$0xff] %v11575_v52  ;;  %v11586_v25 = vmul.f32 %v11556_v51, %v15944_v49  ;;  %v11590_v24 = vmul.f32 %v11556_v51, %v15945_v46  ;;  %v2872_v5 = vmul.f32 %v15928_v41, %v11573_v47  ;;  %v11606_v57 = vmax.f32 %v2374_v3, 0.0  ;;  %v15949_v28 = vld [vmem:[#allocation179_spill] sm:$0xff]  ;;  %v15955_v18 = vld [vmem:[#allocation105_spill] sm:$0xff] }
 0x360   : > { %v3345_v43 = vmul.f32 %v15931_v35, %v11573_v47  ;;  %v3818_v9 = vmul.f32 %v15932_v12, %v11573_v47  ;;  %v4753_v54 = vmul.f32 %v15946_v56, %v11332_v40  ;;  %v4754_v58 = vmul.f32 %v15946_v56, %v11427_v31  ;;  %v15950_v35 = vld [vmem:[#allocation182_spill] sm:$0xff]  ;;  %v15956_v46 = vld [vmem:[#allocation92_spill] sm:$0xff]  ;;  %v11629_v31 = vpop.permute.xlu1 %4641 }
 0x361   : > { %v4291_v21 = vmul.f32 %v15933_v60, %v11573_v47  ;;  %v2876_v36 = vmul.f32 %v15947_v15, %v11575_v52  ;;  %15948 = vst [vmem:[#allocation13_spill] sm:$0xff] %v11606_v57  ;;  %v4755_v41 = vmul.f32 %v15946_v56, %v11347_v26  ;;  %v4756_v62 = vmul.f32 %v11482_v55, %v15949_v28  ;;  %v15951_v60 = vld [vmem:[#allocation117_spill] sm:$0xff]  ;;  %v11627_v26 = vpop.permute.xlu0 %4653 }
 0x362   : > { %v4757_v53 = vmul.f32 %v11482_v55, %v15950_v35  ;;  %v4758_v12 = vmul.f32 %v11482_v55, %v11430_v30  ;;  %v4759_v0 = vmul.f32 %v11482_v55, %v11505_v48  ;;  %6004 = vperm.xlu1 %7087, %v15951_v60   ;;  %v3055_v4 = vadd.f32 %v3054_v61, %v2872_v5  ;;  %v2206_v48 = vpop.f32.mrf.mxu1  ;;  %v15961_v35 = vld [vmem:[#allocation28_spill] sm:$0xff] }
 0x363   : > { %v3349_v13 = vmul.f32 %v15952_v37, %v11575_v52  ;;  %v3822_v27 = vmul.f32 %v15953_v11, %v11575_v52  ;;  %v4295_v20 = vmul.f32 %v15954_v6, %v11575_v52  ;;  %v3528_v45 = vadd.f32 %v3527_v33, %v3345_v43  ;;  %15957 = vst [vmem:[#allocation180_spill] sm:$0xff] %v11627_v26 }
 0x364   : > { %v4001_v3 = vadd.f32 %v4000_v10, %v3818_v9  ;;  %v4834_v56 = vadd.f32 %v4833_v59, %v15955_v18  ;;  %v4871_v49 = vadd.f32 %v4870_v34, %v15956_v46  ;;  %15958 = vst [vmem:[#allocation162_spill] sm:$0xff] %v11629_v31  ;;  %v4474_v61 = vadd.f32 %v4473_v42, %v4291_v21  ;;  %v15959_v46 = vld [vmem:[#allocation89_spill] sm:$0xff] }
 0x365   : > { %v3019_v5 = vadd.f32 %v3018_v14, %v2876_v36  ;;  %v2878_v60 = vmul.f32 %v15947_v15, %v11606_v57  ;;  %v3351_v40 = vmul.f32 %v15952_v37, %v11606_v57  ;;  %v3824_v33 = vmul.f32 %v15953_v11, %v11606_v57  ;;  %v15960_v36 = vld [vmem:[#allocation49_spill] sm:$0xff] }
 0x366   : > { %v4297_v59 = vmul.f32 %v15954_v6, %v11606_v57  ;;  %v4835_v10 = vadd.f32 %v4834_v56, %v4756_v62  ;;  %v4872_v34 = vadd.f32 %v4871_v49, %v4757_v53  ;;  %6012 = vperm.xlu1 %7087, %v15959_v46   ;;  %v11640_v43 = vadd.f32 %v3491_v50, %v3349_v13  ;;  %v15963_v50 = vld [vmem:[#allocation277_spill] sm:$0xff] }
 0x367   : > { %v11642_v42 = vadd.f32 %v3964_v22, %v3822_v27  ;;  %v4908_v14 = vadd.f32 %v4907_v39, %v4753_v54  ;;  %v2205_v9 = vadd.f32 %v2204_v7, %v15938_v1  ;;  %v11645_v21 = vadd.f32 %v4437_v63, %v4295_v20  ;;  %v11656_v63 = vpop.permute.xlu0 %5006  ;;  %v11658_v1 = vpop.permute.xlu1 %4649  ;;  %v15972_v20 = vld [vmem:[#allocation23_spill] sm:$0xff] }
 0x368   : > { %v4760_v18 = vmul.f32 %v11482_v55, %v15960_v36  ;;  %v4945_v30 = vadd.f32 %v4944_v38, %v4754_v58  ;;  %v2207_v28 = vadd.f32 %v2206_v48, %v15961_v35  ;;  %v3093_v51 = vadd.f32 %v3092_v29, %v2878_v60  ;;  %15965 = vst [vmem:[#allocation26_spill] sm:$0xff] %v11658_v1  ;;  %v15966_v55 = vld [vmem:[#allocation46_spill] sm:$0xff] }
 0x369   : > { %v4982_v62 = vadd.f32 %v4981_v32, %v4755_v41  ;;  %v11650_v49 = vmax.f32 %v2205_v9, 0.0  ;;  %v2377_v53 = vadd.f32 %v15963_v50, %v15961_v35  ;;  %v3566_v22 = vadd.f32 %v3565_v19, %v3351_v40  ;;  %v15967_v48 = vld [vmem:[#allocation282_spill] sm:$0xff]  ;;  %v15968_v32 = vld [vmem:[#allocation225_spill] sm:$0xff] }
 0x36a   : > { %v4039_v13 = vadd.f32 %v4038_v8, %v3824_v33  ;;  %v4512_v39 = vadd.f32 %v4511_v16, %v4297_v59  ;;  %v11654_v54 = vmax.f32 %v2207_v28, 0.0  ;;  %6020 = vperm.xlu1 %7087, %v15966_v55   ;;  %v4909_v38 = vadd.f32 %v4908_v14, %v4758_v12  ;;  %v15970_v28 = vld [vmem:[#allocation60_spill] sm:$0xff]  ;;  %v15976_v59 = vld [vmem:[#allocation131_spill] sm:$0xff]  ;;  %v15977_v14 = vld [vmem:[#allocation98_spill] sm:$0xff] }
 0x36b   : > { %15962 = vst [vmem:[#allocation76_spill] sm:$0xff] %v11650_v49  ;;  %v11663_v29 = vmul.f32 %v11579_v2, %v15967_v48  ;;  %v11667_v58 = vmul.f32 %v11579_v2, %v15968_v32  ;;  %v2877_v40 = vmul.f32 %v15947_v15, %v11650_v49  ;;  %v4946_v19 = vadd.f32 %v4945_v30, %v4759_v0  ;;  %v2208_v15 = vpop.f32.mrf.mxu1  ;;  %v15979_v50 = vld [vmem:[#allocation110_spill] sm:$0xff]  ;;  %v15980_v32 = vld [vmem:[#allocation16_spill] sm:$0xff] }
 0x36c   : > { %15964 = vst [vmem:[#allocation123_spill] sm:$0xff] %v11654_v54  ;;  %v3350_v8 = vmul.f32 %v15952_v37, %v11650_v49  ;;  %v3823_v16 = vmul.f32 %v15953_v11, %v11650_v49  ;;  %v4296_v41 = vmul.f32 %v15954_v6, %v11650_v49  ;;  %v4983_v7 = vadd.f32 %v4982_v62, %v4760_v18  ;;  %v15973_v37 = vld [vmem:[#allocation205_spill] sm:$0xff]  ;;  %v15974_v11 = vld [vmem:[#allocation151_spill] sm:$0xff]  ;;  %v15978_v18 = vld [vmem:[#allocation170_spill] sm:$0xff] }
 0x36d   : > { %15969 = vst [vmem:[#allocation111_spill] sm:$0xff] %v11667_v58  ;;  %v2881_v12 = vmul.f32 %v15970_v28, %v11654_v54  ;;  %v11679_v27 = vmax.f32 %v2377_v53, 0.0  ;;  %v4763_v56 = vmul.f32 %v15972_v20, %v11511_v17  ;;  %v4764_v30 = vmul.f32 %v15972_v20, %v11573_v47  ;;  %v15975_v6 = vld [vmem:[#allocation215_spill] sm:$0xff]  ;;  %v15984_v58 = vld [vmem:[#allocation29_spill] sm:$0xff] }
 0x36e   : > { %v4765_v0 = vmul.f32 %v15972_v20, %v11527_v23  ;;  %v4766_v60 = vmul.f32 %v15974_v11, %v15973_v37  ;;  %v4767_v33 = vmul.f32 %v15974_v11, %v15975_v6  ;;  %6028 = vperm.xlu1 %7087, %v15976_v59   ;;  %v3056_v46 = vadd.f32 %v3055_v4, %v2877_v40  ;;  %v11705_v23 = vpop.permute.xlu0 %5018  ;;  %v11707_v4 = vpop.permute.xlu1 %5002 }
 0x36f   : > { %15971 = vst [vmem:[#allocation52_spill] sm:$0xff] %v11679_v27  ;;  %v3354_v9 = vmul.f32 %v15977_v14, %v11654_v54  ;;  %v3827_v62 = vmul.f32 %v15978_v18, %v11654_v54  ;;  %v4300_v53 = vmul.f32 %v15979_v50, %v11654_v54  ;;  %v11698_v55 = vadd.f32 %v3528_v45, %v3350_v8  ;;  %v15982_v8 = vld [vmem:[#allocation55_spill] sm:$0xff] }
 0x370   : > { %v11700_v20 = vadd.f32 %v4001_v3, %v3823_v16  ;;  %v11702_v2 = vadd.f32 %v4474_v61, %v4296_v41  ;;  %v4836_v48 = vadd.f32 %v4835_v10, %v15980_v32  ;;  %15981 = vst [vmem:[#allocation58_spill] sm:$0xff] %v11707_v4  ;;  %v11709_v40 = vadd.f32 %v3019_v5, %v2881_v12  ;;  %v2212_v3 = vpop.f32.mrf.mxu1  ;;  %v15983_v16 = vld [vmem:[#allocation193_spill] sm:$0xff] }
 0x371   : > { %v2883_v59 = vmul.f32 %v15970_v28, %v11679_v27  ;;  %v3356_v47 = vmul.f32 %v15977_v14, %v11679_v27  ;;  %v3829_v45 = vmul.f32 %v15978_v18, %v11679_v27  ;;  %v4302_v61 = vmul.f32 %v15979_v50, %v11679_v27 }
 0x372   : > { %v4768_v10 = vmul.f32 %v15974_v11, %v11575_v52  ;;  %v4837_v32 = vadd.f32 %v4836_v48, %v4766_v60  ;;  %v4873_v5 = vadd.f32 %v4872_v34, %v15982_v8  ;;  %6036 = vperm.xlu1 %7087, %v15983_v16   ;;  %v4769_v41 = vmul.f32 %v15974_v11, %v11650_v49 }
 0x373   : > { %v4770_v12 = vmul.f32 %v15974_v11, %v11606_v57  ;;  %v4910_v17 = vadd.f32 %v4909_v38, %v4763_v56  ;;  %v2209_v6 = vadd.f32 %v2208_v15, %v15961_v35  ;;  %v4947_v36 = vadd.f32 %v4946_v19, %v4764_v30  ;;  %v11734_v38 = vpop.permute.xlu0 %5026  ;;  %v11736_v35 = vpop.permute.xlu1 %5010  ;;  %v15987_v19 = vld [vmem:[#allocation18_spill] sm:$0xff]  ;;  %v15992_v30 = vld [vmem:[#allocation115_spill] sm:$0xff] }
 0x374   : > { %v4874_v37 = vadd.f32 %v4873_v5, %v4767_v33  ;;  %v4984_v4 = vadd.f32 %v4983_v7, %v4765_v0  ;;  %v2213_v1 = vadd.f32 %v2212_v3, %v15984_v58  ;;  %v3493_v48 = vadd.f32 %v11640_v43, %v3354_v9  ;;  %15986 = vst [vmem:[#allocation96_spill] sm:$0xff] %v11736_v35  ;;  %v15988_v7 = vld [vmem:[#allocation145_spill] sm:$0xff]  ;;  %v15989_v43 = vld [vmem:[#allocation138_spill] sm:$0xff]  ;;  %v15993_v33 = vld [vmem:[#allocation227_spill] sm:$0xff] }
 0x375   : > { %v3966_v34 = vadd.f32 %v11642_v42, %v3827_v62  ;;  %v4439_v60 = vadd.f32 %v11645_v21, %v4300_v53  ;;  %v11732_v8 = vmax.f32 %v2209_v6, 0.0  ;;  %v3094_v16 = vadd.f32 %v3093_v51, %v2883_v59  ;;  %v15991_v51 = vld [vmem:[#allocation83_spill] sm:$0xff]  ;;  %v15994_v9 = vld [vmem:[#allocation20_spill] sm:$0xff]  ;;  %v2214_v59 = vpop.f32.mrf.mxu1  ;;  %v15997_v3 = vld [vmem:[#allocation61_spill] sm:$0xff] }
 0x376   : > { %v3567_v49 = vadd.f32 %v3566_v22, %v3356_v47  ;;  %v4040_v52 = vadd.f32 %v4039_v13, %v3829_v45  ;;  %v4513_v11 = vadd.f32 %v4512_v39, %v4302_v61  ;;  %6044 = vperm.xlu1 %7087, %v15987_v19   ;;  %v11741_v56 = vmul.f32 %v11627_v26, %v15988_v7  ;;  %v15996_v45 = vld [vmem:[#allocation154_spill] sm:$0xff]  ;;  %v16004_v7 = vld [vmem:[#allocation37_spill] sm:$0xff] }
 0x377   : > { %15985 = vst [vmem:[#allocation184_spill] sm:$0xff] %v11732_v8  ;;  %v11745_v42 = vmul.f32 %v11627_v26, %v15989_v43  ;;  %v11747_v21 = vmax.f32 %v2213_v1, 0.0  ;;  %v2382_v47 = vadd.f32 %v15991_v51, %v15984_v58  ;;  %v4911_v22 = vadd.f32 %v4910_v17, %v4768_v10  ;;  %v15995_v1 = vld [vmem:[#allocation231_spill] sm:$0xff]  ;;  %v15998_v10 = vld [vmem:[#allocation97_spill] sm:$0xff]  ;;  %v11781_v43 = vpop.permute.xlu0 %5034 }
 0x378   : > { %v4948_v13 = vadd.f32 %v4947_v36, %v4769_v41  ;;  %v4985_v39 = vadd.f32 %v4984_v4, %v4770_v12  ;;  %v2882_v15 = vmul.f32 %v15970_v28, %v11732_v8  ;;  %v4773_v0 = vmul.f32 %v15992_v30, %v11654_v54 }
 0x379   : > { %15990 = vst [vmem:[#allocation158_spill] sm:$0xff] %v11747_v21  ;;  %v4775_v6 = vmul.f32 %v15992_v30, %v11679_v27  ;;  %v4776_v62 = vmul.f32 %v15994_v9, %v15993_v33  ;;  %v4777_v53 = vmul.f32 %v15994_v9, %v15995_v1  ;;  %v3355_v17 = vmul.f32 %v15977_v14, %v11732_v8  ;;  %v16000_v14 = vld [vmem:[#allocation19_spill] sm:$0xff] }
 0x37a   : > { %v3828_v36 = vmul.f32 %v15978_v18, %v11732_v8  ;;  %v4301_v28 = vmul.f32 %v15979_v50, %v11732_v8  ;;  %v4774_v4 = vmul.f32 %v15992_v30, %v11732_v8  ;;  %6052 = vperm.xlu1 %7087, %v15996_v45   ;;  %v2886_v61 = vmul.f32 %v15997_v3, %v11747_v21  ;;  %v16001_v18 = vld [vmem:[#allocation207_spill] sm:$0xff]  ;;  %v16002_v50 = vld [vmem:[#allocation9_spill] sm:$0xff]  ;;  %v11783_v45 = vpop.permute.xlu1 %5014 }
 0x37b   : > { %v3359_v5 = vmul.f32 %v15998_v10, %v11747_v21  ;;  %v11774_v41 = vmax.f32 %v2382_v47, 0.0  ;;  %v4838_v12 = vadd.f32 %v4837_v32, %v16000_v14  ;;  %v3057_v19 = vadd.f32 %v3056_v46, %v2882_v15  ;;  %16003 = vst [vmem:[#allocation199_spill] sm:$0xff] %v11783_v45  ;;  %v16005_v14 = vld [vmem:[#allocation200_spill] sm:$0xff]  ;;  %v11806_v35 = vpop.permute.xlu0 %5042 }
 0x37c   : > { %v3832_v51 = vmul.f32 %v16001_v18, %v11747_v21  ;;  %v4875_v26 = vadd.f32 %v4874_v37, %v16002_v50  ;;  %v2215_v30 = vadd.f32 %v2214_v59, %v15984_v58  ;;  %v4305_v27 = vmul.f32 %v16004_v7, %v11747_v21 }
 0x37d   : > { %15999 = vst [vmem:[#allocation108_spill] sm:$0xff] %v11774_v41  ;;  %v2888_v47 = vmul.f32 %v15997_v3, %v11774_v41  ;;  %v4778_v46 = vmul.f32 %v15994_v9, %v11747_v21  ;;  %v4912_v32 = vadd.f32 %v4911_v22, %v4773_v0  ;;  %v3361_v15 = vmul.f32 %v15998_v10, %v11774_v41 }
 0x37e   : > { %v3834_v58 = vmul.f32 %v16001_v18, %v11774_v41  ;;  %v4839_v37 = vadd.f32 %v4838_v12, %v4776_v62  ;;  %v4876_v59 = vadd.f32 %v4875_v26, %v4777_v53  ;;  %6060 = vperm.xlu1 %7087, %v16005_v14   ;;  %v3530_v50 = vadd.f32 %v11698_v55, %v3355_v17  ;;  %v2216_v62 = vpop.f32.mrf.mxu1 }
 0x37f   : > { %v4307_v8 = vmul.f32 %v16004_v7, %v11774_v41  ;;  %v4780_v54 = vmul.f32 %v15994_v9, %v11774_v41  ;;  %v4986_v21 = vadd.f32 %v4985_v39, %v4775_v6  ;;  %v4003_v22 = vadd.f32 %v11700_v20, %v3828_v36  ;;  %v11808_v39 = vpop.permute.xlu1 %5022  ;;  %v16008_v20 = vld [vmem:[#allocation50_spill] sm:$0xff] }
 0x380   : > { %v4476_v0 = vadd.f32 %v11702_v2, %v4301_v28  ;;  %v4949_v1 = vadd.f32 %v4948_v13, %v4774_v4  ;;  %v11803_v33 = vmax.f32 %v2215_v30, 0.0  ;;  %v3021_v26 = vadd.f32 %v11709_v40, %v2886_v61  ;;  %16007 = vst [vmem:[#allocation27_spill] sm:$0xff] %v11808_v39  ;;  %v16009_v6 = vld [vmem:[#allocation30_spill] sm:$0xff] }
 0x381   : > { %v3494_v53 = vadd.f32 %v3493_v48, %v3359_v5  ;;  %v3967_v12 = vadd.f32 %v3966_v34, %v3832_v51  ;;  %v4440_v55 = vadd.f32 %v4439_v60, %v4305_v27  ;;  %v3095_v17 = vadd.f32 %v3094_v16, %v2888_v47  ;;  %v16010_v40 = vld [vmem:[#allocation74_spill] sm:$0xff]  ;;  %v16018_v47 = vld [vmem:[#allocation79_spill] sm:$0xff] }
 0x382   : > { %16006 = vst [vmem:[#allocation82_spill] sm:$0xff] %v11803_v33  ;;  %v3568_v14 = vadd.f32 %v3567_v49, %v3361_v15  ;;  %v4041_v57 = vadd.f32 %v4040_v52, %v3834_v58  ;;  %v4913_v45 = vadd.f32 %v4912_v32, %v4778_v46  ;;  %6064 = vperm.xlu1 %7087, %v16008_v20   ;;  %v16011_v52 = vld [vmem:[#allocation125_spill] sm:$0xff]  ;;  %v16012_v34 = vld [vmem:[#allocation126_spill] sm:$0xff]  ;;  %v16021_v58 = vld [vmem:[#allocation252_spill] sm:$0xff] }
 0x383   : > { %v11811_v2 = vadd.f32 %v4513_v11, %v4307_v8  ;;  %v11813_v13 = vadd.f32 %v4986_v21, %v4780_v54  ;;  %v2217_v36 = vadd.f32 %v2216_v62, %v16009_v6  ;;  %v2385_v48 = vadd.f32 %v16010_v40, %v16009_v6  ;;  %v16013_v8 = vld [vmem:[#allocation181_spill] sm:$0xff]  ;;  %v16017_v51 = vld [vmem:[#allocation146_spill] sm:$0xff]  ;;  %v16022_v20 = vld [vmem:[#allocation255_spill] sm:$0xff] }
 0x384   : > { %v2887_v49 = vmul.f32 %v15997_v3, %v11803_v33  ;;  %v11822_v27 = vmul.f32 %v11656_v63, %v16011_v52  ;;  %v11826_v60 = vmul.f32 %v11656_v63, %v16012_v34  ;;  %v11830_v54 = vmul.f32 %v11656_v63, %v16013_v8  ;;  %v16014_v21 = vld [vmem:[#allocation201_spill] sm:$0xff]  ;;  %v2218_v3 = vpop.f32.mrf.mxu1  ;;  %v16020_v32 = vld [vmem:[#allocation194_spill] sm:$0xff] }
 0x385   : > { %v3360_v16 = vmul.f32 %v15998_v10, %v11803_v33  ;;  %v3833_v11 = vmul.f32 %v16001_v18, %v11803_v33  ;;  %v11838_v28 = vmul.f32 %v11656_v63, %v16014_v21  ;;  %v11840_v4 = vmax.f32 %v2217_v36, 0.0  ;;  %v16023_v36 = vld [vmem:[#allocation56_spill] sm:$0xff]  ;;  %v16028_v21 = vld [vmem:[#allocation185_spill] sm:$0xff]  ;;  %v16032_v41 = vld [vmem:[#allocation94_spill] sm:$0xff] }
 0x386   : > { %v4306_v61 = vmul.f32 %v16004_v7, %v11803_v33  ;;  %v11844_v5 = vmax.f32 %v2385_v48, 0.0  ;;  %v4840_v30 = vadd.f32 %v4839_v37, %v16017_v51  ;;  %v4877_v46 = vadd.f32 %v4876_v59, %v16018_v47  ;;  %v16024_v59 = vld [vmem:[#allocation62_spill] sm:$0xff]  ;;  %v16025_v48 = vld [vmem:[#allocation100_spill] sm:$0xff]  ;;  %v11865_v47 = vpop.permute.xlu0 %5050 }
 0x387   : > { %16015 = vst [vmem:[#allocation15_spill] sm:$0xff] %v11840_v4  ;;  %v16019_v10 = vmov 6   ;;  %v4779_v18 = vmul.f32 %v15994_v9, %v11803_v33  ;;  %v11853_v15 = vmul.f32 %v11656_v63, %v16020_v32  ;;  %v4786_v62 = vmul.f32 %v11581_v44, %v16021_v58  ;;  %16026 = vst [vmem:[#allocation153_spill] sm:$0xff] %v11865_v47  ;;  %v11867_v63 = vpop.permute.xlu1 %5030 }
 0x388   : > { %16016 = vst [vmem:[#allocation113_spill] sm:$0xff] %v11844_v5  ;;  %7089 = vset.pattern.permute.xlu1 %v16019_v10  ;;  %v4787_v7 = vmul.f32 %v11581_v44, %v16022_v20  ;;  %v3058_v37 = vadd.f32 %v3057_v19, %v2887_v49  ;;  %v2891_v40 = vmul.f32 %v16024_v59, %v11840_v4  ;;  %16027 = vst [vmem:[#allocation59_spill] sm:$0xff] %v11867_v63 }
 0x389   : > { %5595 = vperm.xlu1 %7089, %v16023_v36   ;;  %v3364_v51 = vmul.f32 %v16025_v48, %v11840_v4  ;;  %v2219_v9 = vadd.f32 %v2218_v3, %v16009_v6  ;;  %v3531_v10 = vadd.f32 %v3530_v50, %v3360_v16  ;;  %v4004_v32 = vadd.f32 %v4003_v22, %v3833_v11  ;;  %v16029_v36 = vld [vmem:[#allocation41_spill] sm:$0xff]  ;;  %v2222_v3 = vpop.f32.mrf.mxu1  ;;  %v16030_v16 = vld [vmem:[#allocation166_spill] sm:$0xff] }
 0x38a   : > { %v3837_v8 = vmul.f32 %v16028_v21, %v11840_v4  ;;  %v4310_v19 = vmul.f32 %v16029_v36, %v11840_v4  ;;  %v4477_v49 = vadd.f32 %v4476_v0, %v4306_v61  ;;  %v2893_v34 = vmul.f32 %v16024_v59, %v11844_v5  ;;  %v7225_v0 = vld [vmem:[%s14266_s4 + $0xf8] sm:$0xff]  ;;  %v11895_v47 = vpop.permute.xlu0 %5058 }
 0x38b   : > { %v3366_v52 = vmul.f32 %v16025_v48, %v11844_v5  ;;  %v3839_v6 = vmul.f32 %v16028_v21, %v11844_v5  ;;  %v4950_v20 = vadd.f32 %v4949_v1, %v4779_v18  ;;  %v4841_v50 = vadd.f32 %v4840_v30, %v4786_v62 }
 0x38c   : > { %v4878_v22 = vadd.f32 %v4877_v46, %v4787_v7  ;;  %v11881_v11 = vmul.f32 %v11705_v23, %v16030_v16  ;;  %v3022_v61 = vadd.f32 %v3021_v26, %v2891_v40  ;;  %v3495_v58 = vadd.f32 %v3494_v53, %v3364_v51  ;;  %v16034_v46 = vld [vmem:[#allocation31_spill] sm:$0xff]  ;;  %v11897_v26 = vpop.permute.xlu1 %5038 }
 0x38d   : > { %5599 = vperm.xlu1 %7089, %v7225_v0   ;;  %v4783_v33 = vmul.f32 %v16032_v41, %v11840_v4  ;;  %v11888_v63 = vmax.f32 %v2219_v9, 0.0  ;;  %v3968_v39 = vadd.f32 %v3967_v12, %v3837_v8  ;;  %v4441_v1 = vadd.f32 %v4440_v55, %v4310_v19  ;;  %v16037_v8 = vld [vmem:[#allocation281_spill] sm:$0xff]  ;;  %v16042_v19 = vld [vmem:[#allocation270_spill] sm:$0xff] }
 0x38e   : > { %16031 = vst [vmem:[#allocation117_spill] sm:$0xff] %v11881_v11  ;;  %v4312_v30 = vmul.f32 %v16029_v36, %v11844_v5  ;;  %v2223_v18 = vadd.f32 %v2222_v3, %v16034_v46  ;;  %v3096_v7 = vadd.f32 %v3095_v17, %v2893_v34  ;;  %v3569_v16 = vadd.f32 %v3568_v14, %v3366_v52  ;;  %v16039_v17 = vld [vmem:[#allocation171_spill] sm:$0xff]  ;;  %v16040_v52 = vld [vmem:[#allocation246_spill] sm:$0xff]  ;;  %v16041_v9 = vld [vmem:[#allocation69_spill] sm:$0xff] }
 0x38f   : > { %16033 = vst [vmem:[#allocation95_spill] sm:$0xff] %v11888_v63  ;;  %v11893_v62 = vadd.f32 %v4913_v45, %v4783_v33  ;;  %v4042_v11 = vadd.f32 %v4041_v57, %v3839_v6  ;;  %v4785_v53 = vmul.f32 %v16032_v41, %v11844_v5  ;;  %v2892_v12 = vmul.f32 %v16024_v59, %v11888_v63 }
 0x390   : > { %v11903_v55 = vmax.f32 %v2223_v18, 0.0  ;;  %v2390_v40 = vadd.f32 %v16037_v8, %v16034_v46  ;;  %v16038_v33 = vmov 7   ;;  %v3365_v57 = vmul.f32 %v16025_v48, %v11888_v63  ;;  %v16044_v18 = vld [vmem:[#allocation198_spill] sm:$0xff]  ;;  %v16046_v8 = vld [vmem:[#allocation63_spill] sm:$0xff] }
 0x391   : > { %16035 = vst [vmem:[#allocation196_spill] sm:$0xff] %v11893_v62  ;;  %7091 = vset.pattern.permute.xlu1 %v16038_v33  ;;  %v3838_v45 = vmul.f32 %v16028_v21, %v11888_v63  ;;  %v11914_v14 = vmul.f32 %v11705_v23, %v16039_v17  ;;  %v11918_v34 = vmul.f32 %v11705_v23, %v16040_v52  ;;  %v16047_v62 = vld [vmem:[#allocation279_spill] sm:$0xff]  ;;  %v11951_v17 = vpop.permute.xlu1 %5046 }
 0x392   : > { %16036 = vst [vmem:[#allocation5_spill] sm:$0xff] %v11903_v55  ;;  %6072 = vperm.xlu1 %7091, %v7225_v0   ;;  %v4515_v59 = vadd.f32 %v11811_v2, %v4312_v30  ;;  %v4311_v51 = vmul.f32 %v16029_v36, %v11888_v63  ;;  %v11925_v48 = vmul.f32 %v11705_v23, %v16041_v9  ;;  %v11938_v2 = vmax.f32 %v2390_v40, 0.0  ;;  %v2224_v36 = vpop.f32.mrf.mxu1  ;;  %v11949_v40 = vpop.permute.xlu0 %5066 }
 0x393   : > { %v4796_v21 = vmul.f32 %v11629_v31, %v16042_v19  ;;  %v11930_v6 = vadd.f32 %v11813_v13, %v4785_v53  ;;  %v4784_v3 = vmul.f32 %v16032_v41, %v11888_v63  ;;  %v11936_v0 = vmul.f32 %v11705_v23, %v16044_v18  ;;  %v16048_v41 = vld [vmem:[#allocation99_spill] sm:$0xff]  ;;  %v16049_v23 = vld [vmem:[#allocation216_spill] sm:$0xff] }
 0x394   : > { %16045 = vst [vmem:[#allocation92_spill] sm:$0xff] %v11938_v2  ;;  %v3059_v30 = vadd.f32 %v3058_v37, %v2892_v12  ;;  %v2896_v33 = vmul.f32 %v16046_v8, %v11903_v55  ;;  %v4797_v9 = vmul.f32 %v11629_v31, %v16047_v62  ;;  %v4842_v13 = vadd.f32 %v4841_v50, %v11586_v25  ;;  %v16050_v12 = vld [vmem:[#allocation211_spill] sm:$0xff] }
 0x395   : > { %16043 = vst [vmem:[#allocation105_spill] sm:$0xff] %v11930_v6  ;;  %v3532_v53 = vadd.f32 %v3531_v10, %v3365_v57  ;;  %v4005_v6 = vadd.f32 %v4004_v32, %v3838_v45  ;;  %v3369_v52 = vmul.f32 %v16048_v41, %v11903_v55  ;;  %v3842_v18 = vmul.f32 %v16049_v23, %v11903_v55  ;;  %v2226_v57 = vpop.f32.mrf.mxu1 }
 0x396   : > { %v4478_v37 = vadd.f32 %v4477_v49, %v4311_v51  ;;  %v4315_v5 = vmul.f32 %v16050_v12, %v11903_v55  ;;  %v4843_v63 = vadd.f32 %v4842_v13, %v4796_v21  ;;  %v4879_v31 = vadd.f32 %v4878_v22, %v11590_v24 }
 0x397   : > { %v2898_v25 = vmul.f32 %v16046_v8, %v11938_v2  ;;  %v3371_v32 = vmul.f32 %v16048_v41, %v11938_v2  ;;  %v3844_v10 = vmul.f32 %v16049_v23, %v11938_v2  ;;  %v2225_v50 = vadd.f32 %v2224_v36, %v16034_v46 }
 0x398   : > { %v11963_v45 = vadd.f32 %v4950_v20, %v4784_v3  ;;  %v3023_v49 = vadd.f32 %v3022_v61, %v2896_v33  ;;  %v11967_v51 = vmul.f32 %v11581_v44, %v11903_v55  ;;  %v4880_v24 = vadd.f32 %v4879_v31, %v4797_v9  ;;  %v16056_v20 = vld [vmem:[#allocation32_spill] sm:$0xff]  ;;  %v16057_v3 = vld [vmem:[#allocation45_spill] sm:$0xff]  ;;  %v11986_v9 = vpop.permute.xlu1 %5054 }
 0x399   : > { %v3496_v22 = vadd.f32 %v3495_v58, %v3369_v52  ;;  %v3969_v21 = vadd.f32 %v3968_v39, %v3842_v18  ;;  %v4317_v13 = vmul.f32 %v16050_v12, %v11938_v2  ;;  %v11971_v4 = vmax.f32 %v2225_v50, 0.0  ;;  %v11984_v52 = vpop.permute.xlu0 %5074 }
 0x39a   : > { %16051 = vst [vmem:[#allocation89_spill] sm:$0xff] %v11963_v45  ;;  %16052 = vst [vmem:[#allocation28_spill] sm:$0xff] %v11967_v51  ;;  %v11973_v62 = vadd.f32 %v4441_v1, %v4315_v5  ;;  %v11977_v46 = vmul.f32 %v11581_v44, %v11938_v2  ;;  %v2227_v61 = vadd.f32 %v2226_v57, %v16056_v20  ;;  %v16069_v45 = vld [vmem:[#allocation102_spill] sm:$0xff] }
 0x39b   : > { %16053 = vst [vmem:[#allocation277_spill] sm:$0xff] %v11971_v4  ;;  %v2393_v36 = vadd.f32 %v16057_v3, %v16056_v20  ;;  %v3097_v33 = vadd.f32 %v3096_v7, %v2898_v25  ;;  %v3570_v31 = vadd.f32 %v3569_v16, %v3371_v32  ;;  %v4043_v58 = vadd.f32 %v4042_v11, %v3844_v10  ;;  %v2228_v7 = vpop.f32.mrf.mxu1 }
 0x39c   : > { %16054 = vst [vmem:[#allocation46_spill] sm:$0xff] %v11973_v62  ;;  %16055 = vst [vmem:[#allocation60_spill] sm:$0xff] %v11977_v46  ;;  %v2897_v39 = vmul.f32 %v16046_v8, %v11971_v4  ;;  %v3370_v5 = vmul.f32 %v16048_v41, %v11971_v4  ;;  %v3843_v1 = vmul.f32 %v16049_v23, %v11971_v4  ;;  %v11992_v18 = vmax.f32 %v2227_v61, 0.0  ;;  %v16060_v8 = vld [vmem:[#allocation195_spill] sm:$0xff]  ;;  %v16063_v23 = vld [vmem:[#allocation232_spill] sm:$0xff] }
 0x39d   : > { %v4844_v50 = vadd.f32 %v4843_v63, %v11663_v29  ;;  %v11995_v16 = vadd.f32 %v4515_v59, %v4317_v13  ;;  %v4316_v11 = vmul.f32 %v16050_v12, %v11971_v4  ;;  %v12001_v25 = vmul.f32 %v11734_v38, %v16060_v8  ;;  %v16062_v41 = vld [vmem:[#allocation203_spill] sm:$0xff]  ;;  %v16065_v59 = vld [vmem:[#allocation292_spill] sm:$0xff]  ;;  %v16066_v12 = vld [vmem:[#allocation26_spill] sm:$0xff] }
 0x39e   : > { %16058 = vst [vmem:[#allocation23_spill] sm:$0xff] %v11992_v18  ;;  %v12003_v32 = vmax.f32 %v2393_v36, 0.0  ;;  %v12007_v10 = vmul.f32 %v11734_v38, %v16062_v41  ;;  %v12011_v57 = vmul.f32 %v11734_v38, %v16063_v23  ;;  %v16064_v29 = vld [vmem:[#allocation39_spill] sm:$0xff]  ;;  %v4806_v13 = vmul.f32 %v16066_v12, %v16065_v59  ;;  %v16068_v36 = vld [vmem:[#allocation64_spill] sm:$0xff]  ;;  %v2232_v59 = vpop.f32.mrf.mxu1 }
 0x39f   : > { %16059 = vst [vmem:[#allocation151_spill] sm:$0xff] %v11995_v16  ;;  %v12015_v63 = vmul.f32 %v11734_v38, %v16064_v29  ;;  %v16067_v61 = vld [vmem:[#allocation7_spill] sm:$0xff]  ;;  %v2901_v46 = vmul.f32 %v16068_v36, %v11992_v18  ;;  %v3374_v51 = vmul.f32 %v16069_v45, %v11992_v18  ;;  %v3060_v23 = vadd.f32 %v3059_v30, %v2897_v39  ;;  %v12043_v30 = vpop.permute.xlu1 %5062 }
 0x3a0   : > { %16061 = vst [vmem:[#allocation131_spill] sm:$0xff] %v12003_v32  ;;  %v12021_v3 = vmul.f32 %v11734_v38, %v16067_v61  ;;  %v16070_v16 = vld [vmem:[#allocation167_spill] sm:$0xff]  ;;  %v3533_v41 = vadd.f32 %v3532_v53, %v3370_v5  ;;  %v4006_v29 = vadd.f32 %v4005_v6, %v3843_v1  ;;  %v12031_v8 = vmul.f32 %v11581_v44, %v11971_v4  ;;  %v16073_v38 = vld [vmem:[#allocation197_spill] sm:$0xff]  ;;  %v6462_v5 = vld [vmem:[%s14267_s5] sm:$0xff] }
 0x3a1   : > { %v4807_v62 = vmul.f32 %v16066_v12, %v16070_v16  ;;  %v12033_v19 = vadd.f32 %v4478_v37, %v4316_v11  ;;  %v3847_v61 = vmul.f32 %v16073_v38, %v11992_v18  ;;  %v2903_v2 = vmul.f32 %v16068_v36, %v12003_v32  ;;  %v12041_v12 = vpop.permute.xlu0 %5082  ;;  %16074 = vst [vmem:[#allocation110_spill] sm:$0xff] %v12043_v30  ;;  %v16075_v53 = vld [vmem:[#allocation111_spill] sm:$0xff]  ;;  %v16078_v16 = vld [vmem:[#allocation109_spill] sm:$0xff] }
 0x3a2   : > { %16071 = vst [vmem:[#allocation98_spill] sm:$0xff] %v12031_v8  ;;  %v3376_v55 = vmul.f32 %v16069_v45, %v12003_v32  ;;  %v3849_v44 = vmul.f32 %v16073_v38, %v12003_v32  ;;  %v4845_v6 = vadd.f32 %v4844_v50, %v4806_v13  ;;  %v4881_v37 = vadd.f32 %v4880_v24, %v16075_v53  ;;  %v16076_v8 = vld [vmem:[#allocation245_spill] sm:$0xff]  ;;  %v2234_v53 = vpop.f32.mrf.mxu1 }
 0x3a3   : > { %16072 = vst [vmem:[#allocation170_spill] sm:$0xff] %v12033_v19  ;;  %v2229_v39 = vadd.f32 %v2228_v7, %v16056_v20  ;;  %v3024_v1 = vadd.f32 %v3023_v49, %v2901_v46  ;;  %v3497_v11 = vadd.f32 %v3496_v22, %v3374_v51  ;;  %v12054_v19 = vmul.f32 %v16076_v8, %v11992_v18  ;;  %v16081_v20 = vld [vmem:[#allocation33_spill] sm:$0xff] }
 0x3a4   : > { %v12058_v4 = vmul.f32 %v16078_v16, %v11992_v18  ;;  %6465 = vperm.xlu0 %7092, %v6462_v5   ;;  %v4846_v50 = vadd.f32 %v4845_v6, %v11741_v56  ;;  %v4882_v24 = vadd.f32 %v4881_v37, %v4807_v62  ;;  %v2233_v7 = vadd.f32 %v2232_v59, %v16081_v20  ;;  %v16085_v56 = vld [vmem:[#allocation53_spill] sm:$0xff]  ;;  %v16091_v6 = vld [vmem:[#allocation220_spill] sm:$0xff] }
 0x3a5   : > { %16077 = vst [vmem:[#allocation16_spill] sm:$0xff] %v12054_v19  ;;  %v12061_v13 = vmax.f32 %v2229_v39, 0.0  ;;  %v12064_v30 = vadd.f32 %v3969_v21, %v3847_v61  ;;  %v3098_v49 = vadd.f32 %v3097_v33, %v2903_v2  ;;  %v3571_v51 = vadd.f32 %v3570_v31, %v3376_v55  ;;  %v16087_v21 = vld [vmem:[#allocation219_spill] sm:$0xff]  ;;  %v12086_v31 = vpop.permute.xlu0 %5090 }
 0x3a6   : > { %16079 = vst [vmem:[#allocation55_spill] sm:$0xff] %v12058_v4  ;;  %v12068_v22 = vmul.f32 %v16076_v8, %v12003_v32  ;;  %v12070_v46 = vadd.f32 %v4043_v58, %v3849_v44  ;;  %v4847_v4 = vrot.slane %v4846_v50, 4  ;;  %v4883_v5 = vadd.f32 %v4882_v24, %v11745_v42  ;;  %16089 = vst [vmem:[#allocation154_spill] sm:$0xff] %v12086_v31  ;;  %v12088_v58 = vpop.permute.xlu1 %5070 }
 0x3a7   : > { %16080 = vst [vmem:[#allocation193_spill] sm:$0xff] %v12061_v13  ;;  %16082 = vst [vmem:[#allocation29_spill] sm:$0xff] %v12064_v30  ;;  %v2398_v62 = vadd.f32 %v16085_v56, %v16081_v20  ;;  %v12077_v59 = vmul.f32 %v16078_v16, %v12003_v32  ;;  %v12081_v2 = vmul.f32 %v11781_v43, %v16087_v21  ;;  %v12083_v55 = vmax.f32 %v2233_v7, 0.0  ;;  %v16099_v30 = vld [vmem:[#allocation119_spill] sm:$0xff] }
 0x3a8   : > { %16083 = vst [vmem:[#allocation18_spill] sm:$0xff] %v12068_v22  ;;  %16084 = vst [vmem:[#allocation83_spill] sm:$0xff] %v12070_v46  ;;  %v2235_v33 = vadd.f32 %v2234_v53, %v16081_v20  ;;  %v4848_v42 = vadd.f32 %v4847_v4, %v4846_v50  ;;  %v4884_v61 = vrot.slane %v4883_v5, 4  ;;  %v2902_v44 = vmul.f32 %v16068_v36, %v12061_v13  ;;  %v16092_v20 = vld [vmem:[#allocation10_spill] sm:$0xff]  ;;  %v16093_v53 = vld [vmem:[#allocation112_spill] sm:$0xff] }
 0x3a9   : > { %16086 = vst [vmem:[#allocation115_spill] sm:$0xff] %v12077_v59  ;;  %16088 = vst [vmem:[#allocation20_spill] sm:$0xff] %v12083_v55  ;;  %v12094_v37 = vmul.f32 %v11781_v43, %v16091_v6  ;;  %v3375_v39 = vmul.f32 %v16069_v45, %v12061_v13  ;;  %v3848_v24 = vmul.f32 %v16073_v38, %v12061_v13  ;;  %v16094_v36 = vld [vmem:[#allocation72_spill] sm:$0xff]  ;;  %v16095_v59 = vld [vmem:[#allocation65_spill] sm:$0xff]  ;;  %v12114_v45 = vmax.f32 %v2398_v62, 0.0 }
 0x3aa   : > { %16090 = vst [vmem:[#allocation61_spill] sm:$0xff] %v12088_v58  ;;  %v12102_v7 = vmul.f32 %v11781_v43, %v16092_v20  ;;  %v12106_v4 = vmul.f32 %v11781_v43, %v16093_v53  ;;  %v4885_v50 = vadd.f32 %v4884_v61, %v4883_v5  ;;  %v12110_v56 = vmul.f32 %v11781_v43, %v16094_v36  ;;  %v16097_v38 = vld [vmem:[#allocation101_spill] sm:$0xff]  ;;  %v16100_v20 = vld [vmem:[#allocation58_spill] sm:$0xff]  ;;  %v2236_v36 = vpop.f32.mrf.mxu1 }
 0x3ab   : > { %v2906_v22 = vmul.f32 %v16095_v59, %v12083_v55  ;;  %16096 = vst [vmem:[#allocation97_spill] sm:$0xff] %v12114_v45  ;;  %v3379_v19 = vmul.f32 %v16097_v38, %v12083_v55  ;;  %v12118_v46 = vmax.f32 %v2235_v33, 0.0  ;;  %v5129_v6 = vmul.f32 %v16100_v20, %v16099_v30  ;;  %v16101_v53 = vld [vmem:[#allocation121_spill] sm:$0xff]  ;;  %v16105_v30 = vld [vmem:[#allocation228_spill] sm:$0xff] }
 0x3ac   : > { %v5130_v5 = vmul.f32 %v16100_v20, %v16101_v53  ;;  %v4849_v61 = vrot.slane %v4848_v42, 2  ;;  %v3061_v21 = vadd.f32 %v3060_v23, %v2902_v44  ;;  %v12126_v43 = vmul.f32 %v16076_v8, %v12061_v13  ;;  %v12138_v53 = vpop.permute.xlu0 %5098  ;;  %v12140_v23 = vpop.permute.xlu1 %5078  ;;  %v16110_v8 = vld [vmem:[#allocation8_spill] sm:$0xff] }
 0x3ad   : > { %16098 = vst [vmem:[#allocation19_spill] sm:$0xff] %v12118_v46  ;;  %v12130_v62 = vmul.f32 %v16078_v16, %v12061_v13  ;;  %v4886_v32 = vrot.slane %v4885_v50, 2  ;;  %v3534_v33 = vadd.f32 %v3533_v41, %v3375_v39  ;;  %v12132_v18 = vadd.f32 %v4006_v29, %v3848_v24  ;;  %16107 = vst [vmem:[#allocation50_spill] sm:$0xff] %v12138_v53 }
 0x3ae   : > { %16102 = vst [vmem:[#allocation207_spill] sm:$0xff] %v12126_v43  ;;  %v12136_v58 = vmul.f32 %v16105_v30, %v12083_v55  ;;  %16108 = vst [vmem:[#allocation30_spill] sm:$0xff] %v12140_v23  ;;  %v12142_v44 = vadd.f32 %v3024_v1, %v2906_v22  ;;  %v12146_v43 = vmul.f32 %v16110_v8, %v12083_v55  ;;  %v16113_v1 = vld [vmem:[#allocation175_spill] sm:$0xff]  ;;  %v16165_v23 = vld [vmem:[#allocation186_spill] sm:$0xff] }
 0x3af   : > { %16103 = vst [vmem:[#allocation9_spill] sm:$0xff] %v12130_v62  ;;  %16104 = vst [vmem:[#allocation37_spill] sm:$0xff] %v12132_v18  ;;  %v2908_v16 = vmul.f32 %v16095_v59, %v12114_v45  ;;  %v3381_v41 = vmul.f32 %v16097_v38, %v12114_v45  ;;  %v12152_v29 = vadd.f32 %v3497_v11, %v3379_v19  ;;  %v2238_v19 = vpop.f32.mrf.mxu1 }
 0x3b0   : > { %16106 = vst [vmem:[#allocation200_spill] sm:$0xff] %v12136_v58  ;;  %16109 = vst [vmem:[#allocation74_spill] sm:$0xff] %v12142_v44  ;;  %v2907_v39 = vmul.f32 %v16095_v59, %v12118_v46  ;;  %v3380_v24 = vmul.f32 %v16097_v38, %v12118_v46  ;;  %v5131_v22 = vmul.f32 %v16100_v20, %v16113_v1  ;;  %v16161_v1 = vld [vmem:[#allocation163_spill] sm:$0xff] }
 0x3b1   : > { %16111 = vst [vmem:[#allocation146_spill] sm:$0xff] %v12146_v43  ;;  %16112 = vst [vmem:[#allocation79_spill] sm:$0xff] %v12152_v29  ;;  %v12160_v62 = vadd.f32 %v4849_v61, %v4848_v42  ;;  %v16115_v43 = vld [vmem:[#allocation140_spill] sm:$0xff]  ;;  %v5289_v58 = vadd.f32 %v11822_v27, %v5129_v6  ;;  %v5326_v44 = vadd.f32 %v11826_v60, %v5130_v5  ;;  %v16119_v42 = vld [vmem:[#allocation155_spill] sm:$0xff] }
 0x3b2   : > { %v5133_v18 = vmul.f32 %v16100_v20, %v16115_v43  ;;  %v12166_v11 = vadd.f32 %v4886_v32, %v4885_v50  ;;  %v12170_v59 = vmul.f32 %v16105_v30, %v12114_v45  ;;  %v12174_v38 = vmul.f32 %v16110_v8, %v12114_v45  ;;  %v16122_v60 = vld [vmem:[#allocation34_spill] sm:$0xff]  ;;  %v16154_v45 = vld [vmem:[#allocation81_spill] sm:$0xff]  ;;  %v16158_v43 = vld [vmem:[#allocation80_spill] sm:$0xff] }
 0x3b3   : > { %16114 = vst [vmem:[#allocation56_spill] sm:$0xff] %v12160_v62  ;;  %v5132_v61 = vmul.f32 %v16100_v20, %v16119_v42  ;;  %v12178_v62 = vadd.f32 %v3098_v49, %v2908_v16  ;;  %v12180_v29 = vadd.f32 %v3571_v51, %v3381_v41  ;;  %v2237_v32 = vadd.f32 %v2236_v36, %v16122_v60  ;;  %v12194_v20 = vpop.permute.xlu0 %5106  ;;  %v12196_v49 = vpop.permute.xlu1 %5086  ;;  %v16132_v41 = vld [vmem:[#allocation249_spill] sm:$0xff]  ;;  %v16159_v42 = vld [vmem:[#allocation144_spill] sm:$0xff] }
 0x3b4   : > { %16116 = vst [vmem:[#allocation62_spill] sm:$0xff] %v12166_v11  ;;  %16117 = vst [vmem:[#allocation100_spill] sm:$0xff] %v12170_v59  ;;  %v5437_v27 = vadd.f32 %v11853_v15, %v5133_v18  ;;  %v12184_v6 = vadd.f32 %v3061_v21, %v2907_v39  ;;  %v12186_v50 = vadd.f32 %v3534_v33, %v3380_v24  ;;  %v16126_v11 = vld [vmem:[#allocation54_spill] sm:$0xff]  ;;  %v2242_v36 = vpop.f32.mrf.mxu1  ;;  %v16133_v24 = vld [vmem:[#allocation44_spill] sm:$0xff] }
 0x3b5   : > { %16118 = vst [vmem:[#allocation185_spill] sm:$0xff] %v12174_v38  ;;  %16120 = vst [vmem:[#allocation41_spill] sm:$0xff] %v12178_v62  ;;  %v12190_v5 = vmul.f32 %v16105_v30, %v12118_v46  ;;  %v2401_v38 = vadd.f32 %v16126_v11, %v16122_v60  ;;  %v12200_v15 = vmul.f32 %v16110_v8, %v12118_v46  ;;  %v12203_v51 = vmax.f32 %v2237_v32, 0.0  ;;  %v16131_v33 = vld [vmem:[#allocation78_spill] sm:$0xff] }
 0x3b6   : > { %16121 = vst [vmem:[#allocation94_spill] sm:$0xff] %v12180_v29  ;;  %16123 = vst [vmem:[#allocation31_spill] sm:$0xff] %v12184_v6  ;;  %v5363_v18 = vadd.f32 %v11830_v54, %v5131_v22  ;;  %v2239_v21 = vadd.f32 %v2238_v19, %v16122_v60  ;;  %v5400_v30 = vadd.f32 %v11838_v28, %v5132_v61  ;;  %v16134_v54 = vld [vmem:[#allocation14_spill] sm:$0xff]  ;;  %v16135_v19 = vld [vmem:[#allocation287_spill] sm:$0xff] }
 0x3b7   : > { %16124 = vst [vmem:[#allocation281_spill] sm:$0xff] %v12186_v50  ;;  %16125 = vst [vmem:[#allocation63_spill] sm:$0xff] %v12190_v5  ;;  %v12209_v16 = vmul.f32 %v11806_v35, %v16131_v33  ;;  %v12213_v39 = vmul.f32 %v11806_v35, %v16132_v41  ;;  %v12217_v8 = vmul.f32 %v11806_v35, %v16133_v24  ;;  %v12227_v28 = vmax.f32 %v2401_v38, 0.0  ;;  %v16137_v61 = vld [vmem:[#allocation137_spill] sm:$0xff]  ;;  %v16138_v60 = vld [vmem:[#allocation96_spill] sm:$0xff]  ;;  %v12266_v55 = vpop.permute.xlu1 %5094 }
 0x3b8   : > { %16127 = vst [vmem:[#allocation99_spill] sm:$0xff] %v12194_v20  ;;  %16128 = vst [vmem:[#allocation216_spill] sm:$0xff] %v12196_v49  ;;  %v12221_v22 = vmul.f32 %v11806_v35, %v16134_v54  ;;  %v12225_v11 = vmul.f32 %v11806_v35, %v16135_v19  ;;  %v5139_v32 = vmul.f32 %v16138_v60, %v16137_v61  ;;  %v16140_v5 = vld [vmem:[#allocation202_spill] sm:$0xff]  ;;  %v16142_v6 = vld [vmem:[#allocation161_spill] sm:$0xff]  ;;  %v12243_v38 = vmax.f32 %v2239_v21, 0.0 }
 0x3b9   : > { %16129 = vst [vmem:[#allocation211_spill] sm:$0xff] %v12200_v15  ;;  %16130 = vst [vmem:[#allocation32_spill] sm:$0xff] %v12203_v51  ;;  %v16139_v15 = vld [vmem:[#allocation142_spill] sm:$0xff]  ;;  %v5141_v29 = vmul.f32 %v16138_v60, %v16140_v5  ;;  %v5143_v54 = vmul.f32 %v16138_v60, %v16142_v6  ;;  %v16146_v24 = vld [vmem:[#allocation264_spill] sm:$0xff]  ;;  %v2244_v5 = vpop.f32.mrf.mxu1 }
 0x3ba   : > { %16136 = vst [vmem:[#allocation45_spill] sm:$0xff] %v12227_v28  ;;  %v5140_v59 = vmul.f32 %v16138_v60, %v16139_v15  ;;  %v16141_v50 = vld [vmem:[#allocation178_spill] sm:$0xff]  ;;  %16145 = vst [vmem:[#allocation102_spill] sm:$0xff] %v12243_v38  ;;  %v16147_v41 = vld [vmem:[#allocation153_spill] sm:$0xff] }
 0x3bb   : > { %v5142_v62 = vmul.f32 %v16138_v60, %v16141_v50  ;;  %v16143_v35 = vld [vmem:[#allocation66_spill] sm:$0xff]  ;;  %v12247_v33 = vmul.f32 %v16147_v41, %v16146_v24  ;;  %v16148_v15 = vld [vmem:[#allocation271_spill] sm:$0xff]  ;;  %v16149_v50 = vld [vmem:[#allocation104_spill] sm:$0xff]  ;;  %v12264_v24 = vpop.permute.xlu0 %5114  ;;  %16156 = vst [vmem:[#allocation109_spill] sm:$0xff] %v12266_v55  ;;  %v5438_v31 = vadd.f32 %v5437_v27, %v5143_v54 }
 0x3bc   : > { %v12241_v19 = vmul.f32 %v16143_v35, %v12203_v51  ;;  %v12251_v61 = vmul.f32 %v16147_v41, %v16148_v15  ;;  %v12255_v13 = vmul.f32 %v16149_v50, %v12203_v51  ;;  %v16151_v60 = vld [vmem:[#allocation208_spill] sm:$0xff]  ;;  %16155 = vst [vmem:[#allocation245_spill] sm:$0xff] %v12264_v24  ;;  %v12270_v15 = vmul.f32 %v16143_v35, %v12227_v28  ;;  %v16163_v24 = vld [vmem:[#allocation191_spill] sm:$0xff] }
 0x3bd   : > { %v12259_v6 = vmul.f32 %v16151_v60, %v12203_v51  ;;  %v16160_v51 = vld [vmem:[#allocation199_spill] sm:$0xff]  ;;  %v16164_v20 = vld [vmem:[#allocation192_spill] sm:$0xff] }
 0x3be   : > { %16144 = vst [vmem:[#allocation64_spill] sm:$0xff] %v12241_v19  ;;  %16150 = vst [vmem:[#allocation197_spill] sm:$0xff] %v12255_v13  ;;  %v16153_v19 = vld [vmem:[#allocation35_spill] sm:$0xff]  ;;  %v12274_v13 = vmul.f32 %v16147_v41, %v16158_v43  ;;  %v5146_v49 = vmul.f32 %v16160_v51, %v16163_v24  ;;  %v5147_v43 = vmul.f32 %v16160_v51, %v16164_v20  ;;  %v16172_v27 = vld [vmem:[#allocation152_spill] sm:$0xff] }
 0x3bf   : > { %16152 = vst [vmem:[#allocation111_spill] sm:$0xff] %v12259_v6  ;;  %v2243_v21 = vadd.f32 %v2242_v36, %v16153_v19  ;;  %v2406_v46 = vadd.f32 %v16154_v45, %v16153_v19  ;;  %16157 = vst [vmem:[#allocation33_spill] sm:$0xff] %v12270_v15  ;;  %v5144_v6 = vmul.f32 %v16160_v51, %v16159_v42 }
 0x3c0   : > { %v5145_v36 = vmul.f32 %v16160_v51, %v16161_v1  ;;  %v12282_v45 = vmul.f32 %v16149_v50, %v12227_v28  ;;  %v2245_v55 = vadd.f32 %v2244_v5, %v16153_v19  ;;  %v5290_v15 = vadd.f32 %v5289_v58, %v5139_v32 }
 0x3c1   : > { %v5148_v53 = vmul.f32 %v16160_v51, %v16165_v23  ;;  %v5327_v42 = vadd.f32 %v5326_v44, %v5140_v59  ;;  %v12293_v1 = vmul.f32 %v16151_v60, %v12227_v28  ;;  %v12299_v5 = vmax.f32 %v2243_v21, 0.0  ;;  %v16180_v21 = vld [vmem:[#allocation174_spill] sm:$0xff] }
 0x3c2   : > { %16162 = vst [vmem:[#allocation53_spill] sm:$0xff] %v12282_v45  ;;  %v12297_v45 = vmul.f32 %v16143_v35, %v12243_v38  ;;  %v12301_v19 = vmax.f32 %v2406_v46, 0.0  ;;  %v5291_v58 = vadd.f32 %v5290_v15, %v5144_v6  ;;  %v5364_v20 = vadd.f32 %v5363_v18, %v5141_v29  ;;  %v12317_v46 = vpop.permute.xlu0 %5122  ;;  %v12319_v6 = vpop.permute.xlu1 %5102  ;;  %v16174_v29 = vld [vmem:[#allocation122_spill] sm:$0xff]  ;;  %v16175_v18 = vld [vmem:[#allocation67_spill] sm:$0xff] }
 0x3c3   : > { %16166 = vst [vmem:[#allocation65_spill] sm:$0xff] %v12293_v1  ;;  %16168 = vst [vmem:[#allocation58_spill] sm:$0xff] %v12299_v5  ;;  %v5328_v32 = vadd.f32 %v5327_v42, %v5145_v36  ;;  %v5401_v24 = vadd.f32 %v5400_v30, %v5142_v62  ;;  %v12305_v44 = vmul.f32 %v16149_v50, %v12243_v38  ;;  %v12315_v54 = vmax.f32 %v2245_v55, 0.0  ;;  %v16177_v35 = vld [vmem:[#allocation103_spill] sm:$0xff] }
 0x3c4   : > { %16167 = vst [vmem:[#allocation101_spill] sm:$0xff] %v12297_v45  ;;  %16169 = vst [vmem:[#allocation228_spill] sm:$0xff] %v12301_v19  ;;  %v12309_v59 = vmul.f32 %v16151_v60, %v12243_v38  ;;  %v12313_v51 = vmul.f32 %v16147_v41, %v16172_v27  ;;  %v12323_v62 = vmul.f32 %v16147_v41, %v16174_v29  ;;  %v16181_v36 = vld [vmem:[#allocation27_spill] sm:$0xff]  ;;  %v16182_v41 = vld [vmem:[#allocation190_spill] sm:$0xff] }
 0x3c5   : > { %16170 = vst [vmem:[#allocation8_spill] sm:$0xff] %v12305_v44  ;;  %16173 = vst [vmem:[#allocation54_spill] sm:$0xff] %v12315_v54  ;;  %v5365_v42 = vadd.f32 %v5364_v20, %v5146_v49  ;;  %v5402_v50 = vadd.f32 %v5401_v24, %v5147_v43  ;;  %v5439_v15 = vadd.f32 %v5438_v31, %v5148_v53  ;;  %v16183_v43 = vld [vmem:[#allocation209_spill] sm:$0xff]  ;;  %v16184_v53 = vld [vmem:[#allocation70_spill] sm:$0xff] }
 0x3c6   : > { %16171 = vst [vmem:[#allocation34_spill] sm:$0xff] %v12309_v59  ;;  %v12327_v30 = vmul.f32 %v16175_v18, %v12299_v5  ;;  %v12331_v60 = vmul.f32 %v16177_v35, %v12299_v5  ;;  %v12335_v55 = vmul.f32 %v16175_v18, %v12301_v19  ;;  %v5154_v1 = vmul.f32 %v16181_v36, %v16180_v21  ;;  %v16185_v24 = vld [vmem:[#allocation38_spill] sm:$0xff]  ;;  %v16189_v45 = vld [vmem:[#allocation117_spill] sm:$0xff]  ;;  %v16196_v21 = vld [vmem:[#allocation59_spill] sm:$0xff] }
 0x3c7   : > { %v5155_v20 = vmul.f32 %v16181_v36, %v16182_v41  ;;  %v5156_v31 = vmul.f32 %v16181_v36, %v16183_v43  ;;  %v5157_v49 = vmul.f32 %v16181_v36, %v16184_v53  ;;  %v5158_v59 = vmul.f32 %v16181_v36, %v16185_v24  ;;  %v16195_v41 = vld [vmem:[#allocation206_spill] sm:$0xff]  ;;  %v16199_v38 = vld [vmem:[#allocation107_spill] sm:$0xff] }
 0x3c8   : > { %16176 = vst [vmem:[#allocation96_spill] sm:$0xff] %v12327_v30  ;;  %16178 = vst [vmem:[#allocation66_spill] sm:$0xff] %v12331_v60  ;;  %v12349_v44 = vmul.f32 %v16177_v35, %v12301_v19  ;;  %v12353_v60 = vmul.f32 %v16175_v18, %v12315_v54  ;;  %v2246_v30 = vpop.f32.mrf.mxu1  ;;  %v5292_v29 = vadd.f32 %v5291_v58, %v16189_v45  ;;  %v16191_v18 = vld [vmem:[#allocation291_spill] sm:$0xff] }
 0x3c9   : > { %16179 = vst [vmem:[#allocation153_spill] sm:$0xff] %v12335_v55  ;;  %v12357_v55 = vmul.f32 %v16177_v35, %v12315_v54  ;;  %v5329_v27 = vadd.f32 %v5328_v32, %v11914_v14  ;;  %v5366_v53 = vadd.f32 %v5365_v42, %v11918_v34  ;;  %v5403_v36 = vadd.f32 %v5402_v50, %v11925_v48  ;;  %v16192_v35 = vld [vmem:[#allocation243_spill] sm:$0xff]  ;;  %v12376_v14 = vpop.permute.xlu0 %5948  ;;  %v12378_v34 = vpop.permute.xlu1 %5110  ;;  %v16193_v42 = vld [vmem:[#allocation36_spill] sm:$0xff] }
 0x3ca   : > { %16186 = vst [vmem:[#allocation104_spill] sm:$0xff] %v12349_v44  ;;  %16187 = vst [vmem:[#allocation208_spill] sm:$0xff] %v12353_v60  ;;  %v5440_v24 = vadd.f32 %v5439_v15, %v11936_v0  ;;  %v16190_v44 = vld [vmem:[#allocation283_spill] sm:$0xff]  ;;  %v12370_v60 = vmul.f32 %v11895_v47, %v16191_v18  ;;  %v5293_v45 = vadd.f32 %v5292_v29, %v5154_v1  ;;  %v16194_v15 = vld [vmem:[#allocation169_spill] sm:$0xff]  ;;  %v2248_v18 = vpop.f32.mrf.mxu1 }
 0x3cb   : > { %16188 = vst [vmem:[#allocation35_spill] sm:$0xff] %v12357_v55  ;;  %v12366_v43 = vmul.f32 %v11895_v47, %v16190_v44  ;;  %v12374_v55 = vmul.f32 %v11895_v47, %v16192_v35  ;;  %v5330_v48 = vadd.f32 %v5329_v27, %v5155_v20  ;;  %v5367_v58 = vadd.f32 %v5366_v53, %v5156_v31  ;;  %v16197_v35 = vld [vmem:[#allocation213_spill] sm:$0xff]  ;;  %v16198_v29 = vld [vmem:[#allocation71_spill] sm:$0xff]  ;;  %v16200_v20 = vld [vmem:[#allocation40_spill] sm:$0xff] }
 0x3cc   : > { %v5404_v0 = vadd.f32 %v5403_v36, %v5157_v49  ;;  %v5441_v32 = vadd.f32 %v5440_v24, %v5158_v59  ;;  %v2247_v50 = vadd.f32 %v2246_v30, %v16193_v42  ;;  %v2409_v44 = vadd.f32 %v16194_v15, %v16193_v42  ;;  %v16201_v36 = vld [vmem:[#allocation51_spill] sm:$0xff] }
 0x3cd   : > { %v5164_v23 = vmul.f32 %v16196_v21, %v16195_v41  ;;  %v5165_v1 = vmul.f32 %v16196_v21, %v16197_v35  ;;  %v5166_v28 = vmul.f32 %v16196_v21, %v16198_v29  ;;  %v5167_v27 = vmul.f32 %v16196_v21, %v16199_v38  ;;  %v16202_v29 = vld [vmem:[#allocation156_spill] sm:$0xff] }
 0x3ce   : > { %v5168_v59 = vmul.f32 %v16196_v21, %v16200_v20  ;;  %v5294_v30 = vadd.f32 %v5293_v45, %v12001_v25  ;;  %v5331_v31 = vadd.f32 %v5330_v48, %v12007_v10  ;;  %v5368_v53 = vadd.f32 %v5367_v58, %v12011_v57  ;;  %v12407_v57 = vpop.permute.xlu0 %5960 }
 0x3cf   : > { %v5405_v49 = vadd.f32 %v5404_v0, %v12015_v63  ;;  %v5442_v24 = vadd.f32 %v5441_v32, %v12021_v3  ;;  %v12400_v15 = vmul.f32 %v11895_v47, %v16201_v36  ;;  %v12404_v38 = vmul.f32 %v11895_v47, %v16202_v29  ;;  %v12409_v63 = vpop.permute.xlu1 %5118  ;;  %v16205_v0 = vld [vmem:[#allocation235_spill] sm:$0xff]  ;;  %v16206_v47 = vld [vmem:[#allocation238_spill] sm:$0xff] }
 0x3d0   : > { %v2249_v21 = vadd.f32 %v2248_v18, %v16193_v42  ;;  %v5295_v20 = vadd.f32 %v5294_v30, %v5164_v23  ;;  %v5332_v25 = vadd.f32 %v5331_v31, %v5165_v1  ;;  %v5369_v45 = vadd.f32 %v5368_v53, %v5166_v28  ;;  %v16207_v18 = vld [vmem:[#allocation42_spill] sm:$0xff]  ;;  %v16208_v28 = vld [vmem:[#allocation12_spill] sm:$0xff]  ;;  %v16209_v1 = vld [vmem:[#allocation11_spill] sm:$0xff] }
 0x3d1   : > { %v5406_v10 = vadd.f32 %v5405_v49, %v5167_v27  ;;  %v5443_v48 = vadd.f32 %v5442_v24, %v5168_v59  ;;  %v12411_v3 = vmax.f32 %v2247_v50, 0.0  ;;  %v12413_v58 = vmax.f32 %v2409_v44, 0.0  ;;  %v16211_v49 = vld [vmem:[#allocation124_spill] sm:$0xff]  ;;  %v16212_v36 = vld [vmem:[#allocation127_spill] sm:$0xff] }
 0x3d2   : > { %v5174_v32 = vmul.f32 %v11897_v26, %v16205_v0  ;;  %v5175_v29 = vmul.f32 %v11897_v26, %v16206_v47  ;;  %v5176_v23 = vmul.f32 %v11897_v26, %v16207_v18  ;;  %v5177_v42 = vmul.f32 %v11897_v26, %v16208_v28 }
 0x3d3   : > { %16203 = vst [vmem:[#allocation81_spill] sm:$0xff] %v12411_v3  ;;  %16204 = vst [vmem:[#allocation199_spill] sm:$0xff] %v12413_v58  ;;  %v5178_v27 = vmul.f32 %v11897_v26, %v16209_v1  ;;  %v5296_v50 = vadd.f32 %v5295_v20, %v12081_v2  ;;  %v5333_v44 = vadd.f32 %v5332_v25, %v12094_v37  ;;  %v12430_v53 = vmax.f32 %v2249_v21, 0.0  ;;  %v16222_v1 = vld [vmem:[#allocation150_spill] sm:$0xff] }
 0x3d4   : > { %v5370_v59 = vadd.f32 %v5369_v45, %v12102_v7  ;;  %v5407_v30 = vadd.f32 %v5406_v10, %v12106_v4  ;;  %v5444_v31 = vadd.f32 %v5443_v48, %v12110_v56  ;;  %v12434_v24 = vmul.f32 %v11949_v40, %v16211_v49  ;;  %v16213_v7 = vld [vmem:[#allocation90_spill] sm:$0xff]  ;;  %v16214_v56 = vld [vmem:[#allocation259_spill] sm:$0xff]  ;;  %v16215_v45 = vld [vmem:[#allocation253_spill] sm:$0xff]  ;;  %v12452_v49 = vpop.permute.xlu0 %5968 }
 0x3d5   : > { %16210 = vst [vmem:[#allocation67_spill] sm:$0xff] %v12430_v53  ;;  %v12438_v28 = vmul.f32 %v11949_v40, %v16212_v36  ;;  %v5297_v26 = vadd.f32 %v5296_v50, %v5174_v32  ;;  %v5334_v2 = vadd.f32 %v5333_v44, %v5175_v29  ;;  %v12442_v4 = vmul.f32 %v11949_v40, %v16213_v7  ;;  %v16216_v48 = vld [vmem:[#allocation262_spill] sm:$0xff]  ;;  %v12454_v29 = vpop.permute.xlu1 %5126  ;;  %v16217_v32 = vld [vmem:[#allocation285_spill] sm:$0xff] }
 0x3d6   : > { %v5371_v20 = vadd.f32 %v5370_v59, %v5176_v23  ;;  %v5408_v37 = vadd.f32 %v5407_v30, %v5177_v42  ;;  %v5445_v25 = vadd.f32 %v5444_v31, %v5178_v27  ;;  %v12446_v21 = vmul.f32 %v11949_v40, %v16214_v56  ;;  %v16218_v42 = vld [vmem:[#allocation47_spill] sm:$0xff]  ;;  %v16219_v50 = vld [vmem:[#allocation294_spill] sm:$0xff] }
 0x3d7   : > { %v5184_v10 = vmul.f32 %v11951_v17, %v16215_v45  ;;  %v5185_v36 = vmul.f32 %v11951_v17, %v16216_v48  ;;  %v5186_v23 = vmul.f32 %v11951_v17, %v16217_v32  ;;  %v5187_v27 = vmul.f32 %v11951_v17, %v16218_v42  ;;  %v16220_v48 = vld [vmem:[#allocation77_spill] sm:$0xff] }
 0x3d8   : > { %v5188_v44 = vmul.f32 %v11951_v17, %v16219_v50  ;;  %v5298_v59 = vadd.f32 %v5297_v26, %v12209_v16  ;;  %v5335_v30 = vadd.f32 %v5334_v2, %v12213_v39  ;;  %v5372_v31 = vadd.f32 %v5371_v20, %v12217_v8  ;;  %v16221_v32 = vld [vmem:[#allocation149_spill] sm:$0xff]  ;;  %v16224_v20 = vld [vmem:[#allocation130_spill] sm:$0xff] }
 0x3d9   : > { %v5409_v56 = vadd.f32 %v5408_v37, %v12221_v22  ;;  %v5446_v7 = vadd.f32 %v5445_v25, %v12225_v11  ;;  %v12469_v45 = vmul.f32 %v11949_v40, %v16220_v48  ;;  %v12473_v42 = vmul.f32 %v11984_v52, %v16221_v32  ;;  %v16223_v22 = vld [vmem:[#allocation22_spill] sm:$0xff]  ;;  %v16226_v32 = vld [vmem:[#allocation280_spill] sm:$0xff]  ;;  %v16227_v48 = vld [vmem:[#allocation17_spill] sm:$0xff] }
 0x3da   : > { %v12477_v17 = vmul.f32 %v11984_v52, %v16222_v1  ;;  %v5299_v16 = vadd.f32 %v5298_v59, %v5184_v10  ;;  %v5336_v39 = vadd.f32 %v5335_v30, %v5185_v36  ;;  %v5373_v26 = vadd.f32 %v5372_v31, %v5186_v23  ;;  %v16225_v37 = vld [vmem:[#allocation274_spill] sm:$0xff]  ;;  %v12500_v59 = vpop.permute.xlu1 %5479  ;;  %v16252_v50 = vld [vmem:[#allocation21_spill] sm:$0xff] }
 0x3db   : > { %v5410_v8 = vadd.f32 %v5409_v56, %v5187_v27  ;;  %v5447_v2 = vadd.f32 %v5446_v7, %v5188_v44  ;;  %v12481_v11 = vmul.f32 %v11984_v52, %v16223_v22  ;;  %v12485_v40 = vmul.f32 %v11984_v52, %v16224_v20  ;;  %v16228_v10 = vld [vmem:[#allocation118_spill] sm:$0xff]  ;;  %v16229_v56 = vld [vmem:[#allocation148_spill] sm:$0xff]  ;;  %v12498_v44 = vpop.permute.xlu0 %5976  ;;  %16230 = vst [vmem:[#allocation103_spill] sm:$0xff] %v12500_v59  ;;  %v16239_v59 = vld [vmem:[#allocation139_spill] sm:$0xff] }
 0x3dc   : > { %v5194_v25 = vmul.f32 %v11986_v9, %v16225_v37  ;;  %v5195_v1 = vmul.f32 %v11986_v9, %v16226_v32  ;;  %v5196_v36 = vmul.f32 %v11986_v9, %v16227_v48  ;;  %v5197_v7 = vmul.f32 %v11986_v9, %v16228_v10  ;;  %v16231_v48 = vld [vmem:[#allocation157_spill] sm:$0xff]  ;;  %v16232_v32 = vld [vmem:[#allocation179_spill] sm:$0xff]  ;;  %v16238_v37 = vld [vmem:[#allocation164_spill] sm:$0xff] }
 0x3dd   : > { %v5198_v23 = vmul.f32 %v11986_v9, %v16229_v56  ;;  %v5300_v27 = vadd.f32 %v5299_v16, %v12247_v33  ;;  %v5337_v30 = vadd.f32 %v5336_v39, %v12251_v61  ;;  %v5374_v31 = vadd.f32 %v5373_v26, %v12274_v13  ;;  %v16233_v33 = vld [vmem:[#allocation182_spill] sm:$0xff] }
 0x3de   : > { %v5411_v20 = vadd.f32 %v5410_v8, %v12313_v51  ;;  %v5448_v22 = vadd.f32 %v5447_v2, %v12323_v62  ;;  %v12508_v10 = vmul.f32 %v11984_v52, %v16231_v48  ;;  %v12512_v9 = vmul.f32 %v12041_v12, %v16232_v32  ;;  %v16234_v51 = vld [vmem:[#allocation24_spill] sm:$0xff]  ;;  %v16235_v8 = vld [vmem:[#allocation290_spill] sm:$0xff]  ;;  %v16236_v2 = vld [vmem:[#allocation293_spill] sm:$0xff] }
 0x3df   : > { %v12516_v16 = vmul.f32 %v12041_v12, %v16233_v33  ;;  %v5301_v56 = vadd.f32 %v5300_v27, %v5194_v25  ;;  %v5338_v61 = vadd.f32 %v5337_v30, %v5195_v1  ;;  %v5375_v39 = vadd.f32 %v5374_v31, %v5196_v36  ;;  %v16237_v32 = vld [vmem:[#allocation110_spill] sm:$0xff]  ;;  %v16240_v25 = vld [vmem:[#allocation43_spill] sm:$0xff] }
 0x3e0   : > { %v5412_v13 = vadd.f32 %v5411_v20, %v5197_v7  ;;  %v5449_v26 = vadd.f32 %v5448_v22, %v5198_v23  ;;  %v12520_v62 = vmul.f32 %v12041_v12, %v16234_v51  ;;  %v12524_v52 = vmul.f32 %v12041_v12, %v16235_v8  ;;  %v16241_v20 = vld [vmem:[#allocation183_spill] sm:$0xff]  ;;  %v12541_v8 = vpop.permute.xlu0 %5984  ;;  %v12543_v51 = vpop.permute.xlu1 %5483 }
 0x3e1   : > { %v5204_v48 = vmul.f32 %v16237_v32, %v16236_v2  ;;  %v5205_v33 = vmul.f32 %v16237_v32, %v16238_v37  ;;  %v5206_v1 = vmul.f32 %v16237_v32, %v16239_v59  ;;  %v5207_v22 = vmul.f32 %v16237_v32, %v16240_v25  ;;  %16242 = vst [vmem:[#allocation27_spill] sm:$0xff] %v12543_v51  ;;  %v16243_v59 = vld [vmem:[#allocation49_spill] sm:$0xff] }
 0x3e2   : > { %v5208_v36 = vmul.f32 %v16237_v32, %v16241_v20  ;;  %v5302_v7 = vadd.f32 %v5301_v56, %v12366_v43  ;;  %v5339_v23 = vadd.f32 %v5338_v61, %v12370_v60  ;;  %v5376_v27 = vadd.f32 %v5375_v39, %v12374_v55  ;;  %v16244_v37 = vld [vmem:[#allocation205_spill] sm:$0xff]  ;;  %v16245_v32 = vld [vmem:[#allocation154_spill] sm:$0xff]  ;;  %v16246_v43 = vld [vmem:[#allocation215_spill] sm:$0xff] }
 0x3e3   : > { %v5413_v30 = vadd.f32 %v5412_v13, %v12400_v15  ;;  %v5450_v31 = vadd.f32 %v5449_v26, %v12404_v38  ;;  %v12547_v25 = vmul.f32 %v12041_v12, %v16243_v59  ;;  %v12551_v20 = vmul.f32 %v16245_v32, %v16244_v37  ;;  %v16247_v39 = vld [vmem:[#allocation57_spill] sm:$0xff]  ;;  %v16248_v26 = vld [vmem:[#allocation76_spill] sm:$0xff]  ;;  %v16249_v59 = vld [vmem:[#allocation135_spill] sm:$0xff] }
 0x3e4   : > { %v12555_v60 = vmul.f32 %v16245_v32, %v16246_v43  ;;  %v5303_v55 = vadd.f32 %v5302_v7, %v5204_v48  ;;  %v5340_v15 = vadd.f32 %v5339_v23, %v5205_v33  ;;  %v5377_v56 = vadd.f32 %v5376_v27, %v5206_v1  ;;  %v16250_v37 = vld [vmem:[#allocation61_spill] sm:$0xff] }
 0x3e5   : > { %v5414_v38 = vadd.f32 %v5413_v30, %v5207_v22  ;;  %v5451_v61 = vadd.f32 %v5450_v31, %v5208_v36  ;;  %v12559_v13 = vmul.f32 %v16245_v32, %v16247_v39  ;;  %v12563_v12 = vmul.f32 %v16245_v32, %v16248_v26  ;;  %v16251_v51 = vld [vmem:[#allocation141_spill] sm:$0xff]  ;;  %v16254_v22 = vld [vmem:[#allocation275_spill] sm:$0xff] }
 0x3e6   : > { %v5214_v2 = vmul.f32 %v16250_v37, %v16249_v59  ;;  %v5215_v43 = vmul.f32 %v16250_v37, %v16251_v51  ;;  %v5216_v48 = vmul.f32 %v16250_v37, %v16252_v50  ;;  %v16253_v33 = vld [vmem:[#allocation165_spill] sm:$0xff]  ;;  %v5218_v36 = vmul.f32 %v16250_v37, %v16254_v22  ;;  %v16256_v50 = vld [vmem:[#allocation227_spill] sm:$0xff]  ;;  %v16257_v51 = vld [vmem:[#allocation50_spill] sm:$0xff] }
 0x3e7   : > { %v5217_v1 = vmul.f32 %v16250_v37, %v16253_v33  ;;  %v5304_v7 = vadd.f32 %v5303_v55, %v12434_v24  ;;  %v5341_v23 = vadd.f32 %v5340_v15, %v12438_v28  ;;  %v5378_v27 = vadd.f32 %v5377_v56, %v12442_v4  ;;  %v16255_v26 = vld [vmem:[#allocation13_spill] sm:$0xff]  ;;  %v16258_v59 = vld [vmem:[#allocation231_spill] sm:$0xff]  ;;  %v12592_v28 = vpop.permute.xlu0 %5992  ;;  %v12594_v4 = vpop.permute.xlu1 %5491  ;;  %v16261_v56 = vld [vmem:[#allocation158_spill] sm:$0xff] }
 0x3e8   : > { %v5415_v30 = vadd.f32 %v5414_v38, %v12446_v21  ;;  %v5452_v31 = vadd.f32 %v5451_v61, %v12469_v45  ;;  %v12582_v39 = vmul.f32 %v16245_v32, %v16255_v26  ;;  %v12586_v33 = vmul.f32 %v16257_v51, %v16256_v50  ;;  %16259 = vst [vmem:[#allocation117_spill] sm:$0xff] %v12592_v28  ;;  %v16262_v38 = vld [vmem:[#allocation82_spill] sm:$0xff]  ;;  %v16263_v50 = vld [vmem:[#allocation159_spill] sm:$0xff]  ;;  %v16266_v22 = vld [vmem:[#allocation168_spill] sm:$0xff] }
 0x3e9   : > { %v12590_v37 = vmul.f32 %v16257_v51, %v16258_v59  ;;  %v5305_v24 = vadd.f32 %v5304_v7, %v5214_v2  ;;  %16260 = vst [vmem:[#allocation36_spill] sm:$0xff] %v12594_v4  ;;  %v5342_v21 = vadd.f32 %v5341_v23, %v5215_v43  ;;  %v5379_v55 = vadd.f32 %v5378_v27, %v5216_v48  ;;  %v16264_v59 = vld [vmem:[#allocation30_spill] sm:$0xff]  ;;  %v16265_v2 = vld [vmem:[#allocation176_spill] sm:$0xff]  ;;  %v16271_v4 = vld [vmem:[#allocation99_spill] sm:$0xff] }
 0x3ea   : > { %v5416_v45 = vadd.f32 %v5415_v30, %v5217_v1  ;;  %v5453_v15 = vadd.f32 %v5452_v31, %v5218_v36  ;;  %v12598_v32 = vmul.f32 %v16257_v51, %v16261_v56  ;;  %v12602_v61 = vmul.f32 %v16257_v51, %v16262_v38  ;;  %v16267_v48 = vld [vmem:[#allocation88_spill] sm:$0xff]  ;;  %v16268_v36 = vld [vmem:[#allocation91_spill] sm:$0xff] }
 0x3eb   : > { %v5224_v26 = vmul.f32 %v16264_v59, %v16263_v50  ;;  %v5225_v7 = vmul.f32 %v16264_v59, %v16265_v2  ;;  %v5226_v43 = vmul.f32 %v16264_v59, %v16266_v22  ;;  %v5227_v1 = vmul.f32 %v16264_v59, %v16267_v48  ;;  %v16269_v2 = vld [vmem:[#allocation108_spill] sm:$0xff]  ;;  %v16272_v28 = vld [vmem:[#allocation255_spill] sm:$0xff] }
 0x3ec   : > { %v5228_v23 = vmul.f32 %v16264_v59, %v16268_v36  ;;  %v5306_v27 = vadd.f32 %v5305_v24, %v12473_v42  ;;  %v5343_v30 = vadd.f32 %v5342_v21, %v12477_v17  ;;  %v5380_v31 = vadd.f32 %v5379_v55, %v12481_v11  ;;  %v16270_v22 = vld [vmem:[#allocation252_spill] sm:$0xff]  ;;  %v16275_v55 = vld [vmem:[#allocation5_spill] sm:$0xff] }
 0x3ed   : > { %v5417_v38 = vadd.f32 %v5416_v45, %v12485_v40  ;;  %v5454_v56 = vadd.f32 %v5453_v15, %v12508_v10  ;;  %v12621_v50 = vmul.f32 %v16257_v51, %v16269_v2  ;;  %v12625_v48 = vmul.f32 %v16271_v4, %v16270_v22  ;;  %v12631_v40 = vpop.permute.xlu0 %6000  ;;  %v12633_v10 = vpop.permute.xlu1 %5499  ;;  %v16276_v45 = vld [vmem:[#allocation277_spill] sm:$0xff] }
 0x3ee   : > { %v12629_v59 = vmul.f32 %v16271_v4, %v16272_v28  ;;  %v5307_v42 = vadd.f32 %v5306_v27, %v5224_v26  ;;  %v5344_v17 = vadd.f32 %v5343_v30, %v5225_v7  ;;  %v5381_v24 = vadd.f32 %v5380_v31, %v5226_v43  ;;  %16273 = vst [vmem:[#allocation169_spill] sm:$0xff] %v12631_v40  ;;  %v16277_v22 = vld [vmem:[#allocation189_spill] sm:$0xff]  ;;  %v16278_v28 = vld [vmem:[#allocation216_spill] sm:$0xff]  ;;  %v16281_v43 = vld [vmem:[#allocation86_spill] sm:$0xff] }
 0x3ef   : > { %v5418_v11 = vadd.f32 %v5417_v38, %v5227_v1  ;;  %v5455_v21 = vadd.f32 %v5454_v56, %v5228_v23  ;;  %16274 = vst [vmem:[#allocation206_spill] sm:$0xff] %v12633_v10  ;;  %v12637_v51 = vmul.f32 %v16271_v4, %v16275_v55  ;;  %v12641_v15 = vmul.f32 %v16271_v4, %v16276_v45  ;;  %v16279_v26 = vld [vmem:[#allocation204_spill] sm:$0xff]  ;;  %v16280_v38 = vld [vmem:[#allocation210_spill] sm:$0xff]  ;;  %v16282_v23 = vld [vmem:[#allocation25_spill] sm:$0xff] }
 0x3f0   : > { %v5234_v2 = vmul.f32 %v16278_v28, %v16277_v22  ;;  %v5235_v7 = vmul.f32 %v16278_v28, %v16279_v26  ;;  %v5236_v56 = vmul.f32 %v16278_v28, %v16280_v38  ;;  %v5237_v1 = vmul.f32 %v16278_v28, %v16281_v43  ;;  %v16283_v26 = vld [vmem:[#allocation92_spill] sm:$0xff]  ;;  %v16284_v38 = vld [vmem:[#allocation270_spill] sm:$0xff]  ;;  %v16285_v10 = vld [vmem:[#allocation245_spill] sm:$0xff] }
 0x3f1   : > { %v5238_v27 = vmul.f32 %v16278_v28, %v16282_v23  ;;  %v5308_v30 = vadd.f32 %v5307_v42, %v12512_v9  ;;  %v5345_v31 = vadd.f32 %v5344_v17, %v12516_v16  ;;  %v5382_v45 = vadd.f32 %v5381_v24, %v12520_v62  ;;  %v16286_v28 = vld [vmem:[#allocation175_spill] sm:$0xff]  ;;  %v16290_v24 = vld [vmem:[#allocation140_spill] sm:$0xff] }
 0x3f2   : > { %v5419_v55 = vadd.f32 %v5418_v11, %v12524_v52  ;;  %v5456_v22 = vadd.f32 %v5455_v21, %v12547_v25  ;;  %v12660_v36 = vmul.f32 %v16271_v4, %v16283_v26  ;;  %v12664_v43 = vmul.f32 %v16285_v10, %v16284_v38  ;;  %v16288_v52 = vld [vmem:[#allocation155_spill] sm:$0xff]  ;;  %v16292_v11 = vld [vmem:[#allocation218_spill] sm:$0xff]  ;;  %v16293_v21 = vld [vmem:[#allocation109_spill] sm:$0xff]  ;;  %v12682_v26 = vpop.permute.xlu0 %6008 }
 0x3f3   : > { %v5309_v40 = vadd.f32 %v5308_v30, %v5234_v2  ;;  %v12668_v9 = vmul.f32 %v12376_v14, %v16286_v28  ;;  %v5346_v16 = vadd.f32 %v5345_v31, %v5235_v7  ;;  %v5383_v42 = vadd.f32 %v5382_v45, %v5236_v56  ;;  %v16294_v2 = vld [vmem:[#allocation224_spill] sm:$0xff]  ;;  %v12684_v7 = vpop.permute.xlu1 %5507 }
 0x3f4   : > { %v5420_v62 = vadd.f32 %v5419_v55, %v5237_v1  ;;  %v5457_v17 = vadd.f32 %v5456_v22, %v5238_v27  ;;  %v12672_v25 = vmul.f32 %v12376_v14, %v16288_v52  ;;  %v12676_v4 = vmul.f32 %v12376_v14, %v16290_v24  ;;  %v16295_v55 = vld [vmem:[#allocation123_spill] sm:$0xff]  ;;  %v16296_v45 = vld [vmem:[#allocation184_spill] sm:$0xff] }
 0x3f5   : > { %16287 = vst [vmem:[#allocation59_spill] sm:$0xff] %v12668_v9  ;;  %v5244_v38 = vmul.f32 %v16293_v21, %v16292_v11  ;;  %v5245_v30 = vmul.f32 %v16293_v21, %v16294_v2  ;;  %v5246_v22 = vmul.f32 %v16293_v21, %v16295_v55  ;;  %v5247_v56 = vmul.f32 %v16293_v21, %v16296_v45  ;;  %v16297_v1 = vld [vmem:[#allocation52_spill] sm:$0xff]  ;;  %v16298_v52 = vld [vmem:[#allocation279_spill] sm:$0xff] }
 0x3f6   : > { %16289 = vst [vmem:[#allocation213_spill] sm:$0xff] %v12672_v25  ;;  %16291 = vst [vmem:[#allocation110_spill] sm:$0xff] %v12676_v4  ;;  %v5248_v27 = vmul.f32 %v16293_v21, %v16297_v1  ;;  %v5310_v31 = vadd.f32 %v5309_v40, %v12551_v20  ;;  %v5347_v4 = vadd.f32 %v5346_v16, %v12555_v60  ;;  %v16299_v55 = vld [vmem:[#allocation20_spill] sm:$0xff]  ;;  %v16300_v45 = vld [vmem:[#allocation19_spill] sm:$0xff] }
 0x3f7   : > { %v5384_v25 = vadd.f32 %v5383_v42, %v12559_v13  ;;  %v5421_v9 = vadd.f32 %v5420_v62, %v12563_v12  ;;  %v5458_v24 = vadd.f32 %v5457_v17, %v12582_v39  ;;  %v5270_v28 = vmul.f32 %v16285_v10, %v16298_v52  ;;  %v16301_v16 = vld [vmem:[#allocation97_spill] sm:$0xff]  ;;  %v16302_v12 = vld [vmem:[#allocation292_spill] sm:$0xff]  ;;  %v16305_v52 = vld [vmem:[#allocation15_spill] sm:$0xff] }
 0x3f8   : > { %v5271_v2 = vmul.f32 %v16285_v10, %v16299_v55  ;;  %v5272_v11 = vmul.f32 %v16285_v10, %v16300_v45  ;;  %v5311_v21 = vadd.f32 %v5310_v31, %v5244_v38  ;;  %v5348_v1 = vadd.f32 %v5347_v4, %v5245_v30  ;;  %v16303_v42 = vld [vmem:[#allocation244_spill] sm:$0xff]  ;;  %v16306_v4 = vld [vmem:[#allocation95_spill] sm:$0xff]  ;;  %v12720_v30 = vpop.permute.xlu0 %6016 }
 0x3f9   : > { %v5385_v20 = vadd.f32 %v5384_v25, %v5246_v22  ;;  %v5422_v40 = vadd.f32 %v5421_v9, %v5247_v56  ;;  %v5459_v60 = vadd.f32 %v5458_v24, %v5248_v27  ;;  %v5273_v13 = vmul.f32 %v16285_v10, %v16301_v16  ;;  %v16304_v17 = vld [vmem:[#allocation248_spill] sm:$0xff]  ;;  %v16307_v25 = vld [vmem:[#allocation113_spill] sm:$0xff]  ;;  %v12722_v22 = vpop.permute.xlu1 %5515  ;;  %v16308_v16 = vld [vmem:[#allocation167_spill] sm:$0xff] }
 0x3fa   : > { %v12707_v39 = vmul.f32 %v12317_v46, %v16302_v12  ;;  %v5254_v62 = vmul.f32 %v12319_v6, %v16303_v42  ;;  %v5255_v55 = vmul.f32 %v12319_v6, %v16304_v17  ;;  %v5256_v38 = vmul.f32 %v12319_v6, %v16305_v52 }
 0x3fb   : > { %v5257_v9 = vmul.f32 %v12319_v6, %v16306_v4  ;;  %v5258_v24 = vmul.f32 %v12319_v6, %v16307_v25  ;;  %v5312_v10 = vadd.f32 %v5311_v21, %v12586_v33  ;;  %v5349_v56 = vadd.f32 %v5348_v1, %v12590_v37  ;;  %v16311_v1 = vld [vmem:[#allocation263_spill] sm:$0xff] }
 0x3fc   : > { %v5386_v27 = vadd.f32 %v5385_v20, %v12598_v32  ;;  %v5423_v31 = vadd.f32 %v5422_v40, %v12602_v61  ;;  %v5460_v12 = vadd.f32 %v5459_v60, %v12621_v50  ;;  %v5280_v45 = vmul.f32 %v12317_v46, %v16308_v16  ;;  %v16309_v61 = vld [vmem:[#allocation119_spill] sm:$0xff]  ;;  %v16312_v40 = vld [vmem:[#allocation266_spill] sm:$0xff] }
 0x3fd   : > { %v5281_v6 = vmul.f32 %v12317_v46, %v12299_v5  ;;  %v5282_v33 = vmul.f32 %v12317_v46, %v12315_v54  ;;  %v5313_v21 = vadd.f32 %v5312_v10, %v5254_v62  ;;  %v5350_v25 = vadd.f32 %v5349_v56, %v5255_v55  ;;  %v16313_v5 = vld [vmem:[#allocation23_spill] sm:$0xff]  ;;  %v16314_v55 = vld [vmem:[#allocation193_spill] sm:$0xff] }
 0x3fe   : > { %v5387_v4 = vadd.f32 %v5386_v27, %v5256_v38  ;;  %v5424_v52 = vadd.f32 %v5423_v31, %v5257_v9  ;;  %v5461_v37 = vadd.f32 %v5460_v12, %v5258_v24  ;;  %v5283_v32 = vmul.f32 %v12317_v46, %v12301_v19  ;;  %v16315_v12 = vld [vmem:[#allocation131_spill] sm:$0xff]  ;;  %v12755_v31 = vpop.permute.xlu0 %6024  ;;  %v12757_v19 = vpop.permute.xlu1 %5523  ;;  %v16316_v54 = vld [vmem:[#allocation121_spill] sm:$0xff] }
 0x3ff   : > { %v12738_v50 = vmul.f32 %v12376_v14, %v16309_v61  ;;  %v5264_v20 = vmul.f32 %v12378_v34, %v16311_v1  ;;  %v5265_v60 = vmul.f32 %v12378_v34, %v16312_v40  ;;  %v5266_v62 = vmul.f32 %v12378_v34, %v16313_v5 }
 0x400   : > { %v5267_v38 = vmul.f32 %v12378_v34, %v16314_v55  ;;  %v5268_v9 = vmul.f32 %v12378_v34, %v16315_v12  ;;  %v5314_v46 = vadd.f32 %v5313_v21, %v12625_v48  ;;  %v5351_v24 = vadd.f32 %v5350_v25, %v12629_v59  ;;  %v16320_v48 = vld [vmem:[#allocation163_spill] sm:$0xff] }
 0x401   : > { %16310 = vst [vmem:[#allocation154_spill] sm:$0xff] %v12738_v50  ;;  %v5388_v10 = vadd.f32 %v5387_v4, %v12637_v51  ;;  %v5425_v56 = vadd.f32 %v5424_v52, %v12641_v15  ;;  %v5462_v27 = vadd.f32 %v5461_v37, %v12660_v36  ;;  %v12761_v16 = vmul.f32 %v12376_v14, %v16316_v54  ;;  %v16318_v50 = vld [vmem:[#allocation144_spill] sm:$0xff]  ;;  %v16322_v25 = vld [vmem:[#allocation191_spill] sm:$0xff] }
 0x402   : > { %v12765_v34 = vmul.f32 %v12407_v57, %v16318_v50  ;;  %v12769_v59 = vmul.f32 %v12407_v57, %v16320_v48  ;;  %v5315_v51 = vadd.f32 %v5314_v46, %v5264_v20  ;;  %v5352_v15 = vadd.f32 %v5351_v24, %v5265_v60  ;;  %v16324_v37 = vld [vmem:[#allocation192_spill] sm:$0xff]  ;;  %v16327_v50 = vld [vmem:[#allocation225_spill] sm:$0xff]  ;;  %v16329_v60 = vld [vmem:[#allocation102_spill] sm:$0xff] }
 0x403   : > { %16317 = vst [vmem:[#allocation61_spill] sm:$0xff] %v12761_v16  ;;  %v5389_v52 = vadd.f32 %v5388_v10, %v5266_v62  ;;  %v5426_v36 = vadd.f32 %v5425_v56, %v5267_v38  ;;  %v5463_v4 = vadd.f32 %v5462_v27, %v5268_v9  ;;  %v12773_v21 = vmul.f32 %v12407_v57, %v16322_v25  ;;  %v16326_v16 = vld [vmem:[#allocation282_spill] sm:$0xff]  ;;  %v16330_v38 = vld [vmem:[#allocation45_spill] sm:$0xff] }
 0x404   : > { %16319 = vst [vmem:[#allocation50_spill] sm:$0xff] %v12765_v34  ;;  %16321 = vst [vmem:[#allocation30_spill] sm:$0xff] %v12769_v59  ;;  %v12777_v14 = vmul.f32 %v12407_v57, %v16324_v37  ;;  %v5274_v34 = vmul.f32 %v12409_v63, %v16326_v16  ;;  %v5275_v48 = vmul.f32 %v12409_v63, %v16327_v50  ;;  %v16328_v59 = vld [vmem:[#allocation32_spill] sm:$0xff]  ;;  %v16333_v50 = vld [vmem:[#allocation174_spill] sm:$0xff] }
 0x405   : > { %16323 = vst [vmem:[#allocation99_spill] sm:$0xff] %v12773_v21  ;;  %v5276_v20 = vmul.f32 %v12409_v63, %v16328_v59  ;;  %v5277_v62 = vmul.f32 %v12409_v63, %v16329_v60  ;;  %v5278_v9 = vmul.f32 %v12409_v63, %v16330_v38  ;;  %v5316_v46 = vadd.f32 %v5315_v51, %v12664_v43  ;;  %v16335_v59 = vld [vmem:[#allocation190_spill] sm:$0xff]  ;;  %v12802_v63 = vpop.permute.xlu0 %6032  ;;  %v12804_v43 = vpop.permute.xlu1 %5531  ;;  %v16337_v51 = vld [vmem:[#allocation209_spill] sm:$0xff] }
 0x406   : > { %16325 = vst [vmem:[#allocation216_spill] sm:$0xff] %v12777_v14  ;;  %v5353_v24 = vadd.f32 %v5352_v15, %v5270_v28  ;;  %v5390_v10 = vadd.f32 %v5389_v52, %v5271_v2  ;;  %v5427_v56 = vadd.f32 %v5426_v36, %v5272_v11  ;;  %v5464_v27 = vadd.f32 %v5463_v4, %v5273_v13  ;;  %v16331_v14 = vld [vmem:[#allocation186_spill] sm:$0xff]  ;;  %v16341_v36 = vld [vmem:[#allocation145_spill] sm:$0xff] }
 0x407   : > { %v12792_v16 = vmul.f32 %v12407_v57, %v16331_v14  ;;  %v12796_v21 = vmul.f32 %v12452_v49, %v16333_v50  ;;  %v12800_v60 = vmul.f32 %v12452_v49, %v16335_v59  ;;  %v5317_v37 = vadd.f32 %v5316_v46, %v5274_v34  ;;  %v16339_v15 = vld [vmem:[#allocation70_spill] sm:$0xff] }
 0x408   : > { %v5354_v28 = vadd.f32 %v5353_v24, %v5275_v48  ;;  %v5391_v11 = vadd.f32 %v5390_v10, %v5276_v20  ;;  %v5428_v2 = vadd.f32 %v5427_v56, %v5277_v62  ;;  %v5465_v13 = vadd.f32 %v5464_v27, %v5278_v9  ;;  %v16342_v34 = vld [vmem:[#allocation138_spill] sm:$0xff] }
 0x409   : > { %16332 = vst [vmem:[#allocation245_spill] sm:$0xff] %v12792_v16  ;;  %16334 = vst [vmem:[#allocation109_spill] sm:$0xff] %v12796_v21  ;;  %v12808_v57 = vmul.f32 %v12452_v49, %v16337_v51  ;;  %v12812_v52 = vmul.f32 %v12452_v49, %v16339_v15  ;;  %v5284_v4 = vmul.f32 %v12454_v29, %v16341_v36  ;;  %v16343_v38 = vld [vmem:[#allocation38_spill] sm:$0xff]  ;;  %v16375_v21 = vld [vmem:[#allocation181_spill] sm:$0xff] }
 0x40a   : > { %16336 = vst [vmem:[#allocation119_spill] sm:$0xff] %v12800_v60  ;;  %v5285_v46 = vmul.f32 %v12454_v29, %v16342_v34  ;;  %v5286_v48 = vmul.f32 %v12454_v29, %v12411_v3  ;;  %v5287_v20 = vmul.f32 %v12454_v29, %v12430_v53  ;;  %v5288_v62 = vmul.f32 %v12454_v29, %v12413_v58  ;;  %v16374_v60 = vld [vmem:[#allocation126_spill] sm:$0xff] }
 0x40b   : > { %16338 = vst [vmem:[#allocation121_spill] sm:$0xff] %v12808_v57  ;;  %16340 = vst [vmem:[#allocation191_spill] sm:$0xff] %v12812_v52  ;;  %v5318_v9 = vadd.f32 %v5317_v37, %v12707_v39  ;;  %v5355_v24 = vadd.f32 %v5354_v28, %v5280_v45  ;;  %v5392_v10 = vadd.f32 %v5391_v11, %v5281_v6  ;;  %v12837_v6 = vpop.permute.xlu0 %6040  ;;  %v16349_v37 = vld [vmem:[#allocation107_spill] sm:$0xff]  ;;  %v16351_v11 = vld [vmem:[#allocation40_spill] sm:$0xff] }
 0x40c   : > { %v5429_v56 = vadd.f32 %v5428_v2, %v5282_v33  ;;  %v5466_v27 = vadd.f32 %v5465_v13, %v5283_v32  ;;  %v12827_v36 = vmul.f32 %v12452_v49, %v16343_v38  ;;  %v12831_v34 = vmul.f32 %v12498_v44, %v16195_v41  ;;  %v12839_v33 = vpop.permute.xlu1 %5539  ;;  %v16347_v32 = vld [vmem:[#allocation71_spill] sm:$0xff] }
 0x40d   : > { %v12835_v53 = vmul.f32 %v12498_v44, %v16197_v35  ;;  %v5319_v3 = vadd.f32 %v5318_v9, %v5284_v4  ;;  %v5356_v29 = vadd.f32 %v5355_v24, %v5285_v46  ;;  %v5393_v58 = vadd.f32 %v5392_v10, %v5286_v48 }
 0x40e   : > { %16344 = vst [vmem:[#allocation186_spill] sm:$0xff] %v12827_v36  ;;  %16345 = vst [vmem:[#allocation174_spill] sm:$0xff] %v12831_v34  ;;  %v5430_v39 = vadd.f32 %v5429_v56, %v5287_v20  ;;  %v5467_v45 = vadd.f32 %v5466_v27, %v5288_v62  ;;  %v12843_v49 = vmul.f32 %v12498_v44, %v16347_v32  ;;  %v16360_v36 = vld [vmem:[#allocation253_spill] sm:$0xff] }
 0x40f   : > { %16346 = vst [vmem:[#allocation190_spill] sm:$0xff] %v12835_v53  ;;  %v12847_v28 = vmul.f32 %v12498_v44, %v16349_v37  ;;  %v12851_v2 = vmul.f32 %v12498_v44, %v16351_v11  ;;  %v5320_v13 = vrot.slane %v5319_v3, 4  ;;  %v5357_v4 = vrot.slane %v5356_v29, 4  ;;  %v16358_v53 = vld [vmem:[#allocation11_spill] sm:$0xff] }
 0x410   : > { %16348 = vst [vmem:[#allocation209_spill] sm:$0xff] %v12843_v49  ;;  %v5394_v46 = vrot.slane %v5393_v58, 4  ;;  %v5431_v48 = vrot.slane %v5430_v39, 4  ;;  %v5468_v20 = vrot.slane %v5467_v45, 4  ;;  %v12855_v62 = vmul.f32 %v12541_v8, %v16205_v0 }
 0x411   : > { %16350 = vst [vmem:[#allocation70_spill] sm:$0xff] %v12847_v28  ;;  %16352 = vst [vmem:[#allocation38_spill] sm:$0xff] %v12851_v2  ;;  %v12859_v9 = vmul.f32 %v12541_v8, %v16206_v47  ;;  %v12863_v24 = vmul.f32 %v12541_v8, %v16207_v18  ;;  %v5321_v10 = vadd.f32 %v5320_v13, %v5319_v3  ;;  %v16356_v28 = vld [vmem:[#allocation12_spill] sm:$0xff]  ;;  %v12891_v13 = vpop.permute.xlu1 %5547  ;;  %v16426_v18 = vld [vmem:[#allocation206_spill] sm:$0xff] }
 0x412   : > { %16353 = vst [vmem:[#allocation71_spill] sm:$0xff] %v12855_v62  ;;  %v5358_v44 = vadd.f32 %v5357_v4, %v5356_v29  ;;  %v5395_v56 = vadd.f32 %v5394_v46, %v5393_v58  ;;  %v5432_v27 = vadd.f32 %v5431_v48, %v5430_v39  ;;  %v5469_v2 = vadd.f32 %v5468_v20, %v5467_v45  ;;  %v16365_v58 = vld [vmem:[#allocation285_spill] sm:$0xff]  ;;  %v16367_v39 = vld [vmem:[#allocation47_spill] sm:$0xff]  ;;  %v16438_v47 = vld [vmem:[#allocation168_spill] sm:$0xff] }
 0x413   : > { %16354 = vst [vmem:[#allocation107_spill] sm:$0xff] %v12859_v9  ;;  %16355 = vst [vmem:[#allocation40_spill] sm:$0xff] %v12863_v24  ;;  %v12867_v49 = vmul.f32 %v12541_v8, %v16356_v28  ;;  %v12871_v62 = vmul.f32 %v12541_v8, %v16358_v53  ;;  %v5322_v34 = vrot.slane %v5321_v10, 2  ;;  %v16361_v9 = vld [vmem:[#allocation117_spill] sm:$0xff]  ;;  %v16363_v24 = vld [vmem:[#allocation262_spill] sm:$0xff]  ;;  %v12889_v8 = vpop.permute.xlu0 %6048 }
 0x414   : > { %v12875_v52 = vmul.f32 %v16361_v9, %v16360_v36  ;;  %v5359_v57 = vrot.slane %v5358_v44, 2  ;;  %v12879_v3 = vmul.f32 %v16361_v9, %v16363_v24  ;;  %v12883_v29 = vmul.f32 %v16361_v9, %v16365_v58  ;;  %v16381_v58 = vld [vmem:[#allocation280_spill] sm:$0xff]  ;;  %v16423_v28 = vld [vmem:[#allocation275_spill] sm:$0xff] }
 0x415   : > { %16357 = vst [vmem:[#allocation298_spill] sm:$0xff] %v12867_v49  ;;  %16359 = vst [vmem:[#allocation299_spill] sm:$0xff] %v12871_v62  ;;  %v12887_v45 = vmul.f32 %v16361_v9, %v16367_v39  ;;  %v12893_v4 = vadd.f32 %v5322_v34, %v5321_v10  ;;  %v5396_v46 = vrot.slane %v5395_v56, 2  ;;  %v5433_v48 = vrot.slane %v5432_v27, 2  ;;  %v16372_v62 = vld [vmem:[#allocation125_spill] sm:$0xff]  ;;  %v16373_v49 = vld [vmem:[#allocation103_spill] sm:$0xff] }
 0x416   : > { %16362 = vst [vmem:[#allocation117_spill] sm:$0xff] %v12875_v52  ;;  %16364 = vst [vmem:[#allocation300_spill] sm:$0xff] %v12879_v3  ;;  %v5470_v20 = vrot.slane %v5469_v2, 2  ;;  %v16370_v52 = vld [vmem:[#allocation294_spill] sm:$0xff]  ;;  %v12909_v16 = vmul.f32 %v16373_v49, %v16375_v21  ;;  %v16376_v34 = vld [vmem:[#allocation201_spill] sm:$0xff]  ;;  %v12927_v24 = vadd.f32 %v5359_v57, %v5358_v44 }
 0x417   : > { %16366 = vst [vmem:[#allocation301_spill] sm:$0xff] %v12883_v29  ;;  %16368 = vst [vmem:[#allocation302_spill] sm:$0xff] %v12887_v45  ;;  %v12897_v3 = vmul.f32 %v16361_v9, %v16370_v52  ;;  %v12901_v29 = vmul.f32 %v16373_v49, %v16372_v62  ;;  %v12905_v45 = vmul.f32 %v16373_v49, %v16374_v60  ;;  %v16377_v39 = vld [vmem:[#allocation194_spill] sm:$0xff]  ;;  %v16379_v52 = vld [vmem:[#allocation169_spill] sm:$0xff] }
 0x418   : > { %16369 = vst [vmem:[#allocation303_spill] sm:$0xff] %v12893_v4  ;;  %v12913_v10 = vmul.f32 %v16373_v49, %v16376_v34  ;;  %v12917_v9 = vmul.f32 %v16373_v49, %v16377_v39  ;;  %v12925_v60 = vmul.f32 %v16379_v52, %v16381_v58  ;;  %16383 = vst [vmem:[#allocation305_spill] sm:$0xff] %v12927_v24  ;;  %v16384_v21 = vld [vmem:[#allocation17_spill] sm:$0xff]  ;;  %v16386_v34 = vld [vmem:[#allocation118_spill] sm:$0xff] }
 0x419   : > { %16371 = vst [vmem:[#allocation304_spill] sm:$0xff] %v12897_v3  ;;  %v16378_v3 = vld [vmem:[#allocation274_spill] sm:$0xff]  ;;  %v12931_v36 = vmul.f32 %v16379_v52, %v16384_v21  ;;  %v12935_v53 = vmul.f32 %v16379_v52, %v16386_v34  ;;  %v16388_v49 = vld [vmem:[#allocation148_spill] sm:$0xff]  ;;  %v12944_v58 = vadd.f32 %v5433_v48, %v5432_v27  ;;  %v12946_v57 = vadd.f32 %v5470_v20, %v5469_v2  ;;  %v16393_v44 = vld [vmem:[#allocation137_spill] sm:$0xff]  ;;  %v12964_v27 = vpop.permute.xlu0 %6056  ;;  %v12966_v2 = vpop.permute.xlu1 %5555 }
 0x41a   : > { %v12921_v62 = vmul.f32 %v16379_v52, %v16378_v3  ;;  %16382 = vst [vmem:[#allocation169_spill] sm:$0xff] %v12925_v60  ;;  %v12939_v39 = vmul.f32 %v16379_v52, %v16388_v49  ;;  %v12942_v3 = vadd.f32 %v5396_v46, %v5395_v56  ;;  %v16394_v24 = vld [vmem:[#allocation27_spill] sm:$0xff]  ;;  %v16398_v46 = vld [vmem:[#allocation161_spill] sm:$0xff]  ;;  %v16401_v4 = vld [vmem:[#allocation164_spill] sm:$0xff] }
 0x41b   : > { %16385 = vst [vmem:[#allocation306_spill] sm:$0xff] %v12931_v36  ;;  %16387 = vst [vmem:[#allocation307_spill] sm:$0xff] %v12935_v53  ;;  %v12950_v60 = vmul.f32 %v16394_v24, %v16393_v44  ;;  %v16395_v36 = vld [vmem:[#allocation142_spill] sm:$0xff]  ;;  %v12970_v48 = vmul.f32 %v16394_v24, %v16398_v46  ;;  %v16399_v20 = vld [vmem:[#allocation293_spill] sm:$0xff] }
 0x41c   : > { %16380 = vst [vmem:[#allocation103_spill] sm:$0xff] %v12921_v62  ;;  %16389 = vst [vmem:[#allocation308_spill] sm:$0xff] %v12939_v39  ;;  %v12954_v34 = vmul.f32 %v16394_v24, %v16395_v36  ;;  %v16396_v53 = vld [vmem:[#allocation202_spill] sm:$0xff]  ;;  %v12974_v62 = vmul.f32 %v12682_v26, %v16399_v20  ;;  %v16407_v36 = vld [vmem:[#allocation183_spill] sm:$0xff] }
 0x41d   : > { %16390 = vst [vmem:[#allocation309_spill] sm:$0xff] %v12942_v3  ;;  %16391 = vst [vmem:[#allocation310_spill] sm:$0xff] %v12944_v58  ;;  %v12958_v52 = vmul.f32 %v16394_v24, %v16396_v53  ;;  %v16397_v39 = vld [vmem:[#allocation178_spill] sm:$0xff]  ;;  %v16403_v58 = vld [vmem:[#allocation139_spill] sm:$0xff]  ;;  %v5476_v0 = vpop.permute.xlu0 %5475 }
 0x41e   : > { %16392 = vst [vmem:[#allocation311_spill] sm:$0xff] %v12946_v57  ;;  %v12962_v56 = vmul.f32 %v16394_v24, %v16397_v39  ;;  %16400 = vst [vmem:[#allocation27_spill] sm:$0xff] %v12974_v62  ;;  %v12978_v57 = vmul.f32 %v12682_v26, %v16401_v4  ;;  %v12982_v3 = vmul.f32 %v12682_v26, %v16403_v58  ;;  %v16405_v39 = vld [vmem:[#allocation43_spill] sm:$0xff]  ;;  %v16409_v46 = vld [vmem:[#allocation166_spill] sm:$0xff] }
 0x41f   : > { %v12986_v53 = vmul.f32 %v12682_v26, %v16405_v39  ;;  %v12990_v24 = vmul.f32 %v12682_v26, %v16407_v36  ;;  %v16410_v44 = vld [vmem:[#allocation36_spill] sm:$0xff]  ;;  %v16411_v62 = vld [vmem:[#allocation171_spill] sm:$0xff]  ;;  %v16417_v36 = vld [vmem:[#allocation141_spill] sm:$0xff] }
 0x420   : > { %16402 = vst [vmem:[#allocation312_spill] sm:$0xff] %v12978_v57  ;;  %16404 = vst [vmem:[#allocation313_spill] sm:$0xff] %v12982_v3  ;;  %v12994_v20 = vmul.f32 %v16410_v44, %v16409_v46  ;;  %v12998_v4 = vmul.f32 %v16410_v44, %v16411_v62  ;;  %v16412_v57 = vld [vmem:[#allocation246_spill] sm:$0xff]  ;;  %v16413_v3 = vld [vmem:[#allocation69_spill] sm:$0xff]  ;;  %v13018_v62 = vmul.f32 %v12720_v30, %v16417_v36 }
 0x421   : > { %16406 = vst [vmem:[#allocation314_spill] sm:$0xff] %v12986_v53  ;;  %16408 = vst [vmem:[#allocation315_spill] sm:$0xff] %v12990_v24  ;;  %v13002_v58 = vmul.f32 %v16410_v44, %v16412_v57  ;;  %v13006_v39 = vmul.f32 %v16410_v44, %v16413_v3  ;;  %v16414_v53 = vld [vmem:[#allocation198_spill] sm:$0xff]  ;;  %v16415_v24 = vld [vmem:[#allocation135_spill] sm:$0xff] }
 0x422   : > { %v13010_v26 = vmul.f32 %v16410_v44, %v16414_v53  ;;  %v13014_v46 = vmul.f32 %v12720_v30, %v16415_v24  ;;  %16418 = vst [vmem:[#allocation316_spill] sm:$0xff] %v13018_v62  ;;  %v16419_v49 = vld [vmem:[#allocation21_spill] sm:$0xff]  ;;  %v13030_v44 = vmul.f32 %v12720_v30, %v16423_v28  ;;  %v16425_v53 = vld [vmem:[#allocation195_spill] sm:$0xff]  ;;  %v16428_v62 = vld [vmem:[#allocation232_spill] sm:$0xff] }
 0x423   : > { %v13022_v57 = vmul.f32 %v12720_v30, %v16419_v49  ;;  %v16421_v21 = vld [vmem:[#allocation165_spill] sm:$0xff]  ;;  %v13034_v24 = vmul.f32 %v16426_v18, %v16425_v53  ;;  %v13042_v49 = vmul.f32 %v16426_v18, %v16428_v62  ;;  %v16436_v28 = vld [vmem:[#allocation176_spill] sm:$0xff]  ;;  %v13062_v62 = vmul.f32 %v12755_v31, %v16438_v47 }
 0x424   : > { %16416 = vst [vmem:[#allocation36_spill] sm:$0xff] %v13014_v46  ;;  %v13026_v3 = vmul.f32 %v12720_v30, %v16421_v21  ;;  %16424 = vst [vmem:[#allocation319_spill] sm:$0xff] %v13030_v44  ;;  %v16427_v46 = vld [vmem:[#allocation203_spill] sm:$0xff] }
 0x425   : > { %16420 = vst [vmem:[#allocation317_spill] sm:$0xff] %v13022_v57  ;;  %v13038_v36 = vmul.f32 %v16426_v18, %v16427_v46  ;;  %16429 = vst [vmem:[#allocation206_spill] sm:$0xff] %v13042_v49  ;;  %v16430_v57 = vld [vmem:[#allocation39_spill] sm:$0xff]  ;;  %v13058_v46 = vmul.f32 %v12755_v31, %v16436_v28  ;;  %v13064_v49 = vpop.permute.xlu1 %5563 }
 0x426   : > { %16422 = vst [vmem:[#allocation318_spill] sm:$0xff] %v13026_v3  ;;  %v13046_v21 = vmul.f32 %v16426_v18, %v16430_v57  ;;  %v16432_v3 = vld [vmem:[#allocation7_spill] sm:$0xff]  ;;  %16439 = vst [vmem:[#allocation324_spill] sm:$0xff] %v13062_v62  ;;  %v16440_v57 = vld [vmem:[#allocation88_spill] sm:$0xff] }
 0x427   : > { %v13050_v30 = vmul.f32 %v16426_v18, %v16432_v3  ;;  %v16434_v44 = vld [vmem:[#allocation159_spill] sm:$0xff]  ;;  %16437 = vst [vmem:[#allocation323_spill] sm:$0xff] %v13058_v46  ;;  %v16445_v46 = vld [vmem:[#allocation220_spill] sm:$0xff]  ;;  %v16447_v62 = vld [vmem:[#allocation10_spill] sm:$0xff] }
 0x428   : > { %16431 = vst [vmem:[#allocation320_spill] sm:$0xff] %v13046_v21  ;;  %v13054_v53 = vmul.f32 %v12755_v31, %v16434_v44  ;;  %v13068_v21 = vmul.f32 %v12755_v31, %v16440_v57  ;;  %v16442_v18 = vld [vmem:[#allocation91_spill] sm:$0xff]  ;;  %v13080_v28 = vmul.f32 %v12684_v7, %v16445_v46  ;;  %v13084_v47 = vmul.f32 %v12684_v7, %v16447_v62 }
 0x429   : > { %16433 = vst [vmem:[#allocation321_spill] sm:$0xff] %v13050_v30  ;;  %v13072_v3 = vmul.f32 %v12755_v31, %v16442_v18  ;;  %v16449_v30 = vld [vmem:[#allocation112_spill] sm:$0xff] }
 0x42a   : > { %16435 = vst [vmem:[#allocation322_spill] sm:$0xff] %v13054_v53  ;;  %16441 = vst [vmem:[#allocation325_spill] sm:$0xff] %v13068_v21  ;;  %v16444_v53 = vld [vmem:[#allocation219_spill] sm:$0xff]  ;;  %v13088_v57 = vmul.f32 %v12684_v7, %v16449_v30  ;;  %v16450_v21 = vld [vmem:[#allocation72_spill] sm:$0xff] }
 0x42b   : > { %16443 = vst [vmem:[#allocation326_spill] sm:$0xff] %v13072_v3  ;;  %v13076_v44 = vmul.f32 %v12684_v7, %v16444_v53  ;;  %16446 = vst [vmem:[#allocation327_spill] sm:$0xff] %v13080_v28  ;;  %v13092_v31 = vmul.f32 %v12684_v7, %v16450_v21  ;;  %v16451_v3 = vld [vmem:[#allocation189_spill] sm:$0xff]  ;;  %v16453_v18 = vld [vmem:[#allocation204_spill] sm:$0xff]  ;;  %v13112_v7 = vmul.f32 %v12802_v63, %v16282_v23 }
 0x42c   : > { %16448 = vst [vmem:[#allocation328_spill] sm:$0xff] %v13084_v47  ;;  %v13096_v53 = vmul.f32 %v12802_v63, %v16451_v3  ;;  %v13100_v46 = vmul.f32 %v12802_v63, %v16453_v18  ;;  %v16455_v28 = vld [vmem:[#allocation210_spill] sm:$0xff]  ;;  %v16471_v23 = vld [vmem:[#allocation224_spill] sm:$0xff] }
 0x42d   : > { %v13104_v62 = vmul.f32 %v12802_v63, %v16455_v28  ;;  %v16457_v47 = vld [vmem:[#allocation86_spill] sm:$0xff]  ;;  %16459 = vst [vmem:[#allocation333_spill] sm:$0xff] %v13112_v7 }
 0x42e   : > { %16452 = vst [vmem:[#allocation329_spill] sm:$0xff] %v13096_v53  ;;  %16454 = vst [vmem:[#allocation330_spill] sm:$0xff] %v13100_v46  ;;  %v13108_v30 = vmul.f32 %v12802_v63, %v16457_v47  ;;  %v16460_v21 = vld [vmem:[#allocation78_spill] sm:$0xff]  ;;  %v16461_v53 = vld [vmem:[#allocation249_spill] sm:$0xff] }
 0x42f   : > { %16456 = vst [vmem:[#allocation331_spill] sm:$0xff] %v13104_v62  ;;  %v13116_v3 = vmul.f32 %v12722_v22, %v16460_v21  ;;  %v13120_v18 = vmul.f32 %v12722_v22, %v16461_v53  ;;  %v16463_v46 = vld [vmem:[#allocation44_spill] sm:$0xff]  ;;  %v16465_v62 = vld [vmem:[#allocation14_spill] sm:$0xff]  ;;  %v13140_v53 = vmul.f32 %v12837_v6, %v16471_v23 }
 0x430   : > { %16458 = vst [vmem:[#allocation332_spill] sm:$0xff] %v13108_v30  ;;  %v13124_v28 = vmul.f32 %v12722_v22, %v16463_v46  ;;  %v13128_v47 = vmul.f32 %v12722_v22, %v16465_v62  ;;  %v16467_v30 = vld [vmem:[#allocation287_spill] sm:$0xff]  ;;  %v16469_v7 = vld [vmem:[#allocation218_spill] sm:$0xff] }
 0x431   : > { %16462 = vst [vmem:[#allocation334_spill] sm:$0xff] %v13120_v18  ;;  %v13132_v63 = vmul.f32 %v12722_v22, %v16467_v30  ;;  %v13136_v21 = vmul.f32 %v12837_v6, %v16469_v7  ;;  %16472 = vst [vmem:[#allocation339_spill] sm:$0xff] %v13140_v53  ;;  %v16473_v18 = vld [vmem:[#allocation123_spill] sm:$0xff]  ;;  %v16479_v30 = vld [vmem:[#allocation264_spill] sm:$0xff]  ;;  %v5488_v53 = vpop.permute.xlu0 %5487 }
 0x432   : > { %16464 = vst [vmem:[#allocation335_spill] sm:$0xff] %v13124_v28  ;;  %16466 = vst [vmem:[#allocation336_spill] sm:$0xff] %v13128_v47  ;;  %v13144_v46 = vmul.f32 %v12837_v6, %v16473_v18  ;;  %v16475_v28 = vld [vmem:[#allocation184_spill] sm:$0xff]  ;;  %v13156_v7 = vmul.f32 %v12757_v19, %v16479_v30  ;;  %v13178_v30 = vmul.f32 %v12889_v8, %v16303_v42 }
 0x433   : > { %16468 = vst [vmem:[#allocation337_spill] sm:$0xff] %v13132_v63  ;;  %16470 = vst [vmem:[#allocation338_spill] sm:$0xff] %v13136_v21  ;;  %v13148_v62 = vmul.f32 %v12837_v6, %v16475_v28  ;;  %v16477_v47 = vld [vmem:[#allocation52_spill] sm:$0xff]  ;;  %v16480_v21 = vld [vmem:[#allocation271_spill] sm:$0xff]  ;;  %v13162_v63 = vpop.permute.xlu1 %5571 }
 0x434   : > { %16474 = vst [vmem:[#allocation340_spill] sm:$0xff] %v13144_v46  ;;  %v13152_v22 = vmul.f32 %v12837_v6, %v16477_v47  ;;  %v13160_v23 = vmul.f32 %v12757_v19, %v16480_v21  ;;  %v16481_v46 = vld [vmem:[#allocation80_spill] sm:$0xff]  ;;  %v16485_v6 = vld [vmem:[#allocation122_spill] sm:$0xff]  ;;  %16486 = vst [vmem:[#allocation345_spill] sm:$0xff] %v13178_v30  ;;  %v13182_v21 = vmul.f32 %v12889_v8, %v16304_v17 }
 0x435   : > { %16476 = vst [vmem:[#allocation341_spill] sm:$0xff] %v13148_v62  ;;  %v13166_v18 = vmul.f32 %v12757_v19, %v16481_v46  ;;  %v16483_v62 = vld [vmem:[#allocation152_spill] sm:$0xff]  ;;  %v16488_v47 = vld [vmem:[#allocation15_spill] sm:$0xff] }
 0x436   : > { %16478 = vst [vmem:[#allocation342_spill] sm:$0xff] %v13152_v22  ;;  %v13170_v28 = vmul.f32 %v12757_v19, %v16483_v62  ;;  %v13174_v22 = vmul.f32 %v12757_v19, %v16485_v6  ;;  %16487 = vst [vmem:[#allocation346_spill] sm:$0xff] %v13182_v21  ;;  %v13186_v46 = vmul.f32 %v12889_v8, %v16488_v47  ;;  %v16494_v6 = vld [vmem:[#allocation283_spill] sm:$0xff] }
 0x437   : > { %16482 = vst [vmem:[#allocation343_spill] sm:$0xff] %v13166_v18  ;;  %v16490_v18 = vld [vmem:[#allocation95_spill] sm:$0xff]  ;;  %v13198_v42 = vmul.f32 %v12804_v43, %v16494_v6  ;;  %v5602_v6 = vmul.f32 %v5476_v0, %v16309_v61 }
 0x438   : > { %16484 = vst [vmem:[#allocation344_spill] sm:$0xff] %v13170_v28  ;;  %16489 = vst [vmem:[#allocation347_spill] sm:$0xff] %v13186_v46  ;;  %v13190_v62 = vmul.f32 %v12889_v8, %v16490_v18  ;;  %v16492_v28 = vld [vmem:[#allocation113_spill] sm:$0xff]  ;;  %v16495_v30 = vld [vmem:[#allocation291_spill] sm:$0xff] }
 0x439   : > { %v13194_v19 = vmul.f32 %v12889_v8, %v16492_v28  ;;  %v13202_v17 = vmul.f32 %v12804_v43, %v16495_v30  ;;  %v16496_v21 = vld [vmem:[#allocation243_spill] sm:$0xff]  ;;  %v13222_v30 = vmul.f32 %v12964_v27, %v16312_v40  ;;  %v5496_v40 = vpop.permute.xlu0 %5495 }
 0x43a   : > { %16491 = vst [vmem:[#allocation348_spill] sm:$0xff] %v13190_v62  ;;  %v13206_v47 = vmul.f32 %v12804_v43, %v16496_v21  ;;  %v16497_v46 = vld [vmem:[#allocation51_spill] sm:$0xff]  ;;  %v16499_v62 = vld [vmem:[#allocation156_spill] sm:$0xff]  ;;  %v13226_v21 = vmul.f32 %v12964_v27, %v16313_v5 }
 0x43b   : > { %16493 = vst [vmem:[#allocation349_spill] sm:$0xff] %v13194_v19  ;;  %v13210_v18 = vmul.f32 %v12804_v43, %v16497_v46  ;;  %v13214_v8 = vmul.f32 %v12804_v43, %v16499_v62  ;;  %v13218_v19 = vmul.f32 %v12964_v27, %v16311_v1  ;;  %16502 = vst [vmem:[#allocation353_spill] sm:$0xff] %v13222_v30  ;;  %v16504_v28 = vld [vmem:[#allocation175_spill] sm:$0xff]  ;;  %v16508_v30 = vld [vmem:[#allocation124_spill] sm:$0xff] }
 0x43c   : > { %16503 = vst [vmem:[#allocation354_spill] sm:$0xff] %v13226_v21  ;;  %v5603_v46 = vmul.f32 %v5476_v0, %v16316_v54  ;;  %v16505_v43 = vld [vmem:[#allocation155_spill] sm:$0xff]  ;;  %v13234_v1 = vmul.f32 %v12964_v27, %v16314_v55  ;;  %v13242_v5 = vmul.f32 %v12839_v33, %v16508_v30  ;;  %v16510_v21 = vld [vmem:[#allocation140_spill] sm:$0xff]  ;;  %v13245_v54 = vpop.permute.xlu1 %5579 }
 0x43d   : > { %16498 = vst [vmem:[#allocation350_spill] sm:$0xff] %v13210_v18  ;;  %16500 = vst [vmem:[#allocation351_spill] sm:$0xff] %v13214_v8  ;;  %v5604_v18 = vmul.f32 %v5476_v0, %v16504_v28  ;;  %v5605_v62 = vmul.f32 %v5476_v0, %v16505_v43  ;;  %v5606_v61 = vmul.f32 %v5476_v0, %v16510_v21  ;;  %v16511_v8 = vld [vmem:[#allocation127_spill] sm:$0xff]  ;;  %v16513_v21 = vld [vmem:[#allocation144_spill] sm:$0xff] }
 0x43e   : > { %16501 = vst [vmem:[#allocation352_spill] sm:$0xff] %v13218_v19  ;;  %16506 = vst [vmem:[#allocation175_spill] sm:$0xff] %v13234_v1  ;;  %v13238_v19 = vmul.f32 %v12964_v27, %v16315_v12  ;;  %v5762_v28 = vadd.f32 %v12901_v29, %v5602_v6  ;;  %v5799_v43 = vadd.f32 %v12905_v45, %v5603_v46  ;;  %v16515_v46 = vld [vmem:[#allocation192_spill] sm:$0xff] }
 0x43f   : > { %16509 = vst [vmem:[#allocation355_spill] sm:$0xff] %v13242_v5  ;;  %v5836_v55 = vadd.f32 %v12909_v16, %v5604_v18  ;;  %v5873_v1 = vadd.f32 %v12913_v10, %v5605_v62  ;;  %v13253_v27 = vmul.f32 %v12839_v33, %v16511_v8  ;;  %v5910_v0 = vadd.f32 %v12917_v9, %v5606_v61  ;;  %v16514_v5 = vld [vmem:[#allocation163_spill] sm:$0xff]  ;;  %v16517_v61 = vld [vmem:[#allocation77_spill] sm:$0xff] }
 0x440   : > { %16507 = vst [vmem:[#allocation155_spill] sm:$0xff] %v13238_v19  ;;  %v16512_v19 = vld [vmem:[#allocation90_spill] sm:$0xff]  ;;  %v5617_v12 = vmul.f32 %v5488_v53, %v16513_v21  ;;  %v5618_v29 = vmul.f32 %v5488_v53, %v16514_v5  ;;  %v5619_v45 = vmul.f32 %v5488_v53, %v16322_v25  ;;  %v5620_v16 = vmul.f32 %v5488_v53, %v16515_v46  ;;  %v16516_v8 = vld [vmem:[#allocation259_spill] sm:$0xff]  ;;  %v16518_v25 = vld [vmem:[#allocation149_spill] sm:$0xff] }
 0x441   : > { %v13257_v30 = vmul.f32 %v12839_v33, %v16512_v19  ;;  %v5621_v62 = vmul.f32 %v5488_v53, %v16331_v14  ;;  %v5763_v10 = vadd.f32 %v5762_v28, %v12950_v60  ;;  %v5800_v18 = vadd.f32 %v5799_v43, %v12954_v34  ;;  %v16520_v43 = vld [vmem:[#allocation22_spill] sm:$0xff] }
 0x442   : > { %v5837_v6 = vadd.f32 %v5836_v55, %v12958_v52  ;;  %v5874_v19 = vadd.f32 %v5873_v1, %v12962_v56  ;;  %v13271_v9 = vmul.f32 %v12839_v33, %v16516_v8  ;;  %v13275_v5 = vmul.f32 %v12839_v33, %v16517_v61  ;;  %v5504_v52 = vpop.permute.xlu0 %5503  ;;  %v13282_v1 = vpop.permute.xlu1 %5587  ;;  %v16519_v56 = vld [vmem:[#allocation150_spill] sm:$0xff]  ;;  %v16566_v61 = vld [vmem:[#allocation17_spill] sm:$0xff] }
 0x443   : > { %v13279_v21 = vmul.f32 %v12891_v13, %v16518_v25  ;;  %v5911_v53 = vadd.f32 %v5910_v0, %v12970_v48  ;;  %v5764_v14 = vadd.f32 %v5763_v10, %v5617_v12  ;;  %v5801_v60 = vadd.f32 %v5800_v18, %v5618_v29  ;;  %v16521_v18 = vld [vmem:[#allocation130_spill] sm:$0xff] }
 0x444   : > { %v5838_v34 = vadd.f32 %v5837_v6, %v5619_v45  ;;  %v5875_v55 = vadd.f32 %v5874_v19, %v5620_v16  ;;  %v13286_v28 = vmul.f32 %v12891_v13, %v16519_v56  ;;  %v13290_v33 = vmul.f32 %v12891_v13, %v16520_v43  ;;  %v16524_v6 = vld [vmem:[#allocation182_spill] sm:$0xff]  ;;  %v16565_v56 = vld [vmem:[#allocation280_spill] sm:$0xff] }
 0x445   : > { %v5912_v46 = vadd.f32 %v5911_v53, %v5621_v62  ;;  %v5627_v25 = vmul.f32 %v5496_v40, %v16333_v50  ;;  %v5628_v48 = vmul.f32 %v5496_v40, %v16335_v59  ;;  %v5629_v12 = vmul.f32 %v5496_v40, %v16337_v51  ;;  %v16522_v50 = vld [vmem:[#allocation157_spill] sm:$0xff]  ;;  %v16523_v51 = vld [vmem:[#allocation179_spill] sm:$0xff]  ;;  %v16525_v53 = vld [vmem:[#allocation24_spill] sm:$0xff] }
 0x446   : > { %v5630_v19 = vmul.f32 %v5496_v40, %v16339_v15  ;;  %v5631_v0 = vmul.f32 %v5496_v40, %v16343_v38  ;;  %v5765_v29 = vadd.f32 %v5764_v14, %v12994_v20  ;;  %v5802_v45 = vadd.f32 %v5801_v60, %v12998_v4 }
 0x447   : > { %v5839_v16 = vadd.f32 %v5838_v34, %v13002_v58  ;;  %v5876_v10 = vadd.f32 %v5875_v55, %v13006_v39  ;;  %v13303_v62 = vmul.f32 %v12891_v13, %v16521_v18  ;;  %v13307_v59 = vmul.f32 %v12891_v13, %v16522_v50  ;;  %v5512_v34 = vpop.permute.xlu0 %5511  ;;  %v13323_v55 = vpop.permute.xlu1 %5952  ;;  %v16548_v50 = vld [vmem:[#allocation285_spill] sm:$0xff] }
 0x448   : > { %v13311_v15 = vmul.f32 %v12966_v2, %v16523_v51  ;;  %v5913_v40 = vadd.f32 %v5912_v46, %v13010_v26  ;;  %v5766_v38 = vadd.f32 %v5765_v29, %v5627_v25  ;;  %v5803_v4 = vadd.f32 %v5802_v45, %v5628_v48  ;;  %v16526_v29 = vld [vmem:[#allocation206_spill] sm:$0xff] }
 0x449   : > { %v5840_v20 = vadd.f32 %v5839_v16, %v5629_v12  ;;  %v5877_v58 = vadd.f32 %v5876_v10, %v5630_v19  ;;  %v13316_v39 = vmul.f32 %v12966_v2, %v16524_v6  ;;  %v13320_v14 = vmul.f32 %v12966_v2, %v16525_v53  ;;  %v16535_v53 = vld [vmem:[#allocation238_spill] sm:$0xff] }
 0x44a   : > { %v5914_v13 = vadd.f32 %v5913_v40, %v5631_v0  ;;  %v5637_v60 = vmul.f32 %v5504_v52, %v16195_v41  ;;  %v5638_v26 = vmul.f32 %v5504_v52, %v16197_v35  ;;  %v5639_v25 = vmul.f32 %v5504_v52, %v16347_v32  ;;  %v16527_v0 = vld [vmem:[#allocation320_spill] sm:$0xff]  ;;  %v16528_v41 = vld [vmem:[#allocation290_spill] sm:$0xff]  ;;  %v16529_v40 = vld [vmem:[#allocation49_spill] sm:$0xff] }
 0x44b   : > { %v5640_v46 = vmul.f32 %v5504_v52, %v16349_v37  ;;  %v5641_v48 = vmul.f32 %v5504_v52, %v16351_v11  ;;  %v5767_v12 = vadd.f32 %v5766_v38, %v13034_v24  ;;  %v5804_v19 = vadd.f32 %v5803_v4, %v13038_v36  ;;  %v16530_v32 = vld [vmem:[#allocation205_spill] sm:$0xff]  ;;  %v16536_v6 = vld [vmem:[#allocation42_spill] sm:$0xff] }
 0x44c   : > { %v5841_v45 = vadd.f32 %v5840_v20, %v16526_v29  ;;  %v5878_v16 = vadd.f32 %v5877_v58, %v16527_v0  ;;  %v13335_v10 = vmul.f32 %v12966_v2, %v16528_v41  ;;  %v13339_v35 = vmul.f32 %v12966_v2, %v16529_v40  ;;  %v16531_v11 = vld [vmem:[#allocation321_spill] sm:$0xff]  ;;  %v16532_v20 = vld [vmem:[#allocation215_spill] sm:$0xff] }
 0x44d   : > { %v13343_v37 = vmul.f32 %v13064_v49, %v16530_v32  ;;  %v5915_v24 = vadd.f32 %v5914_v13, %v16531_v11  ;;  %v5768_v52 = vadd.f32 %v5767_v12, %v5637_v60  ;;  %v5805_v36 = vadd.f32 %v5804_v19, %v5638_v26  ;;  %v16533_v29 = vld [vmem:[#allocation57_spill] sm:$0xff]  ;;  %v16534_v40 = vld [vmem:[#allocation235_spill] sm:$0xff]  ;;  %v16537_v13 = vld [vmem:[#allocation12_spill] sm:$0xff]  ;;  %v13359_v12 = vpop.permute.xlu1 %5956 }
 0x44e   : > { %v5842_v38 = vadd.f32 %v5841_v45, %v5639_v25  ;;  %v5879_v4 = vadd.f32 %v5878_v16, %v5640_v46  ;;  %v13348_v58 = vmul.f32 %v13064_v49, %v16532_v20  ;;  %v13352_v0 = vmul.f32 %v13064_v49, %v16533_v29  ;;  %v16538_v26 = vld [vmem:[#allocation11_spill] sm:$0xff]  ;;  %v5520_v46 = vpop.permute.xlu0 %5519  ;;  %v16540_v11 = vld [vmem:[#allocation328_spill] sm:$0xff]  ;;  %v16547_v20 = vld [vmem:[#allocation262_spill] sm:$0xff] }
 0x44f   : > { %v5916_v2 = vadd.f32 %v5915_v24, %v5641_v48  ;;  %v5647_v41 = vmul.f32 %v5512_v34, %v16534_v40  ;;  %v5648_v32 = vmul.f32 %v5512_v34, %v16535_v53  ;;  %v5649_v51 = vmul.f32 %v5512_v34, %v16536_v6  ;;  %v16539_v45 = vld [vmem:[#allocation327_spill] sm:$0xff]  ;;  %v16541_v40 = vld [vmem:[#allocation76_spill] sm:$0xff]  ;;  %v16542_v6 = vld [vmem:[#allocation13_spill] sm:$0xff] }
 0x450   : > { %v5650_v60 = vmul.f32 %v5512_v34, %v16537_v13  ;;  %v5651_v25 = vmul.f32 %v5512_v34, %v16538_v26  ;;  %v5769_v19 = vadd.f32 %v5768_v52, %v13076_v44  ;;  %v5806_v16 = vadd.f32 %v5805_v36, %v16539_v45  ;;  %v16543_v34 = vld [vmem:[#allocation227_spill] sm:$0xff] }
 0x451   : > { %v5843_v29 = vadd.f32 %v5842_v38, %v16540_v11  ;;  %v5880_v48 = vadd.f32 %v5879_v4, %v13088_v57  ;;  %v13367_v53 = vmul.f32 %v13064_v49, %v16541_v40  ;;  %v13371_v24 = vmul.f32 %v13064_v49, %v16542_v6  ;;  %v16544_v45 = vld [vmem:[#allocation231_spill] sm:$0xff]  ;;  %v16545_v4 = vld [vmem:[#allocation158_spill] sm:$0xff]  ;;  %v16546_v6 = vld [vmem:[#allocation253_spill] sm:$0xff] }
 0x452   : > { %v13375_v13 = vmul.f32 %v13162_v63, %v16543_v34  ;;  %v5917_v44 = vadd.f32 %v5916_v2, %v13092_v31  ;;  %v5770_v52 = vadd.f32 %v5769_v19, %v5647_v41  ;;  %v5807_v36 = vadd.f32 %v5806_v16, %v5648_v32  ;;  %v16549_v31 = vld [vmem:[#allocation47_spill] sm:$0xff]  ;;  %v16550_v32 = vld [vmem:[#allocation294_spill] sm:$0xff] }
 0x453   : > { %v5844_v26 = vadd.f32 %v5843_v29, %v5649_v51  ;;  %v5881_v38 = vadd.f32 %v5880_v48, %v5650_v60  ;;  %v13380_v57 = vmul.f32 %v13162_v63, %v16544_v45  ;;  %v13384_v11 = vmul.f32 %v13162_v63, %v16545_v4  ;;  %v16551_v2 = vld [vmem:[#allocation334_spill] sm:$0xff]  ;;  %v16552_v19 = vld [vmem:[#allocation335_spill] sm:$0xff]  ;;  %v16553_v48 = vld [vmem:[#allocation336_spill] sm:$0xff]  ;;  %v5528_v45 = vpop.permute.xlu0 %5527 }
 0x454   : > { %v5918_v49 = vadd.f32 %v5917_v44, %v5651_v25  ;;  %v5657_v40 = vmul.f32 %v5520_v46, %v16546_v6  ;;  %v5658_v34 = vmul.f32 %v5520_v46, %v16547_v20  ;;  %v5659_v18 = vmul.f32 %v5520_v46, %v16548_v50  ;;  %v13395_v25 = vpop.permute.xlu1 %5964  ;;  %v16554_v6 = vld [vmem:[#allocation82_spill] sm:$0xff]  ;;  %v16555_v50 = vld [vmem:[#allocation108_spill] sm:$0xff] }
 0x455   : > { %v5660_v41 = vmul.f32 %v5520_v46, %v16549_v31  ;;  %v5661_v51 = vmul.f32 %v5520_v46, %v16550_v32  ;;  %v5771_v29 = vadd.f32 %v5770_v52, %v13116_v3  ;;  %v5808_v60 = vadd.f32 %v5807_v36, %v16551_v2  ;;  %v16557_v46 = vld [vmem:[#allocation252_spill] sm:$0xff]  ;;  %v16559_v52 = vld [vmem:[#allocation337_spill] sm:$0xff]  ;;  %v16560_v2 = vld [vmem:[#allocation255_spill] sm:$0xff] }
 0x456   : > { %v5845_v16 = vadd.f32 %v5844_v26, %v16552_v19  ;;  %v5882_v4 = vadd.f32 %v5881_v38, %v16553_v48  ;;  %v13399_v20 = vmul.f32 %v13162_v63, %v16554_v6  ;;  %v13403_v44 = vmul.f32 %v13162_v63, %v16555_v50  ;;  %v16562_v48 = vld [vmem:[#allocation5_spill] sm:$0xff]  ;;  %v16564_v50 = vld [vmem:[#allocation274_spill] sm:$0xff] }
 0x457   : > { %v13407_v3 = vmul.f32 %v13245_v54, %v16557_v46  ;;  %v5919_v36 = vadd.f32 %v5918_v49, %v16559_v52  ;;  %v5772_v26 = vadd.f32 %v5771_v29, %v5657_v40  ;;  %v5809_v31 = vadd.f32 %v5808_v60, %v5658_v34  ;;  %v16567_v49 = vld [vmem:[#allocation118_spill] sm:$0xff]  ;;  %v16568_v34 = vld [vmem:[#allocation148_spill] sm:$0xff]  ;;  %v16569_v29 = vld [vmem:[#allocation343_spill] sm:$0xff] }
 0x458   : > { %16556 = vst [vmem:[#allocation140_spill] sm:$0xff] %v13403_v44  ;;  %v5846_v38 = vadd.f32 %v5845_v16, %v5659_v18  ;;  %v5883_v32 = vadd.f32 %v5882_v4, %v5660_v41  ;;  %v13412_v19 = vmul.f32 %v13245_v54, %v16560_v2  ;;  %v13416_v6 = vmul.f32 %v13245_v54, %v16562_v48  ;;  %v16570_v16 = vld [vmem:[#allocation344_spill] sm:$0xff]  ;;  %v16573_v48 = vld [vmem:[#allocation181_spill] sm:$0xff] }
 0x459   : > { %16558 = vst [vmem:[#allocation144_spill] sm:$0xff] %v13407_v3  ;;  %v5920_v63 = vadd.f32 %v5919_v36, %v5661_v51  ;;  %v5667_v43 = vmul.f32 %v5528_v45, %v16564_v50  ;;  %v5668_v46 = vmul.f32 %v5528_v45, %v16565_v56  ;;  %v5669_v8 = vmul.f32 %v5528_v45, %v16566_v61  ;;  %v16571_v36 = vld [vmem:[#allocation125_spill] sm:$0xff]  ;;  %v16572_v56 = vld [vmem:[#allocation126_spill] sm:$0xff]  ;;  %v16580_v44 = vld [vmem:[#allocation164_spill] sm:$0xff] }
 0x45a   : > { %16561 = vst [vmem:[#allocation163_spill] sm:$0xff] %v13412_v19  ;;  %16563 = vst [vmem:[#allocation192_spill] sm:$0xff] %v13416_v6  ;;  %v5670_v40 = vmul.f32 %v5528_v45, %v16567_v49  ;;  %v5671_v18 = vmul.f32 %v5528_v45, %v16568_v34  ;;  %v5773_v4 = vadd.f32 %v5772_v26, %v13156_v7  ;;  %v5536_v45 = vpop.permute.xlu0 %5535  ;;  %v13434_v34 = vpop.permute.xlu1 %5972  ;;  %v16578_v6 = vld [vmem:[#allocation59_spill] sm:$0xff]  ;;  %v16579_v19 = vld [vmem:[#allocation293_spill] sm:$0xff] }
 0x45b   : > { %v5810_v41 = vadd.f32 %v5809_v31, %v13160_v23  ;;  %v5847_v60 = vadd.f32 %v5846_v38, %v16569_v29  ;;  %v5884_v52 = vadd.f32 %v5883_v32, %v16570_v16  ;;  %v5921_v51 = vadd.f32 %v5920_v63, %v13174_v22  ;;  %v16574_v32 = vld [vmem:[#allocation201_spill] sm:$0xff]  ;;  %v16575_v63 = vld [vmem:[#allocation194_spill] sm:$0xff] }
 0x45c   : > { %v6080_v50 = vmul.f32 %v13323_v55, %v16571_v36  ;;  %v6081_v61 = vmul.f32 %v13323_v55, %v16572_v56  ;;  %v6082_v49 = vmul.f32 %v13323_v55, %v16573_v48  ;;  %v5774_v7 = vadd.f32 %v5773_v4, %v5667_v43  ;;  %v16576_v16 = vld [vmem:[#allocation154_spill] sm:$0xff]  ;;  %v16577_v56 = vld [vmem:[#allocation61_spill] sm:$0xff]  ;;  %v16583_v4 = vld [vmem:[#allocation139_spill] sm:$0xff] }
 0x45d   : > { %v5811_v23 = vadd.f32 %v5810_v41, %v5668_v46  ;;  %v5848_v26 = vadd.f32 %v5847_v60, %v5669_v8  ;;  %v5885_v31 = vadd.f32 %v5884_v52, %v5670_v40  ;;  %v5922_v38 = vadd.f32 %v5921_v51, %v5671_v18  ;;  %v16581_v46 = vld [vmem:[#allocation213_spill] sm:$0xff]  ;;  %v16582_v40 = vld [vmem:[#allocation110_spill] sm:$0xff]  ;;  %v16584_v60 = vld [vmem:[#allocation43_spill] sm:$0xff] }
 0x45e   : > { %v6083_v22 = vmul.f32 %v13323_v55, %v16574_v32  ;;  %v6084_v29 = vmul.f32 %v13323_v55, %v16575_v63  ;;  %v6235_v36 = vadd.f32 %v6080_v50, %v16576_v16  ;;  %v6272_v2 = vadd.f32 %v6081_v61, %v16577_v56  ;;  %v16585_v51 = vld [vmem:[#allocation183_spill] sm:$0xff]  ;;  %v16588_v63 = vld [vmem:[#allocation137_spill] sm:$0xff]  ;;  %v5544_v56 = vpop.permute.xlu0 %5543 }
 0x45f   : > { %v6309_v48 = vadd.f32 %v6082_v49, %v16578_v6  ;;  %v5677_v3 = vmul.f32 %v5536_v45, %v16579_v19  ;;  %v5678_v43 = vmul.f32 %v5536_v45, %v16580_v44  ;;  %v5679_v41 = vmul.f32 %v5536_v45, %v16583_v4  ;;  %v16586_v49 = vld [vmem:[#allocation350_spill] sm:$0xff]  ;;  %v16587_v32 = vld [vmem:[#allocation351_spill] sm:$0xff] }
 0x460   : > { %v6346_v8 = vadd.f32 %v6083_v22, %v16581_v46  ;;  %v6383_v18 = vadd.f32 %v6084_v29, %v16582_v40  ;;  %v5680_v52 = vmul.f32 %v5536_v45, %v16584_v60  ;;  %v5681_v55 = vmul.f32 %v5536_v45, %v16585_v51  ;;  %v16589_v29 = vld [vmem:[#allocation142_spill] sm:$0xff]  ;;  %v13459_v46 = vpop.permute.xlu1 %5980 }
 0x461   : > { %v5775_v50 = vadd.f32 %v5774_v7, %v13198_v42  ;;  %v5812_v61 = vadd.f32 %v5811_v23, %v13202_v17  ;;  %v5849_v6 = vadd.f32 %v5848_v26, %v13206_v47  ;;  %v5886_v19 = vadd.f32 %v5885_v31, %v16586_v49  ;;  %v16590_v7 = vld [vmem:[#allocation202_spill] sm:$0xff] }
 0x462   : > { %v5923_v44 = vadd.f32 %v5922_v38, %v16587_v32  ;;  %v6085_v22 = vmul.f32 %v13359_v12, %v16588_v63  ;;  %v6086_v16 = vmul.f32 %v13359_v12, %v16589_v29  ;;  %v6087_v17 = vmul.f32 %v13359_v12, %v16590_v7  ;;  %v16591_v26 = vld [vmem:[#allocation178_spill] sm:$0xff]  ;;  %v16592_v38 = vld [vmem:[#allocation161_spill] sm:$0xff]  ;;  %v16593_v32 = vld [vmem:[#allocation135_spill] sm:$0xff] }
 0x463   : > { %v5776_v45 = vadd.f32 %v5775_v50, %v5677_v3  ;;  %v5813_v40 = vadd.f32 %v5812_v61, %v5678_v43  ;;  %v5850_v42 = vadd.f32 %v5849_v6, %v5679_v41  ;;  %v5887_v47 = vadd.f32 %v5886_v19, %v5680_v52  ;;  %v16594_v43 = vld [vmem:[#allocation141_spill] sm:$0xff] }
 0x464   : > { %v5924_v23 = vadd.f32 %v5923_v44, %v5681_v55  ;;  %v6088_v31 = vmul.f32 %v13359_v12, %v16591_v26  ;;  %v6089_v4 = vmul.f32 %v13359_v12, %v16592_v38  ;;  %v6236_v60 = vadd.f32 %v6235_v36, %v6085_v22  ;;  %v16595_v50 = vld [vmem:[#allocation21_spill] sm:$0xff]  ;;  %v16597_v55 = vld [vmem:[#allocation275_spill] sm:$0xff]  ;;  %v16604_v38 = vld [vmem:[#allocation50_spill] sm:$0xff] }
 0x465   : > { %v6273_v51 = vadd.f32 %v6272_v2, %v6086_v16  ;;  %v6310_v49 = vadd.f32 %v6309_v48, %v6087_v17  ;;  %v5687_v63 = vmul.f32 %v5544_v56, %v16593_v32  ;;  %v5688_v41 = vmul.f32 %v5544_v56, %v16594_v43  ;;  %v16596_v6 = vld [vmem:[#allocation165_spill] sm:$0xff]  ;;  %v16598_v44 = vld [vmem:[#allocation355_spill] sm:$0xff]  ;;  %v16599_v48 = vld [vmem:[#allocation166_spill] sm:$0xff] }
 0x466   : > { %v6347_v29 = vadd.f32 %v6346_v8, %v6088_v31  ;;  %v6384_v3 = vadd.f32 %v6383_v18, %v6089_v4  ;;  %v5689_v61 = vmul.f32 %v5544_v56, %v16595_v50  ;;  %v5690_v52 = vmul.f32 %v5544_v56, %v16596_v6  ;;  %v13479_v18 = vpop.permute.xlu1 %5988  ;;  %v16600_v17 = vld [vmem:[#allocation171_spill] sm:$0xff]  ;;  %v16601_v31 = vld [vmem:[#allocation246_spill] sm:$0xff]  ;;  %v16607_v50 = vld [vmem:[#allocation216_spill] sm:$0xff] }
 0x467   : > { %v5691_v19 = vmul.f32 %v5544_v56, %v16597_v55  ;;  %v5777_v7 = vadd.f32 %v5776_v45, %v16598_v44  ;;  %v5814_v26 = vadd.f32 %v5813_v40, %v13253_v27  ;;  %v5851_v12 = vadd.f32 %v5850_v42, %v13257_v30  ;;  %v5552_v27 = vpop.permute.xlu0 %5551  ;;  %v16605_v32 = vld [vmem:[#allocation30_spill] sm:$0xff]  ;;  %v16606_v43 = vld [vmem:[#allocation99_spill] sm:$0xff]  ;;  %v16608_v55 = vld [vmem:[#allocation245_spill] sm:$0xff] }
 0x468   : > { %v5888_v2 = vadd.f32 %v5887_v47, %v13271_v9  ;;  %v5925_v36 = vadd.f32 %v5924_v23, %v13275_v5  ;;  %v6095_v8 = vmul.f32 %v13395_v25, %v16599_v48  ;;  %v6096_v56 = vmul.f32 %v13395_v25, %v16600_v17  ;;  %v16602_v9 = vld [vmem:[#allocation69_spill] sm:$0xff]  ;;  %v16603_v47 = vld [vmem:[#allocation198_spill] sm:$0xff] }
 0x469   : > { %v5778_v22 = vadd.f32 %v5777_v7, %v5687_v63  ;;  %v5815_v16 = vadd.f32 %v5814_v26, %v5688_v41  ;;  %v6097_v45 = vmul.f32 %v13395_v25, %v16601_v31  ;;  %v5852_v40 = vadd.f32 %v5851_v12, %v5689_v61  ;;  %v16609_v7 = vld [vmem:[#allocation159_spill] sm:$0xff] }
 0x46a   : > { %v5889_v30 = vadd.f32 %v5888_v2, %v5690_v52  ;;  %v5926_v42 = vadd.f32 %v5925_v36, %v5691_v19  ;;  %v6098_v5 = vmul.f32 %v13395_v25, %v16602_v9  ;;  %v6099_v23 = vmul.f32 %v13395_v25, %v16603_v47  ;;  %v16610_v52 = vld [vmem:[#allocation176_spill] sm:$0xff] }
 0x46b   : > { %v6237_v4 = vadd.f32 %v6236_v60, %v16604_v38  ;;  %v6274_v63 = vadd.f32 %v6273_v51, %v16605_v32  ;;  %v6311_v41 = vadd.f32 %v6310_v49, %v16606_v43  ;;  %v6348_v6 = vadd.f32 %v6347_v29, %v16607_v50  ;;  %v16611_v36 = vld [vmem:[#allocation168_spill] sm:$0xff]  ;;  %v16613_v51 = vld [vmem:[#allocation91_spill] sm:$0xff]  ;;  %v13499_v49 = vpop.permute.xlu1 %5996  ;;  %v16621_v50 = vld [vmem:[#allocation121_spill] sm:$0xff] }
 0x46c   : > { %v6385_v44 = vadd.f32 %v6384_v3, %v16608_v55  ;;  %v5697_v61 = vmul.f32 %v5552_v27, %v16609_v7  ;;  %v5698_v19 = vmul.f32 %v5552_v27, %v16610_v52  ;;  %v5699_v48 = vmul.f32 %v5552_v27, %v16611_v36  ;;  %v16612_v60 = vld [vmem:[#allocation88_spill] sm:$0xff]  ;;  %v16620_v43 = vld [vmem:[#allocation119_spill] sm:$0xff]  ;;  %v16623_v7 = vld [vmem:[#allocation186_spill] sm:$0xff] }
 0x46d   : > { %v6238_v26 = vadd.f32 %v6237_v4, %v6095_v8  ;;  %v6275_v12 = vadd.f32 %v6274_v63, %v6096_v56  ;;  %v6312_v2 = vadd.f32 %v6311_v41, %v6097_v45  ;;  %v6349_v25 = vadd.f32 %v6348_v6, %v6098_v5  ;;  %v16614_v45 = vld [vmem:[#allocation195_spill] sm:$0xff]  ;;  %v16616_v4 = vld [vmem:[#allocation232_spill] sm:$0xff]  ;;  %v16624_v52 = vld [vmem:[#allocation277_spill] sm:$0xff] }
 0x46e   : > { %v6386_v17 = vadd.f32 %v6385_v44, %v6099_v23  ;;  %v5700_v31 = vmul.f32 %v5552_v27, %v16612_v60  ;;  %v5701_v9 = vmul.f32 %v5552_v27, %v16613_v51  ;;  %v5779_v29 = vadd.f32 %v5778_v22, %v13279_v21  ;;  %v16615_v23 = vld [vmem:[#allocation203_spill] sm:$0xff] }
 0x46f   : > { %v5816_v3 = vadd.f32 %v5815_v16, %v13286_v28  ;;  %v5853_v47 = vadd.f32 %v5852_v40, %v13290_v33  ;;  %v5890_v8 = vadd.f32 %v5889_v30, %v13303_v62  ;;  %v5927_v56 = vadd.f32 %v5926_v42, %v13307_v59  ;;  %v5560_v28 = vpop.permute.xlu0 %5559  ;;  %v16617_v33 = vld [vmem:[#allocation39_spill] sm:$0xff]  ;;  %v16619_v30 = vld [vmem:[#allocation109_spill] sm:$0xff] }
 0x470   : > { %v6105_v5 = vmul.f32 %v13434_v34, %v16614_v45  ;;  %v6106_v38 = vmul.f32 %v13434_v34, %v16615_v23  ;;  %v6107_v27 = vmul.f32 %v13434_v34, %v16616_v4  ;;  %v5780_v32 = vadd.f32 %v5779_v29, %v5697_v61  ;;  %v16618_v40 = vld [vmem:[#allocation7_spill] sm:$0xff]  ;;  %v16627_v29 = vld [vmem:[#allocation210_spill] sm:$0xff] }
 0x471   : > { %v5817_v63 = vadd.f32 %v5816_v3, %v5698_v19  ;;  %v5854_v21 = vadd.f32 %v5853_v47, %v5699_v48  ;;  %v5891_v22 = vadd.f32 %v5890_v8, %v5700_v31  ;;  %v5928_v16 = vadd.f32 %v5927_v56, %v5701_v9  ;;  %v16622_v55 = vld [vmem:[#allocation191_spill] sm:$0xff]  ;;  %v16625_v48 = vld [vmem:[#allocation189_spill] sm:$0xff]  ;;  %v16626_v31 = vld [vmem:[#allocation204_spill] sm:$0xff] }
 0x472   : > { %v6108_v62 = vmul.f32 %v13434_v34, %v16617_v33  ;;  %v6109_v59 = vmul.f32 %v13434_v34, %v16618_v40  ;;  %v6239_v42 = vadd.f32 %v6238_v26, %v16619_v30  ;;  %v6276_v41 = vadd.f32 %v6275_v12, %v16620_v43  ;;  %v13527_v34 = vpop.permute.xlu1 %6004  ;;  %v16629_v56 = vld [vmem:[#allocation25_spill] sm:$0xff]  ;;  %v16630_v33 = vld [vmem:[#allocation219_spill] sm:$0xff]  ;;  %v16631_v40 = vld [vmem:[#allocation220_spill] sm:$0xff] }
 0x473   : > { %v6313_v6 = vadd.f32 %v6312_v2, %v16621_v50  ;;  %v6350_v44 = vadd.f32 %v6349_v25, %v16622_v55  ;;  %v6387_v61 = vadd.f32 %v6386_v17, %v16623_v7  ;;  %v13523_v19 = vmul.f32 %v13245_v54, %v16624_v52  ;;  %v16628_v25 = vld [vmem:[#allocation86_spill] sm:$0xff]  ;;  %v5568_v30 = vpop.permute.xlu0 %5567  ;;  %v16637_v43 = vld [vmem:[#allocation209_spill] sm:$0xff] }
 0x474   : > { %v6240_v36 = vadd.f32 %v6239_v42, %v6105_v5  ;;  %v5707_v60 = vmul.f32 %v5560_v28, %v16625_v48  ;;  %v5708_v51 = vmul.f32 %v5560_v28, %v16626_v31  ;;  %v6277_v26 = vadd.f32 %v6276_v41, %v6106_v38  ;;  %v16638_v55 = vld [vmem:[#allocation70_spill] sm:$0xff] }
 0x475   : > { %v6314_v9 = vadd.f32 %v6313_v6, %v6107_v27  ;;  %v6351_v12 = vadd.f32 %v6350_v44, %v6108_v62  ;;  %v5709_v2 = vmul.f32 %v5560_v28, %v16627_v29  ;;  %v6388_v3 = vadd.f32 %v6387_v61, %v6109_v59  ;;  %v16639_v7 = vld [vmem:[#allocation38_spill] sm:$0xff]  ;;  %v16641_v29 = vld [vmem:[#allocation224_spill] sm:$0xff] }
 0x476   : > { %v5710_v47 = vmul.f32 %v5560_v28, %v16628_v25  ;;  %v5781_v17 = vadd.f32 %v5780_v32, %v13311_v15  ;;  %v5818_v8 = vadd.f32 %v5817_v63, %v13316_v39  ;;  %v5711_v45 = vmul.f32 %v5560_v28, %v16629_v56  ;;  %v16632_v39 = vld [vmem:[#allocation10_spill] sm:$0xff]  ;;  %v16633_v28 = vld [vmem:[#allocation112_spill] sm:$0xff]  ;;  %v13550_v50 = vpop.permute.xlu1 %6012 }
 0x477   : > { %v5855_v5 = vadd.f32 %v5854_v21, %v13320_v14  ;;  %v5892_v23 = vadd.f32 %v5891_v22, %v13335_v10  ;;  %v5929_v4 = vadd.f32 %v5928_v16, %v13339_v35  ;;  %v6115_v62 = vmul.f32 %v13459_v46, %v16630_v33  ;;  %v16634_v10 = vld [vmem:[#allocation72_spill] sm:$0xff]  ;;  %v16635_v21 = vld [vmem:[#allocation174_spill] sm:$0xff] }
 0x478   : > { %v5782_v38 = vadd.f32 %v5781_v17, %v5707_v60  ;;  %v5819_v27 = vadd.f32 %v5818_v8, %v5708_v51  ;;  %v6116_v59 = vmul.f32 %v13459_v46, %v16631_v40  ;;  %v6117_v63 = vmul.f32 %v13459_v46, %v16632_v39  ;;  %v16636_v16 = vld [vmem:[#allocation190_spill] sm:$0xff]  ;;  %v16643_v17 = vld [vmem:[#allocation184_spill] sm:$0xff] }
 0x479   : > { %v5856_v15 = vadd.f32 %v5855_v5, %v5709_v2  ;;  %v5893_v32 = vadd.f32 %v5892_v23, %v5710_v47  ;;  %v6118_v14 = vmul.f32 %v13459_v46, %v16633_v28  ;;  %v6119_v35 = vmul.f32 %v13459_v46, %v16634_v10  ;;  %v16640_v48 = vld [vmem:[#allocation218_spill] sm:$0xff]  ;;  %v16642_v46 = vld [vmem:[#allocation123_spill] sm:$0xff] }
 0x47a   : > { %v6241_v22 = vadd.f32 %v6240_v36, %v16635_v21  ;;  %v6278_v42 = vadd.f32 %v6277_v26, %v16636_v16  ;;  %v6315_v41 = vadd.f32 %v6314_v9, %v16637_v43  ;;  %v5930_v6 = vadd.f32 %v5929_v4, %v5711_v45  ;;  %v16644_v45 = vld [vmem:[#allocation52_spill] sm:$0xff]  ;;  %v16645_v4 = vld [vmem:[#allocation78_spill] sm:$0xff] }
 0x47b   : > { %v6352_v44 = vadd.f32 %v6351_v12, %v16638_v55  ;;  %v6389_v61 = vadd.f32 %v6388_v3, %v16639_v7  ;;  %v5717_v60 = vmul.f32 %v5568_v30, %v16640_v48  ;;  %v5718_v2 = vmul.f32 %v5568_v30, %v16641_v29  ;;  %v16659_v29 = vld [vmem:[#allocation15_spill] sm:$0xff] }
 0x47c   : > { %v6242_v31 = vadd.f32 %v6241_v22, %v6115_v62  ;;  %v6279_v51 = vadd.f32 %v6278_v42, %v6116_v59  ;;  %v5719_v25 = vmul.f32 %v5568_v30, %v16642_v46  ;;  %v6316_v36 = vadd.f32 %v6315_v41, %v6117_v63  ;;  %v16646_v62 = vld [vmem:[#allocation249_spill] sm:$0xff]  ;;  %v16653_v22 = vld [vmem:[#allocation298_spill] sm:$0xff]  ;;  %v16654_v42 = vld [vmem:[#allocation299_spill] sm:$0xff] }
 0x47d   : > { %v6353_v47 = vadd.f32 %v6352_v44, %v6118_v14  ;;  %v6390_v26 = vadd.f32 %v6389_v61, %v6119_v35  ;;  %v5720_v9 = vmul.f32 %v5568_v30, %v16643_v17  ;;  %v5783_v8 = vadd.f32 %v5782_v38, %v13343_v37  ;;  %v16647_v37 = vld [vmem:[#allocation44_spill] sm:$0xff]  ;;  %v5576_v38 = vpop.permute.xlu0 %5575  ;;  %v16651_v14 = vld [vmem:[#allocation107_spill] sm:$0xff] }
 0x47e   : > { %v5820_v56 = vadd.f32 %v5819_v27, %v13348_v58  ;;  %v5857_v12 = vadd.f32 %v5856_v15, %v13352_v0  ;;  %v5894_v3 = vadd.f32 %v5893_v32, %v13367_v53  ;;  %v5721_v5 = vmul.f32 %v5568_v30, %v16644_v45  ;;  %v13570_v0 = vpop.permute.xlu1 %6020  ;;  %v16648_v27 = vld [vmem:[#allocation14_spill] sm:$0xff]  ;;  %v16650_v32 = vld [vmem:[#allocation71_spill] sm:$0xff]  ;;  %v16652_v35 = vld [vmem:[#allocation40_spill] sm:$0xff] }
 0x47f   : > { %v5931_v23 = vadd.f32 %v5930_v6, %v13371_v24  ;;  %v6125_v33 = vmul.f32 %v13479_v18, %v16645_v4  ;;  %v6126_v40 = vmul.f32 %v13479_v18, %v16646_v62  ;;  %v5784_v59 = vadd.f32 %v5783_v8, %v5717_v60  ;;  %v16649_v24 = vld [vmem:[#allocation287_spill] sm:$0xff]  ;;  %v16655_v41 = vld [vmem:[#allocation92_spill] sm:$0xff] }
 0x480   : > { %v5821_v39 = vadd.f32 %v5820_v56, %v5718_v2  ;;  %v5858_v63 = vadd.f32 %v5857_v12, %v5719_v25  ;;  %v6127_v58 = vmul.f32 %v13479_v18, %v16647_v37  ;;  %v5895_v53 = vadd.f32 %v5894_v3, %v5720_v9  ;;  %v16656_v44 = vld [vmem:[#allocation244_spill] sm:$0xff] }
 0x481   : > { %v6128_v30 = vmul.f32 %v13479_v18, %v16648_v27  ;;  %v6129_v15 = vmul.f32 %v13479_v18, %v16649_v24  ;;  %v6243_v28 = vadd.f32 %v6242_v31, %v16650_v32  ;;  %v6280_v10 = vadd.f32 %v6279_v51, %v16651_v14  ;;  %v16657_v61 = vld [vmem:[#allocation248_spill] sm:$0xff]  ;;  %v16658_v18 = vld [vmem:[#allocation270_spill] sm:$0xff]  ;;  %v16670_v24 = vld [vmem:[#allocation301_spill] sm:$0xff] }
 0x482   : > { %v6317_v21 = vadd.f32 %v6316_v36, %v16652_v35  ;;  %v6354_v16 = vadd.f32 %v6353_v47, %v16653_v22  ;;  %v6391_v43 = vadd.f32 %v6390_v26, %v16654_v42  ;;  %v13583_v6 = vmul.f32 %v13245_v54, %v16655_v41  ;;  %v16660_v26 = vld [vmem:[#allocation95_spill] sm:$0xff]  ;;  %v13597_v56 = vpop.permute.xlu1 %6028  ;;  %v16661_v45 = vld [vmem:[#allocation264_spill] sm:$0xff] }
 0x483   : > { %v6244_v55 = vadd.f32 %v6243_v28, %v6125_v33  ;;  %v5727_v7 = vmul.f32 %v5576_v38, %v16656_v44  ;;  %v5728_v48 = vmul.f32 %v5576_v38, %v16657_v61  ;;  %v13589_v60 = vmul.f32 %v13282_v1, %v16658_v18  ;;  %v16669_v27 = vld [vmem:[#allocation300_spill] sm:$0xff]  ;;  %v16671_v28 = vld [vmem:[#allocation302_spill] sm:$0xff] }
 0x484   : > { %v5932_v31 = vadd.f32 %v5931_v23, %v5721_v5  ;;  %v6281_v51 = vadd.f32 %v6280_v10, %v6126_v40  ;;  %v5729_v2 = vmul.f32 %v5576_v38, %v16659_v29  ;;  %v6318_v46 = vadd.f32 %v6317_v21, %v6127_v58  ;;  %v16662_v23 = vld [vmem:[#allocation271_spill] sm:$0xff]  ;;  %v16665_v40 = vld [vmem:[#allocation80_spill] sm:$0xff]  ;;  %v16668_v58 = vld [vmem:[#allocation117_spill] sm:$0xff] }
 0x485   : > { %v6355_v25 = vadd.f32 %v6354_v16, %v6128_v30  ;;  %v5785_v36 = vadd.f32 %v5784_v59, %v13375_v13  ;;  %v5822_v54 = vadd.f32 %v5821_v39, %v13380_v57  ;;  %v6392_v47 = vadd.f32 %v6391_v43, %v6129_v15  ;;  %v16663_v13 = vld [vmem:[#allocation113_spill] sm:$0xff]  ;;  %v16664_v57 = vld [vmem:[#allocation140_spill] sm:$0xff]  ;;  %v5584_v39 = vpop.permute.xlu0 %5583  ;;  %v16673_v16 = vld [vmem:[#allocation263_spill] sm:$0xff] }
 0x486   : > { %v5730_v17 = vmul.f32 %v5576_v38, %v16660_v26  ;;  %v5859_v9 = vadd.f32 %v5858_v63, %v13384_v11  ;;  %v5896_v8 = vadd.f32 %v5895_v53, %v13399_v20  ;;  %v6135_v5 = vmul.f32 %v13499_v49, %v16661_v45  ;;  %v16666_v11 = vld [vmem:[#allocation152_spill] sm:$0xff]  ;;  %v16667_v63 = vld [vmem:[#allocation122_spill] sm:$0xff] }
 0x487   : > { %v5786_v12 = vadd.f32 %v5785_v36, %v5727_v7  ;;  %v5823_v3 = vadd.f32 %v5822_v54, %v5728_v48  ;;  %v6136_v4 = vmul.f32 %v13499_v49, %v16662_v23  ;;  %v5731_v33 = vmul.f32 %v5576_v38, %v16663_v13  ;;  %v16672_v10 = vld [vmem:[#allocation304_spill] sm:$0xff]  ;;  %v16674_v43 = vld [vmem:[#allocation266_spill] sm:$0xff]  ;;  %v16675_v7 = vld [vmem:[#allocation279_spill] sm:$0xff] }
 0x488   : > { %v5933_v62 = vadd.f32 %v5932_v31, %v16664_v57  ;;  %v6137_v59 = vmul.f32 %v13499_v49, %v16665_v40  ;;  %v6138_v20 = vmul.f32 %v13499_v49, %v16666_v11  ;;  %v6139_v37 = vmul.f32 %v13499_v49, %v16667_v63  ;;  %v16678_v36 = vld [vmem:[#allocation163_spill] sm:$0xff] }
 0x489   : > { %v6245_v53 = vadd.f32 %v6244_v55, %v16668_v58  ;;  %v6282_v30 = vadd.f32 %v6281_v51, %v16669_v27  ;;  %v6319_v15 = vadd.f32 %v6318_v46, %v16670_v24  ;;  %v5860_v32 = vadd.f32 %v5859_v9, %v5729_v2  ;;  %v16676_v55 = vld [vmem:[#allocation20_spill] sm:$0xff]  ;;  %v13622_v51 = vpop.permute.xlu1 %6036  ;;  %v16683_v57 = vld [vmem:[#allocation291_spill] sm:$0xff]  ;;  %v5592_v40 = vpop.permute.xlu0 %5591 }
 0x48a   : > { %v5897_v38 = vadd.f32 %v5896_v8, %v5730_v17  ;;  %v6356_v14 = vadd.f32 %v6355_v25, %v16671_v28  ;;  %v6393_v35 = vadd.f32 %v6392_v47, %v16672_v10  ;;  %v5737_v42 = vmul.f32 %v5584_v39, %v16673_v16  ;;  %v16677_v46 = vld [vmem:[#allocation144_spill] sm:$0xff]  ;;  %v16679_v47 = vld [vmem:[#allocation23_spill] sm:$0xff]  ;;  %v16680_v17 = vld [vmem:[#allocation193_spill] sm:$0xff] }
 0x48b   : > { %v6246_v21 = vadd.f32 %v6245_v53, %v6135_v5  ;;  %v6283_v22 = vadd.f32 %v6282_v30, %v6136_v4  ;;  %v5738_v44 = vmul.f32 %v5584_v39, %v16674_v43  ;;  %v5743_v49 = vmul.f32 %v13282_v1, %v16675_v7  ;;  %v16681_v8 = vld [vmem:[#allocation192_spill] sm:$0xff]  ;;  %v16682_v5 = vld [vmem:[#allocation283_spill] sm:$0xff]  ;;  %v16688_v53 = vld [vmem:[#allocation169_spill] sm:$0xff] }
 0x48c   : > { %v5744_v61 = vmul.f32 %v13282_v1, %v16676_v55  ;;  %v5934_v48 = vadd.f32 %v5933_v62, %v5731_v33  ;;  %v6320_v31 = vadd.f32 %v6319_v15, %v6137_v59  ;;  %v6357_v29 = vadd.f32 %v6356_v14, %v6138_v20  ;;  %v16685_v59 = vld [vmem:[#allocation51_spill] sm:$0xff]  ;;  %v16686_v20 = vld [vmem:[#allocation156_spill] sm:$0xff]  ;;  %v16689_v30 = vld [vmem:[#allocation306_spill] sm:$0xff] }
 0x48d   : > { %v6394_v2 = vadd.f32 %v6393_v35, %v6139_v37  ;;  %v5787_v25 = vadd.f32 %v5786_v12, %v16677_v46  ;;  %v5824_v54 = vadd.f32 %v5823_v3, %v16678_v36  ;;  %v5739_v26 = vmul.f32 %v5584_v39, %v16679_v47  ;;  %v16684_v12 = vld [vmem:[#allocation243_spill] sm:$0xff]  ;;  %v16693_v35 = vld [vmem:[#allocation282_spill] sm:$0xff] }
 0x48e   : > { %v5740_v9 = vmul.f32 %v5584_v39, %v16680_v17  ;;  %v5861_v45 = vadd.f32 %v5860_v32, %v16681_v8  ;;  %v6145_v23 = vmul.f32 %v13527_v34, %v16682_v5  ;;  %v5898_v33 = vadd.f32 %v5897_v38, %v13523_v19  ;;  %v16687_v37 = vld [vmem:[#allocation103_spill] sm:$0xff]  ;;  %v16691_v32 = vld [vmem:[#allocation308_spill] sm:$0xff] }
 0x48f   : > { %v5788_v4 = vadd.f32 %v5787_v25, %v5737_v42  ;;  %v5825_v13 = vadd.f32 %v5824_v54, %v5738_v44  ;;  %v6146_v62 = vmul.f32 %v13527_v34, %v16683_v57  ;;  %v6147_v3 = vmul.f32 %v13527_v34, %v16684_v12  ;;  %v16690_v19 = vld [vmem:[#allocation307_spill] sm:$0xff]  ;;  %v16694_v42 = vld [vmem:[#allocation225_spill] sm:$0xff]  ;;  %v13649_v44 = vpop.permute.xlu1 %6044  ;;  %v16697_v5 = vld [vmem:[#allocation124_spill] sm:$0xff] }
 0x490   : > { %v6148_v11 = vmul.f32 %v13527_v34, %v16685_v59  ;;  %v6149_v63 = vmul.f32 %v13527_v34, %v16686_v20  ;;  %v6247_v58 = vadd.f32 %v6246_v21, %v16687_v37  ;;  %v6284_v27 = vadd.f32 %v6283_v22, %v16688_v53  ;;  %v16692_v28 = vld [vmem:[#allocation19_spill] sm:$0xff]  ;;  %v16696_v25 = vld [vmem:[#allocation97_spill] sm:$0xff]  ;;  %v16704_v59 = vld [vmem:[#allocation312_spill] sm:$0xff] }
 0x491   : > { %v6321_v24 = vadd.f32 %v6320_v31, %v16689_v30  ;;  %v6358_v15 = vadd.f32 %v6357_v29, %v16690_v19  ;;  %v6395_v38 = vadd.f32 %v6394_v2, %v16691_v32  ;;  %v5745_v14 = vmul.f32 %v13282_v1, %v16692_v28  ;;  %v16695_v34 = vld [vmem:[#allocation131_spill] sm:$0xff]  ;;  %v16705_v20 = vld [vmem:[#allocation313_spill] sm:$0xff] }
 0x492   : > { %v6248_v10 = vadd.f32 %v6247_v58, %v6145_v23  ;;  %v5747_v16 = vmul.f32 %v5592_v40, %v16693_v35  ;;  %v5748_v43 = vmul.f32 %v5592_v40, %v16694_v42  ;;  %v5741_v21 = vmul.f32 %v5584_v39, %v16695_v34  ;;  %v16703_v12 = vld [vmem:[#allocation27_spill] sm:$0xff]  ;;  %v16706_v58 = vld [vmem:[#allocation102_spill] sm:$0xff] }
 0x493   : > { %v5862_v46 = vadd.f32 %v5861_v45, %v5739_v26  ;;  %v5935_v22 = vadd.f32 %v5934_v48, %v13583_v6  ;;  %v6285_v31 = vadd.f32 %v6284_v27, %v6146_v62  ;;  %v5746_v29 = vmul.f32 %v13282_v1, %v16696_v25  ;;  %v16698_v26 = vld [vmem:[#allocation127_spill] sm:$0xff]  ;;  %v16699_v48 = vld [vmem:[#allocation90_spill] sm:$0xff]  ;;  %v16700_v62 = vld [vmem:[#allocation32_spill] sm:$0xff]  ;;  %v13674_v37 = vpop.permute.xlu1 %6052 }
 0x494   : > { %v6322_v2 = vadd.f32 %v6321_v24, %v6147_v3  ;;  %v5789_v36 = vadd.f32 %v5788_v4, %v13589_v60  ;;  %v5826_v54 = vadd.f32 %v5825_v13, %v5743_v49  ;;  %v5899_v47 = vadd.f32 %v5898_v33, %v5740_v9  ;;  %v16701_v9 = vld [vmem:[#allocation259_spill] sm:$0xff]  ;;  %v16702_v13 = vld [vmem:[#allocation77_spill] sm:$0xff]  ;;  %v16708_v24 = vld [vmem:[#allocation314_spill] sm:$0xff] }
 0x495   : > { %v6359_v17 = vadd.f32 %v6358_v15, %v6148_v11  ;;  %v6396_v8 = vadd.f32 %v6395_v38, %v6149_v63  ;;  %v6155_v23 = vmul.f32 %v13550_v50, %v16697_v5  ;;  %v6156_v6 = vmul.f32 %v13550_v50, %v16698_v26  ;;  %v16707_v27 = vld [vmem:[#allocation45_spill] sm:$0xff]  ;;  %v16709_v19 = vld [vmem:[#allocation315_spill] sm:$0xff] }
 0x496   : > { %v13658_v57 = vadd.f32 %v5789_v36, %v5747_v16  ;;  %v13660_v39 = vadd.f32 %v5826_v54, %v5748_v43  ;;  %v6157_v1 = vmul.f32 %v13550_v50, %v16699_v48  ;;  %v5936_v45 = vadd.f32 %v5935_v22, %v5741_v21  ;;  %v16713_v54 = vld [vmem:[#allocation130_spill] sm:$0xff]  ;;  %v16717_v26 = vld [vmem:[#allocation317_spill] sm:$0xff] }
 0x497   : > { %v5749_v60 = vmul.f32 %v5592_v40, %v16700_v62  ;;  %v5863_v49 = vadd.f32 %v5862_v46, %v5744_v61  ;;  %v6158_v4 = vmul.f32 %v13550_v50, %v16701_v9  ;;  %v6159_v33 = vmul.f32 %v13550_v50, %v16702_v13  ;;  %v16710_v46 = vld [vmem:[#allocation149_spill] sm:$0xff]  ;;  %v16718_v48 = vld [vmem:[#allocation318_spill] sm:$0xff] }
 0x498   : > { %v6249_v3 = vadd.f32 %v6248_v10, %v16703_v12  ;;  %v6286_v11 = vadd.f32 %v6285_v31, %v16704_v59  ;;  %v6323_v63 = vadd.f32 %v6322_v2, %v16705_v20  ;;  %v5750_v53 = vmul.f32 %v5592_v40, %v16706_v58  ;;  %v16711_v31 = vld [vmem:[#allocation150_spill] sm:$0xff]  ;;  %v16722_v59 = vld [vmem:[#allocation24_spill] sm:$0xff] }
 0x499   : > { %v5751_v30 = vmul.f32 %v5592_v40, %v16707_v27  ;;  %v6360_v61 = vadd.f32 %v6359_v17, %v16708_v24  ;;  %v6397_v15 = vadd.f32 %v6396_v8, %v16709_v19  ;;  %v5900_v32 = vadd.f32 %v5899_v47, %v5745_v14  ;;  %v16712_v40 = vld [vmem:[#allocation22_spill] sm:$0xff]  ;;  %v16714_v47 = vld [vmem:[#allocation157_spill] sm:$0xff]  ;;  %v16715_v8 = vld [vmem:[#allocation36_spill] sm:$0xff] }
 0x49a   : > { %v6250_v38 = vadd.f32 %v6249_v3, %v6155_v23  ;;  %v6287_v16 = vadd.f32 %v6286_v11, %v6156_v6  ;;  %v6324_v50 = vadd.f32 %v6323_v63, %v6157_v1  ;;  %v13680_v43 = vadd.f32 %v5863_v49, %v5749_v60  ;;  %v16720_v49 = vld [vmem:[#allocation179_spill] sm:$0xff]  ;;  %v16723_v24 = vld [vmem:[#allocation290_spill] sm:$0xff]  ;;  %v16724_v19 = vld [vmem:[#allocation49_spill] sm:$0xff] }
 0x49b   : > { %v5937_v10 = vadd.f32 %v5936_v45, %v5746_v29  ;;  %v6361_v34 = vadd.f32 %v6360_v61, %v6158_v4  ;;  %v6398_v21 = vadd.f32 %v6397_v15, %v6159_v33  ;;  %v6165_v22 = vmul.f32 %v13570_v0, %v16710_v46  ;;  %v16716_v29 = vld [vmem:[#allocation316_spill] sm:$0xff]  ;;  %v16719_v45 = vld [vmem:[#allocation319_spill] sm:$0xff]  ;;  %v16721_v4 = vld [vmem:[#allocation182_spill] sm:$0xff]  ;;  %v13701_v33 = vpop.permute.xlu1 %6060 }
 0x49c   : > { %v6166_v2 = vmul.f32 %v13570_v0, %v16711_v31  ;;  %v6167_v36 = vmul.f32 %v13570_v0, %v16712_v40  ;;  %v6168_v14 = vmul.f32 %v13570_v0, %v16713_v54  ;;  %v6169_v17 = vmul.f32 %v13570_v0, %v16714_v47  ;;  %v16727_v46 = vld [vmem:[#allocation324_spill] sm:$0xff]  ;;  %v16728_v31 = vld [vmem:[#allocation325_spill] sm:$0xff]  ;;  %v16729_v40 = vld [vmem:[#allocation326_spill] sm:$0xff] }
 0x49d   : > { %v6251_v5 = vadd.f32 %v6250_v38, %v16715_v8  ;;  %v6288_v23 = vadd.f32 %v6287_v16, %v16716_v29  ;;  %v6325_v6 = vadd.f32 %v6324_v50, %v16717_v26  ;;  %v6362_v1 = vadd.f32 %v6361_v34, %v16718_v48  ;;  %v16725_v16 = vld [vmem:[#allocation322_spill] sm:$0xff]  ;;  %v16726_v34 = vld [vmem:[#allocation323_spill] sm:$0xff]  ;;  %v16730_v54 = vld [vmem:[#allocation205_spill] sm:$0xff] }
 0x49e   : > { %v6399_v60 = vadd.f32 %v6398_v21, %v16719_v45  ;;  %v6175_v9 = vmul.f32 %v13597_v56, %v16720_v49  ;;  %v6176_v13 = vmul.f32 %v13597_v56, %v16721_v4  ;;  %v6177_v11 = vmul.f32 %v13597_v56, %v16722_v59  ;;  %v16731_v47 = vld [vmem:[#allocation215_spill] sm:$0xff]  ;;  %v16733_v26 = vld [vmem:[#allocation76_spill] sm:$0xff]  ;;  %v16734_v48 = vld [vmem:[#allocation13_spill] sm:$0xff] }
 0x49f   : > { %v6252_v12 = vadd.f32 %v6251_v5, %v6165_v22  ;;  %v6289_v0 = vadd.f32 %v6288_v23, %v6166_v2  ;;  %v6326_v3 = vadd.f32 %v6325_v6, %v6167_v36  ;;  %v6363_v20 = vadd.f32 %v6362_v1, %v6168_v14  ;;  %v13726_v45 = vpop.permute.xlu1 %6064  ;;  %v16735_v49 = vld [vmem:[#allocation329_spill] sm:$0xff]  ;;  %v16738_v59 = vld [vmem:[#allocation332_spill] sm:$0xff] }
 0x4a0   : > { %v6400_v63 = vadd.f32 %v6399_v60, %v6169_v17  ;;  %v6178_v61 = vmul.f32 %v13597_v56, %v16723_v24  ;;  %v6179_v15 = vmul.f32 %v13597_v56, %v16724_v19  ;;  %v13709_v38 = vadd.f32 %v5900_v32, %v5750_v53  ;;  %v16732_v32 = vld [vmem:[#allocation57_spill] sm:$0xff]  ;;  %v16740_v24 = vld [vmem:[#allocation227_spill] sm:$0xff] }
 0x4a1   : > { %v6253_v50 = vadd.f32 %v6252_v12, %v16725_v16  ;;  %v6290_v21 = vadd.f32 %v6289_v0, %v16726_v34  ;;  %v6327_v22 = vadd.f32 %v6326_v3, %v16727_v46  ;;  %v6364_v2 = vadd.f32 %v6363_v20, %v16728_v31  ;;  %v16737_v12 = vld [vmem:[#allocation331_spill] sm:$0xff]  ;;  %v13733_v3 = vpop.permute.xlu0 %6068  ;;  %v16739_v20 = vld [vmem:[#allocation333_spill] sm:$0xff]  ;;  %v16742_v16 = vld [vmem:[#allocation158_spill] sm:$0xff] }
 0x4a2   : > { %v6401_v36 = vadd.f32 %v6400_v63, %v16729_v40  ;;  %v6185_v14 = vmul.f32 %v13622_v51, %v16730_v54  ;;  %v6186_v17 = vmul.f32 %v13622_v51, %v16731_v47  ;;  %v6187_v5 = vmul.f32 %v13622_v51, %v16732_v32  ;;  %v16743_v46 = vld [vmem:[#allocation82_spill] sm:$0xff]  ;;  %v16744_v31 = vld [vmem:[#allocation108_spill] sm:$0xff] }
 0x4a3   : > { %v6254_v8 = vadd.f32 %v6253_v50, %v6175_v9  ;;  %v6291_v56 = vadd.f32 %v6290_v21, %v6176_v13  ;;  %v6328_v53 = vadd.f32 %v6327_v22, %v6177_v11  ;;  %v6365_v29 = vadd.f32 %v6364_v2, %v6178_v61  ;;  %v16736_v9 = vld [vmem:[#allocation330_spill] sm:$0xff]  ;;  %v16745_v40 = vld [vmem:[#allocation292_spill] sm:$0xff] }
 0x4a4   : > { %v6402_v23 = vadd.f32 %v6401_v36, %v6179_v15  ;;  %v6188_v6 = vmul.f32 %v13622_v51, %v16733_v26  ;;  %v6189_v1 = vmul.f32 %v13622_v51, %v16734_v48  ;;  %v13728_v60 = vadd.f32 %v5937_v10, %v5751_v30  ;;  %v16741_v51 = vld [vmem:[#allocation231_spill] sm:$0xff]  ;;  %v16746_v54 = vld [vmem:[#allocation338_spill] sm:$0xff]  ;;  %v5596_v48 = vpop.permute.xlu1 %5595 }
 0x4a5   : > { %v6255_v4 = vadd.f32 %v6254_v8, %v16735_v49  ;;  %v6292_v13 = vadd.f32 %v6291_v56, %v16736_v9  ;;  %v6329_v0 = vadd.f32 %v6328_v53, %v16737_v12  ;;  %v6366_v11 = vadd.f32 %v6365_v29, %v16738_v59  ;;  %v16748_v8 = vld [vmem:[#allocation340_spill] sm:$0xff]  ;;  %v16749_v53 = vld [vmem:[#allocation341_spill] sm:$0xff] }
 0x4a6   : > { %v6403_v63 = vadd.f32 %v6402_v23, %v16739_v20  ;;  %v6195_v61 = vmul.f32 %v13649_v44, %v16740_v24  ;;  %v6196_v19 = vmul.f32 %v13649_v44, %v16741_v51  ;;  %v6197_v50 = vmul.f32 %v13649_v44, %v16742_v16  ;;  %v16751_v23 = vld [vmem:[#allocation252_spill] sm:$0xff]  ;;  %v16753_v9 = vld [vmem:[#allocation5_spill] sm:$0xff]  ;;  %v16754_v20 = vld [vmem:[#allocation167_spill] sm:$0xff] }
 0x4a7   : > { %v6256_v30 = vadd.f32 %v6255_v4, %v6185_v14  ;;  %v6293_v10 = vadd.f32 %v6292_v13, %v6186_v17  ;;  %v6330_v15 = vadd.f32 %v6329_v0, %v6187_v5  ;;  %v6367_v34 = vadd.f32 %v6366_v11, %v6188_v6  ;;  %v16747_v14 = vld [vmem:[#allocation339_spill] sm:$0xff]  ;;  %v16750_v5 = vld [vmem:[#allocation342_spill] sm:$0xff]  ;;  %v16755_v24 = vld [vmem:[#allocation345_spill] sm:$0xff] }
 0x4a8   : > { %v6404_v21 = vadd.f32 %v6403_v63, %v6189_v1  ;;  %v6198_v22 = vmul.f32 %v13649_v44, %v16743_v46  ;;  %v6199_v2 = vmul.f32 %v13649_v44, %v16744_v31  ;;  %v13749_v36 = vmul.f32 %v13733_v3, %v16745_v40  ;;  %v16752_v6 = vld [vmem:[#allocation255_spill] sm:$0xff] }
 0x4a9   : > { %v6257_v47 = vadd.f32 %v6256_v30, %v16746_v54  ;;  %v6294_v17 = vadd.f32 %v6293_v10, %v16747_v14  ;;  %v6331_v56 = vadd.f32 %v6330_v15, %v16748_v8  ;;  %v6368_v32 = vadd.f32 %v6367_v34, %v16749_v53  ;;  %v16757_v30 = vld [vmem:[#allocation347_spill] sm:$0xff]  ;;  %v16758_v15 = vld [vmem:[#allocation348_spill] sm:$0xff]  ;;  %v5600_v14 = vpop.permute.xlu1 %5599  ;;  %v16761_v8 = vld [vmem:[#allocation353_spill] sm:$0xff] }
 0x4aa   : > { %v6405_v29 = vadd.f32 %v6404_v21, %v16750_v5  ;;  %v6205_v26 = vmul.f32 %v13674_v37, %v16751_v23  ;;  %v6206_v44 = vmul.f32 %v13674_v37, %v16752_v6  ;;  %v6207_v13 = vmul.f32 %v13674_v37, %v16753_v9  ;;  %v16763_v5 = vld [vmem:[#allocation175_spill] sm:$0xff] }
 0x4ab   : > { %v6258_v1 = vadd.f32 %v6257_v47, %v6195_v61  ;;  %v6295_v49 = vadd.f32 %v6294_v17, %v6196_v19  ;;  %v6332_v4 = vadd.f32 %v6331_v56, %v6197_v50  ;;  %v6369_v12 = vadd.f32 %v6368_v32, %v6198_v22  ;;  %v16756_v61 = vld [vmem:[#allocation346_spill] sm:$0xff]  ;;  %v16759_v50 = vld [vmem:[#allocation349_spill] sm:$0xff]  ;;  %v16760_v17 = vld [vmem:[#allocation352_spill] sm:$0xff] }
 0x4ac   : > { %v6406_v0 = vadd.f32 %v6405_v29, %v6199_v2  ;;  %v6208_v59 = vmul.f32 %v13674_v37, %v16624_v52  ;;  %v6209_v11 = vmul.f32 %v13674_v37, %v16655_v41  ;;  %v13768_v63 = vmul.f32 %v13733_v3, %v16754_v20  ;;  %v16764_v23 = vld [vmem:[#allocation155_spill] sm:$0xff] }
 0x4ad   : > { %v6259_v51 = vadd.f32 %v6258_v1, %v16755_v24  ;;  %v6296_v19 = vadd.f32 %v6295_v49, %v16756_v61  ;;  %v6333_v10 = vadd.f32 %v6332_v4, %v16757_v30  ;;  %v6370_v16 = vadd.f32 %v6369_v12, %v16758_v15  ;;  %v16765_v1 = vld [vmem:[#allocation58_spill] sm:$0xff] }
 0x4ae   : > { %v6407_v34 = vadd.f32 %v6406_v0, %v16759_v50  ;;  %v6215_v52 = vmul.f32 %v13701_v33, %v16658_v18  ;;  %v6216_v41 = vmul.f32 %v13701_v33, %v16675_v7  ;;  %v6217_v22 = vmul.f32 %v13701_v33, %v16676_v55  ;;  %v16762_v7 = vld [vmem:[#allocation354_spill] sm:$0xff] }
 0x4af   : > { %v6260_v37 = vadd.f32 %v6259_v51, %v6205_v26  ;;  %v6297_v21 = vadd.f32 %v6296_v19, %v6206_v44  ;;  %v6334_v46 = vadd.f32 %v6333_v10, %v6207_v13  ;;  %v6371_v31 = vadd.f32 %v6370_v16, %v6208_v59  ;;  %v16766_v12 = vld [vmem:[#allocation54_spill] sm:$0xff]  ;;  %v16767_v59 = vld [vmem:[#allocation228_spill] sm:$0xff]  ;;  %v6073_v16 = vpop.permute.xlu1 %6072 }
 0x4b0   : > { %v6408_v2 = vadd.f32 %v6407_v34, %v6209_v11  ;;  %v6218_v54 = vmul.f32 %v13701_v33, %v16692_v28  ;;  %v6220_v47 = vmul.f32 %v13726_v45, %v16693_v35  ;;  %v6221_v32 = vmul.f32 %v13726_v45, %v16694_v42 }
 0x4b1   : > { %v6261_v18 = vadd.f32 %v6260_v37, %v16760_v17  ;;  %v6298_v56 = vadd.f32 %v6297_v21, %v16761_v8  ;;  %v6335_v53 = vadd.f32 %v6334_v46, %v16762_v7  ;;  %v6372_v29 = vadd.f32 %v6371_v31, %v16763_v5  ;;  %v16770_v46 = vld [vmem:[#allocation81_spill] sm:$0xff] }
 0x4b2   : > { %v6409_v26 = vadd.f32 %v6408_v2, %v16764_v23  ;;  %v5752_v6 = vmul.f32 %v5596_v48, %v16745_v40  ;;  %v5753_v44 = vmul.f32 %v5596_v48, %v16754_v20  ;;  %v6227_v35 = vmul.f32 %v13733_v3, %v16765_v1  ;;  %v16772_v2 = vld [vmem:[#allocation199_spill] sm:$0xff] }
 0x4b3   : > { %v6262_v49 = vadd.f32 %v6261_v18, %v6215_v52  ;;  %v6299_v4 = vadd.f32 %v6298_v56, %v6216_v41  ;;  %v5754_v9 = vmul.f32 %v5596_v48, %v16765_v1  ;;  %v6219_v13 = vmul.f32 %v13701_v33, %v16696_v25  ;;  %v16769_v41 = vld [vmem:[#allocation138_spill] sm:$0xff] }
 0x4b4   : > { %v6222_v42 = vmul.f32 %v13726_v45, %v16700_v62  ;;  %v5755_v0 = vmul.f32 %v5596_v48, %v16766_v12  ;;  %v5756_v11 = vmul.f32 %v5596_v48, %v16767_v59  ;;  %v6223_v24 = vmul.f32 %v13726_v45, %v16706_v58  ;;  %v16768_v48 = vld [vmem:[#allocation145_spill] sm:$0xff] }
 0x4b5   : > { %v6263_v51 = vadd.f32 %v6262_v49, %v6220_v47  ;;  %v6300_v61 = vadd.f32 %v6299_v4, %v6221_v32  ;;  %v5791_v19 = vadd.f32 %v13658_v57, %v5752_v6  ;;  %v6336_v30 = vadd.f32 %v6335_v53, %v6217_v22  ;;  %v16771_v22 = vld [vmem:[#allocation67_spill] sm:$0xff] }
 0x4b6   : > { %v6373_v10 = vadd.f32 %v6372_v29, %v6218_v54  ;;  %v6224_v15 = vmul.f32 %v13726_v45, %v16707_v27  ;;  %v5828_v33 = vadd.f32 %v13660_v39, %v5753_v44  ;;  %v5865_v50 = vadd.f32 %v13680_v43, %v5754_v9 }
 0x4b7   : > { %v5902_v34 = vadd.f32 %v13709_v38, %v5755_v0  ;;  %v5757_v52 = vmul.f32 %v5600_v14, %v16768_v48  ;;  %v5758_v37 = vmul.f32 %v5600_v14, %v16769_v41  ;;  %v5939_v21 = vadd.f32 %v13728_v60, %v5756_v11 }
 0x4b8   : > { %v5759_v57 = vmul.f32 %v5600_v14, %v16770_v46  ;;  %v5760_v31 = vmul.f32 %v5600_v14, %v16771_v22  ;;  %v5761_v54 = vmul.f32 %v5600_v14, %v16772_v2  ;;  %v6337_v45 = vadd.f32 %v6336_v30, %v6222_v42 }
 0x4b9   : > { %v5792_v47 = vadd.f32 %v5791_v19, %v5757_v52  ;;  %v5829_v39 = vadd.f32 %v5828_v33, %v5758_v37  ;;  %v6230_v17 = vmul.f32 %v6073_v16, %v16768_v48  ;;  %v6231_v8 = vmul.f32 %v6073_v16, %v16769_v41 }
 0x4ba   : > { %v5866_v43 = vadd.f32 %v5865_v50, %v5759_v57  ;;  %v5903_v18 = vadd.f32 %v5902_v34, %v5760_v31  ;;  %v5940_v38 = vadd.f32 %v5939_v21, %v5761_v54  ;;  %v6232_v60 = vmul.f32 %v6073_v16, %v16770_v46  ;;  %v16773_v31 = vld [vmem:[#allocation305_spill] sm:$0xff]  ;;  %v16810_v54 = vld [vmem:[#allocation268_spill] sm:$0xff] }
 0x4bb   : > { %v5793_v56 = vrot.slane %v5792_v47, 4  ;;  %v5830_v7 = vrot.slane %v5829_v39, 4  ;;  %v6264_v53 = vadd.f32 %v6263_v51, %v13749_v36  ;;  %v6301_v14 = vadd.f32 %v6300_v61, %v13768_v63 }
 0x4bc   : > { %v5867_v32 = vrot.slane %v5866_v43, 4  ;;  %v5904_v5 = vrot.slane %v5903_v18, 4  ;;  %v5941_v29 = vrot.slane %v5940_v38, 4  ;;  %v6410_v23 = vadd.f32 %v6409_v26, %v6219_v13 }
 0x4bd   : > { %v6374_v6 = vadd.f32 %v6373_v10, %v6223_v24  ;;  %v6265_v44 = vadd.f32 %v6264_v53, %v6230_v17  ;;  %v6338_v49 = vadd.f32 %v6337_v45, %v6227_v35  ;;  %v5794_v4 = vadd.f32 %v5793_v56, %v5792_v47  ;;  %v16804_v56 = vld [vmem:[#allocation260_spill] sm:$0xff] }
 0x4be   : > { %v5831_v9 = vadd.f32 %v5830_v7, %v5829_v39  ;;  %v5868_v42 = vadd.f32 %v5867_v32, %v5866_v43  ;;  %v6302_v0 = vadd.f32 %v6301_v14, %v6231_v8  ;;  %v6411_v11 = vadd.f32 %v6410_v23, %v6224_v15 }
 0x4bf   : > { %v5905_v19 = vadd.f32 %v5904_v5, %v5903_v18  ;;  %v6266_v30 = vrot.slane %v6265_v44, 4  ;;  %v6339_v33 = vadd.f32 %v6338_v49, %v6232_v60  ;;  %v6228_v36 = vmul.f32 %v13733_v3, %v16766_v12  ;;  %v16779_v49 = vld [vmem:[#allocation68_spill] sm:$0xff]  ;;  %v16809_v18 = vld [vmem:[#allocation229_spill] sm:$0xff] }
 0x4c0   : > { %v6229_v51 = vmul.f32 %v13733_v3, %v16767_v59  ;;  %v5942_v50 = vadd.f32 %v5941_v29, %v5940_v38  ;;  %v6303_v63 = vrot.slane %v6302_v0, 4  ;;  %v6233_v26 = vmul.f32 %v6073_v16, %v16771_v22 }
 0x4c1   : > { %v6234_v35 = vmul.f32 %v6073_v16, %v16772_v2  ;;  %v6267_v13 = vadd.f32 %v6266_v30, %v6265_v44  ;;  %v6340_v24 = vrot.slane %v6339_v33, 4  ;;  %v5795_v61 = vrot.slane %v5794_v4, 2  ;;  %v16782_v30 = vld [vmem:[#allocation222_spill] sm:$0xff] }
 0x4c2   : > { %v5832_v10 = vrot.slane %v5831_v9, 2  ;;  %v5869_v15 = vrot.slane %v5868_v42, 2  ;;  %v6304_v34 = vadd.f32 %v6303_v63, %v6302_v0  ;;  %v5906_v52 = vrot.slane %v5905_v19, 2  ;;  %v16785_v63 = vld [vmem:[#allocation74_spill] sm:$0xff] }
 0x4c3   : > { %v6341_v37 = vadd.f32 %v6340_v24, %v6339_v33  ;;  %v6375_v21 = vadd.f32 %v6374_v6, %v6228_v36  ;;  %v6412_v57 = vadd.f32 %v6411_v11, %v6229_v51  ;;  %v5943_v45 = vrot.slane %v5942_v50, 2  ;;  %v16781_v11 = vld [vmem:[#allocation160_spill] sm:$0xff]  ;;  %v16783_v33 = vld [vmem:[#allocation187_spill] sm:$0xff] }
 0x4c4   : > { %v6268_v3 = vrot.slane %v6267_v13, 2  ;;  %v6305_v47 = vrot.slane %v6304_v34, 2  ;;  %v13832_v7 = vadd.f32 %v5795_v61, %v5794_v4  ;;  %v13834_v60 = vadd.f32 %v5832_v10, %v5831_v9  ;;  %v16788_v61 = vld [vmem:[#allocation33_spill] sm:$0xff] }
 0x4c5   : > { %v6376_v16 = vadd.f32 %v6375_v21, %v6233_v26  ;;  %v6413_v38 = vadd.f32 %v6412_v57, %v6234_v35  ;;  %v13836_v53 = vadd.f32 %v5869_v15, %v5868_v42  ;;  %v13838_v32 = vadd.f32 %v5906_v52, %v5905_v19  ;;  %v16780_v42 = vld [vmem:[#allocation212_spill] sm:$0xff]  ;;  %v16786_v35 = vld [vmem:[#allocation101_spill] sm:$0xff]  ;;  %v16791_v21 = vld [vmem:[#allocation226_spill] sm:$0xff] }
 0x4c6   : > { %v6342_v5 = vrot.slane %v6341_v37, 2  ;;  %v13840_v23 = vadd.f32 %v5943_v45, %v5942_v50  ;;  %v13842_v6 = vadd.f32 %v6268_v3, %v6267_v13  ;;  %v13844_v44 = vadd.f32 %v6305_v47, %v6304_v34  ;;  %v16784_v50 = vld [vmem:[#allocation64_spill] sm:$0xff]  ;;  %v16787_v13 = vld [vmem:[#allocation31_spill] sm:$0xff]  ;;  %v16789_v10 = vld [vmem:[#allocation41_spill] sm:$0xff] }
 0x4c7   : > { %v6377_v29 = vrot.slane %v6376_v16, 4  ;;  %v6414_v14 = vrot.slane %v6413_v38, 4  ;;  %v2921_v0 = vmul.f32 %v16779_v49, %v16770_v46  ;;  %v2922_v4 = vmul.f32 %v16779_v49, %v16771_v22  ;;  %v16792_v45 = vld [vmem:[#allocation230_spill] sm:$0xff] }
 0x4c8   : > { %16777 = vst [vmem:[#allocation206_spill] sm:$0xff] %v13842_v6  ;;  %16778 = vst [vmem:[#allocation320_spill] sm:$0xff] %v13844_v44  ;;  %v2923_v9 = vmul.f32 %v16779_v49, %v16772_v2  ;;  %v2945_v19 = vadd.f32 %v16781_v11, %v16780_v42  ;;  %v2982_v36 = vadd.f32 %v16783_v33, %v16782_v30  ;;  %v16794_v42 = vld [vmem:[#allocation208_spill] sm:$0xff]  ;;  %v16795_v30 = vld [vmem:[#allocation153_spill] sm:$0xff] }
 0x4c9   : > { %v6378_v51 = vadd.f32 %v6377_v29, %v6376_v16  ;;  %v3026_v26 = vadd.f32 %v16785_v63, %v16784_v50  ;;  %v3063_v24 = vadd.f32 %v16787_v13, %v16786_v35  ;;  %v3100_v15 = vadd.f32 %v16789_v10, %v16788_v61  ;;  %v16793_v16 = vld [vmem:[#allocation96_spill] sm:$0xff]  ;;  %v16799_v10 = vld [vmem:[#allocation247_spill] sm:$0xff] }
 0x4ca   : > { %v13862_v34 = vadd.f32 %v6342_v5, %v6341_v37  ;;  %v6415_v52 = vadd.f32 %v6414_v14, %v6413_v38  ;;  %v2946_v57 = vadd.f32 %v2945_v19, %v16791_v21  ;;  %v2983_v3 = vadd.f32 %v2982_v36, %v16792_v45  ;;  %v16796_v63 = vld [vmem:[#allocation236_spill] sm:$0xff]  ;;  %v16797_v5 = vld [vmem:[#allocation239_spill] sm:$0xff]  ;;  %v16798_v14 = vld [vmem:[#allocation106_spill] sm:$0xff] }
 0x4cb   : > { %v2919_v47 = vmul.f32 %v16779_v49, %v16768_v48  ;;  %v3027_v29 = vadd.f32 %v3026_v26, %v16793_v16  ;;  %v3064_v11 = vadd.f32 %v3063_v24, %v16794_v42  ;;  %v3101_v33 = vadd.f32 %v3100_v15, %v16795_v30  ;;  %v16800_v21 = vld [vmem:[#allocation84_spill] sm:$0xff]  ;;  %v16802_v42 = vld [vmem:[#allocation177_spill] sm:$0xff] }
 0x4cc   : > { %16790 = vst [vmem:[#allocation321_spill] sm:$0xff] %v13862_v34  ;;  %v2920_v50 = vmul.f32 %v16779_v49, %v16769_v41  ;;  %v2947_v37 = vadd.f32 %v2946_v57, %v16796_v63  ;;  %v2984_v38 = vadd.f32 %v2983_v3, %v16797_v5  ;;  %v13877_v19 = vmul.f32 %v16798_v14, %v16768_v48  ;;  %v16801_v3 = vld [vmem:[#allocation214_spill] sm:$0xff]  ;;  %v16803_v63 = vld [vmem:[#allocation257_spill] sm:$0xff]  ;;  %v16811_v44 = vld [vmem:[#allocation272_spill] sm:$0xff] }
 0x4cd   : > { %v6379_v36 = vrot.slane %v6378_v51, 2  ;;  %v3028_v35 = vadd.f32 %v3027_v29, %v2921_v0  ;;  %v3065_v13 = vadd.f32 %v3064_v11, %v2922_v4  ;;  %v3102_v61 = vadd.f32 %v3101_v33, %v2923_v9  ;;  %v16805_v4 = vld [vmem:[#allocation223_spill] sm:$0xff]  ;;  %v16806_v9 = vld [vmem:[#allocation188_spill] sm:$0xff]  ;;  %v16807_v11 = vld [vmem:[#allocation197_spill] sm:$0xff] }
 0x4ce   : > { %v6416_v26 = vrot.slane %v6415_v52, 2  ;;  %v2948_v24 = vadd.f32 %v2947_v37, %v16799_v10  ;;  %v2985_v15 = vadd.f32 %v2984_v38, %v16800_v21  ;;  %v3394_v49 = vmul.f32 %v16798_v14, %v16770_v46  ;;  %v16808_v33 = vld [vmem:[#allocation79_spill] sm:$0xff] }
 0x4cf   : > { %v3029_v45 = vrot.slane %v3028_v35, 4  ;;  %v3066_v57 = vrot.slane %v3065_v13, 4  ;;  %v3103_v16 = vrot.slane %v3102_v61, 4  ;;  %v3418_v30 = vadd.f32 %v16802_v42, %v16801_v3  ;;  %v16812_v3 = vld [vmem:[#allocation233_spill] sm:$0xff] }
 0x4d0   : > { %v2949_v5 = vadd.f32 %v2948_v24, %v16803_v63  ;;  %v2986_v0 = vadd.f32 %v2985_v15, %v16804_v56  ;;  %v3455_v29 = vadd.f32 %v16806_v9, %v16805_v4  ;;  %v3499_v37 = vadd.f32 %v16808_v33, %v16807_v11  ;;  %v16813_v24 = vld [vmem:[#allocation66_spill] sm:$0xff]  ;;  %v16814_v9 = vld [vmem:[#allocation237_spill] sm:$0xff] }
 0x4d1   : > { %v3030_v38 = vadd.f32 %v3029_v45, %v3028_v35  ;;  %v3067_v10 = vadd.f32 %v3066_v57, %v3065_v13  ;;  %v3104_v21 = vadd.f32 %v3103_v16, %v3102_v61  ;;  %v3419_v17 = vadd.f32 %v3418_v30, %v16809_v18  ;;  %v16815_v35 = vld [vmem:[#allocation276_spill] sm:$0xff] }
 0x4d2   : > { %v2950_v34 = vadd.f32 %v2949_v5, %v16810_v54  ;;  %v2987_v6 = vadd.f32 %v2986_v0, %v16811_v44  ;;  %v3456_v42 = vadd.f32 %v3455_v29, %v16812_v3  ;;  %v3500_v63 = vadd.f32 %v3499_v37, %v16813_v24  ;;  %v16816_v61 = vld [vmem:[#allocation136_spill] sm:$0xff]  ;;  %v16819_v5 = vld [vmem:[#allocation250_spill] sm:$0xff]  ;;  %v16821_v37 = vld [vmem:[#allocation295_spill] sm:$0xff] }
 0x4d3   : > { %v3031_v56 = vrot.slane %v3030_v38, 2  ;;  %v3068_v15 = vrot.slane %v3067_v10, 2  ;;  %v3393_v4 = vmul.f32 %v16798_v14, %v16769_v41  ;;  %v3420_v11 = vadd.f32 %v3419_v17, %v16814_v9  ;;  %v16817_v18 = vld [vmem:[#allocation240_spill] sm:$0xff]  ;;  %v16822_v24 = vld [vmem:[#allocation254_spill] sm:$0xff] }
 0x4d4   : > { %v2951_v13 = vadd.f32 %v2950_v34, %v16815_v35  ;;  %v2988_v45 = vadd.f32 %v2987_v6, %v16816_v61  ;;  %v3457_v57 = vadd.f32 %v3456_v42, %v16817_v18  ;;  %v3501_v54 = vadd.f32 %v3500_v63, %v3394_v49  ;;  %v16820_v29 = vld [vmem:[#allocation288_spill] sm:$0xff]  ;;  %v16824_v49 = vld [vmem:[#allocation87_spill] sm:$0xff]  ;;  %v16829_v18 = vld [vmem:[#allocation273_spill] sm:$0xff] }
 0x4d5   : > { %v13902_v16 = vadd.f32 %v6379_v36, %v6378_v51  ;;  %v3032_v44 = vadd.f32 %v3031_v56, %v3030_v38  ;;  %v3105_v30 = vrot.slane %v3104_v21, 2  ;;  %v3421_v0 = vadd.f32 %v3420_v11, %v16819_v5  ;;  %v16825_v36 = vld [vmem:[#allocation132_spill] sm:$0xff]  ;;  %v16827_v56 = vld [vmem:[#allocation261_spill] sm:$0xff] }
 0x4d6   : > { %v2952_v33 = vadd.f32 %v2951_v13, %v16820_v29  ;;  %v2989_v3 = vadd.f32 %v2988_v45, %v16821_v37  ;;  %v3458_v8 = vadd.f32 %v3457_v57, %v16822_v24  ;;  %v3502_v17 = vrot.slane %v3501_v54, 4  ;;  %v16826_v42 = vld [vmem:[#allocation172_spill] sm:$0xff]  ;;  %v16830_v29 = vld [vmem:[#allocation278_spill] sm:$0xff] }
 0x4d7   : > { %16818 = vst [vmem:[#allocation235_spill] sm:$0xff] %v13902_v16  ;;  %v13908_v9 = vadd.f32 %v6416_v26, %v6415_v52  ;;  %v3069_v34 = vadd.f32 %v3068_v15, %v3067_v10  ;;  %v3395_v6 = vmul.f32 %v16798_v14, %v16771_v22  ;;  %v3422_v51 = vadd.f32 %v3421_v0, %v16824_v49  ;;  %v16828_v52 = vld [vmem:[#allocation269_spill] sm:$0xff]  ;;  %v16831_v37 = vld [vmem:[#allocation8_spill] sm:$0xff]  ;;  %v16888_v16 = vld [vmem:[#allocation211_spill] sm:$0xff] }
 0x4d8   : > { %v2953_v38 = vadd.f32 %v2952_v33, %v16825_v36  ;;  %v2990_v63 = vadd.f32 %v2989_v3, %v16826_v42  ;;  %v3459_v11 = vadd.f32 %v3458_v8, %v16827_v56  ;;  %v3503_v35 = vadd.f32 %v3502_v17, %v3501_v54  ;;  %v16832_v3 = vld [vmem:[#allocation281_spill] sm:$0xff]  ;;  %v16834_v54 = vld [vmem:[#allocation94_spill] sm:$0xff]  ;;  %v16835_v49 = vld [vmem:[#allocation284_spill] sm:$0xff] }
 0x4d9   : > { %16823 = vst [vmem:[#allocation238_spill] sm:$0xff] %v13908_v9  ;;  %v3033_v13 = vrot.slane %v3032_v44, 1  ;;  %v3106_v61 = vadd.f32 %v3105_v30, %v3104_v21  ;;  %v3396_v45 = vmul.f32 %v16798_v14, %v16772_v2  ;;  %v3423_v26 = vadd.f32 %v3422_v51, %v16828_v52  ;;  %v16833_v8 = vld [vmem:[#allocation53_spill] sm:$0xff] }
 0x4da   : > { %v2954_v10 = vadd.f32 %v2953_v38, %v2919_v47  ;;  %v2991_v15 = vadd.f32 %v2990_v63, %v2920_v50  ;;  %v3460_v57 = vadd.f32 %v3459_v11, %v16829_v18  ;;  %v3504_v5 = vrot.slane %v3503_v35, 2  ;;  %v16836_v47 = vld [vmem:[#allocation147_spill] sm:$0xff]  ;;  %v16838_v63 = vld [vmem:[#allocation104_spill] sm:$0xff] }
 0x4db   : > { %v3070_v0 = vrot.slane %v3069_v34, 1  ;;  %v3424_v33 = vadd.f32 %v3423_v26, %v16830_v29  ;;  %v3536_v24 = vadd.f32 %v16832_v3, %v16831_v37  ;;  %v3573_v17 = vadd.f32 %v16834_v54, %v16833_v8  ;;  %v16837_v38 = vld [vmem:[#allocation35_spill] sm:$0xff]  ;;  %v16840_v18 = vld [vmem:[#allocation296_spill] sm:$0xff]  ;;  %v16842_v3 = vld [vmem:[#allocation134_spill] sm:$0xff] }
 0x4dc   : > { %v2955_v21 = vrot.slane %v2954_v10, 4  ;;  %v2992_v30 = vrot.slane %v2991_v15, 4  ;;  %v3461_v14 = vadd.f32 %v3460_v57, %v16835_v49  ;;  %v3505_v36 = vadd.f32 %v3504_v5, %v3503_v35  ;;  %v16843_v49 = vld [vmem:[#allocation297_spill] sm:$0xff] }
 0x4dd   : > { %v3107_v51 = vrot.slane %v3106_v61, 1  ;;  %v3425_v50 = vadd.f32 %v3424_v33, %v16836_v47  ;;  %v3537_v42 = vadd.f32 %v3536_v24, %v16837_v38  ;;  %v3574_v56 = vadd.f32 %v3573_v17, %v16838_v63 }
 0x4de   : > { %v2956_v11 = vadd.f32 %v2955_v21, %v2954_v10  ;;  %v2993_v52 = vadd.f32 %v2992_v30, %v2991_v15  ;;  %v13929_v26 = vadd.f32 %v3033_v13, %v3032_v44  ;;  %v3462_v29 = vadd.f32 %v3461_v14, %v16840_v18 }
 0x4df   : > { %v13932_v37 = vadd.f32 %v3070_v0, %v3069_v34  ;;  %v3426_v8 = vadd.f32 %v3425_v50, %v16842_v3  ;;  %v3538_v54 = vadd.f32 %v3537_v42, %v3395_v6  ;;  %v3575_v57 = vadd.f32 %v3574_v56, %v3396_v45  ;;  %v16845_v34 = vld [vmem:[#allocation242_spill] sm:$0xff] }
 0x4e0   : > { %16839 = vst [vmem:[#allocation42_spill] sm:$0xff] %v13929_v26  ;;  %v2957_v35 = vrot.slane %v2956_v11, 2  ;;  %v2994_v5 = vrot.slane %v2993_v52, 2  ;;  %v3463_v33 = vadd.f32 %v3462_v29, %v16843_v49  ;;  %v3506_v47 = vrot.slane %v3505_v36, 1  ;;  %v16851_v49 = vld [vmem:[#allocation6_spill] sm:$0xff] }
 0x4e1   : > { %16841 = vst [vmem:[#allocation12_spill] sm:$0xff] %v13932_v37  ;;  %v13936_v24 = vadd.f32 %v3107_v51, %v3106_v61  ;;  %v3427_v10 = vadd.f32 %v3426_v8, %v13877_v19  ;;  %v3539_v15 = vrot.slane %v3538_v54, 4  ;;  %v3576_v44 = vrot.slane %v3575_v57, 4  ;;  %v16858_v37 = vld [vmem:[#allocation234_spill] sm:$0xff] }
 0x4e2   : > { %v2958_v13 = vadd.f32 %v2957_v35, %v2956_v11  ;;  %v2995_v17 = vadd.f32 %v2994_v5, %v2993_v52  ;;  %v3464_v21 = vadd.f32 %v3463_v33, %v3393_v4  ;;  %v13941_v0 = vmul.f32 %v16845_v34, %v16745_v40  ;;  %v16850_v5 = vld [vmem:[#allocation128_spill] sm:$0xff]  ;;  %v16882_v26 = vld [vmem:[#allocation170_spill] sm:$0xff] }
 0x4e3   : > { %16844 = vst [vmem:[#allocation11_spill] sm:$0xff] %v13936_v24  ;;  %v3428_v6 = vrot.slane %v3427_v10, 4  ;;  %v3540_v45 = vadd.f32 %v3539_v15, %v3538_v54  ;;  %v3577_v30 = vadd.f32 %v3576_v44, %v3575_v57  ;;  %v13945_v14 = vmul.f32 %v16845_v34, %v16754_v20  ;;  %v16847_v20 = vld [vmem:[#allocation221_spill] sm:$0xff] }
 0x4e4   : > { %v3465_v61 = vrot.slane %v3464_v21, 4  ;;  %v13947_v51 = vadd.f32 %v3506_v47, %v3505_v36  ;;  %v3862_v19 = vmul.f32 %v16845_v34, %v16765_v1  ;;  %v3863_v4 = vmul.f32 %v16845_v34, %v16766_v12  ;;  %v16848_v54 = vld [vmem:[#allocation217_spill] sm:$0xff]  ;;  %v16852_v47 = vld [vmem:[#allocation200_spill] sm:$0xff] }
 0x4e5   : > { %v2959_v50 = vrot.slane %v2958_v13, 1  ;;  %v3429_v38 = vadd.f32 %v3428_v6, %v3427_v10  ;;  %v3541_v40 = vrot.slane %v3540_v45, 2  ;;  %v3578_v42 = vrot.slane %v3577_v30, 2  ;;  %v16849_v57 = vld [vmem:[#allocation173_spill] sm:$0xff] }
 0x4e6   : > { %16846 = vst [vmem:[#allocation327_spill] sm:$0xff] %v13947_v51  ;;  %v2996_v63 = vrot.slane %v2995_v17, 1  ;;  %v3466_v56 = vadd.f32 %v3465_v61, %v3464_v21  ;;  %v3864_v11 = vmul.f32 %v16845_v34, %v16767_v59  ;;  %v13957_v52 = vmul.f32 %v16847_v20, %v16768_v48  ;;  %v16853_v10 = vld [vmem:[#allocation29_spill] sm:$0xff] }
 0x4e7   : > { %v3430_v36 = vrot.slane %v3429_v38, 2  ;;  %v3542_v18 = vadd.f32 %v3541_v40, %v3540_v45  ;;  %v13961_v29 = vmul.f32 %v16847_v20, %v16769_v41  ;;  %v3867_v3 = vmul.f32 %v16847_v20, %v16770_v46  ;;  %v16855_v41 = vld [vmem:[#allocation63_spill] sm:$0xff]  ;;  %v16856_v34 = vld [vmem:[#allocation37_spill] sm:$0xff] }
 0x4e8   : > { %v3467_v8 = vrot.slane %v3466_v56, 2  ;;  %v3891_v35 = vadd.f32 %v16849_v57, %v16848_v54  ;;  %v3928_v33 = vadd.f32 %v16851_v49, %v16850_v5  ;;  %v3971_v48 = vadd.f32 %v16853_v10, %v16852_v47  ;;  %v16857_v61 = vld [vmem:[#allocation133_spill] sm:$0xff]  ;;  %v16859_v57 = vld [vmem:[#allocation111_spill] sm:$0xff] }
 0x4e9   : > { %v13971_v15 = vadd.f32 %v2959_v50, %v2958_v13  ;;  %v13973_v44 = vadd.f32 %v3430_v36, %v3429_v38  ;;  %v13975_v21 = vadd.f32 %v3578_v42, %v3577_v30  ;;  %v4008_v6 = vadd.f32 %v16856_v34, %v16855_v41  ;;  %v16861_v50 = vld [vmem:[#allocation34_spill] sm:$0xff]  ;;  %v16862_v42 = vld [vmem:[#allocation143_spill] sm:$0xff]  ;;  %v16863_v47 = vld [vmem:[#allocation241_spill] sm:$0xff] }
 0x4ea   : > { %v3543_v45 = vrot.slane %v3542_v18, 1  ;;  %v3892_v40 = vadd.f32 %v3891_v35, %v16857_v61  ;;  %v3929_v54 = vadd.f32 %v3928_v33, %v16858_v37  ;;  %v3972_v24 = vadd.f32 %v3971_v48, %v16859_v57  ;;  %v16867_v41 = vld [vmem:[#allocation251_spill] sm:$0xff] }
 0x4eb   : > { %16854 = vst [vmem:[#allocation328_spill] sm:$0xff] %v13971_v15  ;;  %v13982_v5 = vadd.f32 %v2996_v63, %v2995_v17  ;;  %v13984_v49 = vadd.f32 %v3467_v8, %v3466_v56  ;;  %v3868_v13 = vmul.f32 %v16847_v20, %v16771_v22  ;;  %v4009_v30 = vadd.f32 %v4008_v6, %v16861_v50  ;;  %v16864_v56 = vld [vmem:[#allocation100_spill] sm:$0xff]  ;;  %v16865_v8 = vld [vmem:[#allocation83_spill] sm:$0xff] }
 0x4ec   : > { %v3869_v38 = vmul.f32 %v16847_v20, %v16772_v2  ;;  %v3893_v36 = vadd.f32 %v3892_v40, %v16862_v42  ;;  %v3930_v35 = vadd.f32 %v3929_v54, %v16863_v47  ;;  %v3973_v10 = vadd.f32 %v3972_v24, %v3862_v19  ;;  %v16868_v6 = vld [vmem:[#allocation256_spill] sm:$0xff]  ;;  %v16869_v54 = vld [vmem:[#allocation65_spill] sm:$0xff]  ;;  %v16870_v19 = vld [vmem:[#allocation114_spill] sm:$0xff] }
 0x4ed   : > { %16860 = vst [vmem:[#allocation253_spill] sm:$0xff] %v13982_v5  ;;  %v3580_v17 = vrot.slane %v13975_v21, 1  ;;  %v4010_v63 = vadd.f32 %v4009_v30, %v3863_v4  ;;  %v4045_v33 = vadd.f32 %v16865_v8, %v16864_v56  ;;  %v13997_v48 = vadd.f32 %v3543_v45, %v3542_v18  ;;  %v16871_v42 = vld [vmem:[#allocation258_spill] sm:$0xff]  ;;  %v16872_v30 = vld [vmem:[#allocation265_spill] sm:$0xff]  ;;  %v16875_v8 = vld [vmem:[#allocation120_spill] sm:$0xff] }
 0x4ee   : > { %v3894_v34 = vadd.f32 %v3893_v36, %v16867_v41  ;;  %v3931_v61 = vadd.f32 %v3930_v35, %v16868_v6  ;;  %v3974_v20 = vadd.f32 %v3973_v10, %v3867_v3  ;;  %v3469_v40 = vrot.slane %v13984_v49, 1  ;;  %v16874_v10 = vld [vmem:[#allocation116_spill] sm:$0xff]  ;;  %v16886_v5 = vld [vmem:[#allocation75_spill] sm:$0xff] }
 0x4ef   : > { %16866 = vst [vmem:[#allocation262_spill] sm:$0xff] %v13997_v48  ;;  %v4011_v57 = vadd.f32 %v4010_v63, %v3868_v13  ;;  %v4046_v24 = vadd.f32 %v4045_v33, %v16869_v54  ;;  %v4330_v50 = vmul.f32 %v16870_v19, %v16700_v62  ;;  %v4331_v18 = vmul.f32 %v16870_v19, %v16706_v58  ;;  %v16873_v13 = vld [vmem:[#allocation73_spill] sm:$0xff] }
 0x4f0   : > { %v3895_v4 = vadd.f32 %v3894_v34, %v16871_v42  ;;  %v3932_v47 = vadd.f32 %v3931_v61, %v16872_v30  ;;  %v3975_v56 = vrot.slane %v3974_v20, 4  ;;  %v4332_v3 = vmul.f32 %v16870_v19, %v16707_v27  ;;  %v16877_v19 = vld [vmem:[#allocation129_spill] sm:$0xff]  ;;  %v16878_v30 = vld [vmem:[#allocation286_spill] sm:$0xff] }
 0x4f1   : > { %v4012_v45 = vrot.slane %v4011_v57, 4  ;;  %v4047_v36 = vadd.f32 %v4046_v24, %v3864_v11  ;;  %v4335_v35 = vmul.f32 %v16873_v13, %v16765_v1  ;;  %v4336_v34 = vmul.f32 %v16873_v13, %v16766_v12  ;;  %v16876_v11 = vld [vmem:[#allocation267_spill] sm:$0xff] }
 0x4f2   : > { %v3896_v63 = vadd.f32 %v3895_v4, %v16874_v10  ;;  %v3933_v33 = vadd.f32 %v3932_v47, %v16875_v8  ;;  %v3976_v41 = vadd.f32 %v3975_v56, %v3974_v20  ;;  %v4337_v54 = vmul.f32 %v16873_v13, %v16767_v59  ;;  %v16879_v4 = vld [vmem:[#allocation16_spill] sm:$0xff]  ;;  %v16880_v10 = vld [vmem:[#allocation46_spill] sm:$0xff]  ;;  %v16881_v8 = vld [vmem:[#allocation207_spill] sm:$0xff] }
 0x4f3   : > { %v4013_v6 = vadd.f32 %v4012_v45, %v4011_v57  ;;  %v4048_v61 = vadd.f32 %v4047_v36, %v3869_v38  ;;  %v4340_v24 = vmul.f32 %v16876_v11, %v16770_v46  ;;  %v4443_v47 = vadd.f32 %v16880_v10, %v16879_v4  ;;  %v16883_v38 = vld [vmem:[#allocation18_spill] sm:$0xff]  ;;  %v16884_v45 = vld [vmem:[#allocation151_spill] sm:$0xff]  ;;  %v16885_v13 = vld [vmem:[#allocation289_spill] sm:$0xff] }
 0x4f4   : > { %v3897_v42 = vadd.f32 %v3896_v63, %v16877_v19  ;;  %v3934_v37 = vadd.f32 %v3933_v33, %v16878_v30  ;;  %v3977_v48 = vrot.slane %v3976_v41, 2  ;;  %v4480_v57 = vadd.f32 %v16882_v26, %v16881_v8  ;;  %v16887_v63 = vld [vmem:[#allocation146_spill] sm:$0xff]  ;;  %v16889_v4 = vld [vmem:[#allocation185_spill] sm:$0xff] }
 0x4f5   : > { %v4014_v20 = vrot.slane %v4013_v6, 2  ;;  %v4049_v56 = vrot.slane %v4048_v61, 4  ;;  %v4517_v36 = vadd.f32 %v16884_v45, %v16883_v38  ;;  %v4444_v19 = vadd.f32 %v4443_v47, %v16887_v63 }
 0x4f6   : > { %v3898_v51 = vadd.f32 %v3897_v42, %v16885_v13  ;;  %v3935_v9 = vadd.f32 %v3934_v37, %v16886_v5  ;;  %v3978_v15 = vadd.f32 %v3977_v48, %v3976_v41  ;;  %v4481_v43 = vadd.f32 %v4480_v57, %v16888_v16 }
 0x4f7   : > { %v4015_v33 = vadd.f32 %v4014_v20, %v4013_v6  ;;  %v4050_v30 = vadd.f32 %v4049_v56, %v4048_v61  ;;  %v4518_v10 = vadd.f32 %v4517_v36, %v16889_v4  ;;  %v4341_v8 = vmul.f32 %v16876_v11, %v16771_v22 }
 0x4f8   : > { %v3899_v39 = vadd.f32 %v3898_v51, %v13941_v0  ;;  %v3936_v26 = vadd.f32 %v3935_v9, %v13945_v14  ;;  %v4445_v38 = vadd.f32 %v4444_v19, %v4330_v50  ;;  %v4342_v5 = vmul.f32 %v16876_v11, %v16772_v2 }
 0x4f9   : > { %v4051_v42 = vrot.slane %v4050_v30, 2  ;;  %v4482_v37 = vadd.f32 %v4481_v43, %v4331_v18  ;;  %v4519_v48 = vadd.f32 %v4518_v10, %v4332_v3  ;;  %v3979_v6 = vrot.slane %v3978_v15, 1 }
 0x4fa   : > { %v3900_v41 = vadd.f32 %v3899_v39, %v13957_v52  ;;  %v3937_v16 = vadd.f32 %v3936_v26, %v13961_v29  ;;  %v4446_v61 = vadd.f32 %v4445_v38, %v4335_v35  ;;  %v4016_v47 = vrot.slane %v4015_v33, 1 }
 0x4fb   : > { %v4052_v0 = vadd.f32 %v4051_v42, %v4050_v30  ;;  %v4483_v51 = vadd.f32 %v4482_v37, %v4336_v34  ;;  %v4520_v9 = vadd.f32 %v4519_v48, %v4337_v54  ;;  %v14043_v14 = vadd.f32 %v3580_v17, %v13975_v21 }
 0x4fc   : > { %v3901_v50 = vrot.slane %v3900_v41, 4  ;;  %v3938_v20 = vrot.slane %v3937_v16, 4  ;;  %v4447_v56 = vadd.f32 %v4446_v61, %v4340_v24  ;;  %v16890_v43 = vrot.slane %v13973_v44, 1 }
 0x4fd   : > { %v14051_v39 = vadd.f32 %v3469_v40, %v13984_v49  ;;  %v4484_v52 = vadd.f32 %v4483_v51, %v4341_v8  ;;  %v4521_v29 = vadd.f32 %v4520_v9, %v4342_v5  ;;  %v4053_v34 = vrot.slane %v4052_v0, 1  ;;  %v16892_v8 = vld [vmem:[#allocation93_spill] sm:$0xff] }
 0x4fe   : > { %v14048_v18 = vadd.f32 %v16890_v43, %v13973_v44  ;;  %v3902_v3 = vadd.f32 %v3901_v50, %v3900_v41  ;;  %v3939_v35 = vadd.f32 %v3938_v20, %v3937_v16  ;;  %v4448_v54 = vrot.slane %v4447_v56, 4  ;;  %v16891_v44 = vld [vmem:[#allocation162_spill] sm:$0xff] }
 0x4ff   : > { %v14053_v11 = vadd.f32 %v3979_v6, %v3978_v15  ;;  %v14055_v21 = vadd.f32 %v4016_v47, %v4015_v33  ;;  %v4485_v17 = vrot.slane %v4484_v52, 4  ;;  %v4522_v24 = vrot.slane %v4521_v29, 4  ;;  %v16894_v6 = vld [vmem:[#allocation56_spill] sm:$0xff] }
 0x500   : > { %v3903_v57 = vrot.slane %v3902_v3, 2  ;;  %v3940_v45 = vrot.slane %v3939_v35, 2  ;;  %v4449_v36 = vadd.f32 %v4448_v54, %v4447_v56  ;;  %v4798_v13 = vmul.f32 %v16891_v44, %v16676_v55  ;;  %v16898_v56 = vld [vmem:[#allocation196_spill] sm:$0xff] }
 0x501   : > { %v4486_v49 = vadd.f32 %v4485_v17, %v4484_v52  ;;  %v4523_v40 = vadd.f32 %v4522_v24, %v4521_v29  ;;  %v4799_v63 = vmul.f32 %v16891_v44, %v16692_v28  ;;  %v4800_v19 = vmul.f32 %v16891_v44, %v16696_v25  ;;  %v16893_v25 = vld [vmem:[#allocation26_spill] sm:$0xff] }
 0x502   : > { %v3904_v15 = vadd.f32 %v3903_v57, %v3902_v3  ;;  %v3941_v30 = vadd.f32 %v3940_v45, %v3939_v35  ;;  %v14063_v33 = vadd.f32 %v4053_v34, %v4052_v0  ;;  %v4450_v4 = vrot.slane %v4449_v36, 2  ;;  %v16895_v0 = vld [vmem:[#allocation62_spill] sm:$0xff]  ;;  %v16900_v3 = vld [vmem:[#allocation89_spill] sm:$0xff]  ;;  %v16901_v35 = vld [vmem:[#allocation60_spill] sm:$0xff] }
 0x503   : > { %v4487_v10 = vrot.slane %v4486_v49, 2  ;;  %v4524_v26 = vrot.slane %v4523_v40, 2  ;;  %v4803_v38 = vmul.f32 %v16892_v8, %v16700_v62  ;;  %v4804_v55 = vmul.f32 %v16892_v8, %v16706_v58  ;;  %v16899_v29 = vld [vmem:[#allocation98_spill] sm:$0xff]  ;;  %v16902_v34 = vld [vmem:[#allocation105_spill] sm:$0xff]  ;;  %v16903_v57 = vld [vmem:[#allocation55_spill] sm:$0xff] }
 0x504   : > { %v3905_v42 = vrot.slane %v3904_v15, 1  ;;  %v4451_v5 = vadd.f32 %v4450_v4, %v4449_v36  ;;  %v4805_v28 = vmul.f32 %v16892_v8, %v16707_v27  ;;  %v4808_v37 = vmul.f32 %v16893_v25, %v16765_v1  ;;  %v16896_v27 = vld [vmem:[#allocation180_spill] sm:$0xff] }
 0x505   : > { %v3942_v48 = vrot.slane %v3941_v30, 1  ;;  %v4488_v41 = vadd.f32 %v4487_v10, %v4486_v49  ;;  %v4525_v16 = vadd.f32 %v4524_v26, %v4523_v40  ;;  %v4851_v61 = vrot.slane %v16894_v6, 1  ;;  %v16897_v1 = vld [vmem:[#allocation28_spill] sm:$0xff]  ;;  %v16905_v49 = vld [vmem:[#allocation115_spill] sm:$0xff] }
 0x506   : > { %v4452_v47 = vrot.slane %v4451_v5, 1  ;;  %v4809_v62 = vmul.f32 %v16893_v25, %v16766_v12  ;;  %v4810_v58 = vmul.f32 %v16893_v25, %v16767_v59  ;;  %v4888_v51 = vrot.slane %v16895_v0, 1 }
 0x507   : > { %v4489_v9 = vrot.slane %v4488_v41, 1  ;;  %v4526_v50 = vrot.slane %v4525_v16, 1  ;;  %v4813_v20 = vmul.f32 %v16896_v27, %v16770_v46  ;;  %v4915_v43 = vadd.f32 %v16898_v56, %v16897_v1  ;;  %v16913_v56 = vld [vmem:[#allocation311_spill] sm:$0xff] }
 0x508   : > { %v4814_v52 = vmul.f32 %v16896_v27, %v16771_v22  ;;  %v4815_v12 = vmul.f32 %v16896_v27, %v16772_v2  ;;  %v4952_v59 = vadd.f32 %v16900_v3, %v16899_v29  ;;  %v4989_v54 = vadd.f32 %v16902_v34, %v16901_v35  ;;  %v16904_v2 = vld [vmem:[#allocation9_spill] sm:$0xff] }
 0x509   : > { %v3906_v17 = vadd.f32 %v3905_v42, %v3904_v15  ;;  %v3943_v24 = vadd.f32 %v3942_v48, %v3941_v30  ;;  %v14092_v46 = vadd.f32 %v4851_v61, %v16894_v6  ;;  %v4916_v45 = vadd.f32 %v4915_v43, %v16903_v57  ;;  %v16906_v30 = vld [vmem:[#allocation303_spill] sm:$0xff]  ;;  %v16915_v43 = vld [vmem:[#allocation206_spill] sm:$0xff] }
 0x50a   : > { %v14095_v36 = vadd.f32 %v4452_v47, %v4451_v5  ;;  %v14098_v22 = vadd.f32 %v4888_v51, %v16895_v0  ;;  %v4953_v44 = vadd.f32 %v4952_v59, %v16904_v2  ;;  %v4990_v40 = vadd.f32 %v4989_v54, %v16905_v49 }
 0x50b   : > { %v14102_v4 = vadd.f32 %v4489_v9, %v4488_v41  ;;  %v14104_v10 = vadd.f32 %v4526_v50, %v4525_v16  ;;  %v4917_v15 = vadd.f32 %v4916_v45, %v4798_v13  ;;  %v16907_v26 = vrot.slane %v16906_v30, 1  ;;  %v16909_v9 = vld [vmem:[#allocation309_spill] sm:$0xff]  ;;  %v16911_v50 = vld [vmem:[#allocation310_spill] sm:$0xff] }
 0x50c   : > { %v4954_v42 = vadd.f32 %v4953_v44, %v4799_v63  ;;  %v4991_v5 = vadd.f32 %v4990_v40, %v4800_v19  ;;  %v5797_v25 = vrot.slane %v13832_v7, 1  ;;  %v5834_v48 = vrot.slane %v13834_v60, 1  ;;  %v16916_v44 = vld [vmem:[#allocation320_spill] sm:$0xff]  ;;  %v16921_v40 = vld [vmem:[#allocation238_spill] sm:$0xff] }
 0x50d   : > { %v14109_v8 = vadd.f32 %v16907_v26, %v16906_v30  ;;  %v4918_v6 = vadd.f32 %v4917_v15, %v4803_v38  ;;  %v5871_v41 = vrot.slane %v13836_v53, 1  ;;  %v5908_v16 = vrot.slane %v13838_v32, 1  ;;  %v16922_v30 = vld [vmem:[#allocation253_spill] sm:$0xff] }
 0x50e   : > { %v5945_v61 = vrot.slane %v13840_v23, 1  ;;  %v4955_v13 = vadd.f32 %v4954_v42, %v4804_v55  ;;  %v4992_v47 = vadd.f32 %v4991_v5, %v4805_v28  ;;  %v16908_v0 = vrot.slane %v16773_v31, 1  ;;  %v16923_v5 = vld [vmem:[#allocation327_spill] sm:$0xff] }
 0x50f   : > { %v16910_v63 = vrot.slane %v16909_v9, 1  ;;  %v4919_v38 = vadd.f32 %v4918_v6, %v4808_v37  ;;  %v16912_v27 = vrot.slane %v16911_v50, 1  ;;  %v16914_v55 = vrot.slane %v16913_v56, 1  ;;  %v16925_v6 = vld [vmem:[#allocation11_spill] sm:$0xff] }
 0x510   : > { %v5362_v51 = vadd.f32 %v16908_v0, %v16773_v31  ;;  %v6270_v31 = vrot.slane %v16915_v43, 1  ;;  %v4956_v29 = vadd.f32 %v4955_v13, %v4809_v62  ;;  %v4993_v3 = vadd.f32 %v4992_v47, %v4810_v58  ;;  %v16917_v58 = vld [vmem:[#allocation321_spill] sm:$0xff]  ;;  %v16926_v13 = vld [vmem:[#allocation262_spill] sm:$0xff]  ;;  %v16927_v47 = vld [vmem:[#allocation12_spill] sm:$0xff] }
 0x511   : > { %v14122_v19 = vadd.f32 %v16910_v63, %v16909_v9  ;;  %v14128_v1 = vadd.f32 %v16912_v27, %v16911_v50  ;;  %v14133_v28 = vadd.f32 %v16914_v55, %v16913_v56  ;;  %v5798_v59 = vadd.f32 %v5797_v25, %v13832_v7  ;;  %v16924_v25 = vld [vmem:[#allocation42_spill] sm:$0xff] }
 0x512   : > { %v5835_v37 = vadd.f32 %v5834_v48, %v13834_v60  ;;  %v4920_v35 = vadd.f32 %v4919_v38, %v4813_v20  ;;  %v14139_v34 = vadd.f32 %v5871_v41, %v13836_v53  ;;  %v14142_v54 = vadd.f32 %v5908_v16, %v13838_v32  ;;  %v16919_v53 = vld [vmem:[#allocation235_spill] sm:$0xff] }
 0x513   : > { %v14145_v57 = vadd.f32 %v5945_v61, %v13840_v23  ;;  %v4957_v45 = vadd.f32 %v4956_v29, %v4814_v52  ;;  %v4994_v2 = vadd.f32 %v4993_v3, %v4815_v12  ;;  %v6307_v62 = vrot.slane %v16916_v44, 1  ;;  %v16920_v23 = vld [vmem:[#allocation328_spill] sm:$0xff]  ;;  %v6466_v3 = vpop.permute.xlu0 %6465 }
 0x514   : > { %v6344_v49 = vrot.slane %v16917_v58, 1  ;;  %v4921_v7 = vrot.slane %v4920_v35, 4  ;;  %v6271_v60 = vadd.f32 %v6270_v31, %v16915_v43  ;;  %v6381_v32 = vrot.slane %v16919_v53, 1 }
 0x515   : > { %v6421_v20 = vsel %vm6420_vm10, %v16920_v23, %v14048_v18  ;;  %v4958_v52 = vrot.slane %v4957_v45, 4  ;;  %v4995_v12 = vrot.slane %v4994_v2, 4  ;;  %v6418_v15 = vrot.slane %v16921_v40, 1 }
 0x516   : > { %v6422_v26 = vsel %vm6420_vm10, %v16922_v30, %v14051_v39  ;;  %v4922_v42 = vadd.f32 %v4921_v7, %v4920_v35  ;;  %v6423_v48 = vsel %vm6420_vm10, %v16924_v25, %v16923_v5  ;;  %v6425_v41 = vsel %vm6420_vm10, %v16925_v6, %v14043_v14 }
 0x517   : > { %v6427_v16 = vsel %vm6426_vm11, %v6421_v20, %v3906_v17  ;;  %v4959_v18 = vadd.f32 %v4958_v52, %v4957_v45  ;;  %v4996_v61 = vadd.f32 %v4995_v12, %v4994_v2  ;;  %v6424_v0 = vsel %vm6420_vm10, %v16927_v47, %v16926_v13  ;;  %v16928_v17 = vld [vmem:[#allocation48_spill] sm:$0xff] }
 0x518   : > { %v6428_v9 = vsel %vm6426_vm11, %v6422_v26, %v3943_v24  ;;  %v4923_v39 = vrot.slane %v4922_v42, 2  ;;  %v6308_v63 = vadd.f32 %v6307_v62, %v16916_v44  ;;  %v6431_v14 = vsel %vm6426_vm11, %v6425_v41, %v14063_v33  ;;  %v16929_v24 = vld [vmem:[#allocation85_spill] sm:$0xff] }
 0x519   : > { %v6433_v38 = vsel %vm6432_vm12, %v6427_v16, %v16928_v17  ;;  %v4960_v50 = vrot.slane %v4959_v18, 2  ;;  %v4997_v27 = vrot.slane %v4996_v61, 2  ;;  %v6429_v56 = vsel %vm6426_vm11, %v6423_v48, %v14053_v11 }
 0x51a   : > { %v6434_v55 = vsel %vm6432_vm12, %v6428_v9, %v16929_v24  ;;  %v4924_v43 = vadd.f32 %v4923_v39, %v4922_v42  ;;  %v6430_v31 = vsel %vm6426_vm11, %v6424_v0, %v14055_v21  ;;  %v6437_v29 = vsel %vm6432_vm12, %v6431_v14, %v14104_v10 }
 0x51b   : > { %v6439_v33 = vsel %vm849_vm2, %v6433_v38, %v14092_v46  ;;  %v4961_v35 = vadd.f32 %v4960_v50, %v4959_v18  ;;  %v4998_v45 = vadd.f32 %v4997_v27, %v4996_v61  ;;  %v6440_v2 = vsel %vm849_vm2, %v6434_v55, %v14098_v22 }
 0x51c   : > { %v6445_v11 = vsel %vm6444_vm13, %v6439_v33, %v14109_v8  ;;  %v4925_v44 = vrot.slane %v4924_v43, 1  ;;  %v6435_v21 = vsel %vm6432_vm12, %v6429_v56, %v14095_v36  ;;  %v6446_v62 = vsel %vm6444_vm13, %v6440_v2, %v5362_v51 }
 0x51d   : > { %v6451_v10 = vsel %vm6450_vm14, %v6445_v11, %v5798_v59  ;;  %v4962_v7 = vrot.slane %v4961_v35, 1  ;;  %v4999_v46 = vrot.slane %v4998_v45, 1  ;;  %v6452_v23 = vsel %vm6450_vm14, %v6446_v62, %v5835_v37 }
 0x51e   : > { %v6457_v20 = vsel %vm6456_vm15, %v6451_v10, %v6271_v60  ;;  %v4926_v52 = vadd.f32 %v4925_v44, %v4924_v43  ;;  %v6436_v22 = vsel %vm6432_vm12, %v6430_v31, %v14102_v4  ;;  %v6458_v8 = vsel %vm6456_vm15, %v6452_v23, %v6308_v63 }
 0x51f   : > { %v6468_v12 = vadd.f32 %v6466_v3, %v6457_v20  ;;  %v4963_v36 = vadd.f32 %v4962_v7, %v4961_v35  ;;  %v5000_v51 = vadd.f32 %v4999_v46, %v4998_v45  ;;  %v6345_v59 = vadd.f32 %v6344_v49, %v16917_v58 }
 0x520   : > { %v6469_v37 = vadd.f32 %v6466_v3, %v6458_v8  ;;  %v6382_v60 = vadd.f32 %v6381_v32, %v16919_v53  ;;  %v6419_v30 = vadd.f32 %v6418_v15, %v16921_v40  ;;  %v6441_v4 = vsel %vm849_vm2, %v6435_v21, %v4926_v52 }
 0x521   : > { %v6473_v26 = vmax.f32 %v6468_v12, 0.0  ;;  %v6442_v42 = vsel %vm849_vm2, %v6436_v22, %v4963_v36  ;;  %v6443_v5 = vsel %vm849_vm2, %v6437_v29, %v5000_v51  ;;  %v6447_v25 = vsel %vm6444_vm13, %v6441_v4, %v14122_v19 }
 0x522   : > { %v6474_v48 = vmax.f32 %v6469_v37, 0.0  ;;  %v6448_v58 = vsel %vm6444_vm13, %v6442_v42, %v14128_v1  ;;  %v6449_v49 = vsel %vm6444_vm13, %v6443_v5, %v14133_v28  ;;  %v6453_v53 = vsel %vm6450_vm14, %v6447_v25, %v14139_v34 }
 0x523   : > { %6478 = vst [vmem:[%s14213_s18] sm:$0xff] %v6473_v26  ;;  %v6454_v32 = vsel %vm6450_vm14, %v6448_v58, %v14142_v54  ;;  %v6455_v19 = vsel %vm6450_vm14, %v6449_v49, %v14145_v57  ;;  %v6459_v40 = vsel %vm6456_vm15, %v6453_v53, %v6345_v59 }
 0x524   : > { %6479 = vst [vmem:[%s14213_s18 + $0x8] sm:$0xff] %v6474_v48  ;;  %v6460_v1 = vsel %vm6456_vm15, %v6454_v32, %v6382_v60  ;;  %v6461_v15 = vsel %vm6456_vm15, %v6455_v19, %v6419_v30  ;;  %v6470_v28 = vadd.f32 %v6466_v3, %v6459_v40 }
 0x525   : > { %v6471_v6 = vadd.f32 %v6466_v3, %v6460_v1  ;;  %v6472_v41 = vadd.f32 %v6466_v3, %v6461_v15 }
 0x526   : > { %v6475_v16 = vmax.f32 %v6470_v28, 0.0 }
 0x527   : > { %v6476_v34 = vmax.f32 %v6471_v6, 0.0  ;;  %v6477_v18 = vmax.f32 %v6472_v41, 0.0 }
 0x528   : > { %6480 = vst [vmem:[%s14213_s18 + $0x10] sm:$0xff] %v6475_v16 }
 0x529   : > { %6481 = vst [vmem:[%s14213_s18 + $0x18] sm:$0xff] %v6476_v34  ;;  %6482 = vst [vmem:[%s14213_s18 + $0x20] sm:$0xff] %v6477_v18 }
 0x52a PF: > { %s16_s27 = sadd.s32 1, %s7348_s27   ;;  %s16930_s21 = smov %s7328_s22 }
 0x52b   : > { %p13_p1 = scmp.ge.s32.totalorder %s16_s27, 6   ;;  %s16931_s22 = smov %s7477_s16 }
 0x52c   : > { %s16932_s23 = smov %s7336_s24  ;;  %s16933_s24 = smov %s7470_s13 }
 0x52d   : > { %s16934_s25 = smov %s7344_s26  ;;  %s16935_s26 = smov %s7457_s30 }
 0x52e   :  { %15 = sbr.rel (!%p13_p1) target bundleno = 4 (0x4), region = 256 }

</bundles_post_ra>
